<compile_context>
chip_gen: v7x
topology: tpu7x:2x2x1
jax: 0.10.0
libtpu: 0.0.40
codegen_flags: <defaults>
</compile_context>

<pallas_src>
import jax
import jax.numpy as jnp
from jax.experimental import pallas as pl
from jax.experimental.pallas import tpu as pltpu

NEG_SLOPE = 0.01          # PyTorch nn.LeakyReLU default
BN_EPS = 1e-5             # PyTorch nn.BatchNorm1d default


# ----------------------------------------------------------------------------
# Pallas kernel: fused MLP encoder + decoder + hero masking (one batch tile)
# ----------------------------------------------------------------------------
def _hero_recommender_kernel(x_ref, hero_ids_ref, *rest):
    """rest = [w1, b1, ..., w7, b7, w_dec, b_dec, out_ref].

    Weights are bf16 (native MXU path), biases f32, accumulation f32.
    """
    out_ref = rest[-1]
    params = rest[:-1]
    n_layers = len(params) // 2

    h = x_ref[...]                                   # (TM, total) bf16

    # Encoder: Linear (eval-mode BN folded in) + LeakyReLU, 7 layers.
    for li in range(n_layers - 1):
        w = params[2 * li][...]                      # bf16 (in, out)
        b = params[2 * li + 1][...]                  # f32  (1, out)
        a = jnp.dot(h, w, preferred_element_type=jnp.float32) + b
        a = jnp.maximum(a, NEG_SLOPE * a)            # LeakyReLU (mul + max)
        h = a.astype(jnp.bfloat16)

    # Decoder: plain Linear -> hero scores (f32).
    scores = jnp.dot(h, params[-2][...], preferred_element_type=jnp.float32)
    scores = scores + params[-1][...]                # (TM, N_pad)

    # Mask: column 0 always masked, plus each nonzero already-picked hero id.
    cols = jax.lax.broadcasted_iota(jnp.int32, scores.shape, 1)
    mask = cols == 0
    for j in range(4):
        hid = hero_ids_ref[:, j:j + 1]               # (TM, 1) int32
        mask = jnp.logical_or(mask, jnp.logical_and(cols == hid, hid > 0))

    out_ref[...] = jnp.where(mask, jnp.float32(-100.0), scores)


def _round_up(x, m):
    return (x + m - 1) // m * m


def hero_recommender_pallas(x, hero_ids, layer_params, *, tm=128):
    """x: (B, total_input_dim); hero_ids: (B, 4) int;
    layer_params: 7 encoder (W:(in,out), b:(1,out)) pairs (BN folded) + decoder."""
    B, total = x.shape
    num_heroes = layer_params[-1][0].shape[1]
    n_pad = _round_up(num_heroes, 128)               # lane-dense output stores
    b_pad = _round_up(max(B, 1), tm)
    nb = b_pad // tm

    # Boundary casts / batch padding: bf16 activations & weights, f32 biases.
    x_p = jnp.zeros((b_pad, total), jnp.bfloat16).at[:B].set(
        x.astype(jnp.bfloat16))
    ids_p = jnp.zeros((b_pad, 4), jnp.int32).at[:B].set(
        hero_ids.astype(jnp.int32))

    flat, in_specs = [], []
    in_specs.append(pl.BlockSpec((tm, total), lambda i: (i, 0)))   # x tile
    in_specs.append(pl.BlockSpec((tm, 4), lambda i: (i, 0)))       # hero_ids tile
    for li, (w, b) in enumerate(layer_params):
        if li == len(layer_params) - 1 and n_pad != num_heroes:
            w = jnp.pad(w, ((0, 0), (0, n_pad - num_heroes)))
            b = jnp.pad(b, ((0, 0), (0, n_pad - num_heroes)))
        flat.append(w.astype(jnp.bfloat16))
        flat.append(b.astype(jnp.float32))
        in_specs.append(pl.BlockSpec(w.shape, lambda i: (0, 0)))   # resident weight
        in_specs.append(pl.BlockSpec(b.shape, lambda i: (0, 0)))   # resident bias

    out = pl.pallas_call(
        _hero_recommender_kernel,
        out_shape=jax.ShapeDtypeStruct((b_pad, n_pad), jnp.float32),
        grid_spec=pltpu.PrefetchScalarGridSpec(
            num_scalar_prefetch=0,
            grid=(nb,),
            in_specs=in_specs,
            out_specs=pl.BlockSpec((tm, n_pad), lambda i: (i, 0)),
        ),
        compiler_params=pltpu.CompilerParams(
            dimension_semantics=("parallel",),          # v7x: shard batch tiles
            vmem_limit_bytes=32 * 1024 * 1024,          # safe on v5e/v6e/v7x
        ),
    )(x_p, ids_p, *flat)
    return out[:B, :num_heroes]


# ----------------------------------------------------------------------------
# Deterministic parameter construction (synthetic; no checkpoint loading)
# ----------------------------------------------------------------------------
def _linear_init(key, fan_in, fan_out):
    kw, kb = jax.random.split(key)
    bound = 1.0 / jnp.sqrt(jnp.float32(fan_in))
    w = jax.random.uniform(kw, (fan_in, fan_out), jnp.float32, -bound, bound)
    b = jax.random.uniform(kb, (1, fan_out), jnp.float32, -bound, bound)
    return w, b


def _bn_fold(key, w, b):
    """Fold eval-mode BatchNorm1d (gamma, beta, running stats) into (w, b)."""
    k1, k2, k3, k4 = jax.random.split(key, 4)
    dim = w.shape[1]
    gamma = jax.random.uniform(k1, (dim,), jnp.float32, 0.8, 1.2)
    beta = jax.random.uniform(k2, (dim,), jnp.float32, -0.1, 0.1)
    r_mean = jax.random.uniform(k3, (dim,), jnp.float32, -0.1, 0.1)
    r_var = jax.random.uniform(k4, (dim,), jnp.float32, 0.5, 1.5)
    scale = gamma / jnp.sqrt(r_var + BN_EPS)
    w_eff = w * scale[None, :]
    b_eff = b * scale[None, :] + (beta - r_mean * scale)[None, :]
    return w_eff, b_eff


def build_model(key, num_heroes, num_roles, num_attributes,
                hero_dim, role_dim, attr_dim):
    keys = jax.random.split(key, 32)
    ki = iter(keys)

    # Embedding tables (hero table has padding_idx=0 -> zero row).
    hero_emb = jax.random.normal(next(ki), (num_heroes, hero_dim), jnp.float32) * 0.1
    hero_emb = hero_emb.at[0].set(0.0)
    role_emb = jax.random.normal(next(ki), (num_roles, role_dim), jnp.float32) * 0.1
    attr_emb = jax.random.normal(next(ki), (num_attributes, attr_dim), jnp.float32) * 0.1

    single = hero_dim + role_dim + attr_dim
    total = single * 4
    h1, h2, h3, h4 = total * 2, total * 4, total * 8, total * 16
    dims = [total, h1, h2, h3, h4, h3, h2, h1]

    layer_params = []
    for i in range(7):                       # encoder: Linear + BN (folded) + LeakyReLU
        w, b = _linear_init(next(ki), dims[i], dims[i + 1])
        w, b = _bn_fold(next(ki), w, b)
        layer_params.append((w, b))
    w_dec, b_dec = _linear_init(next(ki), h1, num_heroes)   # hero_decoder
    layer_params.append((w_dec, b_dec))

    return (hero_emb, role_emb, attr_emb), layer_params


def build_combined_input(tables, hero_ids, attr_ids, role_ids):
    """Glue: embedding gathers + concat (cat order per hero: hero, attr, role)."""
    hero_emb, role_emb, attr_emb = tables
    parts = []
    for i in range(4):
        parts.append(hero_emb[hero_ids[:, i]])
        parts.append(attr_emb[attr_ids[:, i]])
        parts.append(role_emb[role_ids[:, i]])
    return jnp.concatenate(parts, axis=1).astype(jnp.float32)


# ----------------------------------------------------------------------------
# Pure-JAX f32 reference (same folded params) for a sanity check
# ----------------------------------------------------------------------------
def reference_forward(x, hero_ids, layer_params):
    h = x
    for w, b in layer_params[:-1]:
        h = h @ w + b
        h = jnp.where(h > 0, h, NEG_SLOPE * h)
    w, b = layer_params[-1]
    scores = h @ w + b
    num_heroes = scores.shape[1]
    cols = jnp.arange(num_heroes)[None, :]
    mask = cols == 0
    for j in range(4):
        hid = hero_ids[:, j:j + 1]
        mask = mask | ((cols == hid) & (hid > 0))
    return jnp.where(mask, -100.0, scores)


# ----------------------------------------------------------------------------
if __name__ == "__main__":
    # Small, self-consistent sizes (structure matches the PyTorch module).
    NUM_HEROES = 128
    NUM_ROLES = 8
    NUM_ATTRS = 4
    HERO_DIM, ROLE_DIM, ATTR_DIM = 8, 4, 4   # single_hero_dim = 16, total = 64
    B = 200                                   # padded to 256 -> 2 batch tiles

    key = jax.random.PRNGKey(0)
    k_model, k_h, k_a, k_r = jax.random.split(key, 4)

    tables, layer_params = build_model(
        k_model, NUM_HEROES, NUM_ROLES, NUM_ATTRS, HERO_DIM, ROLE_DIM, ATTR_DIM
    )

    hero_ids = jax.random.randint(k_h, (B, 4), 0, NUM_HEROES, dtype=jnp.int32)
    attr_ids = jax.random.randint(k_a, (B, 4), 0, NUM_ATTRS, dtype=jnp.int32)
    role_ids = jax.random.randint(k_r, (B, 4), 0, NUM_ROLES, dtype=jnp.int32)

    x = build_combined_input(tables, hero_ids, attr_ids, role_ids)  # (B, 64)

    scores = hero_recommender_pallas(x, hero_ids, layer_params)
    scores = jax.block_until_ready(scores)

    ref = reference_forward(x, hero_ids, layer_params)
    assert scores.shape == (B, NUM_HEROES)
    # bf16 weights/activations vs f32 reference -> loose tolerance.
    assert jnp.allclose(scores, ref, rtol=5e-2, atol=5e-2), "mismatch vs JAX reference"
    # Masked positions must be exactly -100.
    assert jnp.all(scores[:, 0] == -100.0), "padding column not masked"

    print("KERNEL_OK")
</pallas_src>

<mosaic_0001>
module attributes {stable_mosaic.version = 11 : i64} {
  func.func @_hero_recommender_kernel(%arg0: i32, %arg1: memref<128x64xbf16, #tpu.memory_space<vmem>>, %arg2: memref<128x4xi32, #tpu.memory_space<vmem>>, %arg3: memref<64x128xbf16, #tpu.memory_space<vmem>>, %arg4: memref<1x128xf32, #tpu.memory_space<vmem>>, %arg5: memref<128x256xbf16, #tpu.memory_space<vmem>>, %arg6: memref<1x256xf32, #tpu.memory_space<vmem>>, %arg7: memref<256x512xbf16, #tpu.memory_space<vmem>>, %arg8: memref<1x512xf32, #tpu.memory_space<vmem>>, %arg9: memref<512x1024xbf16, #tpu.memory_space<vmem>>, %arg10: memref<1x1024xf32, #tpu.memory_space<vmem>>, %arg11: memref<1024x512xbf16, #tpu.memory_space<vmem>>, %arg12: memref<1x512xf32, #tpu.memory_space<vmem>>, %arg13: memref<512x256xbf16, #tpu.memory_space<vmem>>, %arg14: memref<1x256xf32, #tpu.memory_space<vmem>>, %arg15: memref<256x128xbf16, #tpu.memory_space<vmem>>, %arg16: memref<1x128xf32, #tpu.memory_space<vmem>>, %arg17: memref<128x128xbf16, #tpu.memory_space<vmem>>, %arg18: memref<1x128xf32, #tpu.memory_space<vmem>>, %arg19: memref<128x128xf32, #tpu.memory_space<vmem>>) attributes {dimension_semantics = [#tpu.dimension_semantics<parallel>], iteration_bounds = array<i64: 2>, scalar_prefetch = 0 : i64, scratch_operands = 0 : i64, tpu.core_type = #tpu.core_type<tc>, window_params = [{transform_indices = @transform_0, window_bounds = array<i64: 128, 64>}, {transform_indices = @transform_1, window_bounds = array<i64: 128, 4>}, {pipeline_mode = #tpu.pipeline_mode<synchronous>, transform_indices = @transform_2, window_bounds = array<i64: 64, 128>}, {pipeline_mode = #tpu.pipeline_mode<synchronous>, transform_indices = @transform_3, window_bounds = array<i64: 1, 128>}, {pipeline_mode = #tpu.pipeline_mode<synchronous>, transform_indices = @transform_4, window_bounds = array<i64: 128, 256>}, {pipeline_mode = #tpu.pipeline_mode<synchronous>, transform_indices = @transform_5, window_bounds = array<i64: 1, 256>}, {pipeline_mode = #tpu.pipeline_mode<synchronous>, transform_indices = @transform_6, window_bounds = array<i64: 256, 512>}, {pipeline_mode = #tpu.pipeline_mode<synchronous>, transform_indices = @transform_7, window_bounds = array<i64: 1, 512>}, {pipeline_mode = #tpu.pipeline_mode<synchronous>, transform_indices = @transform_8, window_bounds = array<i64: 512, 1024>}, {pipeline_mode = #tpu.pipeline_mode<synchronous>, transform_indices = @transform_9, window_bounds = array<i64: 1, 1024>}, {pipeline_mode = #tpu.pipeline_mode<synchronous>, transform_indices = @transform_10, window_bounds = array<i64: 1024, 512>}, {pipeline_mode = #tpu.pipeline_mode<synchronous>, transform_indices = @transform_11, window_bounds = array<i64: 1, 512>}, {pipeline_mode = #tpu.pipeline_mode<synchronous>, transform_indices = @transform_12, window_bounds = array<i64: 512, 256>}, {pipeline_mode = #tpu.pipeline_mode<synchronous>, transform_indices = @transform_13, window_bounds = array<i64: 1, 256>}, {pipeline_mode = #tpu.pipeline_mode<synchronous>, transform_indices = @transform_14, window_bounds = array<i64: 256, 128>}, {pipeline_mode = #tpu.pipeline_mode<synchronous>, transform_indices = @transform_15, window_bounds = array<i64: 1, 128>}, {pipeline_mode = #tpu.pipeline_mode<synchronous>, transform_indices = @transform_16, window_bounds = array<i64: 128, 128>}, {pipeline_mode = #tpu.pipeline_mode<synchronous>, transform_indices = @transform_17, window_bounds = array<i64: 1, 128>}, {transform_indices = @transform_18, window_bounds = array<i64: 128, 128>}]} {
    %c0 = arith.constant 0 : index
    %c0_0 = arith.constant 0 : index
    %0 = vector.load %arg1[%c0, %c0_0] : memref<128x64xbf16, #tpu.memory_space<vmem>>, vector<128x64xbf16>
    %c0_1 = arith.constant 0 : index
    %c0_2 = arith.constant 0 : index
    %1 = vector.load %arg3[%c0_1, %c0_2] : memref<64x128xbf16, #tpu.memory_space<vmem>>, vector<64x128xbf16>
    %c0_3 = arith.constant 0 : index
    %c0_4 = arith.constant 0 : index
    %2 = vector.load %arg4[%c0_3, %c0_4] : memref<1x128xf32, #tpu.memory_space<vmem>>, vector<1x128xf32>
    %cst = arith.constant dense<0.000000e+00> : vector<128x128xf32>
    %3 = tpu.matmul %0, %1, %cst {dimension_numbers = #tpu.dot_dimension_numbers<[1], [0], [0], [1], [0, 0, 1, 1], [], []>} : vector<128x64xbf16>, vector<64x128xbf16>, vector<128x128xf32> -> vector<128x128xf32>
    %4 = vector.broadcast %2 : vector<1x128xf32> to vector<128x128xf32>
    %5 = arith.addf %3, %4 : vector<128x128xf32>
    %cst_5 = arith.constant 0.00999999977 : f32
    %6 = vector.broadcast %cst_5 : f32 to vector<128x128xf32>
    %7 = arith.mulf %6, %5 : vector<128x128xf32>
    %8 = arith.maximumf %5, %7 : vector<128x128xf32>
    %9 = arith.truncf %8 : vector<128x128xf32> to vector<128x128xbf16>
    %c0_6 = arith.constant 0 : index
    %c0_7 = arith.constant 0 : index
    %10 = vector.load %arg5[%c0_6, %c0_7] : memref<128x256xbf16, #tpu.memory_space<vmem>>, vector<128x256xbf16>
    %c0_8 = arith.constant 0 : index
    %c0_9 = arith.constant 0 : index
    %11 = vector.load %arg6[%c0_8, %c0_9] : memref<1x256xf32, #tpu.memory_space<vmem>>, vector<1x256xf32>
    %cst_10 = arith.constant dense<0.000000e+00> : vector<128x256xf32>
    %12 = tpu.matmul %9, %10, %cst_10 {dimension_numbers = #tpu.dot_dimension_numbers<[1], [0], [0], [1], [0, 0, 1, 1], [], []>} : vector<128x128xbf16>, vector<128x256xbf16>, vector<128x256xf32> -> vector<128x256xf32>
    %13 = vector.broadcast %11 : vector<1x256xf32> to vector<128x256xf32>
    %14 = arith.addf %12, %13 : vector<128x256xf32>
    %cst_11 = arith.constant 0.00999999977 : f32
    %15 = vector.broadcast %cst_11 : f32 to vector<128x256xf32>
    %16 = arith.mulf %15, %14 : vector<128x256xf32>
    %17 = arith.maximumf %14, %16 : vector<128x256xf32>
    %18 = arith.truncf %17 : vector<128x256xf32> to vector<128x256xbf16>
    %c0_12 = arith.constant 0 : index
    %c0_13 = arith.constant 0 : index
    %19 = vector.load %arg7[%c0_12, %c0_13] : memref<256x512xbf16, #tpu.memory_space<vmem>>, vector<256x512xbf16>
    %c0_14 = arith.constant 0 : index
    %c0_15 = arith.constant 0 : index
    %20 = vector.load %arg8[%c0_14, %c0_15] : memref<1x512xf32, #tpu.memory_space<vmem>>, vector<1x512xf32>
    %cst_16 = arith.constant dense<0.000000e+00> : vector<128x512xf32>
    %21 = tpu.matmul %18, %19, %cst_16 {dimension_numbers = #tpu.dot_dimension_numbers<[1], [0], [0], [1], [0, 0, 1, 1], [], []>} : vector<128x256xbf16>, vector<256x512xbf16>, vector<128x512xf32> -> vector<128x512xf32>
    %22 = vector.broadcast %20 : vector<1x512xf32> to vector<128x512xf32>
    %23 = arith.addf %21, %22 : vector<128x512xf32>
    %cst_17 = arith.constant 0.00999999977 : f32
    %24 = vector.broadcast %cst_17 : f32 to vector<128x512xf32>
    %25 = arith.mulf %24, %23 : vector<128x512xf32>
    %26 = arith.maximumf %23, %25 : vector<128x512xf32>
    %27 = arith.truncf %26 : vector<128x512xf32> to vector<128x512xbf16>
    %c0_18 = arith.constant 0 : index
    %c0_19 = arith.constant 0 : index
    %28 = vector.load %arg9[%c0_18, %c0_19] : memref<512x1024xbf16, #tpu.memory_space<vmem>>, vector<512x1024xbf16>
    %c0_20 = arith.constant 0 : index
    %c0_21 = arith.constant 0 : index
    %29 = vector.load %arg10[%c0_20, %c0_21] : memref<1x1024xf32, #tpu.memory_space<vmem>>, vector<1x1024xf32>
    %cst_22 = arith.constant dense<0.000000e+00> : vector<128x1024xf32>
    %30 = tpu.matmul %27, %28, %cst_22 {dimension_numbers = #tpu.dot_dimension_numbers<[1], [0], [0], [1], [0, 0, 1, 1], [], []>} : vector<128x512xbf16>, vector<512x1024xbf16>, vector<128x1024xf32> -> vector<128x1024xf32>
    %31 = vector.broadcast %29 : vector<1x1024xf32> to vector<128x1024xf32>
    %32 = arith.addf %30, %31 : vector<128x1024xf32>
    %cst_23 = arith.constant 0.00999999977 : f32
    %33 = vector.broadcast %cst_23 : f32 to vector<128x1024xf32>
    %34 = arith.mulf %33, %32 : vector<128x1024xf32>
    %35 = arith.maximumf %32, %34 : vector<128x1024xf32>
    %36 = arith.truncf %35 : vector<128x1024xf32> to vector<128x1024xbf16>
    %c0_24 = arith.constant 0 : index
    %c0_25 = arith.constant 0 : index
    %37 = vector.load %arg11[%c0_24, %c0_25] : memref<1024x512xbf16, #tpu.memory_space<vmem>>, vector<1024x512xbf16>
    %c0_26 = arith.constant 0 : index
    %c0_27 = arith.constant 0 : index
    %38 = vector.load %arg12[%c0_26, %c0_27] : memref<1x512xf32, #tpu.memory_space<vmem>>, vector<1x512xf32>
    %cst_28 = arith.constant dense<0.000000e+00> : vector<128x512xf32>
    %39 = tpu.matmul %36, %37, %cst_28 {dimension_numbers = #tpu.dot_dimension_numbers<[1], [0], [0], [1], [0, 0, 1, 1], [], []>} : vector<128x1024xbf16>, vector<1024x512xbf16>, vector<128x512xf32> -> vector<128x512xf32>
    %40 = vector.broadcast %38 : vector<1x512xf32> to vector<128x512xf32>
    %41 = arith.addf %39, %40 : vector<128x512xf32>
    %cst_29 = arith.constant 0.00999999977 : f32
    %42 = vector.broadcast %cst_29 : f32 to vector<128x512xf32>
    %43 = arith.mulf %42, %41 : vector<128x512xf32>
    %44 = arith.maximumf %41, %43 : vector<128x512xf32>
    %45 = arith.truncf %44 : vector<128x512xf32> to vector<128x512xbf16>
    %c0_30 = arith.constant 0 : index
    %c0_31 = arith.constant 0 : index
    %46 = vector.load %arg13[%c0_30, %c0_31] : memref<512x256xbf16, #tpu.memory_space<vmem>>, vector<512x256xbf16>
    %c0_32 = arith.constant 0 : index
    %c0_33 = arith.constant 0 : index
    %47 = vector.load %arg14[%c0_32, %c0_33] : memref<1x256xf32, #tpu.memory_space<vmem>>, vector<1x256xf32>
    %cst_34 = arith.constant dense<0.000000e+00> : vector<128x256xf32>
    %48 = tpu.matmul %45, %46, %cst_34 {dimension_numbers = #tpu.dot_dimension_numbers<[1], [0], [0], [1], [0, 0, 1, 1], [], []>} : vector<128x512xbf16>, vector<512x256xbf16>, vector<128x256xf32> -> vector<128x256xf32>
    %49 = vector.broadcast %47 : vector<1x256xf32> to vector<128x256xf32>
    %50 = arith.addf %48, %49 : vector<128x256xf32>
    %cst_35 = arith.constant 0.00999999977 : f32
    %51 = vector.broadcast %cst_35 : f32 to vector<128x256xf32>
    %52 = arith.mulf %51, %50 : vector<128x256xf32>
    %53 = arith.maximumf %50, %52 : vector<128x256xf32>
    %54 = arith.truncf %53 : vector<128x256xf32> to vector<128x256xbf16>
    %c0_36 = arith.constant 0 : index
    %c0_37 = arith.constant 0 : index
    %55 = vector.load %arg15[%c0_36, %c0_37] : memref<256x128xbf16, #tpu.memory_space<vmem>>, vector<256x128xbf16>
    %c0_38 = arith.constant 0 : index
    %c0_39 = arith.constant 0 : index
    %56 = vector.load %arg16[%c0_38, %c0_39] : memref<1x128xf32, #tpu.memory_space<vmem>>, vector<1x128xf32>
    %cst_40 = arith.constant dense<0.000000e+00> : vector<128x128xf32>
    %57 = tpu.matmul %54, %55, %cst_40 {dimension_numbers = #tpu.dot_dimension_numbers<[1], [0], [0], [1], [0, 0, 1, 1], [], []>} : vector<128x256xbf16>, vector<256x128xbf16>, vector<128x128xf32> -> vector<128x128xf32>
    %58 = vector.broadcast %56 : vector<1x128xf32> to vector<128x128xf32>
    %59 = arith.addf %57, %58 : vector<128x128xf32>
    %cst_41 = arith.constant 0.00999999977 : f32
    %60 = vector.broadcast %cst_41 : f32 to vector<128x128xf32>
    %61 = arith.mulf %60, %59 : vector<128x128xf32>
    %62 = arith.maximumf %59, %61 : vector<128x128xf32>
    %63 = arith.truncf %62 : vector<128x128xf32> to vector<128x128xbf16>
    %c0_42 = arith.constant 0 : index
    %c0_43 = arith.constant 0 : index
    %64 = vector.load %arg17[%c0_42, %c0_43] : memref<128x128xbf16, #tpu.memory_space<vmem>>, vector<128x128xbf16>
    %cst_44 = arith.constant dense<0.000000e+00> : vector<128x128xf32>
    %65 = tpu.matmul %63, %64, %cst_44 {dimension_numbers = #tpu.dot_dimension_numbers<[1], [0], [0], [1], [0, 0, 1, 1], [], []>} : vector<128x128xbf16>, vector<128x128xbf16>, vector<128x128xf32> -> vector<128x128xf32>
    %c0_45 = arith.constant 0 : index
    %c0_46 = arith.constant 0 : index
    %66 = vector.load %arg18[%c0_45, %c0_46] : memref<1x128xf32, #tpu.memory_space<vmem>>, vector<1x128xf32>
    %67 = vector.broadcast %66 : vector<1x128xf32> to vector<128x128xf32>
    %68 = arith.addf %65, %67 : vector<128x128xf32>
    %69 = tpu.iota {dimensions = array<i32: 1>} : vector<128x128xi32>
    %c0_i32 = arith.constant 0 : i32
    %70 = vector.broadcast %c0_i32 : i32 to vector<128x128xi32>
    %71 = arith.cmpi eq, %69, %70 : vector<128x128xi32>
    %c0_47 = arith.constant 0 : index
    %c0_48 = arith.constant 0 : index
    %72 = vector.load %arg2[%c0_47, %c0_48] : memref<128x4xi32, #tpu.memory_space<vmem>>, vector<128x1xi32>
    %73 = vector.broadcast %72 : vector<128x1xi32> to vector<128x128xi32>
    %74 = arith.cmpi eq, %69, %73 : vector<128x128xi32>
    %c0_i32_49 = arith.constant 0 : i32
    %75 = vector.broadcast %c0_i32_49 : i32 to vector<128x1xi32>
    %76 = arith.cmpi sgt, %72, %75 : vector<128x1xi32>
    %77 = vector.broadcast %76 : vector<128x1xi1> to vector<128x128xi1>
    %78 = arith.andi %74, %77 : vector<128x128xi1>
    %79 = arith.ori %71, %78 : vector<128x128xi1>
    %c0_50 = arith.constant 0 : index
    %c1 = arith.constant 1 : index
    %80 = vector.load %arg2[%c0_50, %c1] : memref<128x4xi32, #tpu.memory_space<vmem>>, vector<128x1xi32>
    %81 = vector.broadcast %80 : vector<128x1xi32> to vector<128x128xi32>
    %82 = arith.cmpi eq, %69, %81 : vector<128x128xi32>
    %c0_i32_51 = arith.constant 0 : i32
    %83 = vector.broadcast %c0_i32_51 : i32 to vector<128x1xi32>
    %84 = arith.cmpi sgt, %80, %83 : vector<128x1xi32>
    %85 = vector.broadcast %84 : vector<128x1xi1> to vector<128x128xi1>
    %86 = arith.andi %82, %85 : vector<128x128xi1>
    %87 = arith.ori %79, %86 : vector<128x128xi1>
    %c0_52 = arith.constant 0 : index
    %c2 = arith.constant 2 : index
    %88 = vector.load %arg2[%c0_52, %c2] : memref<128x4xi32, #tpu.memory_space<vmem>>, vector<128x1xi32>
    %89 = vector.broadcast %88 : vector<128x1xi32> to vector<128x128xi32>
    %90 = arith.cmpi eq, %69, %89 : vector<128x128xi32>
    %c0_i32_53 = arith.constant 0 : i32
    %91 = vector.broadcast %c0_i32_53 : i32 to vector<128x1xi32>
    %92 = arith.cmpi sgt, %88, %91 : vector<128x1xi32>
    %93 = vector.broadcast %92 : vector<128x1xi1> to vector<128x128xi1>
    %94 = arith.andi %90, %93 : vector<128x128xi1>
    %95 = arith.ori %87, %94 : vector<128x128xi1>
    %c0_54 = arith.constant 0 : index
    %c3 = arith.constant 3 : index
    %96 = vector.load %arg2[%c0_54, %c3] : memref<128x4xi32, #tpu.memory_space<vmem>>, vector<128x1xi32>
    %97 = vector.broadcast %96 : vector<128x1xi32> to vector<128x128xi32>
    %98 = arith.cmpi eq, %69, %97 : vector<128x128xi32>
    %c0_i32_55 = arith.constant 0 : i32
    %99 = vector.broadcast %c0_i32_55 : i32 to vector<128x1xi32>
    %100 = arith.cmpi sgt, %96, %99 : vector<128x1xi32>
    %101 = vector.broadcast %100 : vector<128x1xi1> to vector<128x128xi1>
    %102 = arith.andi %98, %101 : vector<128x128xi1>
    %103 = arith.ori %95, %102 : vector<128x128xi1>
    %cst_56 = arith.constant -1.000000e+02 : f32
    %104 = vector.broadcast %cst_56 : f32 to vector<128x128xf32>
    %105 = arith.select %103, %104, %68 : vector<128x128xi1>, vector<128x128xf32>
    %c0_57 = arith.constant 0 : index
    %c0_58 = arith.constant 0 : index
    %106 = vector.load %arg19[%c0_57, %c0_58] : memref<128x128xf32, #tpu.memory_space<vmem>>, vector<128x128xf32>
    tpu.vector_store %arg19[%c0_57, %c0_58], %105 {strides = array<i32>} : memref<128x128xf32, #tpu.memory_space<vmem>>, vector<128x128xf32>,
    return
  }
  func.func @transform_0(%arg0: i32) -> (i32, i32) {
    %c0_i32 = arith.constant 0 : i32
    %c0_i32_0 = arith.constant 0 : i32
    return %arg0, %c0_i32 : i32, i32
  }
  func.func @transform_1(%arg0: i32) -> (i32, i32) {
    %c0_i32 = arith.constant 0 : i32
    %c0_i32_0 = arith.constant 0 : i32
    return %arg0, %c0_i32 : i32, i32
  }
  func.func @transform_2(%arg0: i32) -> (i32, i32) {
    %c0_i32 = arith.constant 0 : i32
    %c0_i32_0 = arith.constant 0 : i32
    %c0_i32_1 = arith.constant 0 : i32
    return %c0_i32, %c0_i32_0 : i32, i32
  }
  func.func @transform_3(%arg0: i32) -> (i32, i32) {
    %c0_i32 = arith.constant 0 : i32
    %c0_i32_0 = arith.constant 0 : i32
    %c0_i32_1 = arith.constant 0 : i32
    return %c0_i32, %c0_i32_0 : i32, i32
  }
  func.func @transform_4(%arg0: i32) -> (i32, i32) {
    %c0_i32 = arith.constant 0 : i32
    %c0_i32_0 = arith.constant 0 : i32
    %c0_i32_1 = arith.constant 0 : i32
    return %c0_i32, %c0_i32_0 : i32, i32
  }
  func.func @transform_5(%arg0: i32) -> (i32, i32) {
    %c0_i32 = arith.constant 0 : i32
    %c0_i32_0 = arith.constant 0 : i32
    %c0_i32_1 = arith.constant 0 : i32
    return %c0_i32, %c0_i32_0 : i32, i32
  }
  func.func @transform_6(%arg0: i32) -> (i32, i32) {
    %c0_i32 = arith.constant 0 : i32
    %c0_i32_0 = arith.constant 0 : i32
    %c0_i32_1 = arith.constant 0 : i32
    return %c0_i32, %c0_i32_0 : i32, i32
  }
  func.func @transform_7(%arg0: i32) -> (i32, i32) {
    %c0_i32 = arith.constant 0 : i32
    %c0_i32_0 = arith.constant 0 : i32
    %c0_i32_1 = arith.constant 0 : i32
    return %c0_i32, %c0_i32_0 : i32, i32
  }
  func.func @transform_8(%arg0: i32) -> (i32, i32) {
    %c0_i32 = arith.constant 0 : i32
    %c0_i32_0 = arith.constant 0 : i32
    %c0_i32_1 = arith.constant 0 : i32
    return %c0_i32, %c0_i32_0 : i32, i32
  }
  func.func @transform_9(%arg0: i32) -> (i32, i32) {
    %c0_i32 = arith.constant 0 : i32
    %c0_i32_0 = arith.constant 0 : i32
    %c0_i32_1 = arith.constant 0 : i32
    return %c0_i32, %c0_i32_0 : i32, i32
  }
  func.func @transform_10(%arg0: i32) -> (i32, i32) {
    %c0_i32 = arith.constant 0 : i32
    %c0_i32_0 = arith.constant 0 : i32
    %c0_i32_1 = arith.constant 0 : i32
    return %c0_i32, %c0_i32_0 : i32, i32
  }
  func.func @transform_11(%arg0: i32) -> (i32, i32) {
    %c0_i32 = arith.constant 0 : i32
    %c0_i32_0 = arith.constant 0 : i32
    %c0_i32_1 = arith.constant 0 : i32
    return %c0_i32, %c0_i32_0 : i32, i32
  }
  func.func @transform_12(%arg0: i32) -> (i32, i32) {
    %c0_i32 = arith.constant 0 : i32
    %c0_i32_0 = arith.constant 0 : i32
    %c0_i32_1 = arith.constant 0 : i32
    return %c0_i32, %c0_i32_0 : i32, i32
  }
  func.func @transform_13(%arg0: i32) -> (i32, i32) {
    %c0_i32 = arith.constant 0 : i32
    %c0_i32_0 = arith.constant 0 : i32
    %c0_i32_1 = arith.constant 0 : i32
    return %c0_i32, %c0_i32_0 : i32, i32
  }
  func.func @transform_14(%arg0: i32) -> (i32, i32) {
    %c0_i32 = arith.constant 0 : i32
    %c0_i32_0 = arith.constant 0 : i32
    %c0_i32_1 = arith.constant 0 : i32
    return %c0_i32, %c0_i32_0 : i32, i32
  }
  func.func @transform_15(%arg0: i32) -> (i32, i32) {
    %c0_i32 = arith.constant 0 : i32
    %c0_i32_0 = arith.constant 0 : i32
    %c0_i32_1 = arith.constant 0 : i32
    return %c0_i32, %c0_i32_0 : i32, i32
  }
  func.func @transform_16(%arg0: i32) -> (i32, i32) {
    %c0_i32 = arith.constant 0 : i32
    %c0_i32_0 = arith.constant 0 : i32
    %c0_i32_1 = arith.constant 0 : i32
    return %c0_i32, %c0_i32_0 : i32, i32
  }
  func.func @transform_17(%arg0: i32) -> (i32, i32) {
    %c0_i32 = arith.constant 0 : i32
    %c0_i32_0 = arith.constant 0 : i32
    %c0_i32_1 = arith.constant 0 : i32
    return %c0_i32, %c0_i32_0 : i32, i32
  }
  func.func @transform_18(%arg0: i32) -> (i32, i32) {
    %c0_i32 = arith.constant 0 : i32
    %c0_i32_0 = arith.constant 0 : i32
    return %arg0, %c0_i32 : i32, i32
  }
}

</mosaic_0001>

<bundles_post_ra>
// kernel: tpu_custom_call.1
= control target key start
LH: loop header
LB: loop body
LE: loop exit
PB: predicated region body
PF: predicated region fallthrough
CT: control target
= control target key end

     0   :  { %s14910_s0 = inlined_call_operand.vmem [shape: bf16[256,64], index: 0, kind: input, shape index: {}]   ;;  %s14911_s1 = inlined_call_operand.vmem [shape: s32[256,4], index: 1, kind: input, shape index: {}]   ;;  %s14912_s2 = inlined_call_operand.vmem [shape: bf16[64,128], index: 2, kind: input, shape index: {}]   ;;  %s14913_s3 = inlined_call_operand.vmem [shape: f32[1,128], index: 3, kind: input, shape index: {}]   ;;  %s14914_s4 = inlined_call_operand.vmem [shape: bf16[128,256], index: 4, kind: input, shape index: {}]   ;;  %s14915_s5 = inlined_call_operand.vmem [shape: f32[1,256], index: 5, kind: input, shape index: {}]   ;;  %s14916_s6 = inlined_call_operand.hbm [shape: bf16[256,512], index: 6, kind: input, shape index: {}]   ;;  %s14917_s7 = inlined_call_operand.vmem [shape: f32[1,512], index: 7, kind: input, shape index: {}]   ;;  %s14918_s8 = inlined_call_operand.hbm [shape: bf16[512,1024], index: 8, kind: input, shape index: {}]   ;;  %s14919_s9 = inlined_call_operand.vmem [shape: f32[1,1024], index: 9, kind: input, shape index: {}]   ;;  %s14920_s10 = inlined_call_operand.hbm [shape: bf16[1024,512], index: 10, kind: input, shape index: {}]   ;;  %s14921_s11 = inlined_call_operand.vmem [shape: f32[1,512], index: 11, kind: input, shape index: {}]   ;;  %s14922_s12 = inlined_call_operand.hbm [shape: bf16[512,256], index: 12, kind: input, shape index: {}]   ;;  %s14923_s13 = inlined_call_operand.vmem [shape: f32[1,256], index: 13, kind: input, shape index: {}]   ;;  %s14924_s14 = inlined_call_operand.vmem [shape: bf16[256,128], index: 14, kind: input, shape index: {}]   ;;  %s14925_s15 = inlined_call_operand.vmem [shape: f32[1,128], index: 15, kind: input, shape index: {}]   ;;  %s14926_s16 = inlined_call_operand.vmem [shape: bf16[128,128], index: 16, kind: input, shape index: {}]   ;;  %s14927_s17 = inlined_call_operand.vmem [shape: f32[1,128], index: 17, kind: input, shape index: {}]   ;;  %s14928_s18 = inlined_call_operand.hbm [shape: f32[256,128], index: 18, kind: output, shape index: {}]  }
   0x1   :  { %15033 = sst [smem:[#allocation39_spill]] %s14910_s0 }
   0x2   :  { %15034 = sst [smem:[#allocation40_spill]] %s14911_s1 }
   0x3   :  { %15035 = sst [smem:[#allocation41_spill]] %s14912_s2 }
   0x4   :  { %15036 = sst [smem:[#allocation42_spill]] %s14918_s8 }
   0x5   :  { %15037 = sst [smem:[#allocation43_spill]] %s14927_s17 }
   0x6   :  { %15038 = sst [smem:[#allocation44_spill]] %s14928_s18 }
   0x7   :  { %23 = vsyncpa [#allocation3], 0 }
   0x8   :  { %24 = vsyncpa [#allocation6], 0 }
   0x9   :  { %25 = vsyncpa [#allocation9], 0 }
   0xa   :  { %26 = vsyncpa [#allocation4], 0 }
   0xb   :  { %28 = vsyncpa [#allocation4 + $0x1], 0  ;;  %s11920_s27 = smov 0   ;;  %s11922_s28 = smov 0  }
   0xc   :  { %s11924_s29 = smov 0   ;;  %s11926_s30 = smov 0  }
   0xd LB: > { %15039 = sst [smem:[#allocation15_spill]] %s11794_s27  ;;  %s11941_s0 = sadd.s32 4294967295, %s11806_s30   ;;  %s11806_s30 = sphi %s11926_s30, %s15466_s30   ;;  %s11802_s29 = sphi %s11924_s29, %s15469_s29   ;;  %s11798_s28 = sphi %s11922_s28, %s15468_s28   ;;  %s11794_s27 = sphi %s11920_s27, %s15467_s27  }
   0xe   : > { %15040 = sst [smem:[#allocation16_spill]] %s11798_s28  ;;  %s9427_s19 = sadd.s32 4294967294, %s11806_s30  }
   0xf   : > { %15041 = sst [smem:[#allocation17_spill]] %s11802_s29  ;;  %s11945_s1 = sadd.s32 1, %s11806_s30  }
  0x10   : > { %15042 = sst [smem:[#allocation18_spill]] %s11806_s30  ;;  %s429_s20 = sadd.s32 1, %s11802_s29 }
  0x11   : > { %15043 = sst [smem:[#allocation19_spill]] %s11945_s1  ;;  %s426_s21 = ssub.s32 %s11806_s30, %s11945_s1 }
  0x12   : > { %p439_p0 = scmp.ne.s32.totalorder %s11802_s29, %s11798_s28  ;;  %p427_p1 = scmp.eq.s32.totalorder %s426_s21, 0 }
  0x13   : > { %p440_p2 = scmp.eq.s32.totalorder %s11941_s0, 1  ;;  %p445_p3 = scmp.ne.s32.totalorder %s11798_s28, %s11794_s27 }
  0x14   : > { %p446_p4 = scmp.eq.s32.totalorder %s9427_s19, 1  ;;  %p9428_p7 = scmp.ge.s32.totalorder %s11806_s30, 1 }
  0x15   : > { %s11956_s22 = scalar_select %p427_p1, %s11802_s29, %s429_s20  }
  0x16   : > { %p11958_p5 = por %p440_p2, %p439_p0  ;;  %p11962_p6 = por %p446_p4, %p445_p3 }
  0x17   : > { %15044 = sst [smem:[#allocation20_spill]] %s11956_s22  ;;  %p453_p8 = scmp.lt.s32.totalorder %s11806_s30, 3 }
  0x18   : > { %s15045_s2 = scalar_select %p11958_p5, 1, 0 }
  0x19   : > { %s15047_s23 = scalar_select %p11962_p6, 1, 0 }
  0x1a   : > { %15046 = sst [smem:[#allocation21_spill]] %s15045_s2  ;;  %p14936_p9 = scmp.eq.s32.totalorder %s11941_s0, 0 }
  0x1b   : > { %15048 = sst [smem:[#allocation22_spill]] %s15047_s23  ;;  %p11969_p10 = pnand %p9428_p7, %p453_p8 }
  0x1c   : > { %s11808_s25 = smov [#allocation5]   ;;  %s11809_s20 = smov [#allocation2]  }
  0x1d   : > { %s15049_s24 = scalar_select %p11969_p10, 1, 0 }
  0x1e   : > { %s493_s26 = sshll.u32 %s11808_s25, 4  ;;  %p10895_p11 = pneg %p11969_p10  ;;  %s494_s26 = int_to_ptr.vmem [resolvable:$true] %s493_s26 }
  0x1f   : > { %s477_s21 = sshll.u32 %s11809_s20, 4  ;;  %s15051_s8 = sld [smem:[#allocation42_spill]]  ;;  %s11981_s21 = int_to_ptr.vmem [resolvable:$true] %s477_s21 }
  0x20   : > { %p11977_p12 = pnand %p14936_p9, %p10895_p11 }
  0x22   : > { %p11991_p0 = pneg %p11977_p12 }
  0x25   : > { %s11620_s1 = scalar_lea.hbm %s15051_s8, 32768 }
  0x26   : > { %p11621_p13 = scmp.ne.s32.totalorder %s15051_s8, %s11620_s1  ;;  %p11627_p3 = scmp.lt.u32.totalorder %s11620_s1, %s15051_s8 }
  0x28   : > { %p11623_p1 = pnand %p11991_p0, %p11621_p13 }
  0x2a   : > { %p11624_p2 = pneg %p11623_p1 }
  0x2c   : > { %p11629_p4 = pnand %p11627_p3, %p11624_p2 }
  0x2e   : > { %11632 = shalt.err (!%p11629_p4)
}
  0x2f   : > { %s11633_s29 = scalar_lea.vmem %s494_s26, 32768  ;;  %p11641_p9 = scmp.lt.s32.totalorder %s494_s26, %s494_s26 }
  0x30   : > { %p11634_p7 = scmp.ne.s32.totalorder %s494_s26, %s11633_s29  ;;  %p11642_p6 = scmp.lt.s32.totalorder %s11633_s29, %s11633_s29 }
  0x32   : > { %p11636_p8 = pnand %p11634_p7, %p11991_p0  ;;  %p11643_p5 = por %p11642_p6, %p11641_p9 }
  0x34   : > { %p11637_p11 = pneg %p11636_p8 }
  0x36   : > { %p11644_p10 = pnand %p11643_p5, %p11637_p11 }
  0x38   : > { %11647 = shalt.err (!%p11644_p10)
}
  0x39   : > { %s11810_s27 = smov 512   ;;  %s11811_s22 = smov 32  }
  0x3a   : > { %10901 = dma.hbm_to_vmem [thread:$0]  (!%p11977_p12), %s15051_s8, 32768, %s494_s26, [#allocation6], %s11810_s27, %s11810_s27, %s11811_s22  }
  0x3b   : > { %s11648_s18 = scalar_lea.hbm %s14916_s6, 8192 }
  0x3c   : > { %p11649_p13 = scmp.ne.s32.totalorder %s14916_s6, %s11648_s18  ;;  %p11655_p9 = scmp.lt.u32.totalorder %s11648_s18, %s14916_s6 }
  0x3e   : > { %p11651_p5 = pnand %p11649_p13, %p11991_p0 }
  0x40   : > { %p11652_p6 = pneg %p11651_p5 }
  0x42   : > { %p11657_p10 = pnand %p11655_p9, %p11652_p6 }
  0x44   : > { %11660 = shalt.err (!%p11657_p10)
}
  0x45   : > { %s11661_s26 = scalar_lea.vmem %s11981_s21, 8192  ;;  %p11669_p4 = scmp.lt.s32.totalorder %s11981_s21, %s11981_s21 }
  0x46   : > { %p11662_p1 = scmp.ne.s32.totalorder %s11981_s21, %s11661_s26  ;;  %p11670_p7 = scmp.lt.s32.totalorder %s11661_s26, %s11661_s26 }
  0x48   : > { %p11664_p2 = pnand %p11662_p1, %p11991_p0  ;;  %p11671_p8 = por %p11670_p7, %p11669_p4 }
  0x4a   : > { %p11665_p3 = pneg %p11664_p2 }
  0x4c   : > { %p11672_p11 = pnand %p11671_p8, %p11665_p3 }
  0x4e   : > { %11675 = shalt.err (!%p11672_p11)
}
  0x4f   : > { %s11812_s17 = smov 256   ;;  %s11813_s18 = smov 16  }
  0x50   : > { %10898 = dma.hbm_to_vmem [thread:$0]  (!%p11977_p12), %s14916_s6, 8192, %s11981_s21, [#allocation3], %s11812_s17, %s11812_s17, %s11813_s18  }
  0x51   : > { %s11814_s27 = smov [#allocation7]   ;;  %s11815_s30 = smov [#allocation8]  }
  0x52   : > { %s509_s22 = sshll.u32 %s11814_s27, 4  ;;  %s525_s1 = sshll.u32 %s11815_s30, 4  ;;  %s510_s22 = int_to_ptr.vmem [resolvable:$true] %s509_s22  ;;  %s12030_s1 = int_to_ptr.vmem [resolvable:$true] %s525_s1 }
  0x53   : > { %s11676_s29 = scalar_lea.hbm %s14920_s10, 32768 }
  0x54   : > { %p11677_p13 = scmp.ne.s32.totalorder %s14920_s10, %s11676_s29  ;;  %p11683_p9 = scmp.lt.u32.totalorder %s11676_s29, %s14920_s10 }
  0x56   : > { %p11679_p5 = pnand %p11677_p13, %p11991_p0 }
  0x58   : > { %p11680_p6 = pneg %p11679_p5 }
  0x5a   : > { %p11685_p10 = pnand %p11683_p9, %p11680_p6 }
  0x5c   : > { %11688 = shalt.err (!%p11685_p10)
}
  0x5d   : > { %s11689_s2 = scalar_lea.vmem %s510_s22, 32768  ;;  %p11697_p4 = scmp.lt.s32.totalorder %s510_s22, %s510_s22 }
  0x5e   : > { %p11690_p1 = scmp.ne.s32.totalorder %s510_s22, %s11689_s2  ;;  %p11698_p7 = scmp.lt.s32.totalorder %s11689_s2, %s11689_s2 }
  0x60   : > { %p11692_p2 = pnand %p11690_p1, %p11991_p0  ;;  %p11699_p8 = por %p11698_p7, %p11697_p4 }
  0x62   : > { %p11693_p3 = pneg %p11692_p2 }
  0x64   : > { %p11700_p11 = pnand %p11699_p8, %p11693_p3 }
  0x66   : > { %11703 = shalt.err (!%p11700_p11)
}
  0x67   : > { %10904 = dma.hbm_to_vmem [thread:$0]  (!%p11977_p12), %s14920_s10, 32768, %s510_s22, [#allocation6], %s11812_s17, %s11812_s17, %s11813_s18  }
  0x68   : > { %s11704_s20 = scalar_lea.hbm %s14922_s12, 8192 }
  0x69   : > { %p11705_p13 = scmp.ne.s32.totalorder %s14922_s12, %s11704_s20  ;;  %p11711_p9 = scmp.lt.u32.totalorder %s11704_s20, %s14922_s12 }
  0x6b   : > { %p11707_p5 = pnand %p11705_p13, %p11991_p0 }
  0x6d   : > { %p11708_p6 = pneg %p11707_p5 }
  0x6f   : > { %p11713_p10 = pnand %p11711_p9, %p11708_p6 }
  0x71   : > { %11716 = shalt.err (!%p11713_p10)
}
  0x72   : > { %s11717_s17 = scalar_lea.vmem %s12030_s1, 8192  ;;  %p11725_p4 = scmp.lt.s32.totalorder %s12030_s1, %s12030_s1 }
  0x73   : > { %p11718_p1 = scmp.ne.s32.totalorder %s12030_s1, %s11717_s17  ;;  %p11726_p7 = scmp.lt.s32.totalorder %s11717_s17, %s11717_s17 }
  0x75   : > { %p11720_p2 = pnand %p11718_p1, %p11991_p0  ;;  %p11727_p8 = por %p11726_p7, %p11725_p4 }
  0x77   : > { %p11721_p3 = pneg %p11720_p2 }
  0x79   : > { %p11728_p11 = pnand %p11727_p8, %p11721_p3 }
  0x7b   : > { %11731 = shalt.err (!%p11728_p11)
}
  0x7c   : > { %s11816_s18 = smov 128   ;;  %s11817_s22 = smov 8  }
  0x7d   : > { %10907 = dma.hbm_to_vmem [thread:$0]  (!%p11977_p12), %s14922_s12, 8192, %s12030_s1, [#allocation9], %s11816_s18, %s11816_s18, %s11817_s22  }
  0x7e   : > { %p15053_p13 = scmp.ne.s32.totalorder %s15049_s24, 0 }
  0x80   : > { %574 = sbr.rel (%p15053_p13) target bundleno = 2363 (0x93b), region = 92 }
  0x87   : > { %p15054_p0 = scmp.eq.s32.totalorder %s11941_s0, 0 }
  0x89   : > { %11777 = dma.done.wait (%p15054_p0), [#allocation3], 8192   ;;  %p15055_p5 = pmov %p15054_p0 }
  0x8a   : > { %p15056_p6 = pmov %p15054_p0 }
  0x8b   : > { %11779 = vsyncadd (%p15055_p5), [#allocation3], 4294959104 }
  0x8c   : > { %11781 = dma.done.wait (%p15056_p6), [#allocation6], 65536   ;;  %p15057_p9 = pmov %p15054_p0 }
  0x8d   : > { %p15058_p10 = pmov %p15054_p0 }
  0x8e   : > { %11783 = vsyncadd (%p15057_p9), [#allocation6], 4294901760 }
  0x8f   : > { %11785 = dma.done.wait (%p15058_p10), [#allocation9], 8192   ;;  %p15059_p12 = pmov %p15054_p0 }
  0x90   : > { %s9440_s24 = sshll.u32 %s11941_s0, 4  ;;  %s15060_s27 = sld [smem:[#allocation41_spill]]  ;;  %vm754_vm0 = vcmask 523264   ;;  %v10989_v5 = vld [vmem:[%s14914_s4 + $0x4] ss:$8 sps:$4 sm:$0xff]   ;;  %v14945_v28 = vmov 0  }
  0x91   : > { %11787 = vsyncadd (%p15059_p12), [#allocation9], 4294959104  ;;  %p646_p1 = scmp.lt.s32.totalorder %s9440_s24, 31  ;;  %s15062_s28 = sld [smem:[#allocation39_spill]]  ;;  %v10991_v6 = vld [vmem:[%s14914_s4] ss:$8 sps:$4 sm:$0xff]   ;;  %1024 = vmatprep.subr.bf16.mxu1 %v10989_v5  ;;  %1056 = vmatprep.mubr.bf16.mxu1 %v14945_v28 }
  0x92   : > { %v10992_v8 = vld [vmem:[%s14914_s4 + $0x14] ss:$8 sps:$4 sm:$0xff]   ;;  %1025 = vmatpush1.bf16.msra.mxu1 %v10991_v6  ;;  %v10994_v10 = vld [vmem:[%s14914_s4 + $0x10] ss:$8 sps:$4 sm:$0xff]   ;;  %v10995_v11 = vld [vmem:[%s14914_s4 + $0x24] ss:$8 sps:$4 sm:$0xff]   ;;  %10970 = vset.pattern.permute.xlu1 %v14945_v28 }
  0x93   : > { %s15471_s24 = smov (!%p646_p1, %s9440_s24), 31  ;;  %1026 = vmatprep.subr.bf16.mxu1 %v10992_v8  ;;  %v10997_v12 = vld [vmem:[%s14914_s4 + $0x20] ss:$8 sps:$4 sm:$0xff]   ;;  %v10998_v13 = vld [vmem:[%s14914_s4 + $0x34] ss:$8 sps:$4 sm:$0xff]   ;;  %10969 = vset.pattern.permute.xlu0 %v14945_v28  ;;  %s15152_s1 = sld [smem:[#allocation40_spill]] }
  0x94   : > { %s9441_s19 = sshll.u32 %s15471_s24, 2  ;;  %v11000_v16 = vld [vmem:[%s14914_s4 + $0x30] ss:$8 sps:$4 sm:$0xff]   ;;  %v11001_v17 = vld [vmem:[%s14914_s4 + $0x44] ss:$8 sps:$4 sm:$0xff]   ;;  %s9443_s8 = sshll.u32 %s15471_s24, 3 }
  0x95   : > { %v11003_v18 = vld [vmem:[%s14914_s4 + $0x40] ss:$8 sps:$4 sm:$0xff]   ;;  %v11004_v22 = vld [vmem:[%s14914_s4 + $0x54] ss:$8 sps:$4 sm:$0xff]   ;;  %v11006_v23 = vld [vmem:[%s14914_s4 + $0x50] ss:$8 sps:$4 sm:$0xff]  }
  0x96   : > { %s15061_s23 = smov %s15060_s27  ;;  %v10977_v0 = vld [vmem:[%s15060_s27] sm:$0xff]   ;;  %1027 = vmatpush1.bf16.msra.mxu1 %v10994_v10  ;;  %v11010_v26 = vld [vmem:[%s14914_s4 + $0x74] ss:$8 sps:$4 sm:$0xff]   ;;  %v11012_v27 = vld [vmem:[%s14914_s4 + $0x70] ss:$8 sps:$4 sm:$0xff]   ;;  %s15459_s20 = sld [smem:[#allocation44_spill]] }
  0x97   : > { %v10978_v1 = vld [vmem:[%s15061_s23 + $0x8] sm:$0xff]   ;;  %s12100_s21 = scalar_lea.vmem %s15062_s28, %s9441_s19  ;;  %10245 = vmatprep.subr.bf16.mxu0 %v10977_v0  ;;  %v10979_v2 = vld [vmem:[%s15061_s23 + $0x10] sm:$0xff]   ;;  %v10980_v4 = vld [vmem:[%s15061_s23 + $0x18] sm:$0xff]   ;;  %1028 = vmatprep.subr.bf16.mxu1 %v10995_v11  ;;  %s15422_s28 = sld [smem:[#allocation16_spill]] }
  0x98   : > { %10246 = vmatpush3.bf16.msra.mxu0 %v10977_v0  ;;  %v10981_v3 = vld [vmem:[%s12100_s21] sm:$0xff]   ;;  %v10982_v7 = vld [vmem:[%s12100_s21 + $0x8] sm:$0xff]   ;;  %v10983_v9 = vld [vmem:[%s12100_s21 + $0x10] sm:$0xff]   ;;  %s10152_s19 = sshll.u32 %s11941_s0, 11  ;;  %s15458_s0 = sld [smem:[#allocation21_spill]] }
  0x99   : > { %10247 = vmatprep.subr.bf16.mxu0 %v10978_v1  ;;  %10253 = vmatprep.mubr.msk.bf16.mxu0 %vm754_vm0, %v10981_v3  ;;  %v10984_v14 = vld [vmem:[%s12100_s21 + $0x18] sm:$0xff]   ;;  %v10985_v15 = vld [vmem:[%s12100_s21 + $0x20] sm:$0xff]   ;;  %v10986_v19 = vld [vmem:[%s12100_s21 + $0x28] sm:$0xff]   ;;  %s13362_s27 = scalar_lea.vmem %s15152_s1, %s9443_s8  ;;  %s11822_s24 = smov [#allocation10]  }
  0x9a   : > { %1029 = vmatpush1.bf16.msra.mxu1 %v10997_v12  ;;  %v10987_v20 = vld [vmem:[%s12100_s21 + $0x30] sm:$0xff]   ;;  %v10988_v21 = vld [vmem:[%s12100_s21 + $0x38] sm:$0xff]   ;;  %v11007_v24 = vld [vmem:[%s14914_s4 + $0x64] ss:$8 sps:$4 sm:$0xff]   ;;  %s15425_s21 = sld [smem:[#allocation43_spill]] }
  0x9b   : > { %1030 = vmatprep.subr.bf16.mxu1 %v10998_v13  ;;  %v11009_v25 = vld [vmem:[%s14914_s4 + $0x60] ss:$8 sps:$4 sm:$0xff]   ;;  %v11015_v30 = vld [vmem:[#allocation2 + $0x4] ss:$16 sps:$4 sm:$0xff]   ;;  %v11018_v31 = vld [vmem:[#allocation2 + $0xc] ss:$16 sps:$4 sm:$0xff]  }
  0x9c   : > { %10248 = vmatpush3.bf16.msra.mxu0 %v10978_v1  ;;  %v11013_v29 = vld [vmem:[#allocation2] ss:$16 sps:$4 sm:$0xff]   ;;  %v11021_v32 = vld [vmem:[#allocation2 + $0x24] ss:$16 sps:$4 sm:$0xff]   ;;  %v11016_v13 = vld [vmem:[#allocation2 + $0x8] ss:$16 sps:$4 sm:$0xff]   ;;  %s14856_s29 = scalar_lea.hbm %s15459_s20, %s10152_s19 }
  0x9d   : > { %10249 = vmatprep.subr.bf16.mxu0 %v10979_v2  ;;  %v11019_v33 = vld [vmem:[#allocation2 + $0x20] ss:$16 sps:$4 sm:$0xff]   ;;  %v11027_v34 = vld [vmem:[#allocation2 + $0x44] ss:$16 sps:$4 sm:$0xff]   ;;  %s642_s17 = sand.u32 1, %s15422_s28  }
  0x9e   : > { %1031 = vmatpush1.bf16.msra.mxu1 %v11000_v16  ;;  %v11025_v35 = vld [vmem:[#allocation2 + $0x40] ss:$16 sps:$4 sm:$0xff]   ;;  %v11033_v36 = vld [vmem:[#allocation2 + $0x64] ss:$16 sps:$4 sm:$0xff]   ;;  %s9439_s18 = sshll.u32 %s642_s17, 7  ;;  %s14869_s26 = scalar_lea.sflag [#allocation4], %s642_s17 }
  0x9f   : > { %1032 = vmatprep.subr.bf16.mxu1 %v11001_v17  ;;  %v11031_v37 = vld [vmem:[#allocation2 + $0x60] ss:$16 sps:$4 sm:$0xff]   ;;  %v11039_v38 = vld [vmem:[#allocation2 + $0x84] ss:$16 sps:$4 sm:$0xff]   ;;  %v11024_v17 = vld [vmem:[#allocation2 + $0x2c] ss:$16 sps:$4 sm:$0xff]  }
  0xa0   : > { %10250 = vmatpush3.bf16.msra.mxu0 %v10979_v2  ;;  %v11037_v39 = vld [vmem:[#allocation2 + $0x80] ss:$16 sps:$4 sm:$0xff]   ;;  %v11045_v40 = vld [vmem:[#allocation2 + $0xa4] ss:$16 sps:$4 sm:$0xff]   ;;  %s14728_s8 = scalar_lea.vmem [#allocation10], %s9439_s18  ;;  %p15461_p3 = scmp.ne.s32.totalorder %s15458_s0, 0 }
  0xa1   : > { %10251 = vmatprep.subr.bf16.mxu0 %v10980_v4  ;;  %v11043_v41 = vld [vmem:[#allocation2 + $0xa0] ss:$16 sps:$4 sm:$0xff]   ;;  %v11051_v42 = vld [vmem:[#allocation2 + $0xc4] ss:$16 sps:$4 sm:$0xff]   ;;  %s9312_s25 = sshll.u32 %s14728_s8, 4  ;;  %s11736_s18 = sshll.u32 %s11822_s24, 4  ;;  %s14858_s25 = int_to_ptr.vmem [resolvable:$true] %s9312_s25  ;;  %s11737_s18 = int_to_ptr.vmem [resolvable:$false] %s11736_s18 }
  0xa2   : > { %1033 = vmatpush1.bf16.msra.mxu1 %v11003_v18  ;;  %v11049_v43 = vld [vmem:[#allocation2 + $0xc0] ss:$16 sps:$4 sm:$0xff]   ;;  %v11057_v44 = vld [vmem:[#allocation2 + $0xe4] ss:$16 sps:$4 sm:$0xff]   ;;  %s11738_s22 = scalar_lea.vmem %s11737_s18, 4096  ;;  %p11739_p8 = scmp.lt.s32.totalorder %s14858_s25, %s11737_s18 }
  0xa3   : > { %1034 = vmatprep.subr.bf16.mxu1 %v11004_v22  ;;  %v11055_v45 = vld [vmem:[#allocation2 + $0xe0] ss:$16 sps:$4 sm:$0xff]   ;;  %v11063_v46 = vld [vmem:[#allocation2 + $0x104] ss:$16 sps:$4 sm:$0xff]  }
  0xa4   : > { %10252 = vmatpush3.bf16.msra.mxu0 %v10980_v4  ;;  %v11061_v47 = vld [vmem:[#allocation2 + $0x100] ss:$16 sps:$4 sm:$0xff]   ;;  %v11069_v48 = vld [vmem:[#allocation2 + $0x124] ss:$16 sps:$4 sm:$0xff]  }
  0xa5   : > { %1623 = vmatprep.subr.bf16.mxu0 %v11015_v30  ;;  %v11067_v49 = vld [vmem:[#allocation2 + $0x120] ss:$16 sps:$4 sm:$0xff]   ;;  %v11075_v50 = vld [vmem:[#allocation2 + $0x144] ss:$16 sps:$4 sm:$0xff]  }
  0xa6   : > { %1035 = vmatpush1.bf16.msra.mxu1 %v11006_v23  ;;  %v11073_v51 = vld [vmem:[#allocation2 + $0x140] ss:$16 sps:$4 sm:$0xff]   ;;  %v11081_v52 = vld [vmem:[#allocation2 + $0x164] ss:$16 sps:$4 sm:$0xff]  }
  0xa7   : > { %10254 = vmatmul.mubr.msk.bf16.vlgmr.msra.gmra.mrb[0].mxu0 %vm754_vm0, %v10982_v7  ;;  %1036 = vmatprep.subr.bf16.mxu1 %v11007_v24  ;;  %v11079_v53 = vld [vmem:[#allocation2 + $0x160] ss:$16 sps:$4 sm:$0xff]   ;;  %v11087_v54 = vld [vmem:[#allocation2 + $0x184] ss:$16 sps:$4 sm:$0xff]  }
  0xa8   : > { %10257 = vmatprep.mubr.msk.bf16.mxu0 %vm754_vm0, %v10983_v9  ;;  %1624 = vmatpush1.bf16.msra.mxu0 %v11013_v29  ;;  %v11085_v55 = vld [vmem:[#allocation2 + $0x180] ss:$16 sps:$4 sm:$0xff]   ;;  %v11030_v29 = vld [vmem:[#allocation2 + $0x4c] ss:$16 sps:$4 sm:$0xff]  }
  0xa9   : > { %1625 = vmatprep.subr.bf16.mxu0 %v11021_v32  ;;  %v12178_v56 = vld [vmem:[%s14913_s3] ss:$0 sm:$0xff] }
  0xaa   : > { %1037 = vmatpush1.bf16.msra.mxu1 %v11009_v25  ;;  %v11022_v25 = vld [vmem:[#allocation2 + $0x28] ss:$16 sps:$4 sm:$0xff]  }
  0xab   : > { %1038 = vmatprep.subr.bf16.mxu1 %v11010_v26 }
  0xac   : > { %1626 = vmatpush1.bf16.msra.mxu0 %v11019_v33 }
  0xad   : > { %1627 = vmatprep.subr.bf16.mxu0 %v11027_v34 }
  0xae   : > { %1039 = vmatpush1.bf16.msra.mxu1 %v11012_v27 }
  0xaf   : > { %10258 = vmatmul.mubr.msk.bf16.gmra.mrb[4].mxu0 %vm754_vm0, %v10984_v14  ;;  %1736 = vmatprep.subr.bf16.mxu1 %v11018_v31 }
  0xb0   : > { %10261 = vmatprep.mubr.msk.bf16.mxu0 %vm754_vm0, %v10985_v15  ;;  %1628 = vmatpush1.bf16.msra.mxu0 %v11025_v35 }
  0xb1   : > { %1629 = vmatprep.subr.bf16.mxu0 %v11033_v36  ;;  %v11028_v36 = vld [vmem:[#allocation2 + $0x48] ss:$16 sps:$4 sm:$0xff]  }
  0xb4   : > { %1630 = vmatpush1.bf16.msra.mxu0 %v11031_v37 }
  0xb5   : > { %1631 = vmatprep.subr.bf16.mxu0 %v11039_v38 }
  0xb7   : > { %10262 = vmatmul.mubr.msk.bf16.gmra.mrb[8].mxu0 %vm754_vm0, %v10986_v19 }
  0xb8   : > { %10265 = vmatprep.mubr.msk.bf16.mxu0 %vm754_vm0, %v10987_v20  ;;  %1632 = vmatpush1.bf16.msra.mxu0 %v11037_v39 }
  0xb9   : > { %1633 = vmatprep.subr.bf16.mxu0 %v11045_v40  ;;  %v11036_v40 = vld [vmem:[#allocation2 + $0x6c] ss:$16 sps:$4 sm:$0xff]  }
  0xbc   : > { %1634 = vmatpush1.bf16.msra.mxu0 %v11043_v41 }
  0xbd   : > { %1635 = vmatprep.subr.bf16.mxu0 %v11051_v42 }
  0xbf   : > { %10266 = vmatmul.mubr.msk.bf16.gmra.mrb[12].mxu0 %vm754_vm0, %v10988_v21 }
  0xc0   : > { %1636 = vmatpush1.bf16.msra.mxu0 %v11049_v43 }
  0xc1   : > { %1637 = vmatprep.subr.bf16.mxu0 %v11057_v44 }
  0xc4   : > { %1638 = vmatpush1.bf16.msra.mxu0 %v11055_v45 }
  0xc5   : > { %1639 = vmatprep.subr.bf16.mxu0 %v11063_v46 }
  0xc8   : > { %1640 = vmatpush1.bf16.msra.mxu0 %v11061_v47 }
  0xc9   : > { %1641 = vmatprep.subr.bf16.mxu0 %v11069_v48  ;;  %v11034_v48 = vld [vmem:[#allocation2 + $0x68] ss:$16 sps:$4 sm:$0xff]  }
  0xcc   : > { %1642 = vmatpush1.bf16.msra.mxu0 %v11067_v49 }
  0xcd   : > { %1643 = vmatprep.subr.bf16.mxu0 %v11075_v50 }
  0xd0   : > { %1644 = vmatpush1.bf16.msra.mxu0 %v11073_v51  ;;  %v11042_v51 = vld [vmem:[#allocation2 + $0x8c] ss:$16 sps:$4 sm:$0xff]  }
  0xd1   : > { %1645 = vmatprep.subr.bf16.mxu0 %v11081_v52 }
  0xd4   : > { %1646 = vmatpush1.bf16.msra.mxu0 %v11079_v53 }
  0xd5   : > { %1647 = vmatprep.subr.bf16.mxu0 %v11087_v54 }
  0xd8   : > { %1648 = vmatpush1.bf16.msra.mxu0 %v11085_v55 }
 0x17a   : > { %v10255_v57 = vpop.f32.mrb[0].mxu0 }
 0x17b   : > { %v822_v58 = vadd.f32 %v10255_v57, %v12178_v56  ;;  %v813_v59 = vpop.f32.mrb[1].mxu0 }
 0x17c   : > { %v814_v60 = vadd.f32 %v12178_v56, %v813_v59  ;;  %v10256_v61 = vpop.f32.mrb[2].mxu0  ;;  %v11040_v59 = vld [vmem:[#allocation2 + $0x88] ss:$16 sps:$4 sm:$0xff]  }
 0x17d   : > { %v878_v62 = vmul.f32 0.01, %v822_v58  ;;  %v825_v63 = vadd.f32 %v10256_v61, %v12178_v56  ;;  %v816_v0 = vpop.f32.mrb[3].mxu0 }
 0x17e   : > { %v876_v1 = vmul.f32 0.01, %v814_v60  ;;  %v817_v2 = vadd.f32 %v12178_v56, %v816_v0 }
 0x17f   : > { %v879_v3 = vmul.f32 0.01, %v825_v63  ;;  %v894_v5 = vmax.f32 %v822_v58, %v878_v62 }
 0x180   : > { %v877_v4 = vmul.f32 0.01, %v817_v2  ;;  %v892_v7 = vmax.f32 %v814_v60, %v876_v1 }
 0x181   : > { %v895_v6 = vmax.f32 %v825_v63, %v879_v3  ;;  %v11048_v63 = vld [vmem:[#allocation2 + $0xac] ss:$16 sps:$4 sm:$0xff]  }
 0x182   : > { %v893_v8 = vmax.f32 %v817_v2, %v877_v4  ;;  %v10259_v9 = vpop.f32.mrb[4].mxu0 }
 0x183   : > { %v838_v10 = vadd.f32 %v10259_v9, %v12178_v56  ;;  %v829_v11 = vpop.f32.mrb[5].mxu0  ;;  %v909_v12 = vpack.c.bf16 %v895_v6, %v894_v5 }
 0x184   : > { %v830_v14 = vadd.f32 %v12178_v56, %v829_v11  ;;  %v908_v15 = vpack.c.bf16 %v893_v8, %v892_v7  ;;  %v10260_v16 = vpop.f32.mrb[6].mxu0  ;;  %v11046_v7 = vld [vmem:[#allocation2 + $0xa8] ss:$16 sps:$4 sm:$0xff]  }
 0x185   : > { %v882_v18 = vmul.f32 0.01, %v838_v10  ;;  %v841_v19 = vadd.f32 %v10260_v16, %v12178_v56  ;;  %v832_v20 = vpop.f32.mrb[7].mxu0  ;;  %v11060_v16 = vld [vmem:[#allocation2 + $0xec] ss:$16 sps:$4 sm:$0xff]  }
 0x186   : > { %v880_v21 = vmul.f32 0.01, %v830_v14  ;;  %1057 = vmatmul.mubr.bf16.vlgmr.msra.gmra.mrb[0].mxu1 %v908_v15  ;;  %v833_v22 = vadd.f32 %v12178_v56, %v832_v20  ;;  %v11070_v20 = vld [vmem:[#allocation2 + $0x128] ss:$16 sps:$4 sm:$0xff]  }
 0x187   : > { %v898_v23 = vmax.f32 %v838_v10, %v882_v18  ;;  %v883_v24 = vmul.f32 0.01, %v841_v19  ;;  %1066 = vmatprep.mubr.bf16.mxu1 %v14945_v28  ;;  %1737 = vmatpush1.bf16.msra.mxu1 %v11016_v13  ;;  %v11054_v10 = vld [vmem:[#allocation2 + $0xcc] ss:$16 sps:$4 sm:$0xff]   ;;  %v11064_v18 = vld [vmem:[#allocation2 + $0x108] ss:$16 sps:$4 sm:$0xff]  }
 0x188   : > { %v896_v26 = vmax.f32 %v830_v14, %v880_v21  ;;  %v881_v27 = vmul.f32 0.01, %v833_v22  ;;  %1738 = vmatprep.subr.bf16.mxu1 %v11024_v17  ;;  %v11052_v14 = vld [vmem:[#allocation2 + $0xc8] ss:$16 sps:$4 sm:$0xff]   ;;  %v11066_v17 = vld [vmem:[#allocation2 + $0x10c] ss:$16 sps:$4 sm:$0xff]  }
 0x189   : > { %v899_v30 = vmax.f32 %v841_v19, %v883_v24  ;;  %v11072_v19 = vld [vmem:[#allocation2 + $0x12c] ss:$16 sps:$4 sm:$0xff]   ;;  %v11082_v24 = vld [vmem:[#allocation2 + $0x168] ss:$16 sps:$4 sm:$0xff]  }
 0x18a   : > { %v897_v31 = vmax.f32 %v833_v22, %v881_v27  ;;  %v10263_v32 = vpop.f32.mrb[8].mxu0  ;;  %v11078_v21 = vld [vmem:[#allocation2 + $0x14c] ss:$16 sps:$4 sm:$0xff]   ;;  %v11076_v22 = vld [vmem:[#allocation2 + $0x148] ss:$16 sps:$4 sm:$0xff]  }
 0x18b   : > { %v854_v33 = vadd.f32 %v10263_v32, %v12178_v56  ;;  %v845_v34 = vpop.f32.mrb[9].mxu0  ;;  %v911_v35 = vpack.c.bf16 %v899_v30, %v898_v23  ;;  %1739 = vmatpush1.bf16.msra.mxu1 %v11022_v25  ;;  %v11084_v23 = vld [vmem:[#allocation2 + $0x16c] ss:$16 sps:$4 sm:$0xff]   ;;  %v11093_v27 = vld [vmem:[#allocation2 + $0x1a4] ss:$16 sps:$4 sm:$0xff]  }
 0x18c   : > { %v846_v37 = vadd.f32 %v12178_v56, %v845_v34  ;;  %v910_v38 = vpack.c.bf16 %v897_v31, %v896_v26  ;;  %v10264_v39 = vpop.f32.mrb[10].mxu0  ;;  %1740 = vmatprep.subr.bf16.mxu1 %v11030_v29  ;;  %v11090_v25 = vld [vmem:[#allocation2 + $0x18c] ss:$16 sps:$4 sm:$0xff]   ;;  %v11088_v26 = vld [vmem:[#allocation2 + $0x188] ss:$16 sps:$4 sm:$0xff]   ;;  %1649 = vmatprep.subr.bf16.mxu0 %v11093_v27 }
 0x18d   : > { %v886_v41 = vmul.f32 0.01, %v854_v33  ;;  %v857_v42 = vadd.f32 %v10264_v39, %v12178_v56  ;;  %v848_v43 = vpop.f32.mrb[11].mxu0  ;;  %v11096_v29 = vld [vmem:[#allocation2 + $0x1ac] ss:$16 sps:$4 sm:$0xff]  }
 0x18e   : > { %1067 = vmatmul.mubr.bf16.gmra.mrb[4].mxu1 %v909_v12  ;;  %v884_v44 = vmul.f32 0.01, %v846_v37  ;;  %v849_v45 = vadd.f32 %v12178_v56, %v848_v43  ;;  %v11091_v30 = vld [vmem:[#allocation2 + $0x1a0] ss:$16 sps:$4 sm:$0xff]   ;;  %v11094_v31 = vld [vmem:[#allocation2 + $0x1a8] ss:$16 sps:$4 sm:$0xff]  }
 0x18f   : > { %v902_v46 = vmax.f32 %v854_v33, %v886_v41  ;;  %1076 = vmatprep.mubr.bf16.mxu1 %v14945_v28  ;;  %v887_v47 = vmul.f32 0.01, %v857_v42  ;;  %1741 = vmatpush1.bf16.msra.mxu1 %v11028_v36  ;;  %v11099_v32 = vld [vmem:[#allocation2 + $0x1c4] ss:$16 sps:$4 sm:$0xff]   ;;  %v11102_v33 = vld [vmem:[#allocation2 + $0x1cc] ss:$16 sps:$4 sm:$0xff]  }
 0x190   : > { %v900_v49 = vmax.f32 %v846_v37, %v884_v44  ;;  %v885_v50 = vmul.f32 0.01, %v849_v45  ;;  %1742 = vmatprep.subr.bf16.mxu1 %v11036_v40  ;;  %1650 = vmatpush1.bf16.msra.mxu0 %v11091_v30  ;;  %v11097_v34 = vld [vmem:[#allocation2 + $0x1c0] ss:$16 sps:$4 sm:$0xff]   ;;  %v11105_v36 = vld [vmem:[#allocation2 + $0x1e4] ss:$16 sps:$4 sm:$0xff]  }
 0x191   : > { %v903_v52 = vmax.f32 %v857_v42, %v887_v47  ;;  %1651 = vmatprep.subr.bf16.mxu0 %v11099_v32  ;;  %v11108_v37 = vld [vmem:[#allocation2 + $0x1ec] ss:$16 sps:$4 sm:$0xff]   ;;  %v11106_v39 = vld [vmem:[#allocation2 + $0x1e8] ss:$16 sps:$4 sm:$0xff]   ;;  %v2009_v40 = vld [vmem:[#allocation5] sm:$0xff] }
 0x192   : > { %v901_v53 = vmax.f32 %v849_v45, %v885_v50  ;;  %v10267_v54 = vpop.f32.mrb[12].mxu0  ;;  %v2013_v41 = vld [vmem:[#allocation5 + $0x20] sm:$0xff]  ;;  %v2010_v42 = vld [vmem:[#allocation5 + $0x8] sm:$0xff] }
 0x193   : > { %v870_v55 = vadd.f32 %v10267_v54, %v12178_v56  ;;  %v861_v57 = vpop.f32.mrb[13].mxu0  ;;  %v913_v58 = vpack.c.bf16 %v903_v52, %v902_v46  ;;  %1743 = vmatpush1.bf16.msra.mxu1 %v11034_v48  ;;  %v9545_v43 = vcombine.low %v2009_v40, %v2013_v41  ;;  %v9546_v44 = vcombine.high %v2009_v40, %v2013_v41  ;;  %v2014_v45 = vld [vmem:[#allocation5 + $0x28] sm:$0xff] }
 0x194   : > { %v862_v60 = vadd.f32 %v12178_v56, %v861_v57  ;;  %v912_v61 = vpack.c.bf16 %v901_v53, %v900_v49  ;;  %v10268_v62 = vpop.f32.mrb[14].mxu0  ;;  %1744 = vmatprep.subr.bf16.mxu1 %v11042_v51  ;;  %1652 = vmatpush1.bf16.msra.mxu0 %v11097_v34  ;;  %v9547_v46 = vcombine.low %v2010_v42, %v2014_v45  ;;  %v14944_v48 = vlaneseq  ;;  %v932_v51 = vld [vmem:[%s14915_s5] sm:$0x3]  ;;  %v2026_v27 = vld [vmem:[#allocation5 + $0x88] sm:$0xff] }
 0x195   : > { %v890_v0 = vmul.f32 0.01, %v870_v55  ;;  %v873_v1 = vadd.f32 %v10268_v62, %v12178_v56  ;;  %v864_v2 = vpop.f32.mrb[15].mxu0  ;;  %1653 = vmatprep.subr.bf16.mxu0 %v11105_v36  ;;  %v9548_v47 = vcombine.high %v2010_v42, %v2014_v45  ;;  %v2037_v42 = vld [vmem:[#allocation5 + $0xe0] sm:$0xff]  ;;  %v2038_v45 = vld [vmem:[#allocation5 + $0xe8] sm:$0xff] }
 0x196   : > { %1077 = vmatmul.mubr.bf16.gmra.mrb[8].mxu1 %v910_v38  ;;  %v888_v3 = vmul.f32 0.01, %v862_v60  ;;  %v865_v4 = vadd.f32 %v12178_v56, %v864_v2  ;;  %v11058_v56 = vld [vmem:[#allocation2 + $0xe8] ss:$16 sps:$4 sm:$0xff]   ;;  %v11103_v38 = vld [vmem:[#allocation2 + $0x1e0] ss:$16 sps:$4 sm:$0xff]  }
 0x197   : > { %1086 = vmatprep.mubr.bf16.mxu1 %v14945_v28  ;;  %v906_v5 = vmax.f32 %v870_v55, %v890_v0  ;;  %v891_v6 = vmul.f32 0.01, %v873_v1  ;;  %1745 = vmatpush1.bf16.msra.mxu1 %v11040_v59  ;;  %v12204_v49 = vshrl.u32 %v14944_v48, 7  ;;  %v12384_v48 = vld [vmem:[#allocation5 + $0x5e8] sm:$0xff] }
 0x198   : > { %v904_v8 = vmax.f32 %v862_v60, %v888_v3  ;;  %v889_v9 = vmul.f32 0.01, %v865_v4  ;;  %1746 = vmatprep.subr.bf16.mxu1 %v11048_v63  ;;  %1654 = vmatpush1.bf16.msra.mxu0 %v11103_v38  ;;  %v2033_v38 = vld [vmem:[#allocation5 + $0xc0] sm:$0xff]  ;;  %15073 = vst [vmem:[#allocation33_spill] sm:$0xff] %v12384_v48 }
 0x199   : > { %v907_v11 = vmax.f32 %v873_v1, %v891_v6  ;;  %3587 = vmatprep.subr.bf16.mxu0 %v9546_v44  ;;  %15063 = vst [vmem:[#allocation23_spill] sm:$0xff] %v12204_v49  ;;  %v12207_v50 = vsub.s32 0, %v12204_v49  ;;  %v12213_v52 = vsub.s32 1, %v12204_v49  ;;  %v2017_v6 = vld [vmem:[#allocation5 + $0x40] sm:$0xff]  ;;  %v2034_v44 = vld [vmem:[#allocation5 + $0xc8] sm:$0xff] }
 0x19a   : > { %v905_v12 = vmax.f32 %v865_v4, %v889_v9 }
 0x19b   : > { %v915_v13 = vpack.c.bf16 %v907_v11, %v906_v5  ;;  %1747 = vmatpush1.bf16.msra.mxu1 %v11046_v7  ;;  %15064 = vst [vmem:[#allocation24_spill] sm:$0xff] %v12207_v50  ;;  %15065 = vst [vmem:[#allocation25_spill] sm:$0xff] %v12213_v52  ;;  %v12216_v53 = vrot.slane %v932_v51, %v12207_v50  ;;  %v12219_v54 = vrot.slane %v932_v51, %v12213_v52  ;;  %v2018_v11 = vld [vmem:[#allocation5 + $0x48] sm:$0xff] }
 0x19c   : > { %v914_v15 = vpack.c.bf16 %v905_v12, %v904_v8  ;;  %1748 = vmatprep.subr.bf16.mxu1 %v11054_v10  ;;  %v2021_v10 = vld [vmem:[#allocation5 + $0x60] sm:$0xff]  ;;  %v2022_v12 = vld [vmem:[#allocation5 + $0x68] sm:$0xff] }
 0x19d   : > { %v9553_v32 = vcombine.low %v2017_v6, %v2021_v10 }
 0x19e   : > { %1087 = vmatmul.mubr.bf16.gmra.mrb[12].mxu1 %v911_v35  ;;  %v11100_v35 = vld [vmem:[#allocation2 + $0x1c8] ss:$16 sps:$4 sm:$0xff]  }
 0x19f   : > { %1096 = vmatprep.mubr.bf16.mxu1 %v14945_v28  ;;  %1749 = vmatpush1.bf16.msra.mxu1 %v11052_v14 }
 0x1a0   : > { %1750 = vmatprep.subr.bf16.mxu1 %v11060_v16 }
 0x1a3   : > { %1751 = vmatpush1.bf16.msra.mxu1 %v11058_v56 }
 0x1a4   : > { %1752 = vmatprep.subr.bf16.mxu1 %v11066_v17 }
 0x1a6   : > { %1097 = vmatmul.mubr.bf16.gmra.mrb[16].mxu1 %v912_v61 }
 0x1a7   : > { %1106 = vmatprep.mubr.bf16.mxu1 %v14945_v28  ;;  %1753 = vmatpush1.bf16.msra.mxu1 %v11064_v18 }
 0x1a8   : > { %1754 = vmatprep.subr.bf16.mxu1 %v11072_v19 }
 0x1ab   : > { %1755 = vmatpush1.bf16.msra.mxu1 %v11070_v20 }
 0x1ac   : > { %1756 = vmatprep.subr.bf16.mxu1 %v11078_v21  ;;  %v9554_v21 = vcombine.high %v2017_v6, %v2021_v10  ;;  %v2046_v6 = vld [vmem:[#allocation5 + $0x128] sm:$0xff]  ;;  %v9571_v10 = vcombine.low %v2034_v44, %v2038_v45 }
 0x1ae   : > { %1107 = vmatmul.mubr.bf16.gmra.mrb[20].mxu1 %v913_v58 }
 0x1af   : > { %1116 = vmatprep.mubr.bf16.mxu1 %v14945_v28  ;;  %1757 = vmatpush1.bf16.msra.mxu1 %v11076_v22  ;;  %v9556_v22 = vcombine.high %v2018_v11, %v2022_v12 }
 0x1b0   : > { %1758 = vmatprep.subr.bf16.mxu1 %v11084_v23  ;;  %v2025_v23 = vld [vmem:[#allocation5 + $0x80] sm:$0xff] }
 0x1b3   : > { %1759 = vmatpush1.bf16.msra.mxu1 %v11082_v24  ;;  %v2029_v24 = vld [vmem:[#allocation5 + $0xa0] sm:$0xff] }
 0x1b4   : > { %1760 = vmatprep.subr.bf16.mxu1 %v11090_v25  ;;  %v9562_v34 = vcombine.high %v2025_v23, %v2029_v24 }
 0x1b6   : > { %1117 = vmatmul.mubr.bf16.gmra.mrb[24].mxu1 %v914_v15 }
 0x1b7   : > { %1126 = vmatprep.mubr.bf16.mxu1 %v14945_v28  ;;  %1761 = vmatpush1.bf16.msra.mxu1 %v11088_v26 }
 0x1b8   : > { %1762 = vmatprep.subr.bf16.mxu1 %v11096_v29  ;;  %v2030_v29 = vld [vmem:[#allocation5 + $0xa8] sm:$0xff] }
 0x1bb   : > { %1763 = vmatpush1.bf16.msra.mxu1 %v11094_v31 }
 0x1bc   : > { %1764 = vmatprep.subr.bf16.mxu1 %v11102_v33  ;;  %v9555_v33 = vcombine.low %v2018_v11, %v2022_v12 }
 0x1be   : > { %1127 = vmatmul.mubr.bf16.gmra.mrb[28].mxu1 %v915_v13 }
 0x1bf   : > { %1765 = vmatpush1.bf16.msra.mxu1 %v11100_v35 }
 0x1c0   : > { %1766 = vmatprep.subr.bf16.mxu1 %v11108_v37  ;;  %v9564_v37 = vcombine.high %v2026_v27, %v2030_v29 }
 0x1c3   : > { %1767 = vmatpush1.bf16.msra.mxu1 %v11106_v39 }
 0x1c4   : > { %3813 = vmatprep.subr.bf16.mxu1 %v9548_v47 }
 0x259   : > { %v1058_v55 = vpop.f32.mrb[0].mxu1 }
 0x25a   : > { %v1059_v57 = vadd.f32 %v1058_v55, %v12216_v53  ;;  %v1060_v58 = vpop.f32.mrb[1].mxu1 }
 0x25b   : > { %v1061_v59 = vadd.f32 %v1060_v58, %v12219_v54  ;;  %v1062_v60 = vpop.f32.mrb[2].mxu1 }
 0x25c   : > { %v1137_v61 = vmul.f32 0.01, %v1059_v57  ;;  %v1063_v62 = vadd.f32 %v1062_v60, %v12216_v53  ;;  %v1064_v63 = vpop.f32.mrb[3].mxu1 }
 0x25d   : > { %v1138_v0 = vmul.f32 0.01, %v1061_v59  ;;  %v1065_v1 = vadd.f32 %v1064_v63, %v12219_v54  ;;  %v9570_v63 = vcombine.high %v2033_v38, %v2037_v42 }
 0x25e   : > { %v1139_v2 = vmul.f32 0.01, %v1063_v62  ;;  %v1169_v4 = vmax.f32 %v1059_v57, %v1137_v61 }
 0x25f   : > { %v1140_v3 = vmul.f32 0.01, %v1065_v1  ;;  %v1170_v7 = vmax.f32 %v1061_v59, %v1138_v0  ;;  %v9563_v59 = vcombine.low %v2026_v27, %v2030_v29  ;;  %v9572_v0 = vcombine.high %v2034_v44, %v2038_v45 }
 0x260   : > { %v1171_v5 = vmax.f32 %v1063_v62, %v1139_v2  ;;  %v2045_v2 = vld [vmem:[#allocation5 + $0x120] sm:$0xff] }
 0x261   : > { %v1172_v8 = vmax.f32 %v1065_v1, %v1140_v3  ;;  %v1068_v9 = vpop.f32.mrb[4].mxu1  ;;  %v2041_v1 = vld [vmem:[#allocation5 + $0x100] sm:$0xff] }
 0x262   : > { %v1201_v13 = vpack.c.bf16 %v1171_v5, %v1169_v4  ;;  %v1069_v14 = vadd.f32 %v1068_v9, %v12216_v53  ;;  %v1070_v15 = vpop.f32.mrb[5].mxu1  ;;  %v2042_v5 = vld [vmem:[#allocation5 + $0x108] sm:$0xff]  ;;  %v9569_v9 = vcombine.low %v2033_v38, %v2037_v42  ;;  %v9578_v11 = vcombine.high %v2041_v1, %v2045_v2 }
 0x263   : > { %v1071_v16 = vadd.f32 %v1070_v15, %v12219_v54  ;;  %v1072_v56 = vpop.f32.mrb[6].mxu1  ;;  %v1202_v17 = vpack.c.bf16 %v1172_v8, %v1170_v7  ;;  %v2049_v15 = vld [vmem:[#allocation5 + $0x140] sm:$0xff]  ;;  %v9579_v29 = vcombine.low %v2042_v5, %v2046_v6 }
 0x264   : > { %v1141_v18 = vmul.f32 0.01, %v1069_v14  ;;  %v1073_v19 = vadd.f32 %v1072_v56, %v12216_v53  ;;  %v1074_v20 = vpop.f32.mrb[7].mxu1 }
 0x265   : > { %v1142_v25 = vmul.f32 0.01, %v1071_v16  ;;  %v1075_v26 = vadd.f32 %v1074_v20, %v12219_v54  ;;  %1655 = vmatprep.mubr.bf16.mxu0 %v1202_v17  ;;  %1768 = vmatprep.mubr.bf16.mxu1 %v1202_v17  ;;  %v2054_v20 = vld [vmem:[#allocation5 + $0x168] sm:$0xff] }
 0x266   : > { %v1143_v30 = vmul.f32 0.01, %v1073_v19  ;;  %1656 = vmatmul.mubr.bf16.vlgmr.msra.gmra.mrb[16].mxu0 %v1201_v13  ;;  %1769 = vmatmul.mubr.bf16.vlgmr.msra.gmra.mrb[32].mxu1 %v1201_v13  ;;  %v1173_v35 = vmax.f32 %v1069_v14, %v1141_v18  ;;  %v9580_v14 = vcombine.high %v2042_v5, %v2046_v6  ;;  %v2053_v18 = vld [vmem:[#allocation5 + $0x160] sm:$0xff] }
 0x267   : > { %v1144_v31 = vmul.f32 0.01, %v1075_v26  ;;  %3588 = vmatpush1.bf16.msra.mxu0 %v9545_v43  ;;  %3814 = vmatpush1.bf16.msra.mxu1 %v9547_v46  ;;  %v1174_v39 = vmax.f32 %v1071_v16, %v1142_v25  ;;  %v9561_v46 = vcombine.low %v2025_v23, %v2029_v24  ;;  %v9577_v24 = vcombine.low %v2041_v1, %v2045_v2 }
 0x268   : > { %v1175_v36 = vmax.f32 %v1073_v19, %v1143_v30  ;;  %3589 = vmatprep.subr.bf16.mxu0 %v9554_v21  ;;  %3815 = vmatprep.subr.bf16.mxu1 %v9556_v22  ;;  %v2050_v19 = vld [vmem:[#allocation5 + $0x148] sm:$0xff]  ;;  %v9585_v44 = vcombine.low %v2049_v15, %v2053_v18 }
 0x269   : > { %v1176_v40 = vmax.f32 %v1075_v26, %v1144_v31  ;;  %v1078_v41 = vpop.f32.mrb[8].mxu1  ;;  %v9587_v45 = vcombine.low %v2050_v19, %v2054_v20 }
 0x26a   : > { %v1079_v47 = vadd.f32 %v1078_v41, %v12216_v53  ;;  %v1080_v51 = vpop.f32.mrb[9].mxu1  ;;  %v1203_v43 = vpack.c.bf16 %v1175_v36, %v1173_v35  ;;  %v2057_v35 = vld [vmem:[#allocation5 + $0x180] sm:$0xff] }
 0x26b   : > { %v1081_v55 = vadd.f32 %v1080_v51, %v12219_v54  ;;  %v1082_v57 = vpop.f32.mrb[10].mxu1  ;;  %v1204_v58 = vpack.c.bf16 %v1176_v40, %v1174_v39  ;;  %3590 = vmatpush1.bf16.msra.mxu0 %v9553_v32  ;;  %3816 = vmatpush1.bf16.msra.mxu1 %v9555_v33  ;;  %v9586_v33 = vcombine.high %v2049_v15, %v2053_v18  ;;  %v2061_v36 = vld [vmem:[#allocation5 + $0x1a0] sm:$0xff]  ;;  %v2058_v39 = vld [vmem:[#allocation5 + $0x188] sm:$0xff] }
 0x26c   : > { %v1145_v60 = vmul.f32 0.01, %v1079_v47  ;;  %v1083_v61 = vadd.f32 %v1082_v57, %v12216_v53  ;;  %v1084_v62 = vpop.f32.mrb[11].mxu1  ;;  %3591 = vmatprep.subr.bf16.mxu0 %v9562_v34  ;;  %3817 = vmatprep.subr.bf16.mxu1 %v9564_v37  ;;  %v9588_v34 = vcombine.high %v2050_v19, %v2054_v20  ;;  %v2062_v40 = vld [vmem:[#allocation5 + $0x1a8] sm:$0xff]  ;;  %v9593_v2 = vcombine.low %v2057_v35, %v2061_v36 }
 0x26d   : > { %v1146_v3 = vmul.f32 0.01, %v1081_v55  ;;  %v1085_v4 = vadd.f32 %v1084_v62, %v12219_v54  ;;  %1665 = vmatprep.mubr.bf16.mxu0 %v1204_v58  ;;  %1778 = vmatprep.mubr.bf16.mxu1 %v1204_v58  ;;  %v2070_v62 = vld [vmem:[#allocation5 + $0x1e8] sm:$0xff]  ;;  %v9595_v6 = vcombine.low %v2058_v39, %v2062_v40 }
 0x26e   : > { %v1147_v7 = vmul.f32 0.01, %v1083_v61  ;;  %1666 = vmatmul.mubr.bf16.gmra.mrb[20].mxu0 %v1203_v43  ;;  %1779 = vmatmul.mubr.bf16.gmra.mrb[36].mxu1 %v1203_v43  ;;  %v1177_v12 = vmax.f32 %v1079_v47, %v1145_v60  ;;  %v9594_v47 = vcombine.high %v2057_v35, %v2061_v36  ;;  %v2069_v60 = vld [vmem:[#allocation5 + $0x1e0] sm:$0xff] }
 0x26f   : > { %v1148_v8 = vmul.f32 0.01, %v1085_v4  ;;  %3592 = vmatpush1.bf16.msra.mxu0 %v9561_v46  ;;  %3818 = vmatpush1.bf16.msra.mxu1 %v9563_v59  ;;  %v1178_v16 = vmax.f32 %v1081_v55, %v1146_v3  ;;  %v9596_v46 = vcombine.high %v2058_v39, %v2062_v40  ;;  %v2065_v55 = vld [vmem:[#allocation5 + $0x1c0] sm:$0xff] }
 0x270   : > { %v1179_v13 = vmax.f32 %v1083_v61, %v1147_v7  ;;  %3593 = vmatprep.subr.bf16.mxu0 %v9570_v63  ;;  %3819 = vmatprep.subr.bf16.mxu1 %v9572_v0  ;;  %v2066_v61 = vld [vmem:[#allocation5 + $0x1c8] sm:$0xff]  ;;  %v9601_v19 = vcombine.low %v2065_v55, %v2069_v60 }
 0x271   : > { %v1180_v56 = vmax.f32 %v1085_v4, %v1148_v8  ;;  %v1088_v17 = vpop.f32.mrb[12].mxu1  ;;  %v9603_v20 = vcombine.low %v2066_v61, %v2070_v62 }
 0x272   : > { %v1089_v21 = vadd.f32 %v1088_v17, %v12216_v53  ;;  %v1090_v22 = vpop.f32.mrb[13].mxu1  ;;  %v1205_v23 = vpack.c.bf16 %v1179_v13, %v1177_v12  ;;  %v2073_v12 = vld [vmem:[#allocation5 + $0x200] sm:$0xff] }
 0x273   : > { %v1091_v25 = vadd.f32 %v1090_v22, %v12219_v54  ;;  %v1092_v26 = vpop.f32.mrb[14].mxu1  ;;  %v1206_v27 = vpack.c.bf16 %v1180_v56, %v1178_v16  ;;  %3594 = vmatpush1.bf16.msra.mxu0 %v9569_v9  ;;  %3820 = vmatpush1.bf16.msra.mxu1 %v9571_v10  ;;  %v9602_v10 = vcombine.high %v2065_v55, %v2069_v60  ;;  %v2077_v13 = vld [vmem:[#allocation5 + $0x220] sm:$0xff]  ;;  %v2074_v16 = vld [vmem:[#allocation5 + $0x208] sm:$0xff] }
 0x274   : > { %v1149_v30 = vmul.f32 0.01, %v1089_v21  ;;  %v1093_v31 = vadd.f32 %v1092_v26, %v12216_v53  ;;  %v1094_v32 = vpop.f32.mrb[15].mxu1  ;;  %3595 = vmatprep.subr.bf16.mxu0 %v9578_v11  ;;  %3821 = vmatprep.subr.bf16.mxu1 %v9580_v14  ;;  %v9604_v11 = vcombine.high %v2066_v61, %v2070_v62  ;;  %v2078_v56 = vld [vmem:[#allocation5 + $0x228] sm:$0xff]  ;;  %v9609_v36 = vcombine.low %v2073_v12, %v2077_v13 }
 0x275   : > { %v1150_v37 = vmul.f32 0.01, %v1091_v25  ;;  %v1095_v38 = vadd.f32 %v1094_v32, %v12219_v54  ;;  %1675 = vmatprep.mubr.bf16.mxu0 %v1206_v27  ;;  %1788 = vmatprep.mubr.bf16.mxu1 %v1206_v27  ;;  %v2086_v32 = vld [vmem:[#allocation5 + $0x268] sm:$0xff]  ;;  %v9611_v40 = vcombine.low %v2074_v16, %v2078_v56 }
 0x276   : > { %v1151_v41 = vmul.f32 0.01, %v1093_v31  ;;  %1676 = vmatmul.mubr.bf16.gmra.mrb[24].mxu0 %v1205_v23  ;;  %1789 = vmatmul.mubr.bf16.gmra.mrb[40].mxu1 %v1205_v23  ;;  %v1181_v51 = vmax.f32 %v1089_v21, %v1149_v30  ;;  %v9610_v21 = vcombine.high %v2073_v12, %v2077_v13  ;;  %v2085_v30 = vld [vmem:[#allocation5 + $0x260] sm:$0xff] }
 0x277   : > { %v1152_v42 = vmul.f32 0.01, %v1095_v38  ;;  %3596 = vmatpush1.bf16.msra.mxu0 %v9577_v24  ;;  %3822 = vmatpush1.bf16.msra.mxu1 %v9579_v29  ;;  %v1182_v57 = vmax.f32 %v1091_v25, %v1150_v37  ;;  %v9612_v24 = vcombine.high %v2074_v16, %v2078_v56  ;;  %v2081_v25 = vld [vmem:[#allocation5 + $0x240] sm:$0xff] }
 0x278   : > { %v1183_v43 = vmax.f32 %v1093_v31, %v1151_v41  ;;  %3597 = vmatprep.subr.bf16.mxu0 %v9586_v33  ;;  %3823 = vmatprep.subr.bf16.mxu1 %v9588_v34  ;;  %v2082_v31 = vld [vmem:[#allocation5 + $0x248] sm:$0xff]  ;;  %v9617_v61 = vcombine.low %v2081_v25, %v2085_v30 }
 0x279   : > { %v1184_v58 = vmax.f32 %v1095_v38, %v1152_v42  ;;  %v1098_v59 = vpop.f32.mrb[16].mxu1  ;;  %v9619_v62 = vcombine.low %v2082_v31, %v2086_v32 }
 0x27a   : > { %v1099_v63 = vadd.f32 %v1098_v59, %v12216_v53  ;;  %v1100_v0 = vpop.f32.mrb[17].mxu1  ;;  %v1207_v1 = vpack.c.bf16 %v1183_v43, %v1181_v51  ;;  %v2089_v51 = vld [vmem:[#allocation5 + $0x280] sm:$0xff] }
 0x27b   : > { %v1101_v3 = vadd.f32 %v1100_v0, %v12219_v54  ;;  %v1102_v4 = vpop.f32.mrb[18].mxu1  ;;  %v1208_v5 = vpack.c.bf16 %v1184_v58, %v1182_v57  ;;  %3598 = vmatpush1.bf16.msra.mxu0 %v9585_v44  ;;  %3824 = vmatpush1.bf16.msra.mxu1 %v9587_v45  ;;  %v9618_v45 = vcombine.high %v2081_v25, %v2085_v30  ;;  %v2093_v43 = vld [vmem:[#allocation5 + $0x2a0] sm:$0xff]  ;;  %v2090_v57 = vld [vmem:[#allocation5 + $0x288] sm:$0xff] }
 0x27c   : > { %v1153_v7 = vmul.f32 0.01, %v1099_v63  ;;  %v1103_v8 = vadd.f32 %v1102_v4, %v12216_v53  ;;  %v1104_v9 = vpop.f32.mrb[19].mxu1  ;;  %3599 = vmatprep.subr.bf16.mxu0 %v9594_v47  ;;  %3825 = vmatprep.subr.bf16.mxu1 %v9596_v46  ;;  %v9620_v47 = vcombine.high %v2082_v31, %v2086_v32  ;;  %v2094_v58 = vld [vmem:[#allocation5 + $0x2a8] sm:$0xff]  ;;  %v9625_v13 = vcombine.low %v2089_v51, %v2093_v43 }
 0x27d   : > { %v1154_v14 = vmul.f32 0.01, %v1101_v3  ;;  %v1105_v15 = vadd.f32 %v1104_v9, %v12219_v54  ;;  %1685 = vmatprep.mubr.bf16.mxu0 %v1208_v5  ;;  %1798 = vmatprep.mubr.bf16.mxu1 %v1208_v5  ;;  %v2102_v9 = vld [vmem:[#allocation5 + $0x2e8] sm:$0xff]  ;;  %v9627_v56 = vcombine.low %v2090_v57, %v2094_v58 }
 0x27e   : > { %v1155_v17 = vmul.f32 0.01, %v1103_v8  ;;  %1686 = vmatmul.mubr.bf16.gmra.mrb[28].mxu0 %v1207_v1  ;;  %1799 = vmatmul.mubr.bf16.gmra.mrb[44].mxu1 %v1207_v1  ;;  %v1185_v22 = vmax.f32 %v1099_v63, %v1153_v7  ;;  %v9626_v63 = vcombine.high %v2089_v51, %v2093_v43  ;;  %v2101_v7 = vld [vmem:[#allocation5 + $0x2e0] sm:$0xff] }
 0x27f   : > { %v1156_v18 = vmul.f32 0.01, %v1105_v15  ;;  %3600 = vmatpush1.bf16.msra.mxu0 %v9593_v2  ;;  %3826 = vmatpush1.bf16.msra.mxu1 %v9595_v6  ;;  %v1186_v26 = vmax.f32 %v1101_v3, %v1154_v14  ;;  %v9628_v2 = vcombine.high %v2090_v57, %v2094_v58  ;;  %v2097_v3 = vld [vmem:[#allocation5 + $0x2c0] sm:$0xff] }
 0x280   : > { %v1187_v23 = vmax.f32 %v1103_v8, %v1155_v17  ;;  %3601 = vmatprep.subr.bf16.mxu0 %v9602_v10  ;;  %3827 = vmatprep.subr.bf16.mxu1 %v9604_v11  ;;  %v2098_v8 = vld [vmem:[#allocation5 + $0x2c8] sm:$0xff]  ;;  %v9633_v31 = vcombine.low %v2097_v3, %v2101_v7 }
 0x281   : > { %v1188_v27 = vmax.f32 %v1105_v15, %v1156_v18  ;;  %v1108_v29 = vpop.f32.mrb[20].mxu1  ;;  %v9635_v32 = vcombine.low %v2098_v8, %v2102_v9 }
 0x282   : > { %v1109_v33 = vadd.f32 %v1108_v29, %v12216_v53  ;;  %v1110_v34 = vpop.f32.mrb[21].mxu1  ;;  %v1209_v35 = vpack.c.bf16 %v1187_v23, %v1185_v22  ;;  %v2105_v22 = vld [vmem:[#allocation5 + $0x300] sm:$0xff] }
 0x283   : > { %v1111_v37 = vadd.f32 %v1110_v34, %v12219_v54  ;;  %v1112_v38 = vpop.f32.mrb[22].mxu1  ;;  %v1210_v39 = vpack.c.bf16 %v1188_v27, %v1186_v26  ;;  %3602 = vmatpush1.bf16.msra.mxu0 %v9601_v19  ;;  %3828 = vmatpush1.bf16.msra.mxu1 %v9603_v20  ;;  %v9634_v20 = vcombine.high %v2097_v3, %v2101_v7  ;;  %v2109_v23 = vld [vmem:[#allocation5 + $0x320] sm:$0xff]  ;;  %v2106_v26 = vld [vmem:[#allocation5 + $0x308] sm:$0xff] }
 0x284   : > { %v1157_v41 = vmul.f32 0.01, %v1109_v33  ;;  %v1113_v42 = vadd.f32 %v1112_v38, %v12216_v53  ;;  %v1114_v44 = vpop.f32.mrb[23].mxu1  ;;  %3603 = vmatprep.subr.bf16.mxu0 %v9610_v21  ;;  %3829 = vmatprep.subr.bf16.mxu1 %v9612_v24  ;;  %v9636_v21 = vcombine.high %v2098_v8, %v2102_v9  ;;  %v2110_v27 = vld [vmem:[#allocation5 + $0x328] sm:$0xff]  ;;  %v2113_v3 = vld [vmem:[#allocation5 + $0x340] sm:$0xff] }
 0x285   : > { %v1158_v46 = vmul.f32 0.01, %v1111_v37  ;;  %v1115_v55 = vadd.f32 %v1114_v44, %v12219_v54  ;;  %1695 = vmatprep.mubr.bf16.mxu0 %v1210_v39  ;;  %1808 = vmatprep.mubr.bf16.mxu1 %v1210_v39  ;;  %v9641_v44 = vcombine.low %v2105_v22, %v2109_v23  ;;  %v9643_v43 = vcombine.low %v2106_v26, %v2110_v27 }
 0x286   : > { %v1159_v59 = vmul.f32 0.01, %v1113_v42  ;;  %1696 = vmatmul.mubr.bf16.gmra.mrb[32].mxu0 %v1209_v35  ;;  %1809 = vmatmul.mubr.bf16.gmra.mrb[48].mxu1 %v1209_v35  ;;  %v1189_v0 = vmax.f32 %v1109_v33, %v1157_v41  ;;  %v9642_v33 = vcombine.high %v2105_v22, %v2109_v23 }
 0x287   : > { %v1160_v60 = vmul.f32 0.01, %v1115_v55  ;;  %3604 = vmatpush1.bf16.msra.mxu0 %v9609_v36  ;;  %3830 = vmatpush1.bf16.msra.mxu1 %v9611_v40  ;;  %v1190_v4 = vmax.f32 %v1111_v37, %v1158_v46  ;;  %v9644_v36 = vcombine.high %v2106_v26, %v2110_v27  ;;  %v12255_v26 = vld [vmem:[#allocation5 + $0x420] sm:$0xff]  ;;  %v12257_v27 = vld [vmem:[#allocation5 + $0x408] sm:$0xff] }
 0x288   : > { %v1191_v1 = vmax.f32 %v1113_v42, %v1159_v59  ;;  %3605 = vmatprep.subr.bf16.mxu0 %v9618_v45  ;;  %3831 = vmatprep.subr.bf16.mxu1 %v9620_v47 }
 0x289   : > { %v1192_v5 = vmax.f32 %v1115_v55, %v1160_v60  ;;  %v1118_v6 = vpop.f32.mrb[24].mxu1 }
 0x28a   : > { %v1119_v10 = vadd.f32 %v1118_v6, %v12216_v53  ;;  %v1120_v11 = vpop.f32.mrb[25].mxu1  ;;  %v1211_v12 = vpack.c.bf16 %v1191_v1, %v1189_v0  ;;  %v2118_v6 = vld [vmem:[#allocation5 + $0x368] sm:$0xff] }
 0x28b   : > { %v1121_v14 = vadd.f32 %v1120_v11, %v12219_v54  ;;  %v1122_v15 = vpop.f32.mrb[26].mxu1  ;;  %v1212_v16 = vpack.c.bf16 %v1192_v5, %v1190_v4  ;;  %3606 = vmatpush1.bf16.msra.mxu0 %v9617_v61  ;;  %3832 = vmatpush1.bf16.msra.mxu1 %v9619_v62  ;;  %v2114_v4 = vld [vmem:[#allocation5 + $0x348] sm:$0xff]  ;;  %v2125_v11 = vld [vmem:[#allocation5 + $0x3a0] sm:$0xff] }
 0x28c   : > { %v1161_v17 = vmul.f32 0.01, %v1119_v10  ;;  %v1123_v18 = vadd.f32 %v1122_v15, %v12216_v53  ;;  %v1124_v19 = vpop.f32.mrb[27].mxu1  ;;  %3607 = vmatprep.subr.bf16.mxu0 %v9626_v63  ;;  %3833 = vmatprep.subr.bf16.mxu1 %v9628_v2  ;;  %v9651_v8 = vcombine.low %v2114_v4, %v2118_v6  ;;  %v9652_v9 = vcombine.high %v2114_v4, %v2118_v6  ;;  %v12408_v6 = vld [vmem:[#allocation5 + $0x620] sm:$0xff] }
 0x28d   : > { %v1162_v24 = vmul.f32 0.01, %v1121_v14  ;;  %v1125_v25 = vadd.f32 %v1124_v19, %v12219_v54  ;;  %1705 = vmatprep.mubr.bf16.mxu0 %v1212_v16  ;;  %1818 = vmatprep.mubr.bf16.mxu1 %v1212_v16  ;;  %v2130_v19 = vld [vmem:[#allocation5 + $0x3c8] sm:$0xff]  ;;  %15075 = vst [vmem:[#allocation35_spill] sm:$0xff] %v12408_v6 }
 0x28e   : > { %v1163_v29 = vmul.f32 0.01, %v1123_v18  ;;  %1706 = vmatmul.mubr.bf16.gmra.mrb[36].mxu0 %v1211_v12  ;;  %1819 = vmatmul.mubr.bf16.gmra.mrb[52].mxu1 %v1211_v12  ;;  %v1193_v34 = vmax.f32 %v1119_v10, %v1161_v17  ;;  %v2121_v10 = vld [vmem:[#allocation5 + $0x380] sm:$0xff]  ;;  %v2122_v12 = vld [vmem:[#allocation5 + $0x388] sm:$0xff] }
 0x28f   : > { %v1164_v30 = vmul.f32 0.01, %v1125_v25  ;;  %3608 = vmatpush1.bf16.msra.mxu0 %v9625_v13  ;;  %3834 = vmatpush1.bf16.msra.mxu1 %v9627_v56  ;;  %v1194_v37 = vmax.f32 %v1121_v14, %v1162_v24  ;;  %v9658_v13 = vcombine.high %v2121_v10, %v2125_v11  ;;  %v2126_v14 = vld [vmem:[#allocation5 + $0x3a8] sm:$0xff]  ;;  %v9657_v15 = vcombine.low %v2121_v10, %v2125_v11  ;;  %v2129_v17 = vld [vmem:[#allocation5 + $0x3c0] sm:$0xff] }
 0x290   : > { %v1195_v35 = vmax.f32 %v1123_v18, %v1163_v29  ;;  %3609 = vmatprep.subr.bf16.mxu0 %v9634_v20  ;;  %3835 = vmatprep.subr.bf16.mxu1 %v9636_v21  ;;  %v9659_v16 = vcombine.low %v2122_v12, %v2126_v14  ;;  %v9660_v56 = vcombine.high %v2122_v12, %v2126_v14  ;;  %v2133_v18 = vld [vmem:[#allocation5 + $0x3e0] sm:$0xff]  ;;  %v2134_v21 = vld [vmem:[#allocation5 + $0x3e8] sm:$0xff] }
 0x291   : > { %v1196_v38 = vmax.f32 %v1125_v25, %v1164_v30  ;;  %v1128_v39 = vpop.f32.mrb[28].mxu1  ;;  %v9666_v20 = vcombine.high %v2129_v17, %v2133_v18  ;;  %v9665_v22 = vcombine.low %v2129_v17, %v2133_v18  ;;  %v9667_v23 = vcombine.low %v2130_v19, %v2134_v21  ;;  %v12253_v25 = vld [vmem:[#allocation5 + $0x400] sm:$0xff]  ;;  %v12261_v30 = vld [vmem:[#allocation5 + $0x428] sm:$0xff] }
 0x292   : > { %v1129_v40 = vadd.f32 %v1128_v39, %v12216_v53  ;;  %v1130_v41 = vpop.f32.mrb[29].mxu1  ;;  %v1213_v42 = vpack.c.bf16 %v1195_v35, %v1193_v34  ;;  %v9668_v24 = vcombine.high %v2130_v19, %v2134_v21  ;;  %v9674_v29 = vcombine.high %v12253_v25, %v12255_v26  ;;  %v1281_v34 = vld [vmem:[%s14917_s7] sm:$0xf]  ;;  %v12282_v39 = vld [vmem:[#allocation5 + $0x448] sm:$0xff] }
 0x293   : > { %v1131_v45 = vadd.f32 %v1130_v41, %v12219_v54  ;;  %v1132_v47 = vpop.f32.mrb[30].mxu1  ;;  %v1214_v51 = vpack.c.bf16 %v1196_v38, %v1194_v37  ;;  %3610 = vmatpush1.bf16.msra.mxu0 %v9633_v31  ;;  %3836 = vmatpush1.bf16.msra.mxu1 %v9635_v32  ;;  %v12273_v35 = vsub.s32 2, %v12204_v49  ;;  %v12278_v37 = vld [vmem:[#allocation5 + $0x440] sm:$0xff]  ;;  %v12410_v11 = vld [vmem:[#allocation5 + $0x608] sm:$0xff] }
 0x294   : > { %v1165_v46 = vmul.f32 0.01, %v1129_v40  ;;  %v1133_v55 = vadd.f32 %v1132_v47, %v12216_v53  ;;  %v1134_v57 = vpop.f32.mrb[31].mxu1  ;;  %3611 = vmatprep.subr.bf16.mxu0 %v9642_v33  ;;  %3837 = vmatprep.subr.bf16.mxu1 %v9644_v36  ;;  %v9676_v33 = vcombine.high %v12257_v27, %v12261_v30  ;;  %v12276_v36 = vsub.s32 3, %v12204_v49  ;;  %v12280_v38 = vld [vmem:[#allocation5 + $0x460] sm:$0xff] }
 0x295   : > { %v1166_v58 = vmul.f32 0.01, %v1131_v45  ;;  %v1135_v59 = vadd.f32 %v1134_v57, %v12219_v54  ;;  %1715 = vmatprep.mubr.bf16.mxu0 %v1214_v51  ;;  %1828 = vmatprep.mubr.bf16.mxu1 %v1214_v51  ;;  %v2117_v54 = vld [vmem:[#allocation5 + $0x360] sm:$0xff]  ;;  %15066 = vst [vmem:[#allocation26_spill] sm:$0xff] %v12273_v35  ;;  %v12306_v57 = vrot.slane %v1281_v34, %v12273_v35 }
 0x296   : > { %v1167_v60 = vmul.f32 0.01, %v1133_v55  ;;  %1716 = vmatmul.mubr.bf16.gmra.mrb[40].mxu0 %v1213_v42  ;;  %1829 = vmatmul.mubr.bf16.gmra.mrb[56].mxu1 %v1213_v42  ;;  %v1197_v62 = vmax.f32 %v1129_v40, %v1165_v46  ;;  %v9650_v5 = vcombine.high %v2113_v3, %v2117_v54  ;;  %v9649_v7 = vcombine.low %v2113_v3, %v2117_v54  ;;  %v12284_v40 = vld [vmem:[#allocation5 + $0x468] sm:$0xff]  ;;  %v12286_v41 = vld [vmem:[#allocation5 + $0x480] sm:$0xff] }
 0x297   : > { %v1168_v61 = vmul.f32 0.01, %v1135_v59  ;;  %3612 = vmatpush1.bf16.msra.mxu0 %v9641_v44  ;;  %3838 = vmatpush1.bf16.msra.mxu1 %v9643_v43  ;;  %v1198_v0 = vmax.f32 %v1131_v45, %v1166_v58  ;;  %15067 = vst [vmem:[#allocation27_spill] sm:$0xff] %v12276_v36  ;;  %v12288_v42 = vld [vmem:[#allocation5 + $0x4a0] sm:$0xff]  ;;  %v12290_v44 = vld [vmem:[#allocation5 + $0x488] sm:$0xff]  ;;  %v12309_v58 = vrot.slane %v1281_v34, %v12213_v52 }
 0x298   : > { %v1199_v63 = vmax.f32 %v1133_v55, %v1167_v60  ;;  %3613 = vmatprep.subr.bf16.mxu0 %v9650_v5  ;;  %3839 = vmatprep.subr.bf16.mxu1 %v9652_v9  ;;  %v12292_v45 = vld [vmem:[#allocation5 + $0x4a8] sm:$0xff]  ;;  %v12294_v47 = vld [vmem:[#allocation5 + $0x4c0] sm:$0xff]  ;;  %v12303_v55 = vrot.slane %v1281_v34, %v12207_v50 }
 0x299   : > { %v1200_v1 = vmax.f32 %v1135_v59, %v1168_v61  ;;  %v12296_v51 = vld [vmem:[#allocation5 + $0x4e0] sm:$0xff]  ;;  %v12298_v43 = vld [vmem:[#allocation5 + $0x4c8] sm:$0xff]  ;;  %v12312_v59 = vrot.slane %v1281_v34, %v12276_v36 }
 0x29a   : > { %v1215_v2 = vpack.c.bf16 %v1199_v63, %v1197_v62  ;;  %v12300_v46 = vld [vmem:[#allocation5 + $0x4e8] sm:$0xff]  ;;  %v12314_v60 = vld [vmem:[#allocation5 + $0x500] sm:$0xff] }
 0x29b   : > { %v1216_v53 = vpack.c.bf16 %v1200_v1, %v1198_v0  ;;  %3614 = vmatpush1.bf16.msra.mxu0 %v9649_v7  ;;  %3840 = vmatpush1.bf16.msra.mxu1 %v9651_v8  ;;  %v12316_v61 = vld [vmem:[#allocation5 + $0x520] sm:$0xff]  ;;  %v12318_v62 = vld [vmem:[#allocation5 + $0x508] sm:$0xff] }
 0x29c   : > { %3615 = vmatprep.subr.bf16.mxu0 %v9658_v13  ;;  %3841 = vmatprep.subr.bf16.mxu1 %v9660_v56  ;;  %v12330_v3 = vld [vmem:[#allocation5 + $0x540] sm:$0xff]  ;;  %v12342_v8 = vld [vmem:[#allocation5 + $0x548] sm:$0xff] }
 0x29d   : > { %1725 = vmatprep.mubr.bf16.mxu0 %v1216_v53  ;;  %1838 = vmatprep.mubr.bf16.mxu1 %v1216_v53  ;;  %v12328_v53 = vld [vmem:[#allocation5 + $0x528] sm:$0xff]  ;;  %v12332_v54 = vld [vmem:[#allocation5 + $0x560] sm:$0xff] }
 0x29e   : > { %1726 = vmatmul.mubr.bf16.gmra.mrb[44].mxu0 %v1215_v2  ;;  %1839 = vmatmul.mubr.bf16.gmra.mrb[60].mxu1 %v1215_v2  ;;  %v12344_v9 = vld [vmem:[#allocation5 + $0x568] sm:$0xff]  ;;  %v12346_v10 = vld [vmem:[#allocation5 + $0x580] sm:$0xff] }
 0x29f   : > { %3616 = vmatpush1.bf16.msra.mxu0 %v9657_v15  ;;  %3842 = vmatpush1.bf16.msra.mxu1 %v9659_v16  ;;  %v12356_v15 = vld [vmem:[#allocation5 + $0x5a0] sm:$0xff]  ;;  %v12358_v16 = vld [vmem:[#allocation5 + $0x588] sm:$0xff] }
 0x2a0   : > { %3617 = vmatprep.subr.bf16.mxu0 %v9666_v20  ;;  %3843 = vmatprep.subr.bf16.mxu1 %v9668_v24  ;;  %15068 = vst [vmem:[#allocation28_spill] sm:$0xff] %v12358_v16  ;;  %v12360_v56 = vld [vmem:[#allocation5 + $0x5a8] sm:$0xff]  ;;  %v12370_v21 = vld [vmem:[#allocation5 + $0x5c0] sm:$0xff] }
 0x2a1   : > { %15069 = vst [vmem:[#allocation29_spill] sm:$0xff] %v12360_v56  ;;  %15070 = vst [vmem:[#allocation30_spill] sm:$0xff] %v12370_v21  ;;  %v12382_v34 = vld [vmem:[#allocation5 + $0x5c8] sm:$0xff]  ;;  %v12400_v14 = vld [vmem:[#allocation5 + $0x600] sm:$0xff] }
 0x2a2   : > { %15072 = vst [vmem:[#allocation32_spill] sm:$0xff] %v12382_v34  ;;  %15074 = vst [vmem:[#allocation34_spill] sm:$0xff] %v12400_v14  ;;  %v12412_v7 = vld [vmem:[#allocation5 + $0x628] sm:$0xff] }
 0x2a3   : > { %3618 = vmatpush1.bf16.msra.mxu0 %v9665_v22  ;;  %3844 = vmatpush1.bf16.msra.mxu1 %v9667_v23  ;;  %v12372_v22 = vld [vmem:[#allocation5 + $0x5e0] sm:$0xff] }
 0x2a4   : > { %3700 = vmatprep.subr.bf16.mxu0 %v9674_v29  ;;  %3926 = vmatprep.subr.bf16.mxu1 %v9676_v33  ;;  %15071 = vst [vmem:[#allocation31_spill] sm:$0xff] %v12372_v22 }
 0x339   : > { %v1657_v28 = vpop.f32.mrb[16].mxu0  ;;  %v1770_v19 = vpop.f32.mrb[32].mxu1 }
 0x33a   : > { %v1658_v33 = vadd.f32 %v1657_v28, %v12303_v55  ;;  %v1771_v17 = vadd.f32 %v1770_v19, %v12306_v57  ;;  %v1659_v18 = vpop.f32.mrb[17].mxu0  ;;  %v1772_v13 = vpop.f32.mrb[33].mxu1 }
 0x33b   : > { %v1660_v23 = vadd.f32 %v1659_v18, %v12309_v58  ;;  %v1773_v24 = vadd.f32 %v1772_v13, %v12312_v59  ;;  %v1661_v12 = vpop.f32.mrb[18].mxu0  ;;  %v1774_v29 = vpop.f32.mrb[34].mxu1 }
 0x33c   : > { %v1849_v20 = vmul.f32 0.01, %v1658_v33  ;;  %v1851_v4 = vmul.f32 0.01, %v1771_v17  ;;  %v1662_v18 = vadd.f32 %v1661_v12, %v12303_v55  ;;  %v1775_v13 = vadd.f32 %v1774_v29, %v12306_v57  ;;  %v1663_v5 = vpop.f32.mrb[19].mxu0  ;;  %v1776_v1 = vpop.f32.mrb[35].mxu1 }
 0x33d   : > { %v1850_v63 = vmul.f32 0.01, %v1660_v23  ;;  %v1852_v2 = vmul.f32 0.01, %v1773_v24  ;;  %v1664_v28 = vadd.f32 %v1663_v5, %v12309_v58  ;;  %v1777_v19 = vadd.f32 %v1776_v1, %v12312_v59 }
 0x33e   : > { %v1853_v0 = vmul.f32 0.01, %v1662_v18  ;;  %v1855_v32 = vmul.f32 0.01, %v1775_v13  ;;  %v1913_v35 = vmax.f32 %v1658_v33, %v1849_v20  ;;  %v1915_v5 = vmax.f32 %v1771_v17, %v1851_v4  ;;  %v12432_v20 = vld [vmem:[#allocation5 + $0x640] sm:$0xff]  ;;  %v12442_v4 = vld [vmem:[#allocation5 + $0x648] sm:$0xff] }
 0x33f   : > { %v1854_v36 = vmul.f32 0.01, %v1664_v28  ;;  %v1856_v12 = vmul.f32 0.01, %v1777_v19  ;;  %v1914_v48 = vmax.f32 %v1660_v23, %v1850_v63  ;;  %v1916_v34 = vmax.f32 %v1773_v24, %v1852_v2  ;;  %v12440_v2 = vld [vmem:[#allocation5 + $0x660] sm:$0xff] }
 0x340   : > { %v1917_v50 = vmax.f32 %v1662_v18, %v1853_v0  ;;  %v1919_v1 = vmax.f32 %v1775_v13, %v1855_v32  ;;  %v15078_v18 = vcombine.high %v12278_v37, %v12280_v38 }
 0x341   : > { %v1918_v22 = vmax.f32 %v1664_v28, %v1854_v36  ;;  %v1920_v21 = vmax.f32 %v1777_v19, %v1856_v12  ;;  %v1667_v31 = vpop.f32.mrb[20].mxu0  ;;  %v1780_v56 = vpop.f32.mrb[36].mxu1 }
 0x342   : > { %v12426_v16 = vpack.c.bf16 %v1917_v50, %v1913_v35  ;;  %v12428_v49 = vpack.c.bf16 %v1919_v1, %v1915_v5  ;;  %v1668_v6 = vadd.f32 %v1667_v31, %v12303_v55  ;;  %v1781_v29 = vadd.f32 %v1780_v56, %v12306_v57  ;;  %v1669_v14 = vpop.f32.mrb[21].mxu0  ;;  %v1782_v52 = vpop.f32.mrb[37].mxu1  ;;  %v12444_v31 = vld [vmem:[#allocation5 + $0x668] sm:$0xff] }
 0x343   : > { %v12434_v0 = vpack.c.bf16 %v1918_v22, %v1914_v48  ;;  %v12436_v32 = vpack.c.bf16 %v1920_v21, %v1916_v34  ;;  %v1670_v36 = vadd.f32 %v1669_v14, %v12309_v58  ;;  %v1783_v63 = vadd.f32 %v1782_v52, %v12312_v59  ;;  %v1671_v50 = vpop.f32.mrb[22].mxu0  ;;  %v1784_v35 = vpop.f32.mrb[38].mxu1 }
 0x344   : > { %v1857_v56 = vmul.f32 0.01, %v1668_v6  ;;  %v1859_v17 = vmul.f32 0.01, %v1781_v29  ;;  %v1672_v23 = vadd.f32 %v1671_v50, %v12303_v55  ;;  %v1785_v48 = vadd.f32 %v1784_v35, %v12306_v57  ;;  %v1673_v21 = vpop.f32.mrb[23].mxu0  ;;  %v1786_v22 = vpop.f32.mrb[39].mxu1 }
 0x345   : > { %v1858_v24 = vmul.f32 0.01, %v1670_v36  ;;  %v1860_v14 = vmul.f32 0.01, %v1783_v63  ;;  %v1674_v52 = vadd.f32 %v1673_v21, %v12309_v58  ;;  %v1787_v33 = vadd.f32 %v1786_v22, %v12312_v59  ;;  %3619 = vmatprep.mubr.bf16.mxu0 %v12434_v0  ;;  %3845 = vmatprep.mubr.bf16.mxu1 %v12434_v0 }
 0x346   : > { %v1861_v34 = vmul.f32 0.01, %v1672_v23  ;;  %v1863_v28 = vmul.f32 0.01, %v1785_v48  ;;  %3620 = vmatmul.mubr.bf16.vlgmr.msra.gmra.mrb[48].mxu0 %v12426_v16  ;;  %3846 = vmatmul.mubr.bf16.vlgmr.msra.gmra.mrb[64].mxu1 %v12426_v16  ;;  %v1921_v13 = vmax.f32 %v1668_v6, %v1857_v56  ;;  %v15076_v1 = vcombine.low %v12253_v25, %v12255_v26 }
 0x347   : > { %v1862_v12 = vmul.f32 0.01, %v1674_v52  ;;  %v1864_v5 = vmul.f32 0.01, %v1787_v33  ;;  %v15077_v50 = vcombine.low %v12257_v27, %v12261_v30  ;;  %v1923_v21 = vmax.f32 %v1781_v29, %v1859_v17 }
 0x348   : > { %3701 = vmatpush1.bf16.msra.mxu0 %v15076_v1  ;;  %v1925_v22 = vmax.f32 %v1672_v23, %v1861_v34  ;;  %v1927_v19 = vmax.f32 %v1785_v48, %v1863_v28  ;;  %v15079_v6 = vcombine.high %v12282_v39, %v12284_v40  ;;  %v1922_v25 = vmax.f32 %v1670_v36, %v1858_v24 }
 0x349   : > { %3927 = vmatpush1.bf16.msra.mxu1 %v15077_v50  ;;  %3702 = vmatprep.subr.bf16.mxu0 %v15078_v18  ;;  %v1924_v26 = vmax.f32 %v1783_v63, %v1860_v14  ;;  %v1926_v56 = vmax.f32 %v1674_v52, %v1862_v12  ;;  %v1928_v1 = vmax.f32 %v1787_v33, %v1864_v5  ;;  %v1677_v27 = vpop.f32.mrb[24].mxu0  ;;  %v1790_v30 = vpop.f32.mrb[40].mxu1  ;;  %v12487_v33 = vld [vmem:[#allocation5 + $0x680] sm:$0xff] }
 0x34a   : > { %3928 = vmatprep.subr.bf16.mxu1 %v15079_v6  ;;  %v12472_v50 = vpack.c.bf16 %v1925_v22, %v1921_v13  ;;  %v12474_v35 = vpack.c.bf16 %v1927_v19, %v1923_v21  ;;  %v1678_v29 = vadd.f32 %v1677_v27, %v12303_v55  ;;  %v1791_v17 = vadd.f32 %v1790_v30, %v12306_v57  ;;  %v1679_v23 = vpop.f32.mrb[25].mxu0  ;;  %v1792_v48 = vpop.f32.mrb[41].mxu1  ;;  %v12489_v19 = vld [vmem:[#allocation5 + $0x6a0] sm:$0xff] }
 0x34b   : > { %v12478_v34 = vpack.c.bf16 %v1926_v56, %v1922_v25  ;;  %v12480_v28 = vpack.c.bf16 %v1928_v1, %v1924_v26  ;;  %v1680_v36 = vadd.f32 %v1679_v23, %v12309_v58  ;;  %v1793_v63 = vadd.f32 %v1792_v48, %v12312_v59  ;;  %v1681_v14 = vpop.f32.mrb[26].mxu0  ;;  %v1794_v52 = vpop.f32.mrb[42].mxu1 }
 0x34c   : > { %v15080_v24 = vcombine.low %v12278_v37, %v12280_v38  ;;  %v1865_v18 = vmul.f32 0.01, %v1678_v29  ;;  %v1867_v13 = vmul.f32 0.01, %v1791_v17  ;;  %v1682_v12 = vadd.f32 %v1681_v14, %v12303_v55  ;;  %v1683_v22 = vpop.f32.mrb[27].mxu0  ;;  %v1796_v6 = vpop.f32.mrb[43].mxu1 }
 0x34d   : > { %v1795_v5 = vadd.f32 %v1794_v52, %v12306_v57  ;;  %v15081_v21 = vcombine.low %v12282_v39, %v12284_v40  ;;  %v15082_v37 = vcombine.high %v12286_v41, %v12288_v42  ;;  %v1866_v38 = vmul.f32 0.01, %v1680_v36  ;;  %3629 = vmatprep.mubr.bf16.mxu0 %v12478_v34  ;;  %3855 = vmatprep.mubr.bf16.mxu1 %v12478_v34 }
 0x34e   : > { %3703 = vmatpush1.bf16.msra.mxu0 %v15080_v24  ;;  %v1868_v25 = vmul.f32 0.01, %v1793_v63  ;;  %v1684_v26 = vadd.f32 %v1683_v22, %v12309_v58  ;;  %v1797_v56 = vadd.f32 %v1796_v6, %v12312_v59  ;;  %v1869_v1 = vmul.f32 0.01, %v1682_v12  ;;  %3856 = vmatmul.mubr.bf16.gmra.mrb[68].mxu1 %v12472_v50 }
 0x34f   : > { %3929 = vmatpush1.bf16.msra.mxu1 %v15081_v21  ;;  %3704 = vmatprep.subr.bf16.mxu0 %v15082_v37  ;;  %v1871_v27 = vmul.f32 0.01, %v1795_v5  ;;  %v1929_v30 = vmax.f32 %v1678_v29, %v1865_v18  ;;  %v15083_v24 = vcombine.low %v12286_v41, %v12288_v42  ;;  %v15084_v14 = vcombine.high %v12290_v44, %v12292_v45 }
 0x350   : > { %3630 = vmatmul.mubr.bf16.gmra.mrb[52].mxu0 %v12472_v50  ;;  %v1870_v23 = vmul.f32 0.01, %v1684_v26  ;;  %v1872_v48 = vmul.f32 0.01, %v1797_v56  ;;  %v1931_v21 = vmax.f32 %v1791_v17, %v1867_v13  ;;  %v1933_v22 = vmax.f32 %v1682_v12, %v1869_v1 }
 0x351   : > { %3930 = vmatprep.subr.bf16.mxu1 %v15084_v14  ;;  %v1935_v6 = vmax.f32 %v1795_v5, %v1871_v27  ;;  %v15085_v37 = vcombine.low %v12290_v44, %v12292_v45  ;;  %v15086_v29 = vcombine.high %v12294_v47, %v12296_v51  ;;  %v1930_v41 = vmax.f32 %v1680_v36, %v1866_v38  ;;  %v1687_v40 = vpop.f32.mrb[28].mxu0  ;;  %v1800_v14 = vpop.f32.mrb[44].mxu1  ;;  %v12532_v36 = vld [vmem:[#allocation5 + $0x688] sm:$0xff] }
 0x352   : > { %3705 = vmatpush1.bf16.msra.mxu0 %v15083_v24  ;;  %v1932_v42 = vmax.f32 %v1793_v63, %v1868_v25  ;;  %v1934_v18 = vmax.f32 %v1684_v26, %v1870_v23  ;;  %v1936_v24 = vmax.f32 %v1797_v56, %v1872_v48  ;;  %v15087_v52 = vcombine.high %v12298_v43, %v12300_v46  ;;  %v1689_v12 = vpop.f32.mrb[29].mxu0  ;;  %v1802_v5 = vpop.f32.mrb[45].mxu1  ;;  %v12547_v23 = vld [vmem:[#allocation5 + $0x6e0] sm:$0xff] }
 0x353   : > { %3931 = vmatpush1.bf16.msra.mxu1 %v15085_v37  ;;  %3706 = vmatprep.subr.bf16.mxu0 %v15086_v29  ;;  %v12526_v17 = vpack.c.bf16 %v1933_v22, %v1929_v30  ;;  %v12528_v13 = vpack.c.bf16 %v1935_v6, %v1931_v21  ;;  %v1688_v44 = vadd.f32 %v1687_v40, %v12303_v55  ;;  %v1691_v1 = vpop.f32.mrb[30].mxu0  ;;  %v1804_v27 = vpop.f32.mrb[46].mxu1  ;;  %v12543_v40 = vld [vmem:[#allocation5 + $0x6a8] sm:$0xff]  ;;  %v12545_v30 = vld [vmem:[#allocation5 + $0x6c0] sm:$0xff] }
 0x354   : > { %3932 = vmatprep.subr.bf16.mxu1 %v15087_v52  ;;  %v1801_v45 = vadd.f32 %v1800_v14, %v12306_v57  ;;  %v12534_v63 = vpack.c.bf16 %v1934_v18, %v1930_v41  ;;  %v12536_v38 = vpack.c.bf16 %v1936_v24, %v1932_v42  ;;  %v1690_v25 = vadd.f32 %v1689_v12, %v12309_v58 }
 0x355   : > { %15088 = vst [vmem:[#allocation36_spill] sm:$0xff] %v12526_v17  ;;  %v1803_v26 = vadd.f32 %v1802_v5, %v12312_v59  ;;  %v15089_v56 = vcombine.low %v12294_v47, %v12296_v51  ;;  %v1873_v48 = vmul.f32 0.01, %v1688_v44  ;;  %v1692_v21 = vadd.f32 %v1691_v1, %v12303_v55  ;;  %v1693_v47 = vpop.f32.mrb[31].mxu0  ;;  %v1806_v51 = vpop.f32.mrb[47].mxu1 }
 0x356   : > { %v1875_v52 = vmul.f32 0.01, %v1801_v45  ;;  %v1805_v22 = vadd.f32 %v1804_v27, %v12306_v57  ;;  %v15090_v6 = vcombine.low %v12298_v43, %v12300_v46  ;;  %v15091_v37 = vcombine.high %v12314_v60, %v12316_v61  ;;  %3639 = vmatprep.mubr.bf16.mxu0 %v12534_v63  ;;  %3865 = vmatprep.mubr.bf16.mxu1 %v12534_v63 }
 0x357   : > { %3707 = vmatpush1.bf16.msra.mxu0 %v15089_v56  ;;  %v1874_v29 = vmul.f32 0.01, %v1690_v25  ;;  %v1876_v41 = vmul.f32 0.01, %v1803_v26  ;;  %v1694_v42 = vadd.f32 %v1693_v47, %v12309_v58  ;;  %v1807_v18 = vadd.f32 %v1806_v51, %v12312_v59  ;;  %3866 = vmatmul.mubr.bf16.gmra.mrb[72].mxu1 %v12526_v17 }
 0x358   : > { %3933 = vmatpush1.bf16.msra.mxu1 %v15090_v6  ;;  %3708 = vmatprep.subr.bf16.mxu0 %v15091_v37  ;;  %v1877_v24 = vmul.f32 0.01, %v1692_v21  ;;  %v1879_v14 = vmul.f32 0.01, %v1805_v22  ;;  %v1937_v12 = vmax.f32 %v1688_v44, %v1873_v48  ;;  %v15092_v1 = vcombine.low %v12314_v60, %v12316_v61 }
 0x359   : > { %3640 = vmatmul.mubr.bf16.gmra.mrb[56].mxu0 %v12526_v17  ;;  %v1878_v5 = vmul.f32 0.01, %v1694_v42  ;;  %v1880_v56 = vmul.f32 0.01, %v1807_v18  ;;  %v15093_v27 = vcombine.high %v12318_v62, %v12328_v53  ;;  %v1939_v47 = vmax.f32 %v1801_v45, %v1875_v52  ;;  %v1697_v46 = vpop.f32.mrb[32].mxu0  ;;  %v15111_v17 = vld [vmem:[#allocation33_spill] sm:$0xff] }
 0x35a   : > { %v1941_v51 = vmax.f32 %v1692_v21, %v1877_v24  ;;  %v1943_v37 = vmax.f32 %v1805_v22, %v1879_v14  ;;  %v15094_v43 = vcombine.low %v12318_v62, %v12328_v53  ;;  %v15095_v44 = vcombine.high %v12330_v3, %v12332_v54  ;;  %v1699_v21 = vpop.f32.mrb[33].mxu0  ;;  %v12599_v14 = vld [vmem:[#allocation5 + $0x6c8] sm:$0xff] }
 0x35b   : > { %3709 = vmatpush1.bf16.msra.mxu0 %v15092_v1  ;;  %3934 = vmatprep.subr.bf16.mxu1 %v15093_v27  ;;  %v1938_v60 = vmax.f32 %v1690_v25, %v1874_v29  ;;  %v1940_v61 = vmax.f32 %v1803_v26, %v1876_v41  ;;  %v1942_v48 = vmax.f32 %v1694_v42, %v1878_v5  ;;  %v1810_v27 = vpop.f32.mrb[48].mxu1 }
 0x35c   : > { %3935 = vmatpush1.bf16.msra.mxu1 %v15094_v43  ;;  %3710 = vmatprep.subr.bf16.mxu0 %v15095_v44  ;;  %v1944_v1 = vmax.f32 %v1807_v18, %v1880_v56  ;;  %v15096_v6 = vcombine.high %v12342_v8, %v12344_v9  ;;  %v12584_v45 = vpack.c.bf16 %v1941_v51, %v1937_v12  ;;  %v1812_v22 = vpop.f32.mrb[49].mxu1  ;;  %v1701_v18 = vpop.f32.mrb[34].mxu0  ;;  %v12601_v43 = vld [vmem:[#allocation5 + $0x6e8] sm:$0xff] }
 0x35d   : > { %v12586_v52 = vpack.c.bf16 %v1943_v37, %v1939_v47  ;;  %v1698_v62 = vadd.f32 %v1697_v46, %v12303_v55  ;;  %v1811_v53 = vadd.f32 %v1810_v27, %v12306_v57  ;;  %v12590_v25 = vpack.c.bf16 %v1942_v48, %v1938_v60  ;;  %v1814_v24 = vpop.f32.mrb[50].mxu1  ;;  %v1703_v47 = vpop.f32.mrb[35].mxu0 }
 0x35e   : > { %3936 = vmatprep.subr.bf16.mxu1 %v15096_v6  ;;  %15097 = vst [vmem:[#allocation37_spill] sm:$0xff] %v12584_v45  ;;  %v12592_v26 = vpack.c.bf16 %v1944_v1, %v1940_v61  ;;  %v1700_v29 = vadd.f32 %v1699_v21, %v12309_v58  ;;  %v1813_v41 = vadd.f32 %v1812_v22, %v12312_v59  ;;  %v1816_v51 = vpop.f32.mrb[51].mxu1 }
 0x35f   : > { %15098 = vst [vmem:[#allocation38_spill] sm:$0xff] %v12590_v25  ;;  %v15099_v42 = vcombine.low %v12330_v3, %v12332_v54  ;;  %v1881_v46 = vmul.f32 0.01, %v1698_v62  ;;  %v1883_v12 = vmul.f32 0.01, %v1811_v53  ;;  %v1702_v5 = vadd.f32 %v1701_v18, %v12303_v55  ;;  %3649 = vmatprep.mubr.bf16.mxu0 %v12590_v25  ;;  %3875 = vmatprep.mubr.bf16.mxu1 %v12590_v25  ;;  %v15104_v18 = vld [vmem:[#allocation29_spill] sm:$0xff] }
 0x360   : > { %v1815_v56 = vadd.f32 %v1814_v24, %v12306_v57  ;;  %v15100_v6 = vcombine.low %v12342_v8, %v12344_v9  ;;  %v15101_v3 = vcombine.high %v12346_v10, %v12356_v15  ;;  %v1882_v54 = vmul.f32 0.01, %v1700_v29  ;;  %3876 = vmatmul.mubr.bf16.gmra.mrb[76].mxu1 %v12584_v45  ;;  %v15110_v25 = vld [vmem:[#allocation32_spill] sm:$0xff] }
 0x361   : > { %3711 = vmatpush1.bf16.msra.mxu0 %v15099_v42  ;;  %v1884_v37 = vmul.f32 0.01, %v1813_v41  ;;  %v1704_v44 = vadd.f32 %v1703_v47, %v12309_v58  ;;  %v1817_v60 = vadd.f32 %v1816_v51, %v12312_v59  ;;  %v1885_v61 = vmul.f32 0.01, %v1702_v5  ;;  %v15103_v42 = vld [vmem:[#allocation28_spill] sm:$0xff] }
 0x362   : > { %3937 = vmatpush1.bf16.msra.mxu1 %v15100_v6  ;;  %3712 = vmatprep.subr.bf16.mxu0 %v15101_v3  ;;  %v1887_v48 = vmul.f32 0.01, %v1815_v56  ;;  %v1945_v1 = vmax.f32 %v1698_v62, %v1881_v46  ;;  %v15102_v22 = vcombine.low %v12346_v10, %v12356_v15  ;;  %v15105_v24 = vcombine.high %v15103_v42, %v15104_v18  ;;  %v15107_v62 = vld [vmem:[#allocation30_spill] sm:$0xff]  ;;  %v15108_v46 = vld [vmem:[#allocation31_spill] sm:$0xff] }
 0x363   : > { %3650 = vmatmul.mubr.bf16.gmra.mrb[60].mxu0 %v12584_v45  ;;  %v1886_v27 = vmul.f32 0.01, %v1704_v44  ;;  %v1888_v21 = vmul.f32 0.01, %v1817_v60  ;;  %v1947_v47 = vmax.f32 %v1811_v53, %v1883_v12  ;;  %v1949_v51 = vmax.f32 %v1702_v5, %v1885_v61  ;;  %v1707_v45 = vpop.f32.mrb[36].mxu0 }
 0x364   : > { %3938 = vmatprep.subr.bf16.mxu1 %v15105_v24  ;;  %v1951_v3 = vmax.f32 %v1815_v56, %v1887_v48  ;;  %v15106_v9 = vcombine.low %v15103_v42, %v15104_v18  ;;  %v15109_v8 = vcombine.high %v15107_v62, %v15108_v46  ;;  %v1946_v10 = vmax.f32 %v1700_v29, %v1882_v54  ;;  %v1820_v24 = vpop.f32.mrb[52].mxu1  ;;  %v1709_v61 = vpop.f32.mrb[37].mxu0  ;;  %v12644_v29 = vld [vmem:[#allocation5 + $0x700] sm:$0xff] }
 0x365   : > { %3713 = vmatpush1.bf16.msra.mxu0 %v15102_v22  ;;  %v1948_v15 = vmax.f32 %v1813_v41, %v1884_v37  ;;  %v1950_v22 = vmax.f32 %v1704_v44, %v1886_v27  ;;  %v1952_v39 = vmax.f32 %v1817_v60, %v1888_v21  ;;  %v15112_v6 = vcombine.high %v15110_v25, %v15111_v17  ;;  %v1822_v48 = vpop.f32.mrb[53].mxu1  ;;  %v12659_v27 = vld [vmem:[#allocation5 + $0x728] sm:$0xff] }
 0x366   : > { %3939 = vmatpush1.bf16.msra.mxu1 %v15106_v9  ;;  %3714 = vmatprep.subr.bf16.mxu0 %v15109_v8  ;;  %v12638_v53 = vpack.c.bf16 %v1949_v51, %v1945_v1  ;;  %v12640_v12 = vpack.c.bf16 %v1951_v3, %v1947_v47  ;;  %v1708_v5 = vadd.f32 %v1707_v45, %v12303_v55  ;;  %v1711_v8 = vpop.f32.mrb[38].mxu0  ;;  %v1824_v45 = vpop.f32.mrb[54].mxu1  ;;  %v12655_v9 = vld [vmem:[#allocation5 + $0x720] sm:$0xff]  ;;  %v12657_v1 = vld [vmem:[#allocation5 + $0x708] sm:$0xff]  ;;  %v15117_v3 = vld [vmem:[#allocation34_spill] sm:$0xff] }
 0x367   : > { %3940 = vmatprep.subr.bf16.mxu1 %v15112_v6  ;;  %v1821_v56 = vadd.f32 %v1820_v24, %v12306_v57  ;;  %v12646_v41 = vpack.c.bf16 %v1950_v22, %v1946_v10  ;;  %v12648_v54 = vpack.c.bf16 %v1952_v39, %v1948_v15  ;;  %v1710_v37 = vadd.f32 %v1709_v61, %v12309_v58  ;;  %v1713_v47 = vpop.f32.mrb[39].mxu0  ;;  %v1826_v51 = vpop.f32.mrb[55].mxu1 }
 0x368   : > { %15113 = vst [vmem:[#allocation28_spill] sm:$0xff] %v12638_v53  ;;  %v1823_v44 = vadd.f32 %v1822_v48, %v12312_v59  ;;  %v15115_v60 = vcombine.low %v15107_v62, %v15108_v46  ;;  %v1889_v21 = vmul.f32 0.01, %v1708_v5  ;;  %v1712_v39 = vadd.f32 %v1711_v8, %v12303_v55  ;;  %v15118_v62 = vld [vmem:[#allocation35_spill] sm:$0xff] }
 0x369   : > { %15114 = vst [vmem:[#allocation29_spill] sm:$0xff] %v12646_v41  ;;  %v1891_v42 = vmul.f32 0.01, %v1821_v56  ;;  %v1825_v18 = vadd.f32 %v1824_v45, %v12306_v57  ;;  %v15116_v6 = vcombine.low %v15110_v25, %v15111_v17  ;;  %v15119_v46 = vcombine.high %v15117_v3, %v15118_v62  ;;  %3659 = vmatprep.mubr.bf16.mxu0 %v12646_v41 }
 0x36a   : > { %3715 = vmatpush1.bf16.msra.mxu0 %v15115_v60  ;;  %v1890_v10 = vmul.f32 0.01, %v1710_v37  ;;  %v1892_v15 = vmul.f32 0.01, %v1823_v44  ;;  %v1714_v22 = vadd.f32 %v1713_v47, %v12309_v58  ;;  %v1827_v24 = vadd.f32 %v1826_v51, %v12312_v59  ;;  %3885 = vmatprep.mubr.bf16.mxu1 %v12646_v41  ;;  %v1717_v41 = vpop.f32.mrb[40].mxu0 }
 0x36b   : > { %3941 = vmatpush1.bf16.msra.mxu1 %v15116_v6  ;;  %3716 = vmatprep.subr.bf16.mxu0 %v15119_v46  ;;  %v1893_v61 = vmul.f32 0.01, %v1712_v39  ;;  %v1895_v48 = vmul.f32 0.01, %v1825_v18  ;;  %v1953_v60 = vmax.f32 %v1708_v5, %v1889_v21  ;;  %v15120_v6 = vcombine.low %v15117_v3, %v15118_v62 }
 0x36c   : > { %3660 = vmatmul.mubr.bf16.gmra.mrb[64].mxu0 %v12638_v53  ;;  %3886 = vmatmul.mubr.bf16.gmra.mrb[80].mxu1 %v12638_v53  ;;  %v1894_v8 = vmul.f32 0.01, %v1714_v22  ;;  %v1896_v45 = vmul.f32 0.01, %v1827_v24  ;;  %v15121_v47 = vcombine.high %v12410_v11, %v12412_v7  ;;  %v1955_v46 = vmax.f32 %v1821_v56, %v1891_v42 }
 0x36d   : > { %v1957_v53 = vmax.f32 %v1712_v39, %v1893_v61  ;;  %v1959_v17 = vmax.f32 %v1825_v18, %v1895_v48  ;;  %v15122_v25 = vcombine.low %v12410_v11, %v12412_v7  ;;  %v15123_v5 = vcombine.high %v12432_v20, %v12440_v2  ;;  %v1719_v39 = vpop.f32.mrb[41].mxu0  ;;  %v12713_v61 = vld [vmem:[#allocation5 + $0x760] sm:$0xff]  ;;  %v12715_v48 = vld [vmem:[#allocation5 + $0x748] sm:$0xff] }
 0x36e   : > { %3717 = vmatpush1.bf16.msra.mxu0 %v15120_v6  ;;  %3942 = vmatprep.subr.bf16.mxu1 %v15121_v47  ;;  %v1954_v21 = vmax.f32 %v1710_v37, %v1890_v10  ;;  %v1956_v3 = vmax.f32 %v1823_v44, %v1892_v15  ;;  %v1958_v62 = vmax.f32 %v1714_v22, %v1894_v8  ;;  %v1830_v47 = vpop.f32.mrb[56].mxu1  ;;  %v12702_v37 = vld [vmem:[#allocation5 + $0x740] sm:$0xff] }
 0x36f   : > { %3943 = vmatpush1.bf16.msra.mxu1 %v15122_v25  ;;  %3718 = vmatprep.subr.bf16.mxu0 %v15123_v5  ;;  %v1960_v6 = vmax.f32 %v1827_v24, %v1896_v45  ;;  %v15124_v51 = vcombine.high %v12442_v4, %v12444_v31  ;;  %v12696_v56 = vpack.c.bf16 %v1957_v53, %v1953_v60  ;;  %v1832_v18 = vpop.f32.mrb[57].mxu1  ;;  %v1721_v24 = vpop.f32.mrb[42].mxu0 }
 0x370   : > { %v12698_v42 = vpack.c.bf16 %v1959_v17, %v1955_v46  ;;  %v1718_v7 = vadd.f32 %v1717_v41, %v12303_v55  ;;  %v1831_v11 = vadd.f32 %v1830_v47, %v12306_v57  ;;  %v12704_v44 = vpack.c.bf16 %v1958_v62, %v1954_v21  ;;  %v1834_v41 = vpop.f32.mrb[58].mxu1  ;;  %v12717_v17 = vld [vmem:[#allocation5 + $0x768] sm:$0xff] }
 0x371   : > { %3944 = vmatprep.subr.bf16.mxu1 %v15124_v51  ;;  %15125 = vst [vmem:[#allocation30_spill] sm:$0xff] %v12696_v56  ;;  %v12706_v10 = vpack.c.bf16 %v1960_v6, %v1956_v3  ;;  %v1720_v15 = vadd.f32 %v1719_v39, %v12309_v58  ;;  %v1833_v22 = vadd.f32 %v1832_v18, %v12312_v59 }
 0x372   : > { %v15126_v53 = vcombine.low %v12432_v20, %v12440_v2  ;;  %v1897_v25 = vmul.f32 0.01, %v1718_v7  ;;  %v1899_v60 = vmul.f32 0.01, %v1831_v11  ;;  %v1722_v8 = vadd.f32 %v1721_v24, %v12303_v55  ;;  %v1723_v20 = vpop.f32.mrb[43].mxu0  ;;  %v1836_v2 = vpop.f32.mrb[59].mxu1  ;;  %3669 = vmatprep.mubr.bf16.mxu0 %v12704_v44  ;;  %3895 = vmatprep.mubr.bf16.mxu1 %v12704_v44 }
 0x373   : > { %v1835_v45 = vadd.f32 %v1834_v41, %v12306_v57  ;;  %v15127_v51 = vcombine.low %v12442_v4, %v12444_v31  ;;  %v15128_v46 = vcombine.high %v12487_v33, %v12489_v19  ;;  %v1898_v5 = vmul.f32 0.01, %v1720_v15 }
 0x374   : > { %3719 = vmatpush1.bf16.msra.mxu0 %v15126_v53  ;;  %v1900_v21 = vmul.f32 0.01, %v1833_v22  ;;  %v1724_v3 = vadd.f32 %v1723_v20, %v12309_v58  ;;  %v1837_v62 = vadd.f32 %v1836_v2, %v12312_v59  ;;  %v1901_v6 = vmul.f32 0.01, %v1722_v8  ;;  %3896 = vmatmul.mubr.bf16.gmra.mrb[84].mxu1 %v12696_v56 }
 0x375   : > { %3945 = vmatpush1.bf16.msra.mxu1 %v15127_v51  ;;  %3720 = vmatprep.subr.bf16.mxu0 %v15128_v46  ;;  %v1903_v47 = vmul.f32 0.01, %v1835_v45  ;;  %v9772_v4 = vcombine.high %v12657_v1, %v12659_v27  ;;  %v1961_v39 = vmax.f32 %v1718_v7, %v1897_v25  ;;  %v15129_v24 = vcombine.low %v12487_v33, %v12489_v19 }
 0x376   : > { %3670 = vmatmul.mubr.bf16.gmra.mrb[68].mxu0 %v12696_v56  ;;  %v1902_v18 = vmul.f32 0.01, %v1724_v3  ;;  %v1904_v53 = vmul.f32 0.01, %v1837_v62  ;;  %v15130_v41 = vcombine.high %v12532_v36, %v12543_v40  ;;  %v1963_v20 = vmax.f32 %v1831_v11, %v1899_v60  ;;  %v1727_v56 = vpop.f32.mrb[44].mxu0 }
 0x377   : > { %v1965_v2 = vmax.f32 %v1722_v8, %v1901_v6  ;;  %v1967_v46 = vmax.f32 %v1835_v45, %v1903_v47  ;;  %v15131_v31 = vcombine.low %v12532_v36, %v12543_v40  ;;  %v15132_v7 = vcombine.high %v12545_v30, %v12547_v23  ;;  %v1729_v8 = vpop.f32.mrb[45].mxu0  ;;  %v12769_v47 = vld [vmem:[#allocation5 + $0x780] sm:$0xff] }
 0x378   : > { %3721 = vmatpush1.bf16.msra.mxu0 %v15129_v24  ;;  %3946 = vmatprep.subr.bf16.mxu1 %v15130_v41  ;;  %v1962_v33 = vmax.f32 %v1720_v15, %v1898_v5  ;;  %v1964_v19 = vmax.f32 %v1833_v22, %v1900_v21  ;;  %v1966_v25 = vmax.f32 %v1724_v3, %v1902_v18  ;;  %v1840_v41 = vpop.f32.mrb[60].mxu1 }
 0x379   : > { %3947 = vmatpush1.bf16.msra.mxu1 %v15131_v31  ;;  %3722 = vmatprep.subr.bf16.mxu0 %v15132_v7  ;;  %v1968_v24 = vmax.f32 %v1837_v62, %v1904_v53  ;;  %v15133_v51 = vcombine.high %v12599_v14, %v12601_v43  ;;  %v12754_v11 = vpack.c.bf16 %v1965_v2, %v1961_v39  ;;  %v1842_v45 = vpop.f32.mrb[61].mxu1  ;;  %v1731_v62 = vpop.f32.mrb[46].mxu0 }
 0x37a   : > { %v12756_v60 = vpack.c.bf16 %v1967_v46, %v1963_v20  ;;  %v1728_v36 = vadd.f32 %v1727_v56, %v12303_v55  ;;  %v1841_v40 = vadd.f32 %v1840_v41, %v12306_v57  ;;  %v12760_v15 = vpack.c.bf16 %v1966_v25, %v1962_v33  ;;  %v1844_v6 = vpop.f32.mrb[62].mxu1  ;;  %v12771_v56 = vld [vmem:[#allocation5 + $0x7a0] sm:$0xff]  ;;  %v1733_v20 = vpop.f32.mrb[47].mxu0 }
 0x37b   : > { %3948 = vmatprep.subr.bf16.mxu1 %v15133_v51  ;;  %v12762_v22 = vpack.c.bf16 %v1968_v24, %v1964_v19  ;;  %v1730_v5 = vadd.f32 %v1729_v8, %v12309_v58  ;;  %v1843_v21 = vadd.f32 %v1842_v45, %v12312_v59  ;;  %v15134_v3 = vcombine.low %v12545_v30, %v12547_v23  ;;  %v1846_v2 = vpop.f32.mrb[63].mxu1 }
 0x37c   : > { %v1905_v31 = vmul.f32 0.01, %v1728_v36  ;;  %v1907_v39 = vmul.f32 0.01, %v1841_v40  ;;  %v1732_v18 = vadd.f32 %v1731_v62, %v12303_v55  ;;  %v1845_v53 = vadd.f32 %v1844_v6, %v12306_v57  ;;  %3679 = vmatprep.mubr.bf16.mxu0 %v12760_v15  ;;  %3905 = vmatprep.mubr.bf16.mxu1 %v12760_v15  ;;  %v2250_v62 = vld [vmem:[#allocation5 + $0x788] sm:$0xff] }
 0x37d   : > { %3723 = vmatpush1.bf16.msra.mxu0 %v15134_v3  ;;  %v15135_v51 = vcombine.low %v12599_v14, %v12601_v43  ;;  %v15136_v30 = vcombine.high %v12644_v29, %v12655_v9  ;;  %v1906_v23 = vmul.f32 0.01, %v1730_v5  ;;  %v1908_v46 = vmul.f32 0.01, %v1843_v21  ;;  %3906 = vmatmul.mubr.bf16.gmra.mrb[88].mxu1 %v12754_v11  ;;  %v2254_v6 = vld [vmem:[#allocation5 + $0x7a8] sm:$0xff] }
 0x37e   : > { %v1734_v7 = vadd.f32 %v1733_v20, %v12309_v58  ;;  %v1847_v33 = vadd.f32 %v1846_v2, %v12312_v59  ;;  %v1909_v55 = vmul.f32 0.01, %v1732_v18  ;;  %v1911_v57 = vmul.f32 0.01, %v1845_v53  ;;  %3680 = vmatmul.mubr.bf16.gmra.mrb[72].mxu0 %v12754_v11  ;;  %v2011_v20 = vld [vmem:[#allocation5 + $0x10] sm:$0xff] }
 0x37f   : > { %3949 = vmatpush1.bf16.msra.mxu1 %v15135_v51  ;;  %3724 = vmatprep.subr.bf16.mxu0 %v15136_v30  ;;  %v9777_v14 = vcombine.low %v12702_v37, %v12713_v61  ;;  %v9779_v43 = vcombine.low %v12715_v48, %v12717_v17  ;;  %v1969_v19 = vmax.f32 %v1728_v36, %v1905_v31  ;;  %v2015_v2 = vld [vmem:[#allocation5 + $0x30] sm:$0xff] }
 0x380   : > { %v1910_v58 = vmul.f32 0.01, %v1734_v7  ;;  %v1912_v25 = vmul.f32 0.01, %v1847_v33  ;;  %v15137_v59 = vcombine.low %v12644_v29, %v12655_v9  ;;  %3950 = vmatprep.subr.bf16.mxu1 %v9772_v4  ;;  %v9786_v24 = vcombine.high %v12769_v47, %v12771_v56 }
 0x381   : > { %v1971_v41 = vmax.f32 %v1841_v40, %v1907_v39  ;;  %v1973_v8 = vmax.f32 %v1732_v18, %v1909_v55  ;;  %v1975_v45 = vmax.f32 %v1845_v53, %v1911_v57  ;;  %v15138_v3 = vcombine.low %v12657_v1, %v12659_v27  ;;  %v2257_v1 = vld [vmem:[#allocation5 + $0x7c0] sm:$0xff]  ;;  %v2262_v53 = vld [vmem:[#allocation5 + $0x7e8] sm:$0xff]  ;;  %v2019_v55 = vld [vmem:[#allocation5 + $0x50] sm:$0xff] }
 0x382   : > { %3725 = vmatpush1.bf16.msra.mxu0 %v15137_v59  ;;  %v15139_v36 = vcombine.high %v12702_v37, %v12713_v61  ;;  %v1970_v31 = vmax.f32 %v1730_v5, %v1906_v23  ;;  %v1972_v29 = vmax.f32 %v1843_v21, %v1908_v46  ;;  %v1974_v9 = vmax.f32 %v1734_v7, %v1910_v58  ;;  %v2261_v27 = vld [vmem:[#allocation5 + $0x7e0] sm:$0xff]  ;;  %v2258_v21 = vld [vmem:[#allocation5 + $0x7c8] sm:$0xff]  ;;  %v2012_v23 = vld [vmem:[#allocation5 + $0x18] sm:$0xff] }
 0x383   : > { %3951 = vmatpush1.bf16.msra.mxu1 %v15138_v3  ;;  %v1976_v4 = vmax.f32 %v1847_v33, %v1912_v25  ;;  %v15140_v51 = vcombine.high %v12715_v48, %v12717_v17  ;;  %v12805_v40 = vpack.c.bf16 %v1973_v8, %v1969_v19  ;;  %v12807_v39 = vpack.c.bf16 %v1975_v45, %v1971_v41  ;;  %v2023_v57 = vld [vmem:[#allocation5 + $0x70] sm:$0xff]  ;;  %v2024_v19 = vld [vmem:[#allocation5 + $0x78] sm:$0xff] }
 0x384   : > { %3726 = vmatprep.subr.bf16.mxu0 %v15139_v36  ;;  %v12809_v18 = vpack.c.bf16 %v1974_v9, %v1970_v31  ;;  %v9785_v61 = vcombine.low %v12769_v47, %v12771_v56  ;;  %v9788_v5 = vcombine.high %v2250_v62, %v2254_v6  ;;  %v9787_v48 = vcombine.low %v2250_v62, %v2254_v6  ;;  %v2016_v47 = vld [vmem:[#allocation5 + $0x38] sm:$0xff]  ;;  %v2027_v59 = vld [vmem:[#allocation5 + $0x90] sm:$0xff] }
 0x385   : > { %3952 = vmatprep.subr.bf16.mxu1 %v15140_v51  ;;  %v12811_v37 = vpack.c.bf16 %v1976_v4, %v1972_v29  ;;  %v9794_v17 = vcombine.high %v2257_v1, %v2261_v27  ;;  %v9796_v30 = vcombine.high %v2258_v21, %v2262_v53  ;;  %v9793_v56 = vcombine.low %v2257_v1, %v2261_v27  ;;  %v2028_v45 = vld [vmem:[#allocation5 + $0x98] sm:$0xff]  ;;  %v2035_v31 = vld [vmem:[#allocation5 + $0xd0] sm:$0xff] }
 0x386   : > { %3727 = vmatpush1.bf16.msra.mxu0 %v9777_v14  ;;  %3689 = vmatprep.mubr.bf16.mxu0 %v12809_v18  ;;  %v9795_v46 = vcombine.low %v2258_v21, %v2262_v53  ;;  %v9550_v7 = vcombine.high %v2011_v20, %v2015_v2  ;;  %v9552_v33 = vcombine.high %v2012_v23, %v2016_v47  ;;  %v2032_v3 = vld [vmem:[#allocation5 + $0xb8] sm:$0xff]  ;;  %v2039_v29 = vld [vmem:[#allocation5 + $0xf0] sm:$0xff] }
 0x387   : > { %3953 = vmatpush1.bf16.msra.mxu1 %v9779_v43  ;;  %3728 = vmatprep.subr.bf16.mxu0 %v9786_v24  ;;  %v9549_v14 = vcombine.low %v2011_v20, %v2015_v2  ;;  %v2020_v43 = vld [vmem:[#allocation5 + $0x58] sm:$0xff]  ;;  %v9551_v58 = vcombine.low %v2012_v23, %v2016_v47  ;;  %v9558_v25 = vcombine.high %v2019_v55, %v2023_v57  ;;  %v2031_v24 = vld [vmem:[#allocation5 + $0xb0] sm:$0xff] }
 0x388   : > { %3915 = vmatprep.mubr.bf16.mxu1 %v12809_v18  ;;  %3690 = vmatmul.mubr.bf16.gmra.mrb[76].mxu0 %v12805_v40  ;;  %v9560_v41 = vcombine.high %v2020_v43, %v2024_v19  ;;  %v9557_v8 = vcombine.low %v2019_v55, %v2023_v57  ;;  %v9566_v36 = vcombine.high %v2027_v59, %v2031_v24  ;;  %v2036_v4 = vld [vmem:[#allocation5 + $0xd8] sm:$0xff]  ;;  %v2051_v23 = vld [vmem:[#allocation5 + $0x150] sm:$0xff] }
 0x389   : > { %3916 = vmatmul.mubr.bf16.gmra.mrb[92].mxu1 %v12805_v40  ;;  %3954 = vmatprep.subr.bf16.mxu1 %v9788_v5  ;;  %v9559_v62 = vcombine.low %v2020_v43, %v2024_v19  ;;  %v9568_v6 = vcombine.high %v2028_v45, %v2032_v3  ;;  %v9565_v9 = vcombine.low %v2027_v59, %v2031_v24  ;;  %v2040_v51 = vld [vmem:[#allocation5 + $0xf8] sm:$0xff]  ;;  %v2047_v5 = vld [vmem:[#allocation5 + $0x130] sm:$0xff] }
 0x38a   : > { %3729 = vmatpush1.bf16.msra.mxu0 %v9785_v61  ;;  %3732 = vmatprep.mubr.bf16.mxu0 %v12436_v32  ;;  %v9567_v1 = vcombine.low %v2028_v45, %v2032_v3  ;;  %v9574_v27 = vcombine.high %v2035_v31, %v2039_v29  ;;  %v2043_v61 = vld [vmem:[#allocation5 + $0x110] sm:$0xff]  ;;  %v9576_v21 = vcombine.high %v2036_v4, %v2040_v51 }
 0x38b   : > { %3955 = vmatpush1.bf16.msra.mxu1 %v9787_v48  ;;  %3958 = vmatprep.mubr.bf16.mxu1 %v12436_v32  ;;  %v9573_v53 = vcombine.low %v2035_v31, %v2039_v29  ;;  %v2044_v48 = vld [vmem:[#allocation5 + $0x118] sm:$0xff]  ;;  %v9582_v20 = vcombine.high %v2043_v61, %v2047_v5  ;;  %v9575_v2 = vcombine.low %v2036_v4, %v2040_v51  ;;  %v2055_v47 = vld [vmem:[#allocation5 + $0x170] sm:$0xff] }
 0x38c   : > { %3730 = vmatprep.subr.bf16.mxu0 %v9794_v17  ;;  %3956 = vmatprep.subr.bf16.mxu1 %v9796_v30  ;;  %v2048_v17 = vld [vmem:[#allocation5 + $0x138] sm:$0xff]  ;;  %v9590_v55 = vcombine.high %v2051_v23, %v2055_v47  ;;  %v2059_v57 = vld [vmem:[#allocation5 + $0x190] sm:$0xff]  ;;  %v9589_v19 = vcombine.low %v2051_v23, %v2055_v47 }
 0x38d   : > { %v9584_v30 = vcombine.high %v2044_v48, %v2048_v17  ;;  %v2071_v45 = vld [vmem:[#allocation5 + $0x1f0] sm:$0xff] }
 0x38e   : > { %3731 = vmatpush1.bf16.msra.mxu0 %v9793_v56  ;;  %v9581_v56 = vcombine.low %v2043_v61, %v2047_v5  ;;  %v2075_v29 = vld [vmem:[#allocation5 + $0x210] sm:$0xff] }
 0x38f   : > { %3957 = vmatpush1.bf16.msra.mxu1 %v9795_v46  ;;  %4039 = vmatprep.subr.bf16.mxu0 %v9550_v7  ;;  %v2052_v46 = vld [vmem:[#allocation5 + $0x158] sm:$0xff]  ;;  %v2091_v47 = vld [vmem:[#allocation5 + $0x290] sm:$0xff] }
 0x390   : > { %4265 = vmatprep.subr.bf16.mxu1 %v9552_v33  ;;  %v2056_v7 = vld [vmem:[#allocation5 + $0x178] sm:$0xff]  ;;  %v9583_v33 = vcombine.low %v2044_v48, %v2048_v17  ;;  %v2087_v48 = vld [vmem:[#allocation5 + $0x270] sm:$0xff] }
 0x391   : > { %3733 = vmatmul.mubr.bf16.vlgmr.msra.gmra.mrb[48].mxu0 %v12428_v49  ;;  %v9592_v43 = vcombine.high %v2052_v46, %v2056_v7  ;;  %v9591_v24 = vcombine.low %v2052_v46, %v2056_v7 }
 0x392   : > { %3959 = vmatmul.mubr.bf16.vlgmr.msra.gmra.mrb[64].mxu1 %v12428_v49  ;;  %4040 = vmatpush1.bf16.msra.mxu0 %v9549_v14  ;;  %v2063_v14 = vld [vmem:[#allocation5 + $0x1b0] sm:$0xff] }
 0x393   : > { %3742 = vmatprep.mubr.bf16.mxu0 %v12480_v28  ;;  %3968 = vmatprep.mubr.bf16.mxu1 %v12480_v28  ;;  %v9598_v59 = vcombine.high %v2059_v57, %v2063_v14  ;;  %v9597_v3 = vcombine.low %v2059_v57, %v2063_v14 }
 0x394   : > { %4266 = vmatpush1.bf16.msra.mxu1 %v9551_v58  ;;  %4041 = vmatprep.subr.bf16.mxu0 %v9558_v25  ;;  %v2060_v58 = vld [vmem:[#allocation5 + $0x198] sm:$0xff] }
 0x395   : > { %4267 = vmatprep.subr.bf16.mxu1 %v9560_v41  ;;  %v2064_v25 = vld [vmem:[#allocation5 + $0x1b8] sm:$0xff] }
 0x396   : > { %4042 = vmatpush1.bf16.msra.mxu0 %v9557_v8  ;;  %v9600_v41 = vcombine.high %v2060_v58, %v2064_v25  ;;  %v2067_v8 = vld [vmem:[#allocation5 + $0x1d0] sm:$0xff] }
 0x397   : > { %4043 = vmatprep.subr.bf16.mxu0 %v9566_v36  ;;  %v2068_v36 = vld [vmem:[#allocation5 + $0x1d8] sm:$0xff]  ;;  %v9606_v31 = vcombine.high %v2067_v8, %v2071_v45  ;;  %v9605_v51 = vcombine.low %v2067_v8, %v2071_v45  ;;  %v2107_v45 = vld [vmem:[#allocation5 + $0x310] sm:$0xff] }
 0x398   : > { %4268 = vmatpush1.bf16.msra.mxu1 %v9559_v62  ;;  %v2072_v62 = vld [vmem:[#allocation5 + $0x1f8] sm:$0xff] }
 0x399   : > { %3743 = vmatmul.mubr.bf16.gmra.mrb[52].mxu0 %v12474_v35  ;;  %4269 = vmatprep.subr.bf16.mxu1 %v9568_v6  ;;  %v9599_v6 = vcombine.low %v2060_v58, %v2064_v25  ;;  %v9608_v4 = vcombine.high %v2068_v36, %v2072_v62  ;;  %v9607_v5 = vcombine.low %v2068_v36, %v2072_v62  ;;  %v2103_v58 = vld [vmem:[#allocation5 + $0x2f0] sm:$0xff] }
 0x39a   : > { %3969 = vmatmul.mubr.bf16.gmra.mrb[68].mxu1 %v12474_v35  ;;  %4044 = vmatpush1.bf16.msra.mxu0 %v9565_v9  ;;  %v2079_v9 = vld [vmem:[#allocation5 + $0x230] sm:$0xff] }
 0x39b   : > { %3752 = vmatprep.mubr.bf16.mxu0 %v12536_v38  ;;  %3978 = vmatprep.mubr.bf16.mxu1 %v12536_v38  ;;  %v9614_v61 = vcombine.high %v2075_v29, %v2079_v9  ;;  %v9613_v17 = vcombine.low %v2075_v29, %v2079_v9 }
 0x39c   : > { %4270 = vmatpush1.bf16.msra.mxu1 %v9567_v1  ;;  %4045 = vmatprep.subr.bf16.mxu0 %v9574_v27  ;;  %v2076_v1 = vld [vmem:[#allocation5 + $0x218] sm:$0xff] }
 0x39d   : > { %4271 = vmatprep.subr.bf16.mxu1 %v9576_v21  ;;  %v2080_v27 = vld [vmem:[#allocation5 + $0x238] sm:$0xff] }
 0x39e   : > { %4046 = vmatpush1.bf16.msra.mxu0 %v9573_v53  ;;  %v9616_v21 = vcombine.high %v2076_v1, %v2080_v27  ;;  %v2083_v53 = vld [vmem:[#allocation5 + $0x250] sm:$0xff] }
 0x39f   : > { %4047 = vmatprep.subr.bf16.mxu0 %v9582_v20  ;;  %v2084_v20 = vld [vmem:[#allocation5 + $0x258] sm:$0xff]  ;;  %v9622_v23 = vcombine.high %v2083_v53, %v2087_v48  ;;  %v9621_v7 = vcombine.low %v2083_v53, %v2087_v48  ;;  %v2123_v48 = vld [vmem:[#allocation5 + $0x390] sm:$0xff] }
 0x3a0   : > { %4272 = vmatpush1.bf16.msra.mxu1 %v9575_v2  ;;  %v2088_v2 = vld [vmem:[#allocation5 + $0x278] sm:$0xff] }
 0x3a1   : > { %3753 = vmatmul.mubr.bf16.gmra.mrb[56].mxu0 %v12528_v13  ;;  %4273 = vmatprep.subr.bf16.mxu1 %v9584_v30  ;;  %v9615_v30 = vcombine.low %v2076_v1, %v2080_v27  ;;  %v9624_v46 = vcombine.high %v2084_v20, %v2088_v2  ;;  %v9623_v14 = vcombine.low %v2084_v20, %v2088_v2  ;;  %v2119_v1 = vld [vmem:[#allocation5 + $0x370] sm:$0xff] }
 0x3a2   : > { %3979 = vmatmul.mubr.bf16.gmra.mrb[72].mxu1 %v12528_v13  ;;  %4048 = vmatpush1.bf16.msra.mxu0 %v9581_v56  ;;  %v2095_v56 = vld [vmem:[#allocation5 + $0x2b0] sm:$0xff] }
 0x3a3   : > { %3762 = vmatprep.mubr.bf16.mxu0 %v12592_v26  ;;  %3988 = vmatprep.mubr.bf16.mxu1 %v12592_v26  ;;  %v9630_v57 = vcombine.high %v2091_v47, %v2095_v56  ;;  %v9629_v25 = vcombine.low %v2091_v47, %v2095_v56 }
 0x3a4   : > { %4274 = vmatpush1.bf16.msra.mxu1 %v9583_v33  ;;  %4049 = vmatprep.subr.bf16.mxu0 %v9590_v55  ;;  %v2092_v33 = vld [vmem:[#allocation5 + $0x298] sm:$0xff] }
 0x3a5   : > { %4275 = vmatprep.subr.bf16.mxu1 %v9592_v43  ;;  %v2096_v55 = vld [vmem:[#allocation5 + $0x2b8] sm:$0xff] }
 0x3a6   : > { %4050 = vmatpush1.bf16.msra.mxu0 %v9589_v19  ;;  %v9632_v43 = vcombine.high %v2092_v33, %v2096_v55  ;;  %v2099_v19 = vld [vmem:[#allocation5 + $0x2d0] sm:$0xff] }
 0x3a7   : > { %4051 = vmatprep.subr.bf16.mxu0 %v9598_v59  ;;  %v2100_v59 = vld [vmem:[#allocation5 + $0x2d8] sm:$0xff]  ;;  %v9638_v8 = vcombine.high %v2099_v19, %v2103_v58  ;;  %v9637_v62 = vcombine.low %v2099_v19, %v2103_v58  ;;  %v2139_v58 = vld [vmem:[#allocation5 + $0x410] sm:$0xff] }
 0x3a8   : > { %4276 = vmatpush1.bf16.msra.mxu1 %v9591_v24  ;;  %v2104_v24 = vld [vmem:[#allocation5 + $0x2f8] sm:$0xff] }
 0x3a9   : > { %3763 = vmatmul.mubr.bf16.gmra.mrb[60].mxu0 %v12586_v52  ;;  %4277 = vmatprep.subr.bf16.mxu1 %v9600_v41  ;;  %v9631_v41 = vcombine.low %v2092_v33, %v2096_v55  ;;  %v9640_v36 = vcombine.high %v2100_v59, %v2104_v24  ;;  %v9639_v9 = vcombine.low %v2100_v59, %v2104_v24  ;;  %v2135_v33 = vld [vmem:[#allocation5 + $0x3f0] sm:$0xff] }
 0x3aa   : > { %3989 = vmatmul.mubr.bf16.gmra.mrb[76].mxu1 %v12586_v52  ;;  %4052 = vmatpush1.bf16.msra.mxu0 %v9597_v3  ;;  %v2111_v3 = vld [vmem:[#allocation5 + $0x330] sm:$0xff] }
 0x3ab   : > { %3772 = vmatprep.mubr.bf16.mxu0 %v12648_v54  ;;  %3998 = vmatprep.mubr.bf16.mxu1 %v12648_v54  ;;  %v9646_v29 = vcombine.high %v2107_v45, %v2111_v3  ;;  %v9645_v27 = vcombine.low %v2107_v45, %v2111_v3 }
 0x3ac   : > { %4278 = vmatpush1.bf16.msra.mxu1 %v9599_v6  ;;  %4053 = vmatprep.subr.bf16.mxu0 %v9606_v31  ;;  %v2108_v6 = vld [vmem:[#allocation5 + $0x318] sm:$0xff] }
 0x3ad   : > { %4279 = vmatprep.subr.bf16.mxu1 %v9608_v4  ;;  %v2112_v31 = vld [vmem:[#allocation5 + $0x338] sm:$0xff] }
 0x3ae   : > { %4054 = vmatpush1.bf16.msra.mxu0 %v9605_v51  ;;  %v9648_v4 = vcombine.high %v2108_v6, %v2112_v31  ;;  %v2115_v51 = vld [vmem:[#allocation5 + $0x350] sm:$0xff] }
 0x3af   : > { %4055 = vmatprep.subr.bf16.mxu0 %v9614_v61  ;;  %v2116_v61 = vld [vmem:[#allocation5 + $0x358] sm:$0xff]  ;;  %v9654_v53 = vcombine.high %v2115_v51, %v2119_v1  ;;  %v9653_v2 = vcombine.low %v2115_v51, %v2119_v1  ;;  %v2155_v1 = vld [vmem:[#allocation5 + $0x490] sm:$0xff] }
 0x3b0   : > { %4280 = vmatpush1.bf16.msra.mxu1 %v9607_v5  ;;  %v2120_v5 = vld [vmem:[#allocation5 + $0x378] sm:$0xff] }
 0x3b1   : > { %3773 = vmatmul.mubr.bf16.gmra.mrb[64].mxu0 %v12640_v12  ;;  %4281 = vmatprep.subr.bf16.mxu1 %v9616_v21  ;;  %v9647_v21 = vcombine.low %v2108_v6, %v2112_v31  ;;  %v9656_v20 = vcombine.high %v2116_v61, %v2120_v5  ;;  %v9655_v56 = vcombine.low %v2116_v61, %v2120_v5  ;;  %v2156_v5 = vld [vmem:[#allocation5 + $0x498] sm:$0xff] }
 0x3b2   : > { %3999 = vmatmul.mubr.bf16.gmra.mrb[80].mxu1 %v12640_v12  ;;  %4056 = vmatpush1.bf16.msra.mxu0 %v9613_v17  ;;  %v2127_v17 = vld [vmem:[#allocation5 + $0x3b0] sm:$0xff] }
 0x3b3   : > { %3782 = vmatprep.mubr.bf16.mxu0 %v12706_v10  ;;  %4008 = vmatprep.mubr.bf16.mxu1 %v12706_v10  ;;  %v9662_v47 = vcombine.high %v2123_v48, %v2127_v17  ;;  %v9661_v55 = vcombine.low %v2123_v48, %v2127_v17  ;;  %v2163_v17 = vld [vmem:[#allocation5 + $0x4d0] sm:$0xff] }
 0x3b4   : > { %4282 = vmatpush1.bf16.msra.mxu1 %v9615_v30  ;;  %4057 = vmatprep.subr.bf16.mxu0 %v9622_v23  ;;  %v2124_v30 = vld [vmem:[#allocation5 + $0x398] sm:$0xff] }
 0x3b5   : > { %4283 = vmatprep.subr.bf16.mxu1 %v9624_v46  ;;  %v2128_v23 = vld [vmem:[#allocation5 + $0x3b8] sm:$0xff] }
 0x3b6   : > { %4058 = vmatpush1.bf16.msra.mxu0 %v9621_v7  ;;  %v9664_v46 = vcombine.high %v2124_v30, %v2128_v23  ;;  %v2131_v7 = vld [vmem:[#allocation5 + $0x3d0] sm:$0xff] }
 0x3b7   : > { %4059 = vmatprep.subr.bf16.mxu0 %v9630_v57  ;;  %v2132_v57 = vld [vmem:[#allocation5 + $0x3d8] sm:$0xff]  ;;  %v9670_v19 = vcombine.high %v2131_v7, %v2135_v33  ;;  %v9669_v24 = vcombine.low %v2131_v7, %v2135_v33  ;;  %v2171_v7 = vld [vmem:[#allocation5 + $0x510] sm:$0xff] }
 0x3b8   : > { %4284 = vmatpush1.bf16.msra.mxu1 %v9623_v14  ;;  %v2136_v14 = vld [vmem:[#allocation5 + $0x3f8] sm:$0xff] }
 0x3b9   : > { %3783 = vmatmul.mubr.bf16.gmra.mrb[68].mxu0 %v12698_v42  ;;  %4285 = vmatprep.subr.bf16.mxu1 %v9632_v43  ;;  %v9663_v43 = vcombine.low %v2124_v30, %v2128_v23  ;;  %v9672_v59 = vcombine.high %v2132_v57, %v2136_v14  ;;  %v9671_v3 = vcombine.low %v2132_v57, %v2136_v14  ;;  %v2164_v23 = vld [vmem:[#allocation5 + $0x4d8] sm:$0xff] }
 0x3ba   : > { %4009 = vmatmul.mubr.bf16.gmra.mrb[84].mxu1 %v12698_v42  ;;  %4060 = vmatpush1.bf16.msra.mxu0 %v9629_v25  ;;  %v2143_v25 = vld [vmem:[#allocation5 + $0x430] sm:$0xff]  ;;  %v2176_v57 = vld [vmem:[#allocation5 + $0x538] sm:$0xff] }
 0x3bb   : > { %3792 = vmatprep.mubr.bf16.mxu0 %v12762_v22  ;;  %4018 = vmatprep.mubr.bf16.mxu1 %v12762_v22  ;;  %v9678_v45 = vcombine.high %v2139_v58, %v2143_v25  ;;  %v9677_v31 = vcombine.low %v2139_v58, %v2143_v25  ;;  %v2183_v58 = vld [vmem:[#allocation5 + $0x570] sm:$0xff] }
 0x3bc   : > { %4286 = vmatpush1.bf16.msra.mxu1 %v9631_v41  ;;  %4061 = vmatprep.subr.bf16.mxu0 %v9638_v8  ;;  %v2140_v41 = vld [vmem:[#allocation5 + $0x418] sm:$0xff] }
 0x3bd   : > { %4287 = vmatprep.subr.bf16.mxu1 %v9640_v36  ;;  %v2144_v8 = vld [vmem:[#allocation5 + $0x438] sm:$0xff]  ;;  %v2147_v36 = vld [vmem:[#allocation5 + $0x450] sm:$0xff] }
 0x3be   : > { %4062 = vmatpush1.bf16.msra.mxu0 %v9637_v62  ;;  %v2151_v62 = vld [vmem:[#allocation5 + $0x470] sm:$0xff]  ;;  %v9680_v6 = vcombine.high %v2140_v41, %v2144_v8  ;;  %v9679_v51 = vcombine.low %v2140_v41, %v2144_v8  ;;  %v2184_v41 = vld [vmem:[#allocation5 + $0x578] sm:$0xff] }
 0x3bf   : > { %4063 = vmatprep.subr.bf16.mxu0 %v9646_v29  ;;  %v2148_v29 = vld [vmem:[#allocation5 + $0x458] sm:$0xff]  ;;  %v9685_v61 = vcombine.low %v2147_v36, %v2151_v62 }
 0x3c0   : > { %4288 = vmatpush1.bf16.msra.mxu1 %v9639_v9  ;;  %v2152_v9 = vld [vmem:[#allocation5 + $0x478] sm:$0xff] }
 0x3c1   : > { %3793 = vmatmul.mubr.bf16.gmra.mrb[72].mxu0 %v12756_v60  ;;  %4289 = vmatprep.subr.bf16.mxu1 %v9648_v4  ;;  %v9686_v4 = vcombine.high %v2147_v36, %v2151_v62  ;;  %v9687_v48 = vcombine.low %v2148_v29, %v2152_v9  ;;  %v15141_v36 = vld [vmem:[#allocation36_spill] sm:$0xff]  ;;  %v15142_v62 = vld [vmem:[#allocation38_spill] sm:$0xff] }
 0x3c2   : > { %4019 = vmatmul.mubr.bf16.gmra.mrb[88].mxu1 %v12756_v60  ;;  %4064 = vmatpush1.bf16.msra.mxu0 %v9645_v27  ;;  %v2159_v27 = vld [vmem:[#allocation5 + $0x4b0] sm:$0xff] }
 0x3c3   : > { %3802 = vmatprep.mubr.bf16.mxu0 %v12811_v37  ;;  %4028 = vmatprep.mubr.bf16.mxu1 %v12811_v37  ;;  %v9693_v30 = vcombine.low %v2155_v1, %v2159_v27 }
 0x3c4   : > { %4290 = vmatpush1.bf16.msra.mxu1 %v9647_v21  ;;  %4065 = vmatprep.subr.bf16.mxu0 %v9654_v53  ;;  %v2160_v21 = vld [vmem:[#allocation5 + $0x4b8] sm:$0xff]  ;;  %v9694_v53 = vcombine.high %v2155_v1, %v2159_v27  ;;  %v2199_v1 = vld [vmem:[#allocation5 + $0x5f0] sm:$0xff] }
 0x3c5   : > { %4291 = vmatprep.subr.bf16.mxu1 %v9656_v20  ;;  %v2167_v20 = vld [vmem:[#allocation5 + $0x4f0] sm:$0xff] }
 0x3c6   : > { %4066 = vmatpush1.bf16.msra.mxu0 %v9653_v2  ;;  %v9696_v2 = vcombine.high %v2156_v5, %v2160_v21  ;;  %v9701_v33 = vcombine.low %v2163_v17, %v2167_v20 }
 0x3c7   : > { %4067 = vmatprep.subr.bf16.mxu0 %v9662_v47  ;;  %v2168_v47 = vld [vmem:[#allocation5 + $0x4f8] sm:$0xff] }
 0x3c8   : > { %4292 = vmatpush1.bf16.msra.mxu1 %v9655_v56  ;;  %v9702_v56 = vcombine.high %v2163_v17, %v2167_v20  ;;  %v2207_v17 = vld [vmem:[#allocation5 + $0x630] sm:$0xff] }
 0x3c9   : > { %3803 = vmatmul.mubr.bf16.gmra.mrb[76].mxu0 %v12807_v39  ;;  %4293 = vmatprep.subr.bf16.mxu1 %v9664_v46  ;;  %v9695_v46 = vcombine.low %v2156_v5, %v2160_v21  ;;  %v2200_v5 = vld [vmem:[#allocation5 + $0x5f8] sm:$0xff]  ;;  %v15143_v20 = vld [vmem:[#allocation37_spill] sm:$0xff] }
 0x3ca   : > { %4029 = vmatmul.mubr.bf16.gmra.mrb[92].mxu1 %v12807_v39  ;;  %4068 = vmatpush1.bf16.msra.mxu0 %v9661_v55  ;;  %v2172_v55 = vld [vmem:[#allocation5 + $0x518] sm:$0xff] }
 0x3cb   : > { %4071 = vmatprep.mubr.bf16.mxu0 %v12434_v0  ;;  %4297 = vmatprep.mubr.bf16.mxu1 %v12434_v0  ;;  %v9688_v0 = vcombine.high %v2148_v29, %v2152_v9  ;;  %v9712_v25 = vcombine.high %v2172_v55, %v2176_v57  ;;  %v2192_v29 = vld [vmem:[#allocation5 + $0x5b8] sm:$0xff] }
 0x3cc   : > { %4294 = vmatpush1.bf16.msra.mxu1 %v9663_v43  ;;  %4069 = vmatprep.subr.bf16.mxu0 %v9670_v19  ;;  %v9703_v43 = vcombine.low %v2164_v23, %v2168_v47  ;;  %v2179_v19 = vld [vmem:[#allocation5 + $0x550] sm:$0xff] }
 0x3cd   : > { %4295 = vmatprep.subr.bf16.mxu1 %v9672_v59  ;;  %v9718_v8 = vcombine.high %v2179_v19, %v2183_v58 }
 0x3ce   : > { %4070 = vmatpush1.bf16.msra.mxu0 %v9669_v24  ;;  %v2180_v24 = vld [vmem:[#allocation5 + $0x558] sm:$0xff] }
 0x3cf   : > { %4152 = vmatprep.subr.bf16.mxu0 %v9678_v45  ;;  %v9711_v45 = vcombine.low %v2172_v55, %v2176_v57  ;;  %v2212_v57 = vld [vmem:[#allocation5 + $0x658] sm:$0xff] }
 0x3d0   : > { %4296 = vmatpush1.bf16.msra.mxu1 %v9671_v3  ;;  %v2187_v3 = vld [vmem:[#allocation5 + $0x590] sm:$0xff] }
 0x3d1   : > { %4072 = vmatmul.mubr.bf16.vlgmr.msra.gmra.mrb[80].mxu0 %v12426_v16  ;;  %4378 = vmatprep.subr.bf16.mxu1 %v9680_v6  ;;  %v9717_v6 = vcombine.low %v2179_v19, %v2183_v58  ;;  %v2219_v58 = vld [vmem:[#allocation5 + $0x690] sm:$0xff] }
 0x3d2   : > { %4153 = vmatpush1.bf16.msra.mxu0 %v9677_v31  ;;  %4081 = vmatprep.mubr.bf16.mxu0 %v12478_v34  ;;  %v2188_v31 = vld [vmem:[#allocation5 + $0x598] sm:$0xff] }
 0x3d3   : > { %4298 = vmatmul.mubr.bf16.vlgmr.msra.gmra.mrb[96].mxu1 %v12426_v16  ;;  %4154 = vmatprep.subr.bf16.mxu0 %v9686_v4  ;;  %v2175_v16 = vld [vmem:[#allocation5 + $0x530] sm:$0xff]  ;;  %v9719_v4 = vcombine.low %v2180_v24, %v2184_v41  ;;  %v9728_v27 = vcombine.high %v2188_v31, %v2192_v29 }
 0x3d4   : > { %4307 = vmatprep.mubr.bf16.mxu1 %v12478_v34  ;;  %4379 = vmatpush1.bf16.msra.mxu1 %v9679_v51  ;;  %v9704_v34 = vcombine.high %v2164_v23, %v2168_v47  ;;  %v9710_v14 = vcombine.high %v2171_v7, %v2175_v16  ;;  %v9709_v59 = vcombine.low %v2171_v7, %v2175_v16  ;;  %v2195_v51 = vld [vmem:[#allocation5 + $0x5d0] sm:$0xff]  ;;  %v2204_v47 = vld [vmem:[#allocation5 + $0x618] sm:$0xff] }
 0x3d5   : > { %4380 = vmatprep.subr.bf16.mxu1 %v9688_v0  ;;  %v9734_v21 = vcombine.high %v2195_v51, %v2199_v1  ;;  %v9733_v23 = vcombine.low %v2195_v51, %v2199_v1  ;;  %v2211_v16 = vld [vmem:[#allocation5 + $0x650] sm:$0xff] }
 0x3d6   : > { %4155 = vmatpush1.bf16.msra.mxu0 %v9685_v61  ;;  %v2196_v61 = vld [vmem:[#allocation5 + $0x5d8] sm:$0xff]  ;;  %v2235_v51 = vld [vmem:[#allocation5 + $0x710] sm:$0xff] }
 0x3d7   : > { %4156 = vmatprep.subr.bf16.mxu0 %v9694_v53  ;;  %v9727_v53 = vcombine.low %v2188_v31, %v2192_v29  ;;  %v9735_v7 = vcombine.low %v2196_v61, %v2200_v5  ;;  %v2228_v31 = vld [vmem:[#allocation5 + $0x6d8] sm:$0xff]  ;;  %v2239_v1 = vld [vmem:[#allocation5 + $0x730] sm:$0xff] }
 0x3d8   : > { %4381 = vmatpush1.bf16.msra.mxu1 %v9687_v48  ;;  %v2203_v48 = vld [vmem:[#allocation5 + $0x610] sm:$0xff]  ;;  %v2232_v29 = vld [vmem:[#allocation5 + $0x6f8] sm:$0xff] }
 0x3d9   : > { %4082 = vmatmul.mubr.bf16.gmra.mrb[84].mxu0 %v12472_v50  ;;  %4382 = vmatprep.subr.bf16.mxu1 %v9696_v2  ;;  %v9736_v2 = vcombine.high %v2196_v61, %v2200_v5  ;;  %v9741_v55 = vcombine.low %v2203_v48, %v2207_v17  ;;  %v2236_v61 = vld [vmem:[#allocation5 + $0x718] sm:$0xff] }
 0x3da   : > { %4157 = vmatpush1.bf16.msra.mxu0 %v9693_v30  ;;  %4091 = vmatprep.mubr.bf16.mxu0 %v12534_v63  ;;  %v15144_v30 = vld [vmem:[#allocation29_spill] sm:$0xff]  ;;  %v2240_v5 = vld [vmem:[#allocation5 + $0x738] sm:$0xff] }
 0x3db   : > { %4308 = vmatmul.mubr.bf16.gmra.mrb[100].mxu1 %v12472_v50  ;;  %4158 = vmatprep.subr.bf16.mxu0 %v9702_v56  ;;  %v2191_v50 = vld [vmem:[#allocation5 + $0x5b0] sm:$0xff]  ;;  %v2208_v56 = vld [vmem:[#allocation5 + $0x638] sm:$0xff] }
 0x3dc   : > { %4317 = vmatprep.mubr.bf16.mxu1 %v12534_v63  ;;  %4383 = vmatpush1.bf16.msra.mxu1 %v9695_v46  ;;  %v9720_v63 = vcombine.high %v2180_v24, %v2184_v41  ;;  %v9726_v9 = vcombine.high %v2187_v3, %v2191_v50  ;;  %v9725_v0 = vcombine.low %v2187_v3, %v2191_v50 }
 0x3dd   : > { %4384 = vmatprep.subr.bf16.mxu1 %v9704_v34  ;;  %v9742_v46 = vcombine.high %v2203_v48, %v2207_v17  ;;  %v2215_v34 = vld [vmem:[#allocation5 + $0x670] sm:$0xff]  ;;  %v9743_v19 = vcombine.low %v2204_v47, %v2208_v56 }
 0x3de   : > { %4159 = vmatpush1.bf16.msra.mxu0 %v9701_v33  ;;  %v9744_v33 = vcombine.high %v2204_v47, %v2208_v56  ;;  %v9749_v41 = vcombine.low %v2211_v16, %v2215_v34  ;;  %v2243_v48 = vld [vmem:[#allocation5 + $0x750] sm:$0xff]  ;;  %v9775_v56 = vcombine.low %v2236_v61, %v2240_v5 }
 0x3df   : > { %4160 = vmatprep.subr.bf16.mxu0 %v9710_v14  ;;  %v2216_v14 = vld [vmem:[#allocation5 + $0x678] sm:$0xff]  ;;  %v2247_v17 = vld [vmem:[#allocation5 + $0x770] sm:$0xff] }
 0x3e0   : > { %4385 = vmatpush1.bf16.msra.mxu1 %v9703_v43  ;;  %v9750_v43 = vcombine.high %v2211_v16, %v2215_v34  ;;  %v9752_v24 = vcombine.high %v2212_v57, %v2216_v14  ;;  %v9751_v50 = vcombine.low %v2212_v57, %v2216_v14  ;;  %v9782_v47 = vcombine.high %v2243_v48, %v2247_v17  ;;  %v2252_v34 = vld [vmem:[#allocation5 + $0x798] sm:$0xff]  ;;  %v2259_v14 = vld [vmem:[#allocation5 + $0x7d0] sm:$0xff] }
 0x3e1   : > { %4092 = vmatmul.mubr.bf16.gmra.mrb[88].mxu0 %v15141_v36  ;;  %4386 = vmatprep.subr.bf16.mxu1 %v9712_v25  ;;  %v2223_v25 = vld [vmem:[#allocation5 + $0x6b0] sm:$0xff]  ;;  %v9781_v16 = vcombine.low %v2243_v48, %v2247_v17 }
 0x3e2   : > { %4161 = vmatpush1.bf16.msra.mxu0 %v9709_v59  ;;  %4101 = vmatprep.mubr.bf16.mxu0 %v15142_v62  ;;  %v15145_v59 = vld [vmem:[#allocation28_spill] sm:$0xff]  ;;  %v9758_v3 = vcombine.high %v2219_v58, %v2223_v25  ;;  %v11145_v48 = vld [vmem:[#allocation7 + $0xc0] ss:$16 sps:$4 sm:$0xff]   ;;  %v11153_v17 = vld [vmem:[#allocation7 + $0xe4] ss:$16 sps:$4 sm:$0xff]  }
 0x3e3   : > { %4318 = vmatmul.mubr.bf16.gmra.mrb[104].mxu1 %v15141_v36  ;;  %4162 = vmatprep.subr.bf16.mxu0 %v9718_v8  ;;  %v2220_v8 = vld [vmem:[#allocation5 + $0x698] sm:$0xff]  ;;  %v2227_v36 = vld [vmem:[#allocation5 + $0x6d0] sm:$0xff] }
 0x3e4   : > { %4327 = vmatprep.mubr.bf16.mxu1 %v15142_v62  ;;  %4387 = vmatpush1.bf16.msra.mxu1 %v9711_v45  ;;  %v2224_v45 = vld [vmem:[#allocation5 + $0x6b8] sm:$0xff] }
 0x3e5   : > { %4388 = vmatprep.subr.bf16.mxu1 %v9720_v63  ;;  %v2231_v63 = vld [vmem:[#allocation5 + $0x6f0] sm:$0xff]  ;;  %v9760_v62 = vcombine.high %v2220_v8, %v2224_v45 }
 0x3e6   : > { %4163 = vmatpush1.bf16.msra.mxu0 %v9717_v6  ;;  %v9757_v6 = vcombine.low %v2219_v58, %v2223_v25  ;;  %v2260_v25 = vld [vmem:[#allocation5 + $0x7d8] sm:$0xff] }
 0x3e7   : > { %4164 = vmatprep.subr.bf16.mxu0 %v9726_v9  ;;  %v9766_v9 = vcombine.high %v2227_v36, %v2231_v63 }
 0x3e8   : > { %4389 = vmatpush1.bf16.msra.mxu1 %v9719_v4  ;;  %v9759_v4 = vcombine.low %v2220_v8, %v2224_v45  ;;  %v11111_v8 = vld [vmem:[#allocation7 + $0x4] ss:$16 sps:$4 sm:$0xff]  }
 0x3e9   : > { %4102 = vmatmul.mubr.bf16.gmra.mrb[92].mxu0 %v15143_v20  ;;  %4390 = vmatprep.subr.bf16.mxu1 %v9728_v27  ;;  %v15146_v27 = vld [vmem:[#allocation30_spill] sm:$0xff] }
 0x3ea   : > { %4165 = vmatpush1.bf16.msra.mxu0 %v9725_v0  ;;  %4111 = vmatprep.mubr.bf16.mxu0 %v15144_v30  ;;  %v9765_v0 = vcombine.low %v2227_v36, %v2231_v63  ;;  %v11117_v36 = vld [vmem:[#allocation7 + $0x24] ss:$16 sps:$4 sm:$0xff]   ;;  %v11112_v63 = vld [vmem:[#allocation7 + $0x8] ss:$16 sps:$4 sm:$0xff]  }
 0x3eb   : > { %4328 = vmatmul.mubr.bf16.gmra.mrb[108].mxu1 %v15143_v20  ;;  %4166 = vmatprep.subr.bf16.mxu0 %v9734_v21  ;;  %v9774_v21 = vcombine.high %v2235_v51, %v2239_v1  ;;  %v9776_v20 = vcombine.high %v2236_v61, %v2240_v5  ;;  %v11136_v61 = vld [vmem:[#allocation7 + $0x88] ss:$16 sps:$4 sm:$0xff]   ;;  %v11144_v5 = vld [vmem:[#allocation7 + $0xac] ss:$16 sps:$4 sm:$0xff]  }
 0x3ec   : > { %4337 = vmatprep.mubr.bf16.mxu1 %v15144_v30  ;;  %4391 = vmatpush1.bf16.msra.mxu1 %v9727_v53  ;;  %v9767_v53 = vcombine.low %v2228_v31, %v2232_v29  ;;  %v2244_v30 = vld [vmem:[#allocation5 + $0x758] sm:$0xff] }
 0x3ed   : > { %4392 = vmatprep.subr.bf16.mxu1 %v9736_v2  ;;  %v9773_v2 = vcombine.low %v2235_v51, %v2239_v1  ;;  %v11132_v51 = vld [vmem:[#allocation7 + $0x6c] ss:$16 sps:$4 sm:$0xff]   ;;  %v11130_v1 = vld [vmem:[#allocation7 + $0x68] ss:$16 sps:$4 sm:$0xff]  }
 0x3ee   : > { %4167 = vmatpush1.bf16.msra.mxu0 %v9733_v23  ;;  %v2248_v23 = vld [vmem:[#allocation5 + $0x778] sm:$0xff] }
 0x3ef   : > { %4168 = vmatprep.subr.bf16.mxu0 %v9742_v46  ;;  %v2251_v46 = vld [vmem:[#allocation5 + $0x790] sm:$0xff]  ;;  %v9783_v57 = vcombine.low %v2244_v30, %v2248_v23 }
 0x3f0   : > { %4393 = vmatpush1.bf16.msra.mxu1 %v9735_v7  ;;  %v2255_v7 = vld [vmem:[#allocation5 + $0x7b0] sm:$0xff] }
 0x3f1   : > { %4112 = vmatmul.mubr.bf16.gmra.mrb[96].mxu0 %v15145_v59  ;;  %4394 = vmatprep.subr.bf16.mxu1 %v9744_v33  ;;  %v2256_v33 = vld [vmem:[#allocation5 + $0x7b8] sm:$0xff]  ;;  %v9789_v58 = vcombine.low %v2251_v46, %v2255_v7 }
 0x3f2   : > { %4169 = vmatpush1.bf16.msra.mxu0 %v9741_v55  ;;  %4121 = vmatprep.mubr.bf16.mxu0 %v12704_v44  ;;  %v9790_v55 = vcombine.high %v2251_v46, %v2255_v7  ;;  %v11160_v46 = vld [vmem:[#allocation7 + $0x108] ss:$16 sps:$4 sm:$0xff]   ;;  %v11168_v7 = vld [vmem:[#allocation7 + $0x12c] ss:$16 sps:$4 sm:$0xff]  }
 0x3f3   : > { %4338 = vmatmul.mubr.bf16.gmra.mrb[112].mxu1 %v15145_v59  ;;  %4170 = vmatprep.subr.bf16.mxu0 %v9750_v43  ;;  %v2263_v43 = vld [vmem:[#allocation5 + $0x7f0] sm:$0xff]  ;;  %v2264_v59 = vld [vmem:[#allocation5 + $0x7f8] sm:$0xff] }
 0x3f4   : > { %4347 = vmatprep.mubr.bf16.mxu1 %v12704_v44  ;;  %4395 = vmatpush1.bf16.msra.mxu1 %v9743_v19  ;;  %v9768_v44 = vcombine.high %v2228_v31, %v2232_v29  ;;  %v9792_v19 = vcombine.high %v2252_v34, %v2256_v33  ;;  %v9799_v45 = vcombine.low %v2260_v25, %v2264_v59  ;;  %v11126_v31 = vld [vmem:[#allocation7 + $0x4c] ss:$16 sps:$4 sm:$0xff]   ;;  %v11121_v29 = vld [vmem:[#allocation7 + $0x40] ss:$16 sps:$4 sm:$0xff]  }
 0x3f5   : > { %4396 = vmatprep.subr.bf16.mxu1 %v9752_v24  ;;  %v9798_v24 = vcombine.high %v2259_v14, %v2263_v43 }
 0x3f6   : > { %4171 = vmatpush1.bf16.msra.mxu0 %v9749_v41  ;;  %v9791_v41 = vcombine.low %v2252_v34, %v2256_v33  ;;  %v11169_v34 = vld [vmem:[#allocation7 + $0x140] ss:$16 sps:$4 sm:$0xff]   ;;  %v11177_v33 = vld [vmem:[#allocation7 + $0x164] ss:$16 sps:$4 sm:$0xff]  }
 0x3f7   : > { %4172 = vmatprep.subr.bf16.mxu0 %v9758_v3  ;;  %v11114_v3 = vld [vmem:[#allocation7 + $0xc] ss:$16 sps:$4 sm:$0xff]  }
 0x3f8   : > { %4397 = vmatpush1.bf16.msra.mxu1 %v9751_v50  ;;  %v11109_v50 = vld [vmem:[#allocation7] ss:$16 sps:$4 sm:$0xff]  }
 0x3f9   : > { %4122 = vmatmul.mubr.bf16.gmra.mrb[100].mxu0 %v15146_v27  ;;  %4398 = vmatprep.subr.bf16.mxu1 %v9760_v62  ;;  %v11120_v62 = vld [vmem:[#allocation7 + $0x2c] ss:$16 sps:$4 sm:$0xff]  }
 0x3fa   : > { %4173 = vmatpush1.bf16.msra.mxu0 %v9757_v6  ;;  %4131 = vmatprep.mubr.bf16.mxu0 %v12760_v15  ;;  %v11118_v6 = vld [vmem:[#allocation7 + $0x28] ss:$16 sps:$4 sm:$0xff]  }
 0x3fb   : > { %4348 = vmatmul.mubr.bf16.gmra.mrb[116].mxu1 %v15146_v27  ;;  %4174 = vmatprep.subr.bf16.mxu0 %v9766_v9  ;;  %v11129_v9 = vld [vmem:[#allocation7 + $0x64] ss:$16 sps:$4 sm:$0xff]   ;;  %v11138_v27 = vld [vmem:[#allocation7 + $0x8c] ss:$16 sps:$4 sm:$0xff]  }
 0x3fc   : > { %4357 = vmatprep.mubr.bf16.mxu1 %v12760_v15  ;;  %4399 = vmatpush1.bf16.msra.mxu1 %v9759_v4  ;;  %v9784_v15 = vcombine.high %v2244_v30, %v2248_v23  ;;  %v11124_v4 = vld [vmem:[#allocation7 + $0x48] ss:$16 sps:$4 sm:$0xff]   ;;  %v11162_v23 = vld [vmem:[#allocation7 + $0x10c] ss:$16 sps:$4 sm:$0xff]  }
 0x3fd   : > { %4400 = vmatprep.subr.bf16.mxu1 %v9768_v44  ;;  %v11133_v44 = vld [vmem:[#allocation7 + $0x80] ss:$16 sps:$4 sm:$0xff]   ;;  %v11154_v30 = vld [vmem:[#allocation7 + $0xe8] ss:$16 sps:$4 sm:$0xff]  }
 0x3fe   : > { %4175 = vmatpush1.bf16.msra.mxu0 %v9765_v0  ;;  %v11141_v0 = vld [vmem:[#allocation7 + $0xa4] ss:$16 sps:$4 sm:$0xff]  }
 0x3ff   : > { %4176 = vmatprep.subr.bf16.mxu0 %v9774_v21  ;;  %v11142_v21 = vld [vmem:[#allocation7 + $0xa8] ss:$16 sps:$4 sm:$0xff]  }
 0x400   : > { %4401 = vmatpush1.bf16.msra.mxu1 %v9767_v53  ;;  %v11150_v53 = vld [vmem:[#allocation7 + $0xcc] ss:$16 sps:$4 sm:$0xff]  }
 0x401   : > { %4132 = vmatmul.mubr.bf16.gmra.mrb[104].mxu0 %v12754_v11  ;;  %4402 = vmatprep.subr.bf16.mxu1 %v9776_v20  ;;  %v11148_v20 = vld [vmem:[#allocation7 + $0xc8] ss:$16 sps:$4 sm:$0xff]  }
 0x402   : > { %4177 = vmatpush1.bf16.msra.mxu0 %v9773_v2  ;;  %4141 = vmatprep.mubr.bf16.mxu0 %v12809_v18  ;;  %v11156_v2 = vld [vmem:[#allocation7 + $0xec] ss:$16 sps:$4 sm:$0xff]  }
 0x403   : > { %4358 = vmatmul.mubr.bf16.gmra.mrb[120].mxu1 %v12754_v11  ;;  %4178 = vmatprep.subr.bf16.mxu0 %v9782_v47  ;;  %v9800_v11 = vcombine.high %v2260_v25, %v2264_v59  ;;  %v11157_v47 = vld [vmem:[#allocation7 + $0x100] ss:$16 sps:$4 sm:$0xff]   ;;  %v11184_v25 = vld [vmem:[#allocation7 + $0x188] ss:$16 sps:$4 sm:$0xff]   ;;  %v11192_v59 = vld [vmem:[#allocation7 + $0x1ac] ss:$16 sps:$4 sm:$0xff]  }
 0x404   : > { %4367 = vmatprep.mubr.bf16.mxu1 %v12809_v18  ;;  %4403 = vmatpush1.bf16.msra.mxu1 %v9775_v56  ;;  %v9797_v18 = vcombine.low %v2259_v14, %v2263_v43  ;;  %v11165_v56 = vld [vmem:[#allocation7 + $0x124] ss:$16 sps:$4 sm:$0xff]   ;;  %v11178_v14 = vld [vmem:[#allocation7 + $0x168] ss:$16 sps:$4 sm:$0xff]   ;;  %v11186_v43 = vld [vmem:[#allocation7 + $0x18c] ss:$16 sps:$4 sm:$0xff]  }
 0x405   : > { %4404 = vmatprep.subr.bf16.mxu1 %v9784_v15  ;;  %v11166_v15 = vld [vmem:[#allocation7 + $0x128] ss:$16 sps:$4 sm:$0xff]  }
 0x406   : > { %4179 = vmatpush1.bf16.msra.mxu0 %v9781_v16  ;;  %v11174_v16 = vld [vmem:[#allocation7 + $0x14c] ss:$16 sps:$4 sm:$0xff]  }
 0x407   : > { %4180 = vmatprep.subr.bf16.mxu0 %v9790_v55  ;;  %v11172_v55 = vld [vmem:[#allocation7 + $0x148] ss:$16 sps:$4 sm:$0xff]  }
 0x408   : > { %4405 = vmatpush1.bf16.msra.mxu1 %v9783_v57  ;;  %v11180_v57 = vld [vmem:[#allocation7 + $0x16c] ss:$16 sps:$4 sm:$0xff]  }
 0x409   : > { %4142 = vmatmul.mubr.bf16.gmra.mrb[108].mxu0 %v12805_v40  ;;  %4406 = vmatprep.subr.bf16.mxu1 %v9792_v19  ;;  %v11181_v19 = vld [vmem:[#allocation7 + $0x180] ss:$16 sps:$4 sm:$0xff]  }
 0x40a   : > { %4181 = vmatpush1.bf16.msra.mxu0 %v9789_v58  ;;  %4184 = vmatprep.mubr.bf16.mxu0 %v12436_v32  ;;  %v11189_v58 = vld [vmem:[#allocation7 + $0x1a4] ss:$16 sps:$4 sm:$0xff]  }
 0x40b   : > { %4368 = vmatmul.mubr.bf16.gmra.mrb[124].mxu1 %v12805_v40  ;;  %4182 = vmatprep.subr.bf16.mxu0 %v9798_v24  ;;  %v11115_v40 = vld [vmem:[#allocation7 + $0x20] ss:$16 sps:$4 sm:$0xff]   ;;  %v11190_v24 = vld [vmem:[#allocation7 + $0x1a8] ss:$16 sps:$4 sm:$0xff]  }
 0x40c   : > { %4407 = vmatpush1.bf16.msra.mxu1 %v9791_v41  ;;  %4410 = vmatprep.mubr.bf16.mxu1 %v12436_v32  ;;  %v11123_v32 = vld [vmem:[#allocation7 + $0x44] ss:$16 sps:$4 sm:$0xff]   ;;  %v11198_v41 = vld [vmem:[#allocation7 + $0x1cc] ss:$16 sps:$4 sm:$0xff]  }
 0x40d   : > { %4408 = vmatprep.subr.bf16.mxu1 %v9800_v11  ;;  %v11193_v11 = vld [vmem:[#allocation7 + $0x1c0] ss:$16 sps:$4 sm:$0xff]  }
 0x40e   : > { %4183 = vmatpush1.bf16.msra.mxu0 %v9797_v18  ;;  %v11201_v18 = vld [vmem:[#allocation7 + $0x1e4] ss:$16 sps:$4 sm:$0xff]  }
 0x40f   : > { %6369 = vmatprep.subr.bf16.mxu0 %v11111_v8  ;;  %v11196_v8 = vld [vmem:[#allocation7 + $0x1c8] ss:$16 sps:$4 sm:$0xff]  }
 0x410   : > { %4409 = vmatpush1.bf16.msra.mxu1 %v9799_v45  ;;  %v11204_v45 = vld [vmem:[#allocation7 + $0x1ec] ss:$16 sps:$4 sm:$0xff]  }
 0x411   : > { %4185 = vmatmul.mubr.bf16.vlgmr.msra.gmra.mrb[80].mxu0 %v12428_v49  ;;  %6821 = vmatprep.subr.bf16.mxu1 %v11114_v3  ;;  %v11202_v3 = vld [vmem:[#allocation7 + $0x1e8] ss:$16 sps:$4 sm:$0xff]  }
 0x412   : > { %4194 = vmatprep.mubr.bf16.mxu0 %v12480_v28  ;;  %6370 = vmatpush1.bf16.msra.mxu0 %v11109_v50  ;;  %v11210_v50 = vld [vmem:[#allocation7 + $0x20c] ss:$16 sps:$4 sm:$0xff]  }
 0x413   : > { %4411 = vmatmul.mubr.bf16.vlgmr.msra.gmra.mrb[96].mxu1 %v12428_v49  ;;  %6371 = vmatprep.subr.bf16.mxu0 %v11117_v36  ;;  %v11127_v49 = vld [vmem:[#allocation7 + $0x60] ss:$16 sps:$4 sm:$0xff]  }
 0x414   : > { %4420 = vmatprep.mubr.bf16.mxu1 %v12480_v28  ;;  %6822 = vmatpush1.bf16.msra.mxu1 %v11112_v63  ;;  %v11135_v28 = vld [vmem:[#allocation7 + $0x84] ss:$16 sps:$4 sm:$0xff]   ;;  %v15147_v63 = vld [vmem:[#allocation24_spill] sm:$0xff] }
 0x415   : > { %6823 = vmatprep.subr.bf16.mxu1 %v11120_v62  ;;  %v2265_v36 = vld [vmem:[%s14919_s9] sm:$0xff] }
 0x416   : > { %6372 = vmatpush1.bf16.msra.mxu0 %v11115_v40  ;;  %v12919_v62 = vrot.slane %v2265_v36, %v15147_v63  ;;  %v15148_v40 = vld [vmem:[#allocation26_spill] sm:$0xff] }
 0x417   : > { %6373 = vmatprep.subr.bf16.mxu0 %v11123_v32  ;;  %v12922_v32 = vrot.slane %v2265_v36, %v15148_v40 }
 0x418   : > { %6824 = vmatpush1.bf16.msra.mxu1 %v11118_v6 }
 0x419   : > { %4195 = vmatmul.mubr.bf16.gmra.mrb[84].mxu0 %v12474_v35  ;;  %6825 = vmatprep.subr.bf16.mxu1 %v11126_v31  ;;  %v15150_v31 = vld [vmem:[#allocation27_spill] sm:$0xff] }
 0x41a   : > { %4204 = vmatprep.mubr.bf16.mxu0 %v12536_v38  ;;  %6374 = vmatpush1.bf16.msra.mxu0 %v11121_v29  ;;  %v12928_v29 = vrot.slane %v2265_v36, %v15150_v31 }
 0x41b   : > { %4421 = vmatmul.mubr.bf16.gmra.mrb[100].mxu1 %v12474_v35  ;;  %6375 = vmatprep.subr.bf16.mxu0 %v11129_v9  ;;  %v11139_v35 = vld [vmem:[#allocation7 + $0xa0] ss:$16 sps:$4 sm:$0xff]  }
 0x41c   : > { %4430 = vmatprep.mubr.bf16.mxu1 %v12536_v38  ;;  %6826 = vmatpush1.bf16.msra.mxu1 %v11124_v4  ;;  %v11147_v38 = vld [vmem:[#allocation7 + $0xc4] ss:$16 sps:$4 sm:$0xff]  }
 0x41d   : > { %6827 = vmatprep.subr.bf16.mxu1 %v11132_v51 }
 0x41e   : > { %6376 = vmatpush1.bf16.msra.mxu0 %v11127_v49 }
 0x41f   : > { %6377 = vmatprep.subr.bf16.mxu0 %v11135_v28 }
 0x420   : > { %6828 = vmatpush1.bf16.msra.mxu1 %v11130_v1 }
 0x421   : > { %4205 = vmatmul.mubr.bf16.gmra.mrb[88].mxu0 %v12528_v13  ;;  %6829 = vmatprep.subr.bf16.mxu1 %v11138_v27 }
 0x422   : > { %4214 = vmatprep.mubr.bf16.mxu0 %v12592_v26  ;;  %6378 = vmatpush1.bf16.msra.mxu0 %v11133_v44 }
 0x423   : > { %4431 = vmatmul.mubr.bf16.gmra.mrb[104].mxu1 %v12528_v13  ;;  %6379 = vmatprep.subr.bf16.mxu0 %v11141_v0  ;;  %v11151_v13 = vld [vmem:[#allocation7 + $0xe0] ss:$16 sps:$4 sm:$0xff]  }
 0x424   : > { %4440 = vmatprep.mubr.bf16.mxu1 %v12592_v26  ;;  %6830 = vmatpush1.bf16.msra.mxu1 %v11136_v61  ;;  %v11159_v26 = vld [vmem:[#allocation7 + $0x104] ss:$16 sps:$4 sm:$0xff]  }
 0x425   : > { %6831 = vmatprep.subr.bf16.mxu1 %v11144_v5 }
 0x426   : > { %6380 = vmatpush1.bf16.msra.mxu0 %v11139_v35 }
 0x427   : > { %6381 = vmatprep.subr.bf16.mxu0 %v11147_v38 }
 0x428   : > { %6832 = vmatpush1.bf16.msra.mxu1 %v11142_v21 }
 0x429   : > { %4215 = vmatmul.mubr.bf16.gmra.mrb[92].mxu0 %v12586_v52  ;;  %6833 = vmatprep.subr.bf16.mxu1 %v11150_v53 }
 0x42a   : > { %4224 = vmatprep.mubr.bf16.mxu0 %v12648_v54  ;;  %6382 = vmatpush1.bf16.msra.mxu0 %v11145_v48 }
 0x42b   : > { %4441 = vmatmul.mubr.bf16.gmra.mrb[108].mxu1 %v12586_v52  ;;  %6383 = vmatprep.subr.bf16.mxu0 %v11153_v17  ;;  %v11163_v52 = vld [vmem:[#allocation7 + $0x120] ss:$16 sps:$4 sm:$0xff]  }
 0x42c   : > { %4450 = vmatprep.mubr.bf16.mxu1 %v12648_v54  ;;  %6834 = vmatpush1.bf16.msra.mxu1 %v11148_v20  ;;  %v11171_v54 = vld [vmem:[#allocation7 + $0x144] ss:$16 sps:$4 sm:$0xff]  }
 0x42d   : > { %6835 = vmatprep.subr.bf16.mxu1 %v11156_v2 }
 0x42e   : > { %6384 = vmatpush1.bf16.msra.mxu0 %v11151_v13 }
 0x42f   : > { %6385 = vmatprep.subr.bf16.mxu0 %v11159_v26 }
 0x430   : > { %6836 = vmatpush1.bf16.msra.mxu1 %v11154_v30 }
 0x431   : > { %4225 = vmatmul.mubr.bf16.gmra.mrb[96].mxu0 %v12640_v12  ;;  %6837 = vmatprep.subr.bf16.mxu1 %v11162_v23 }
 0x432   : > { %4234 = vmatprep.mubr.bf16.mxu0 %v12706_v10  ;;  %6386 = vmatpush1.bf16.msra.mxu0 %v11157_v47 }
 0x433   : > { %4451 = vmatmul.mubr.bf16.gmra.mrb[112].mxu1 %v12640_v12  ;;  %6387 = vmatprep.subr.bf16.mxu0 %v11165_v56  ;;  %v11175_v12 = vld [vmem:[#allocation7 + $0x160] ss:$16 sps:$4 sm:$0xff]  }
 0x434   : > { %4460 = vmatprep.mubr.bf16.mxu1 %v12706_v10  ;;  %6838 = vmatpush1.bf16.msra.mxu1 %v11160_v46  ;;  %v11183_v10 = vld [vmem:[#allocation7 + $0x184] ss:$16 sps:$4 sm:$0xff]  }
 0x435   : > { %6839 = vmatprep.subr.bf16.mxu1 %v11168_v7 }
 0x436   : > { %6388 = vmatpush1.bf16.msra.mxu0 %v11163_v52 }
 0x437   : > { %6389 = vmatprep.subr.bf16.mxu0 %v11171_v54 }
 0x438   : > { %6840 = vmatpush1.bf16.msra.mxu1 %v11166_v15 }
 0x439   : > { %4235 = vmatmul.mubr.bf16.gmra.mrb[100].mxu0 %v12698_v42  ;;  %6841 = vmatprep.subr.bf16.mxu1 %v11174_v16 }
 0x43a   : > { %4244 = vmatprep.mubr.bf16.mxu0 %v12762_v22  ;;  %6390 = vmatpush1.bf16.msra.mxu0 %v11169_v34 }
 0x43b   : > { %4461 = vmatmul.mubr.bf16.gmra.mrb[116].mxu1 %v12698_v42  ;;  %6391 = vmatprep.subr.bf16.mxu0 %v11177_v33  ;;  %v11187_v42 = vld [vmem:[#allocation7 + $0x1a0] ss:$16 sps:$4 sm:$0xff]  }
 0x43c   : > { %4470 = vmatprep.mubr.bf16.mxu1 %v12762_v22  ;;  %6842 = vmatpush1.bf16.msra.mxu1 %v11172_v55  ;;  %v11195_v22 = vld [vmem:[#allocation7 + $0x1c4] ss:$16 sps:$4 sm:$0xff]  }
 0x43d   : > { %6843 = vmatprep.subr.bf16.mxu1 %v11180_v57 }
 0x43e   : > { %6392 = vmatpush1.bf16.msra.mxu0 %v11175_v12 }
 0x43f   : > { %6393 = vmatprep.subr.bf16.mxu0 %v11183_v10 }
 0x440   : > { %6844 = vmatpush1.bf16.msra.mxu1 %v11178_v14  ;;  %v11205_v14 = vld [vmem:[#allocation7 + $0x200] ss:$16 sps:$4 sm:$0xff]  }
 0x441   : > { %4245 = vmatmul.mubr.bf16.gmra.mrb[104].mxu0 %v12756_v60  ;;  %6845 = vmatprep.subr.bf16.mxu1 %v11186_v43 }
 0x442   : > { %4254 = vmatprep.mubr.bf16.mxu0 %v12811_v37  ;;  %6394 = vmatpush1.bf16.msra.mxu0 %v11181_v19 }
 0x443   : > { %4471 = vmatmul.mubr.bf16.gmra.mrb[120].mxu1 %v12756_v60  ;;  %6395 = vmatprep.subr.bf16.mxu0 %v11189_v58  ;;  %v11199_v60 = vld [vmem:[#allocation7 + $0x1e0] ss:$16 sps:$4 sm:$0xff]  }
 0x444   : > { %4480 = vmatprep.mubr.bf16.mxu1 %v12811_v37  ;;  %6846 = vmatpush1.bf16.msra.mxu1 %v11184_v25  ;;  %v11207_v37 = vld [vmem:[#allocation7 + $0x204] ss:$16 sps:$4 sm:$0xff]  }
 0x445   : > { %6847 = vmatprep.subr.bf16.mxu1 %v11192_v59 }
 0x446   : > { %6396 = vmatpush1.bf16.msra.mxu0 %v11187_v42  ;;  %v11208_v42 = vld [vmem:[#allocation7 + $0x208] ss:$16 sps:$4 sm:$0xff]  }
 0x447   : > { %6397 = vmatprep.subr.bf16.mxu0 %v11195_v22  ;;  %v11213_v22 = vld [vmem:[#allocation7 + $0x224] ss:$16 sps:$4 sm:$0xff]  }
 0x448   : > { %6848 = vmatpush1.bf16.msra.mxu1 %v11190_v24 }
 0x449   : > { %4255 = vmatmul.mubr.bf16.gmra.mrb[108].mxu0 %v12807_v39  ;;  %6849 = vmatprep.subr.bf16.mxu1 %v11198_v41 }
 0x44a   : > { %6398 = vmatpush1.bf16.msra.mxu0 %v11193_v11 }
 0x44b   : > { %4481 = vmatmul.mubr.bf16.gmra.mrb[124].mxu1 %v12807_v39  ;;  %6399 = vmatprep.subr.bf16.mxu0 %v11201_v18  ;;  %v15149_v39 = vld [vmem:[#allocation25_spill] sm:$0xff] }
 0x44c   : > { %6850 = vmatpush1.bf16.msra.mxu1 %v11196_v8  ;;  %v12925_v6 = vrot.slane %v2265_v36, %v15149_v39 }
 0x44d   : > { %6851 = vmatprep.subr.bf16.mxu1 %v11204_v45  ;;  %v11216_v45 = vld [vmem:[#allocation7 + $0x22c] ss:$16 sps:$4 sm:$0xff]  }
 0x44e   : > { %6400 = vmatpush1.bf16.msra.mxu0 %v11199_v60 }
 0x44f   : > { %6482 = vmatprep.subr.bf16.mxu0 %v11207_v37 }
 0x450   : > { %6852 = vmatpush1.bf16.msra.mxu1 %v11202_v3 }
 0x451   : > { %6934 = vmatprep.subr.bf16.mxu1 %v11210_v50 }
 0x464   : > { %v3734_v9 = vpop.f32.mrb[48].mxu0 }
 0x465   : > { %v10301_v4 = vadd.f32 %v3734_v9, %v12919_v62  ;;  %v3960_v51 = vpop.f32.mrb[64].mxu1  ;;  %v3736_v49 = vpop.f32.mrb[49].mxu0 }
 0x466   : > { %v10333_v28 = vadd.f32 %v3960_v51, %v12922_v32  ;;  %v10302_v1 = vadd.f32 %v3736_v49, %v12925_v6  ;;  %v3962_v27 = vpop.f32.mrb[65].mxu1  ;;  %v3738_v44 = vpop.f32.mrb[50].mxu0 }
 0x467   : > { %v4491_v0 = vmul.f32 0.01, %v10301_v4  ;;  %v10334_v61 = vadd.f32 %v3962_v27, %v12928_v29  ;;  %v10303_v5 = vadd.f32 %v3738_v44, %v12919_v62  ;;  %v3964_v35 = vpop.f32.mrb[66].mxu1  ;;  %v3740_v38 = vpop.f32.mrb[51].mxu0  ;;  %v11214_v44 = vld [vmem:[#allocation7 + $0x228] ss:$16 sps:$4 sm:$0xff]  }
 0x468   : > { %v4493_v21 = vmul.f32 0.01, %v10333_v28  ;;  %v4492_v53 = vmul.f32 0.01, %v10302_v1  ;;  %v10335_v48 = vadd.f32 %v3964_v35, %v12922_v32  ;;  %v10304_v17 = vadd.f32 %v3740_v38, %v12925_v6  ;;  %v3966_v20 = vpop.f32.mrb[67].mxu1 }
 0x469   : > { %v4494_v2 = vmul.f32 0.01, %v10334_v61  ;;  %v4499_v13 = vmul.f32 0.01, %v10303_v5  ;;  %v10336_v26 = vadd.f32 %v3966_v20, %v12928_v29  ;;  %v4619_v47 = vmax.f32 %v10301_v4, %v4491_v0  ;;  %v11219_v35 = vld [vmem:[#allocation7 + $0x244] ss:$16 sps:$4 sm:$0xff]  }
 0x46a   : > { %v4501_v30 = vmul.f32 0.01, %v10335_v48  ;;  %v4500_v23 = vmul.f32 0.01, %v10304_v17  ;;  %v4621_v7 = vmax.f32 %v10333_v28, %v4493_v21  ;;  %v4620_v52 = vmax.f32 %v10302_v1, %v4492_v53  ;;  %v11211_v28 = vld [vmem:[#allocation7 + $0x220] ss:$16 sps:$4 sm:$0xff]  }
 0x46b   : > { %v4627_v56 = vmax.f32 %v10303_v5, %v4499_v13  ;;  %v4502_v46 = vmul.f32 0.01, %v10336_v26  ;;  %v4622_v34 = vmax.f32 %v10334_v61, %v4494_v2  ;;  %v11222_v38 = vld [vmem:[#allocation7 + $0x24c] ss:$16 sps:$4 sm:$0xff]  }
 0x46c   : > { %v4629_v54 = vmax.f32 %v10335_v48, %v4501_v30  ;;  %v4628_v15 = vmax.f32 %v10304_v17, %v4500_v23  ;;  %v3744_v16 = vpop.f32.mrb[52].mxu0  ;;  %v11217_v23 = vld [vmem:[#allocation7 + $0x240] ss:$16 sps:$4 sm:$0xff]  }
 0x46d   : > { %v4747_v33 = vpack.c.bf16 %v4627_v56, %v4619_v47  ;;  %v4630_v55 = vmax.f32 %v10336_v26, %v4502_v46  ;;  %v10305_v57 = vadd.f32 %v3744_v16, %v12919_v62  ;;  %v3970_v12 = vpop.f32.mrb[68].mxu1  ;;  %v3746_v10 = vpop.f32.mrb[53].mxu0  ;;  %v11225_v16 = vld [vmem:[#allocation7 + $0x264] ss:$16 sps:$4 sm:$0xff]  }
 0x46e   : > { %v12939_v43 = vpack.c.bf16 %v4629_v54, %v4621_v7  ;;  %v10306_v19 = vadd.f32 %v3746_v10, %v12925_v6  ;;  %v3972_v58 = vpop.f32.mrb[69].mxu1  ;;  %v3748_v25 = vpop.f32.mrb[54].mxu0  ;;  %v4748_v59 = vpack.c.bf16 %v4628_v15, %v4620_v52  ;;  %v12947_v37 = vadd.f32 %v3970_v12, %v12922_v32  ;;  %v11220_v15 = vld [vmem:[#allocation7 + $0x248] ss:$16 sps:$4 sm:$0xff]   ;;  %v11228_v10 = vld [vmem:[#allocation7 + $0x26c] ss:$16 sps:$4 sm:$0xff]  }
 0x46f   : > { %v4507_v24 = vmul.f32 0.01, %v10305_v57  ;;  %v10338_v41 = vadd.f32 %v3972_v58, %v12928_v29  ;;  %v10307_v11 = vadd.f32 %v3748_v25, %v12919_v62  ;;  %v3974_v18 = vpop.f32.mrb[70].mxu1  ;;  %v3750_v8 = vpop.f32.mrb[55].mxu0  ;;  %v12944_v60 = vpack.c.bf16 %v4630_v55, %v4622_v34 }
 0x470   : > { %v4508_v3 = vmul.f32 0.01, %v10306_v19  ;;  %v12950_v50 = vadd.f32 %v3974_v18, %v12922_v32  ;;  %v10308_v36 = vadd.f32 %v3750_v8, %v12925_v6  ;;  %v3976_v9 = vpop.f32.mrb[71].mxu1  ;;  %6401 = vmatprep.mubr.bf16.mxu0 %v4748_v59  ;;  %6853 = vmatprep.mubr.bf16.mxu1 %v4748_v59  ;;  %v4509_v21 = vmul.f32 0.01, %v12947_v37 }
 0x471   : > { %v4510_v4 = vmul.f32 0.01, %v10338_v41  ;;  %v4515_v51 = vmul.f32 0.01, %v10307_v11  ;;  %v10340_v49 = vadd.f32 %v3976_v9, %v12928_v29  ;;  %6402 = vmatmul.mubr.bf16.vlgmr.msra.gmra.mrb[112].mxu0 %v4747_v33  ;;  %6854 = vmatmul.mubr.bf16.vlgmr.msra.gmra.mrb[128].mxu1 %v4747_v33  ;;  %v4635_v0 = vmax.f32 %v10305_v57, %v4507_v24  ;;  %v11223_v18 = vld [vmem:[#allocation7 + $0x260] ss:$16 sps:$4 sm:$0xff]  }
 0x472   : > { %v12955_v1 = vmul.f32 0.01, %v12950_v50  ;;  %v4516_v27 = vmul.f32 0.01, %v10308_v36  ;;  %6483 = vmatpush1.bf16.msra.mxu0 %v11205_v14  ;;  %6935 = vmatpush1.bf16.msra.mxu1 %v11208_v42  ;;  %v4636_v53 = vmax.f32 %v10306_v19, %v4508_v3  ;;  %v11226_v3 = vld [vmem:[#allocation7 + $0x268] ss:$16 sps:$4 sm:$0xff]  }
 0x473   : > { %v4643_v61 = vmax.f32 %v10307_v11, %v4515_v51  ;;  %v4518_v5 = vmul.f32 0.01, %v10340_v49  ;;  %6484 = vmatprep.subr.bf16.mxu0 %v11213_v22  ;;  %6936 = vmatprep.subr.bf16.mxu1 %v11216_v45  ;;  %v4638_v20 = vmax.f32 %v10338_v41, %v4510_v4  ;;  %v4637_v22 = vmax.f32 %v12947_v37, %v4509_v21  ;;  %v11231_v37 = vld [vmem:[#allocation7 + $0x284] ss:$16 sps:$4 sm:$0xff]   ;;  %v11234_v4 = vld [vmem:[#allocation7 + $0x28c] ss:$16 sps:$4 sm:$0xff]  }
 0x474   : > { %v4644_v48 = vmax.f32 %v10308_v36, %v4516_v27  ;;  %v3754_v17 = vpop.f32.mrb[56].mxu0  ;;  %v4645_v56 = vmax.f32 %v12950_v50, %v12955_v1 }
 0x475   : > { %v4646_v2 = vmax.f32 %v10340_v49, %v4518_v5  ;;  %v10309_v13 = vadd.f32 %v3754_v17, %v12919_v62  ;;  %v3980_v26 = vpop.f32.mrb[72].mxu1  ;;  %v3756_v30 = vpop.f32.mrb[57].mxu0  ;;  %v4755_v47 = vpack.c.bf16 %v4643_v61, %v4635_v0 }
 0x476   : > { %v10310_v46 = vadd.f32 %v3756_v30, %v12925_v6  ;;  %v3982_v7 = vpop.f32.mrb[73].mxu1  ;;  %6485 = vmatpush1.bf16.msra.mxu0 %v11211_v28  ;;  %v3758_v52 = vpop.f32.mrb[58].mxu0  ;;  %6937 = vmatpush1.bf16.msra.mxu1 %v11214_v44  ;;  %v4756_v54 = vpack.c.bf16 %v4644_v48, %v4636_v53  ;;  %v12969_v19 = vadd.f32 %v3980_v26, %v12922_v32  ;;  %v11237_v26 = vld [vmem:[#allocation7 + $0x2a4] ss:$16 sps:$4 sm:$0xff]  }
 0x477   : > { %v4523_v34 = vmul.f32 0.01, %v10309_v13  ;;  %v12963_v33 = vadd.f32 %v3982_v7, %v12928_v29  ;;  %v10311_v55 = vadd.f32 %v3758_v52, %v12919_v62  ;;  %v3984_v57 = vpop.f32.mrb[74].mxu1  ;;  %v3760_v12 = vpop.f32.mrb[59].mxu0  ;;  %6486 = vmatprep.subr.bf16.mxu0 %v11219_v35  ;;  %6938 = vmatprep.subr.bf16.mxu1 %v11222_v38  ;;  %v12966_v14 = vpack.c.bf16 %v4646_v2, %v4638_v20  ;;  %v11229_v38 = vld [vmem:[#allocation7 + $0x280] ss:$16 sps:$4 sm:$0xff]  }
 0x478   : > { %v4524_v58 = vmul.f32 0.01, %v10310_v46  ;;  %v12972_v25 = vadd.f32 %v3984_v57, %v12922_v32  ;;  %v10312_v59 = vadd.f32 %v3760_v12, %v12925_v6  ;;  %v3986_v42 = vpop.f32.mrb[75].mxu1  ;;  %6411 = vmatprep.mubr.bf16.mxu0 %v4756_v54  ;;  %6863 = vmatprep.mubr.bf16.mxu1 %v4756_v54  ;;  %v12981_v51 = vpack.c.bf16 %v4645_v56, %v4637_v22  ;;  %v11240_v7 = vld [vmem:[#allocation7 + $0x2ac] ss:$16 sps:$4 sm:$0xff]  }
 0x479   : > { %v4526_v24 = vmul.f32 0.01, %v12963_v33  ;;  %v4531_v41 = vmul.f32 0.01, %v10311_v55  ;;  %v10344_v11 = vadd.f32 %v3986_v42, %v12928_v29  ;;  %6412 = vmatmul.mubr.bf16.gmra.mrb[116].mxu0 %v4755_v47  ;;  %6864 = vmatmul.mubr.bf16.gmra.mrb[132].mxu1 %v4755_v47  ;;  %v4651_v50 = vmax.f32 %v10309_v13, %v4523_v34  ;;  %v11232_v13 = vld [vmem:[#allocation7 + $0x288] ss:$16 sps:$4 sm:$0xff]  }
 0x47a   : > { %v12979_v8 = vmul.f32 0.01, %v12972_v25  ;;  %v4532_v45 = vmul.f32 0.01, %v10312_v59  ;;  %6487 = vmatpush1.bf16.msra.mxu0 %v11217_v23  ;;  %6939 = vmatpush1.bf16.msra.mxu1 %v11220_v15  ;;  %v4525_v49 = vmul.f32 0.01, %v12969_v19  ;;  %v4652_v28 = vmax.f32 %v10310_v46, %v4524_v58 }
 0x47b   : > { %v4659_v36 = vmax.f32 %v10311_v55, %v4531_v41  ;;  %v4534_v9 = vmul.f32 0.01, %v10344_v11  ;;  %6488 = vmatprep.subr.bf16.mxu0 %v11225_v16  ;;  %6940 = vmatprep.subr.bf16.mxu1 %v11228_v10  ;;  %v4654_v44 = vmax.f32 %v12963_v33, %v4526_v24  ;;  %v11235_v58 = vld [vmem:[#allocation7 + $0x2a0] ss:$16 sps:$4 sm:$0xff]   ;;  %v11238_v42 = vld [vmem:[#allocation7 + $0x2a8] ss:$16 sps:$4 sm:$0xff]  }
 0x47c   : > { %v4660_v1 = vmax.f32 %v10312_v59, %v4532_v45  ;;  %v3764_v27 = vpop.f32.mrb[60].mxu0  ;;  %v4661_v53 = vmax.f32 %v12972_v25, %v12979_v8  ;;  %v4653_v55 = vmax.f32 %v12969_v19, %v4525_v49  ;;  %v11243_v19 = vld [vmem:[#allocation7 + $0x2c4] ss:$16 sps:$4 sm:$0xff]  }
 0x47d   : > { %v4662_v0 = vmax.f32 %v10344_v11, %v4534_v9  ;;  %v10313_v61 = vadd.f32 %v3764_v27, %v12919_v62  ;;  %v3990_v5 = vpop.f32.mrb[76].mxu1  ;;  %v3766_v35 = vpop.f32.mrb[61].mxu0  ;;  %v4763_v21 = vpack.c.bf16 %v4659_v36, %v4651_v50  ;;  %v11246_v11 = vld [vmem:[#allocation7 + $0x2cc] ss:$16 sps:$4 sm:$0xff]  }
 0x47e   : > { %v10314_v48 = vadd.f32 %v3766_v35, %v12925_v6  ;;  %v3992_v17 = vpop.f32.mrb[77].mxu1  ;;  %6489 = vmatpush1.bf16.msra.mxu0 %v11223_v18  ;;  %v3768_v20 = vpop.f32.mrb[62].mxu0  ;;  %6941 = vmatpush1.bf16.msra.mxu1 %v11226_v3  ;;  %v4764_v2 = vpack.c.bf16 %v4660_v1, %v4652_v28  ;;  %v12996_v54 = vadd.f32 %v3990_v5, %v12922_v32  ;;  %v11241_v28 = vld [vmem:[#allocation7 + $0x2c0] ss:$16 sps:$4 sm:$0xff]   ;;  %v11244_v35 = vld [vmem:[#allocation7 + $0x2c8] ss:$16 sps:$4 sm:$0xff]  }
 0x47f   : > { %v4539_v30 = vmul.f32 0.01, %v10313_v61  ;;  %v12990_v23 = vadd.f32 %v3992_v17, %v12928_v29  ;;  %v10315_v47 = vadd.f32 %v3768_v20, %v12919_v62  ;;  %v3994_v56 = vpop.f32.mrb[78].mxu1  ;;  %v3770_v46 = vpop.f32.mrb[63].mxu0  ;;  %6490 = vmatprep.subr.bf16.mxu0 %v11231_v37  ;;  %6942 = vmatprep.subr.bf16.mxu1 %v11234_v4  ;;  %v12993_v52 = vpack.c.bf16 %v4662_v0, %v4654_v44 }
 0x480   : > { %v4540_v15 = vmul.f32 0.01, %v10314_v48  ;;  %v12999_v16 = vadd.f32 %v3994_v56, %v12922_v32  ;;  %v10316_v34 = vadd.f32 %v3770_v46, %v12925_v6  ;;  %v3996_v33 = vpop.f32.mrb[79].mxu1  ;;  %6421 = vmatprep.mubr.bf16.mxu0 %v4764_v2  ;;  %6873 = vmatprep.mubr.bf16.mxu1 %v4764_v2  ;;  %v13008_v18 = vpack.c.bf16 %v4661_v53, %v4653_v55  ;;  %v11252_v2 = vld [vmem:[#allocation7 + $0x2ec] ss:$16 sps:$4 sm:$0xff]  }
 0x481   : > { %v4542_v57 = vmul.f32 0.01, %v12990_v23  ;;  %v4547_v12 = vmul.f32 0.01, %v10315_v47  ;;  %v10348_v10 = vadd.f32 %v3996_v33, %v12928_v29  ;;  %6422 = vmatmul.mubr.bf16.gmra.mrb[120].mxu0 %v4763_v21  ;;  %6874 = vmatmul.mubr.bf16.gmra.mrb[136].mxu1 %v4763_v21  ;;  %v4667_v22 = vmax.f32 %v10313_v61, %v4539_v30 }
 0x482   : > { %v13006_v25 = vmul.f32 0.01, %v12999_v16  ;;  %v4548_v59 = vmul.f32 0.01, %v10316_v34  ;;  %6491 = vmatpush1.bf16.msra.mxu0 %v11229_v38  ;;  %6943 = vmatpush1.bf16.msra.mxu1 %v11232_v13  ;;  %v4541_v8 = vmul.f32 0.01, %v12996_v54  ;;  %v4668_v45 = vmax.f32 %v10314_v48, %v4540_v15 }
 0x483   : > { %v4675_v24 = vmax.f32 %v10315_v47, %v4547_v12  ;;  %v4550_v41 = vmul.f32 0.01, %v10348_v10  ;;  %6492 = vmatprep.subr.bf16.mxu0 %v11237_v26  ;;  %6944 = vmatprep.subr.bf16.mxu1 %v11240_v7  ;;  %v4670_v36 = vmax.f32 %v12990_v23, %v4542_v57  ;;  %v11249_v38 = vld [vmem:[#allocation7 + $0x2e4] ss:$16 sps:$4 sm:$0xff]   ;;  %v11250_v57 = vld [vmem:[#allocation7 + $0x2e8] ss:$16 sps:$4 sm:$0xff]  }
 0x484   : > { %v4676_v3 = vmax.f32 %v10316_v34, %v4548_v59  ;;  %v3774_v50 = vpop.f32.mrb[64].mxu0  ;;  %v4677_v27 = vmax.f32 %v12999_v16, %v13006_v25  ;;  %v4669_v46 = vmax.f32 %v12996_v54, %v4541_v8  ;;  %v11247_v34 = vld [vmem:[#allocation7 + $0x2e0] ss:$16 sps:$4 sm:$0xff]   ;;  %v11255_v54 = vld [vmem:[#allocation7 + $0x304] ss:$16 sps:$4 sm:$0xff]  }
 0x485   : > { %v4678_v9 = vmax.f32 %v10348_v10, %v4550_v41  ;;  %v10317_v37 = vadd.f32 %v3774_v50, %v12919_v62  ;;  %v4000_v4 = vpop.f32.mrb[80].mxu1  ;;  %v3776_v49 = vpop.f32.mrb[65].mxu0  ;;  %v4771_v1 = vpack.c.bf16 %v4675_v24, %v4667_v22  ;;  %v11258_v25 = vld [vmem:[#allocation7 + $0x30c] ss:$16 sps:$4 sm:$0xff]   ;;  %v11253_v50 = vld [vmem:[#allocation7 + $0x300] ss:$16 sps:$4 sm:$0xff]  }
 0x486   : > { %v10318_v44 = vadd.f32 %v3776_v49, %v12925_v6  ;;  %v4002_v0 = vpop.f32.mrb[81].mxu1  ;;  %6493 = vmatpush1.bf16.msra.mxu0 %v11235_v58  ;;  %v3778_v61 = vpop.f32.mrb[66].mxu0  ;;  %6945 = vmatpush1.bf16.msra.mxu1 %v11238_v42  ;;  %v4772_v5 = vpack.c.bf16 %v4676_v3, %v4668_v45  ;;  %v13023_v26 = vadd.f32 %v4000_v4, %v12922_v32 }
 0x487   : > { %v4555_v21 = vmul.f32 0.01, %v10317_v37  ;;  %v13017_v53 = vadd.f32 %v4002_v0, %v12928_v29  ;;  %v10319_v48 = vadd.f32 %v3778_v61, %v12919_v62  ;;  %v4004_v17 = vpop.f32.mrb[82].mxu1  ;;  %v3780_v20 = vpop.f32.mrb[67].mxu0  ;;  %6494 = vmatprep.subr.bf16.mxu0 %v11243_v19  ;;  %6946 = vmatprep.subr.bf16.mxu1 %v11246_v11  ;;  %v13020_v13 = vpack.c.bf16 %v4678_v9, %v4670_v36 }
 0x488   : > { %v4556_v30 = vmul.f32 0.01, %v10318_v44  ;;  %v13026_v23 = vadd.f32 %v4004_v17, %v12922_v32  ;;  %v10320_v47 = vadd.f32 %v3780_v20, %v12925_v6  ;;  %v4006_v56 = vpop.f32.mrb[83].mxu1  ;;  %6431 = vmatprep.mubr.bf16.mxu0 %v4772_v5  ;;  %6883 = vmatprep.mubr.bf16.mxu1 %v4772_v5  ;;  %v13035_v59 = vpack.c.bf16 %v4677_v27, %v4669_v46  ;;  %v11261_v27 = vld [vmem:[#allocation7 + $0x324] ss:$16 sps:$4 sm:$0xff]  }
 0x489   : > { %v4558_v7 = vmul.f32 0.01, %v13017_v53  ;;  %v4563_v15 = vmul.f32 0.01, %v10319_v48  ;;  %v10352_v16 = vadd.f32 %v4006_v56, %v12928_v29  ;;  %6432 = vmatmul.mubr.bf16.gmra.mrb[124].mxu0 %v4771_v1  ;;  %6884 = vmatmul.mubr.bf16.gmra.mrb[140].mxu1 %v4771_v1  ;;  %v4683_v12 = vmax.f32 %v10317_v37, %v4555_v21  ;;  %v11256_v1 = vld [vmem:[#allocation7 + $0x308] ss:$16 sps:$4 sm:$0xff]  }
 0x48a   : > { %v13033_v33 = vmul.f32 0.01, %v13026_v23  ;;  %v4564_v55 = vmul.f32 0.01, %v10320_v47  ;;  %6495 = vmatpush1.bf16.msra.mxu0 %v11241_v28  ;;  %6947 = vmatpush1.bf16.msra.mxu1 %v11244_v35  ;;  %v4557_v42 = vmul.f32 0.01, %v13023_v26  ;;  %v4684_v22 = vmax.f32 %v10318_v44, %v4556_v30 }
 0x48b   : > { %v4691_v10 = vmax.f32 %v10319_v48, %v4563_v15  ;;  %v4566_v58 = vmul.f32 0.01, %v10352_v16  ;;  %6496 = vmatprep.subr.bf16.mxu0 %v11249_v38  ;;  %6948 = vmatprep.subr.bf16.mxu1 %v11252_v2  ;;  %v4686_v19 = vmax.f32 %v13017_v53, %v4558_v7  ;;  %v11264_v38 = vld [vmem:[#allocation7 + $0x32c] ss:$16 sps:$4 sm:$0xff]   ;;  %v11259_v46 = vld [vmem:[#allocation7 + $0x320] ss:$16 sps:$4 sm:$0xff]  }
 0x48c   : > { %v4692_v24 = vmax.f32 %v10320_v47, %v4564_v55  ;;  %v3784_v41 = vpop.f32.mrb[68].mxu0  ;;  %v4693_v9 = vmax.f32 %v13026_v23, %v13033_v33  ;;  %v4685_v30 = vmax.f32 %v13023_v26, %v4557_v42  ;;  %v11267_v26 = vld [vmem:[#allocation7 + $0x344] ss:$16 sps:$4 sm:$0xff]  }
 0x48d   : > { %v4694_v11 = vmax.f32 %v10352_v16, %v4566_v58  ;;  %v10321_v8 = vadd.f32 %v3784_v41, %v12919_v62  ;;  %v4010_v45 = vpop.f32.mrb[84].mxu1  ;;  %v3786_v3 = vpop.f32.mrb[69].mxu0  ;;  %v4779_v36 = vpack.c.bf16 %v4691_v10, %v4683_v12  ;;  %v11262_v16 = vld [vmem:[#allocation7 + $0x328] ss:$16 sps:$4 sm:$0xff]  }
 0x48e   : > { %v10322_v37 = vadd.f32 %v3786_v3, %v12925_v6  ;;  %v4012_v4 = vpop.f32.mrb[85].mxu1  ;;  %6497 = vmatpush1.bf16.msra.mxu0 %v11247_v34  ;;  %v3788_v49 = vpop.f32.mrb[70].mxu0  ;;  %6949 = vmatpush1.bf16.msra.mxu1 %v11250_v57  ;;  %v4780_v28 = vpack.c.bf16 %v4692_v24, %v4684_v22  ;;  %v13050_v53 = vadd.f32 %v4010_v45, %v12922_v32  ;;  %v11270_v57 = vld [vmem:[#allocation7 + $0x34c] ss:$16 sps:$4 sm:$0xff]  }
 0x48f   : > { %v4571_v44 = vmul.f32 0.01, %v10321_v8  ;;  %v13044_v0 = vadd.f32 %v4012_v4, %v12928_v29  ;;  %v10323_v61 = vadd.f32 %v3788_v49, %v12919_v62  ;;  %v4014_v5 = vpop.f32.mrb[86].mxu1  ;;  %v3790_v35 = vpop.f32.mrb[71].mxu0  ;;  %6498 = vmatprep.subr.bf16.mxu0 %v11255_v54  ;;  %6950 = vmatprep.subr.bf16.mxu1 %v11258_v25  ;;  %v13047_v21 = vpack.c.bf16 %v4694_v11, %v4686_v19  ;;  %v11265_v11 = vld [vmem:[#allocation7 + $0x340] ss:$16 sps:$4 sm:$0xff]  }
 0x490   : > { %v4572_v48 = vmul.f32 0.01, %v10322_v37  ;;  %v13053_v17 = vadd.f32 %v4014_v5, %v12922_v32  ;;  %v10324_v20 = vadd.f32 %v3790_v35, %v12925_v6  ;;  %v4016_v2 = vpop.f32.mrb[87].mxu1  ;;  %6441 = vmatprep.mubr.bf16.mxu0 %v4780_v28  ;;  %6893 = vmatprep.mubr.bf16.mxu1 %v4780_v28  ;;  %v13062_v12 = vpack.c.bf16 %v4693_v9, %v4685_v30  ;;  %v11273_v4 = vld [vmem:[#allocation7 + $0x364] ss:$16 sps:$4 sm:$0xff]  }
 0x491   : > { %v4574_v23 = vmul.f32 0.01, %v13044_v0  ;;  %v4579_v47 = vmul.f32 0.01, %v10323_v61  ;;  %v10356_v56 = vadd.f32 %v4016_v2, %v12928_v29  ;;  %6442 = vmatmul.mubr.bf16.gmra.mrb[128].mxu0 %v4779_v36  ;;  %6894 = vmatmul.mubr.bf16.gmra.mrb[144].mxu1 %v4779_v36  ;;  %v4699_v34 = vmax.f32 %v10321_v8, %v4571_v44 }
 0x492   : > { %v13060_v7 = vmul.f32 0.01, %v13053_v17  ;;  %v4580_v15 = vmul.f32 0.01, %v10324_v20  ;;  %6499 = vmatpush1.bf16.msra.mxu0 %v11253_v50  ;;  %6951 = vmatpush1.bf16.msra.mxu1 %v11256_v1  ;;  %v4573_v10 = vmul.f32 0.01, %v13050_v53  ;;  %v4700_v58 = vmax.f32 %v10322_v37, %v4572_v48 }
 0x493   : > { %v4707_v33 = vmax.f32 %v10323_v61, %v4579_v47  ;;  %v4582_v55 = vmul.f32 0.01, %v10356_v56  ;;  %6500 = vmatprep.subr.bf16.mxu0 %v11261_v27  ;;  %6952 = vmatprep.subr.bf16.mxu1 %v11264_v38  ;;  %v4702_v42 = vmax.f32 %v13044_v0, %v4574_v23  ;;  %v11268_v37 = vld [vmem:[#allocation7 + $0x348] ss:$16 sps:$4 sm:$0xff]   ;;  %v11276_v0 = vld [vmem:[#allocation7 + $0x36c] ss:$16 sps:$4 sm:$0xff]  }
 0x494   : > { %v4708_v54 = vmax.f32 %v10324_v20, %v4580_v15  ;;  %v3794_v25 = vpop.f32.mrb[72].mxu0  ;;  %v4709_v45 = vmax.f32 %v13053_v17, %v13060_v7  ;;  %v4701_v20 = vmax.f32 %v13050_v53, %v4573_v10  ;;  %v11271_v47 = vld [vmem:[#allocation7 + $0x360] ss:$16 sps:$4 sm:$0xff]   ;;  %v11274_v7 = vld [vmem:[#allocation7 + $0x368] ss:$16 sps:$4 sm:$0xff]  }
 0x495   : > { %v4710_v22 = vmax.f32 %v10356_v56, %v4582_v55  ;;  %v10325_v24 = vadd.f32 %v3794_v25, %v12919_v62  ;;  %v4020_v41 = vpop.f32.mrb[88].mxu1  ;;  %v3796_v19 = vpop.f32.mrb[73].mxu0  ;;  %v4787_v8 = vpack.c.bf16 %v4707_v33, %v4699_v34  ;;  %v11279_v53 = vld [vmem:[#allocation7 + $0x384] ss:$16 sps:$4 sm:$0xff]   ;;  %v11282_v33 = vld [vmem:[#allocation7 + $0x38c] ss:$16 sps:$4 sm:$0xff]  }
 0x496   : > { %v13070_v3 = vadd.f32 %v3796_v19, %v12925_v6  ;;  %v4022_v50 = vpop.f32.mrb[89].mxu1  ;;  %6501 = vmatpush1.bf16.msra.mxu0 %v11259_v46  ;;  %v3798_v36 = vpop.f32.mrb[74].mxu0  ;;  %6953 = vmatpush1.bf16.msra.mxu1 %v11262_v16  ;;  %v4788_v9 = vpack.c.bf16 %v4708_v54, %v4700_v58  ;;  %v13079_v5 = vadd.f32 %v4020_v41, %v12922_v32  ;;  %v11277_v19 = vld [vmem:[#allocation7 + $0x380] ss:$16 sps:$4 sm:$0xff]  }
 0x497   : > { %v4587_v49 = vmul.f32 0.01, %v10325_v24  ;;  %v13073_v28 = vadd.f32 %v4022_v50, %v12928_v29  ;;  %v10327_v1 = vadd.f32 %v3798_v36, %v12919_v62  ;;  %v4024_v27 = vpop.f32.mrb[90].mxu1  ;;  %v3800_v44 = vpop.f32.mrb[75].mxu0  ;;  %6502 = vmatprep.subr.bf16.mxu0 %v11267_v26  ;;  %6954 = vmatprep.subr.bf16.mxu1 %v11270_v57  ;;  %v13076_v61 = vpack.c.bf16 %v4710_v22, %v4702_v42 }
 0x498   : > { %v4588_v35 = vmul.f32 0.01, %v13070_v3  ;;  %v13083_v38 = vadd.f32 %v4024_v27, %v12922_v32  ;;  %v10328_v48 = vadd.f32 %v3800_v44, %v12925_v6  ;;  %v4026_v17 = vpop.f32.mrb[91].mxu1  ;;  %6451 = vmatprep.mubr.bf16.mxu0 %v4788_v9  ;;  %6903 = vmatprep.mubr.bf16.mxu1 %v4788_v9  ;;  %v13092_v55 = vpack.c.bf16 %v4709_v45, %v4701_v20  ;;  %v11280_v9 = vld [vmem:[#allocation7 + $0x388] ss:$16 sps:$4 sm:$0xff]  }
 0x499   : > { %v4590_v2 = vmul.f32 0.01, %v13073_v28  ;;  %v4595_v30 = vmul.f32 0.01, %v10327_v1  ;;  %v10360_v23 = vadd.f32 %v4026_v17, %v12928_v29  ;;  %6452 = vmatmul.mubr.bf16.gmra.mrb[132].mxu0 %v4787_v8  ;;  %6904 = vmatmul.mubr.bf16.gmra.mrb[148].mxu1 %v4787_v8  ;;  %v4715_v15 = vmax.f32 %v10325_v24, %v4587_v49  ;;  %v11288_v44 = vld [vmem:[#allocation7 + $0x3ac] ss:$16 sps:$4 sm:$0xff]  }
 0x49a   : > { %v13090_v56 = vmul.f32 0.01, %v13083_v38  ;;  %v4596_v46 = vmul.f32 0.01, %v10328_v48  ;;  %6503 = vmatpush1.bf16.msra.mxu0 %v11265_v11  ;;  %6955 = vmatpush1.bf16.msra.mxu1 %v11268_v37  ;;  %v4589_v26 = vmul.f32 0.01, %v13079_v5  ;;  %v4716_v57 = vmax.f32 %v13070_v3, %v4588_v35 }
 0x49b   : > { %v4723_v16 = vmax.f32 %v10327_v1, %v4595_v30  ;;  %v4598_v34 = vmul.f32 0.01, %v10360_v23  ;;  %6504 = vmatprep.subr.bf16.mxu0 %v11273_v4  ;;  %6956 = vmatprep.subr.bf16.mxu1 %v11276_v0  ;;  %v4718_v10 = vmax.f32 %v13073_v28, %v4590_v2  ;;  %v11285_v37 = vld [vmem:[#allocation7 + $0x3a4] ss:$16 sps:$4 sm:$0xff]  }
 0x49c   : > { %v4724_v58 = vmax.f32 %v10328_v48, %v4596_v46  ;;  %v3804_v54 = vpop.f32.mrb[76].mxu0  ;;  %v4725_v25 = vmax.f32 %v13083_v38, %v13090_v56  ;;  %v4717_v2 = vmax.f32 %v13079_v5, %v4589_v26 }
 0x49d   : > { %v4726_v42 = vmax.f32 %v10360_v23, %v4598_v34  ;;  %v10329_v22 = vadd.f32 %v3804_v54, %v12919_v62  ;;  %v4030_v24 = vpop.f32.mrb[92].mxu1  ;;  %v3806_v41 = vpop.f32.mrb[77].mxu0  ;;  %v4795_v11 = vpack.c.bf16 %v4723_v16, %v4715_v15  ;;  %v11291_v16 = vld [vmem:[#allocation7 + $0x3c4] ss:$16 sps:$4 sm:$0xff]   ;;  %v11294_v34 = vld [vmem:[#allocation7 + $0x3cc] ss:$16 sps:$4 sm:$0xff]  }
 0x49e   : > { %v10361_v8 = vadd.f32 %v4030_v24, %v12922_v32  ;;  %v10330_v45 = vadd.f32 %v3806_v41, %v12925_v6  ;;  %v4032_v50 = vpop.f32.mrb[93].mxu1  ;;  %6505 = vmatpush1.bf16.msra.mxu0 %v11271_v47  ;;  %v3808_v3 = vpop.f32.mrb[78].mxu0  ;;  %6957 = vmatpush1.bf16.msra.mxu1 %v11274_v7  ;;  %v4796_v36 = vpack.c.bf16 %v4724_v58, %v4716_v57  ;;  %v11283_v47 = vld [vmem:[#allocation7 + $0x3a0] ss:$16 sps:$4 sm:$0xff]   ;;  %v11286_v7 = vld [vmem:[#allocation7 + $0x3a8] ss:$16 sps:$4 sm:$0xff]  }
 0x49f   : > { %v4603_v4 = vmul.f32 0.01, %v10329_v22  ;;  %v10362_v49 = vadd.f32 %v4032_v50, %v12928_v29  ;;  %v10331_v28 = vadd.f32 %v3808_v3, %v12919_v62  ;;  %v4034_v1 = vpop.f32.mrb[94].mxu1  ;;  %v3810_v27 = vpop.f32.mrb[79].mxu0  ;;  %6506 = vmatprep.subr.bf16.mxu0 %v11279_v53  ;;  %6958 = vmatprep.subr.bf16.mxu1 %v11282_v33  ;;  %v13104_v0 = vpack.c.bf16 %v4726_v42, %v4718_v10  ;;  %v11289_v42 = vld [vmem:[#allocation7 + $0x3c0] ss:$16 sps:$4 sm:$0xff]  }
 0x4a0   : > { %v4605_v35 = vmul.f32 0.01, %v10361_v8  ;;  %v4604_v38 = vmul.f32 0.01, %v10330_v45  ;;  %v10363_v48 = vadd.f32 %v4034_v1, %v12922_v32  ;;  %v10332_v17 = vadd.f32 %v3810_v27, %v12925_v6  ;;  %v4036_v20 = vpop.f32.mrb[95].mxu1  ;;  %6461 = vmatprep.mubr.bf16.mxu0 %v4796_v36  ;;  %6913 = vmatprep.mubr.bf16.mxu1 %v4796_v36 }
 0x4a1   : > { %v4606_v30 = vmul.f32 0.01, %v10362_v49  ;;  %v4611_v62 = vmul.f32 0.01, %v10331_v28  ;;  %v10364_v23 = vadd.f32 %v4036_v20, %v12928_v29  ;;  %6462 = vmatmul.mubr.bf16.gmra.mrb[136].mxu0 %v4795_v11  ;;  %6914 = vmatmul.mubr.bf16.gmra.mrb[152].mxu1 %v4795_v11  ;;  %v4731_v32 = vmax.f32 %v10329_v22, %v4603_v4  ;;  %v11292_v24 = vld [vmem:[#allocation7 + $0x3c8] ss:$16 sps:$4 sm:$0xff]  }
 0x4a2   : > { %v4613_v56 = vmul.f32 0.01, %v10363_v48  ;;  %v4612_v46 = vmul.f32 0.01, %v10332_v17  ;;  %6507 = vmatpush1.bf16.msra.mxu0 %v11277_v19  ;;  %6959 = vmatpush1.bf16.msra.mxu1 %v11280_v9  ;;  %v13110_v5 = vpack.c.bf16 %v4725_v25, %v4717_v2  ;;  %v4733_v53 = vmax.f32 %v10361_v8, %v4605_v35  ;;  %v11297_v25 = vld [vmem:[#allocation7 + $0x3e4] ss:$16 sps:$4 sm:$0xff]  }
 0x4a3   : > { %v4739_v15 = vmax.f32 %v10331_v28, %v4611_v62  ;;  %v4614_v6 = vmul.f32 0.01, %v10364_v23  ;;  %6508 = vmatprep.subr.bf16.mxu0 %v11285_v37  ;;  %6960 = vmatprep.subr.bf16.mxu1 %v11288_v44  ;;  %v4732_v33 = vmax.f32 %v10330_v45, %v4604_v38  ;;  %v4734_v57 = vmax.f32 %v10362_v49, %v4606_v30  ;;  %v11300_v19 = vld [vmem:[#allocation7 + $0x3ec] ss:$16 sps:$4 sm:$0xff]   ;;  %v11295_v11 = vld [vmem:[#allocation7 + $0x3e0] ss:$16 sps:$4 sm:$0xff]  }
 0x4a4   : > { %v4741_v29 = vmax.f32 %v10363_v48, %v4613_v56  ;;  %v4740_v26 = vmax.f32 %v10332_v17, %v4612_v46  ;;  %v11298_v8 = vld [vmem:[#allocation7 + $0x3e8] ss:$16 sps:$4 sm:$0xff]   ;;  %v11303_v45 = vld [vmem:[#allocation7 + $0x404] ss:$16 sps:$4 sm:$0xff]   ;;  %v11306_v50 = vld [vmem:[#allocation7 + $0x40c] ss:$16 sps:$4 sm:$0xff]  }
 0x4a5   : > { %v4742_v10 = vmax.f32 %v10364_v23, %v4614_v6  ;;  %v4803_v58 = vpack.c.bf16 %v4739_v15, %v4731_v32  ;;  %v11301_v3 = vld [vmem:[#allocation7 + $0x400] ss:$16 sps:$4 sm:$0xff]   ;;  %v11304_v36 = vld [vmem:[#allocation7 + $0x408] ss:$16 sps:$4 sm:$0xff]   ;;  %v11309_v9 = vld [vmem:[#allocation7 + $0x424] ss:$16 sps:$4 sm:$0xff]  }
 0x4a6   : > { %6509 = vmatpush1.bf16.msra.mxu0 %v11283_v47  ;;  %6961 = vmatpush1.bf16.msra.mxu1 %v11286_v7  ;;  %v4804_v54 = vpack.c.bf16 %v4740_v26, %v4732_v33  ;;  %v13112_v22 = vpack.c.bf16 %v4741_v29, %v4733_v53  ;;  %v11312_v37 = vld [vmem:[#allocation7 + $0x42c] ss:$16 sps:$4 sm:$0xff]   ;;  %v11307_v4 = vld [vmem:[#allocation7 + $0x420] ss:$16 sps:$4 sm:$0xff]   ;;  %v11310_v49 = vld [vmem:[#allocation7 + $0x428] ss:$16 sps:$4 sm:$0xff]  }
 0x4a7   : > { %6510 = vmatprep.subr.bf16.mxu0 %v11291_v16  ;;  %6962 = vmatprep.subr.bf16.mxu1 %v11294_v34  ;;  %v13114_v41 = vpack.c.bf16 %v4742_v10, %v4734_v57  ;;  %v11318_v28 = vld [vmem:[#allocation7 + $0x44c] ss:$16 sps:$4 sm:$0xff]   ;;  %v11313_v1 = vld [vmem:[#allocation7 + $0x440] ss:$16 sps:$4 sm:$0xff]   ;;  %v11316_v27 = vld [vmem:[#allocation7 + $0x448] ss:$16 sps:$4 sm:$0xff]  }
 0x4a8   : > { %6471 = vmatprep.mubr.bf16.mxu0 %v4804_v54  ;;  %6923 = vmatprep.mubr.bf16.mxu1 %v4804_v54  ;;  %v11321_v44 = vld [vmem:[#allocation7 + $0x464] ss:$16 sps:$4 sm:$0xff]   ;;  %v11322_v38 = vld [vmem:[#allocation7 + $0x468] ss:$16 sps:$4 sm:$0xff]   ;;  %v11330_v48 = vld [vmem:[#allocation7 + $0x48c] ss:$16 sps:$4 sm:$0xff]  }
 0x4a9   : > { %6472 = vmatmul.mubr.bf16.gmra.mrb[140].mxu0 %v4803_v58  ;;  %6924 = vmatmul.mubr.bf16.gmra.mrb[156].mxu1 %v4803_v58  ;;  %v11327_v35 = vld [vmem:[#allocation7 + $0x484] ss:$16 sps:$4 sm:$0xff]   ;;  %v11325_v17 = vld [vmem:[#allocation7 + $0x480] ss:$16 sps:$4 sm:$0xff]   ;;  %v11328_v20 = vld [vmem:[#allocation7 + $0x488] ss:$16 sps:$4 sm:$0xff]  }
 0x4aa   : > { %6511 = vmatpush1.bf16.msra.mxu0 %v11289_v42  ;;  %6514 = vmatprep.mubr.bf16.mxu0 %v12944_v60  ;;  %v11333_v2 = vld [vmem:[#allocation7 + $0x4a4] ss:$16 sps:$4 sm:$0xff]   ;;  %v11334_v62 = vld [vmem:[#allocation7 + $0x4a8] ss:$16 sps:$4 sm:$0xff]   ;;  %v11342_v23 = vld [vmem:[#allocation7 + $0x4cc] ss:$16 sps:$4 sm:$0xff]  }
 0x4ab   : > { %6963 = vmatpush1.bf16.msra.mxu1 %v11292_v24  ;;  %6966 = vmatprep.mubr.bf16.mxu1 %v12944_v60  ;;  %v11315_v60 = vld [vmem:[#allocation7 + $0x444] ss:$16 sps:$4 sm:$0xff]   ;;  %v11337_v47 = vld [vmem:[#allocation7 + $0x4c0] ss:$16 sps:$4 sm:$0xff]   ;;  %v11340_v56 = vld [vmem:[#allocation7 + $0x4c8] ss:$16 sps:$4 sm:$0xff]  }
 0x4ac   : > { %6512 = vmatprep.subr.bf16.mxu0 %v11297_v25  ;;  %6964 = vmatprep.subr.bf16.mxu1 %v11300_v19  ;;  %v11339_v30 = vld [vmem:[#allocation7 + $0x4c4] ss:$16 sps:$4 sm:$0xff]   ;;  %v11346_v32 = vld [vmem:[#allocation7 + $0x4e8] ss:$16 sps:$4 sm:$0xff]   ;;  %v11354_v15 = vld [vmem:[#allocation7 + $0x50c] ss:$16 sps:$4 sm:$0xff]  }
 0x4ad   : > { %v11345_v46 = vld [vmem:[#allocation7 + $0x4e4] ss:$16 sps:$4 sm:$0xff]   ;;  %v11349_v6 = vld [vmem:[#allocation7 + $0x500] ss:$16 sps:$4 sm:$0xff]   ;;  %v11352_v16 = vld [vmem:[#allocation7 + $0x508] ss:$16 sps:$4 sm:$0xff]  }
 0x4ae   : > { %6513 = vmatpush1.bf16.msra.mxu0 %v11295_v11  ;;  %v11351_v7 = vld [vmem:[#allocation7 + $0x504] ss:$16 sps:$4 sm:$0xff]   ;;  %v11358_v33 = vld [vmem:[#allocation7 + $0x528] ss:$16 sps:$4 sm:$0xff]   ;;  %v11366_v29 = vld [vmem:[#allocation7 + $0x54c] ss:$16 sps:$4 sm:$0xff]  }
 0x4af   : > { %6965 = vmatpush1.bf16.msra.mxu1 %v11298_v8  ;;  %6595 = vmatprep.subr.bf16.mxu0 %v11303_v45  ;;  %v11357_v34 = vld [vmem:[#allocation7 + $0x524] ss:$16 sps:$4 sm:$0xff]   ;;  %v11361_v26 = vld [vmem:[#allocation7 + $0x540] ss:$16 sps:$4 sm:$0xff]   ;;  %v11364_v57 = vld [vmem:[#allocation7 + $0x548] ss:$16 sps:$4 sm:$0xff]  }
 0x4b0   : > { %7047 = vmatprep.subr.bf16.mxu1 %v11306_v50  ;;  %v11363_v53 = vld [vmem:[#allocation7 + $0x544] ss:$16 sps:$4 sm:$0xff]   ;;  %v11370_v54 = vld [vmem:[#allocation7 + $0x568] ss:$16 sps:$4 sm:$0xff]   ;;  %v11378_v42 = vld [vmem:[#allocation7 + $0x58c] ss:$16 sps:$4 sm:$0xff]  }
 0x4b1   : > { %6515 = vmatmul.mubr.bf16.vlgmr.msra.gmra.mrb[112].mxu0 %v12939_v43  ;;  %v11369_v10 = vld [vmem:[#allocation7 + $0x564] ss:$16 sps:$4 sm:$0xff]   ;;  %v11373_v19 = vld [vmem:[#allocation7 + $0x580] ss:$16 sps:$4 sm:$0xff]   ;;  %v11376_v8 = vld [vmem:[#allocation7 + $0x588] ss:$16 sps:$4 sm:$0xff]  }
 0x4b2   : > { %6596 = vmatpush1.bf16.msra.mxu0 %v11301_v3  ;;  %6967 = vmatmul.mubr.bf16.vlgmr.msra.gmra.mrb[128].mxu1 %v12939_v43  ;;  %v11324_v43 = vld [vmem:[#allocation7 + $0x46c] ss:$16 sps:$4 sm:$0xff]   ;;  %v11375_v58 = vld [vmem:[#allocation7 + $0x584] ss:$16 sps:$4 sm:$0xff]  }
 0x4b3   : > { %6524 = vmatprep.mubr.bf16.mxu0 %v12966_v14  ;;  %6976 = vmatprep.mubr.bf16.mxu1 %v12966_v14  ;;  %v11319_v14 = vld [vmem:[#allocation7 + $0x460] ss:$16 sps:$4 sm:$0xff]   ;;  %v11381_v45 = vld [vmem:[#allocation7 + $0x5a4] ss:$16 sps:$4 sm:$0xff]  }
 0x4b4   : > { %7048 = vmatpush1.bf16.msra.mxu1 %v11304_v36  ;;  %6597 = vmatprep.subr.bf16.mxu0 %v11309_v9  ;;  %v15151_v24 = vld [vmem:[#allocation23_spill] sm:$0xff]  ;;  %v11384_v36 = vld [vmem:[#allocation7 + $0x5ac] ss:$16 sps:$4 sm:$0xff]  }
 0x4b5   : > { %7049 = vmatprep.subr.bf16.mxu1 %v11312_v37  ;;  %v2285_v25 = vsub.s32 4, %v15151_v24  ;;  %v2289_v11 = vsub.s32 5, %v15151_v24  ;;  %v11613_v50 = vld [vmem:[%s14919_s9] sm:$0xff] }
 0x4b6   : > { %6598 = vmatpush1.bf16.msra.mxu0 %v11307_v4  ;;  %v11379_v9 = vld [vmem:[#allocation7 + $0x5a0] ss:$16 sps:$4 sm:$0xff]  }
 0x4b7   : > { %6599 = vmatprep.subr.bf16.mxu0 %v11315_v60  ;;  %v13150_v3 = vrot.slane %v11613_v50, %v2285_v25  ;;  %v13153_v37 = vrot.slane %v11613_v50, %v2289_v11  ;;  %v11387_v60 = vld [vmem:[#allocation7 + $0x5c4] ss:$16 sps:$4 sm:$0xff]  }
 0x4b8   : > { %7050 = vmatpush1.bf16.msra.mxu1 %v11310_v49 }
 0x4b9   : > { %6525 = vmatmul.mubr.bf16.gmra.mrb[116].mxu0 %v12981_v51  ;;  %7051 = vmatprep.subr.bf16.mxu1 %v11318_v28 }
 0x4ba   : > { %6600 = vmatpush1.bf16.msra.mxu0 %v11313_v1  ;;  %6977 = vmatmul.mubr.bf16.gmra.mrb[132].mxu1 %v12981_v51  ;;  %v11336_v51 = vld [vmem:[#allocation7 + $0x4ac] ss:$16 sps:$4 sm:$0xff]   ;;  %v11382_v1 = vld [vmem:[#allocation7 + $0x5a8] ss:$16 sps:$4 sm:$0xff]  }
 0x4bb   : > { %6534 = vmatprep.mubr.bf16.mxu0 %v12993_v52  ;;  %6986 = vmatprep.mubr.bf16.mxu1 %v12993_v52  ;;  %v11331_v52 = vld [vmem:[#allocation7 + $0x4a0] ss:$16 sps:$4 sm:$0xff]  }
 0x4bc   : > { %7052 = vmatpush1.bf16.msra.mxu1 %v11316_v27  ;;  %6601 = vmatprep.subr.bf16.mxu0 %v11321_v44 }
 0x4bd   : > { %7053 = vmatprep.subr.bf16.mxu1 %v11324_v43 }
 0x4be   : > { %6602 = vmatpush1.bf16.msra.mxu0 %v11319_v14 }
 0x4bf   : > { %6603 = vmatprep.subr.bf16.mxu0 %v11327_v35 }
 0x4c0   : > { %7054 = vmatpush1.bf16.msra.mxu1 %v11322_v38  ;;  %v11388_v38 = vld [vmem:[#allocation7 + $0x5c8] ss:$16 sps:$4 sm:$0xff]  }
 0x4c1   : > { %6535 = vmatmul.mubr.bf16.gmra.mrb[120].mxu0 %v13008_v18  ;;  %7055 = vmatprep.subr.bf16.mxu1 %v11330_v48 }
 0x4c2   : > { %6604 = vmatpush1.bf16.msra.mxu0 %v11325_v17  ;;  %6987 = vmatmul.mubr.bf16.gmra.mrb[136].mxu1 %v13008_v18  ;;  %v11348_v18 = vld [vmem:[#allocation7 + $0x4ec] ss:$16 sps:$4 sm:$0xff]  }
 0x4c3   : > { %6544 = vmatprep.mubr.bf16.mxu0 %v13020_v13  ;;  %6996 = vmatprep.mubr.bf16.mxu1 %v13020_v13  ;;  %v11343_v13 = vld [vmem:[#allocation7 + $0x4e0] ss:$16 sps:$4 sm:$0xff]  }
 0x4c4   : > { %7056 = vmatpush1.bf16.msra.mxu1 %v11328_v20  ;;  %6605 = vmatprep.subr.bf16.mxu0 %v11333_v2 }
 0x4c5   : > { %7057 = vmatprep.subr.bf16.mxu1 %v11336_v51 }
 0x4c6   : > { %6606 = vmatpush1.bf16.msra.mxu0 %v11331_v52  ;;  %v11393_v52 = vld [vmem:[#allocation7 + $0x5e4] ss:$16 sps:$4 sm:$0xff]  }
 0x4c7   : > { %6607 = vmatprep.subr.bf16.mxu0 %v11339_v30 }
 0x4c8   : > { %7058 = vmatpush1.bf16.msra.mxu1 %v11334_v62 }
 0x4c9   : > { %6545 = vmatmul.mubr.bf16.gmra.mrb[124].mxu0 %v13035_v59  ;;  %7059 = vmatprep.subr.bf16.mxu1 %v11342_v23 }
 0x4ca   : > { %6608 = vmatpush1.bf16.msra.mxu0 %v11337_v47  ;;  %6997 = vmatmul.mubr.bf16.gmra.mrb[140].mxu1 %v13035_v59  ;;  %v11360_v59 = vld [vmem:[#allocation7 + $0x52c] ss:$16 sps:$4 sm:$0xff]  }
 0x4cb   : > { %6554 = vmatprep.mubr.bf16.mxu0 %v13047_v21  ;;  %7006 = vmatprep.mubr.bf16.mxu1 %v13047_v21  ;;  %v11355_v21 = vld [vmem:[#allocation7 + $0x520] ss:$16 sps:$4 sm:$0xff]  }
 0x4cc   : > { %7060 = vmatpush1.bf16.msra.mxu1 %v11340_v56  ;;  %6609 = vmatprep.subr.bf16.mxu0 %v11345_v46  ;;  %v11396_v56 = vld [vmem:[#allocation7 + $0x5ec] ss:$16 sps:$4 sm:$0xff]  }
 0x4cd   : > { %7061 = vmatprep.subr.bf16.mxu1 %v11348_v18 }
 0x4ce   : > { %6610 = vmatpush1.bf16.msra.mxu0 %v11343_v13 }
 0x4cf   : > { %6611 = vmatprep.subr.bf16.mxu0 %v11351_v7 }
 0x4d0   : > { %7062 = vmatpush1.bf16.msra.mxu1 %v11346_v32 }
 0x4d1   : > { %6555 = vmatmul.mubr.bf16.gmra.mrb[128].mxu0 %v13062_v12  ;;  %7063 = vmatprep.subr.bf16.mxu1 %v11354_v15 }
 0x4d2   : > { %6612 = vmatpush1.bf16.msra.mxu0 %v11349_v6  ;;  %7007 = vmatmul.mubr.bf16.gmra.mrb[144].mxu1 %v13062_v12  ;;  %v11372_v12 = vld [vmem:[#allocation7 + $0x56c] ss:$16 sps:$4 sm:$0xff]  }
 0x4d3   : > { %6564 = vmatprep.mubr.bf16.mxu0 %v13076_v61  ;;  %7016 = vmatprep.mubr.bf16.mxu1 %v13076_v61  ;;  %v11367_v61 = vld [vmem:[#allocation7 + $0x560] ss:$16 sps:$4 sm:$0xff]  }
 0x4d4   : > { %7064 = vmatpush1.bf16.msra.mxu1 %v11352_v16  ;;  %6613 = vmatprep.subr.bf16.mxu0 %v11357_v34  ;;  %v11391_v16 = vld [vmem:[#allocation7 + $0x5e0] ss:$16 sps:$4 sm:$0xff]  }
 0x4d5   : > { %7065 = vmatprep.subr.bf16.mxu1 %v11360_v59 }
 0x4d6   : > { %6614 = vmatpush1.bf16.msra.mxu0 %v11355_v21 }
 0x4d7   : > { %6615 = vmatprep.subr.bf16.mxu0 %v11363_v53  ;;  %v11399_v53 = vld [vmem:[#allocation7 + $0x604] ss:$16 sps:$4 sm:$0xff]  }
 0x4d8   : > { %7066 = vmatpush1.bf16.msra.mxu1 %v11358_v33 }
 0x4d9   : > { %6565 = vmatmul.mubr.bf16.gmra.mrb[132].mxu0 %v13092_v55  ;;  %7067 = vmatprep.subr.bf16.mxu1 %v11366_v29 }
 0x4da   : > { %6616 = vmatpush1.bf16.msra.mxu0 %v11361_v26  ;;  %7017 = vmatmul.mubr.bf16.gmra.mrb[148].mxu1 %v13092_v55  ;;  %v2293_v55 = vsub.s32 6, %v15151_v24 }
 0x4db   : > { %6574 = vmatprep.mubr.bf16.mxu0 %v13104_v0  ;;  %7026 = vmatprep.mubr.bf16.mxu1 %v13104_v0  ;;  %v2297_v0 = vsub.s32 7, %v15151_v24 }
 0x4dc   : > { %7068 = vmatpush1.bf16.msra.mxu1 %v11364_v57  ;;  %6617 = vmatprep.subr.bf16.mxu0 %v11369_v10  ;;  %v13157_v4 = vrot.slane %v11613_v50, %v2293_v55  ;;  %v11394_v10 = vld [vmem:[#allocation7 + $0x5e8] ss:$16 sps:$4 sm:$0xff]  }
 0x4dd   : > { %7069 = vmatprep.subr.bf16.mxu1 %v11372_v12  ;;  %v13159_v28 = vrot.slane %v11613_v50, %v2297_v0  ;;  %v11400_v0 = vld [vmem:[#allocation7 + $0x608] ss:$16 sps:$4 sm:$0xff]  }
 0x4de   : > { %6618 = vmatpush1.bf16.msra.mxu0 %v11367_v61 }
 0x4df   : > { %6619 = vmatprep.subr.bf16.mxu0 %v11375_v58 }
 0x4e0   : > { %7070 = vmatpush1.bf16.msra.mxu1 %v11370_v54 }
 0x4e1   : > { %6575 = vmatmul.mubr.bf16.gmra.mrb[136].mxu0 %v13110_v5  ;;  %7071 = vmatprep.subr.bf16.mxu1 %v11378_v42 }
 0x4e2   : > { %6620 = vmatpush1.bf16.msra.mxu0 %v11373_v19  ;;  %7027 = vmatmul.mubr.bf16.gmra.mrb[152].mxu1 %v13110_v5  ;;  %v11390_v5 = vld [vmem:[#allocation7 + $0x5cc] ss:$16 sps:$4 sm:$0xff]  }
 0x4e3   : > { %6584 = vmatprep.mubr.bf16.mxu0 %v13114_v41  ;;  %7036 = vmatprep.mubr.bf16.mxu1 %v13114_v41  ;;  %v11385_v41 = vld [vmem:[#allocation7 + $0x5c0] ss:$16 sps:$4 sm:$0xff]  }
 0x4e4   : > { %7072 = vmatpush1.bf16.msra.mxu1 %v11376_v8  ;;  %v4186_v49 = vpop.f32.mrb[80].mxu0  ;;  %6621 = vmatprep.subr.bf16.mxu0 %v11381_v45  ;;  %v11397_v45 = vld [vmem:[#allocation7 + $0x600] ss:$16 sps:$4 sm:$0xff]  }
 0x4e5   : > { %v10365_v27 = vadd.f32 %v4186_v49, %v13150_v3  ;;  %v4188_v44 = vpop.f32.mrb[81].mxu0  ;;  %7073 = vmatprep.subr.bf16.mxu1 %v11384_v36 }
 0x4e6   : > { %v4412_v43 = vpop.f32.mrb[96].mxu1  ;;  %v10366_v14 = vadd.f32 %v4188_v44, %v13153_v37  ;;  %6622 = vmatpush1.bf16.msra.mxu0 %v11379_v9  ;;  %v4190_v35 = vpop.f32.mrb[82].mxu0 }
 0x4e7   : > { %v4495_v48 = vmul.f32 0.01, %v10365_v27  ;;  %v10397_v17 = vadd.f32 %v4412_v43, %v13157_v4  ;;  %v4414_v20 = vpop.f32.mrb[97].mxu1  ;;  %v10367_v2 = vadd.f32 %v4190_v35, %v13150_v3  ;;  %v4192_v51 = vpop.f32.mrb[83].mxu0  ;;  %6623 = vmatprep.subr.bf16.mxu0 %v11387_v60  ;;  %v11408_v35 = vld [vmem:[#allocation7 + $0x62c] ss:$16 sps:$4 sm:$0xff]  }
 0x4e8   : > { %v4496_v30 = vmul.f32 0.01, %v10366_v14  ;;  %v10398_v62 = vadd.f32 %v4414_v20, %v13159_v28  ;;  %v4416_v23 = vpop.f32.mrb[98].mxu1  ;;  %7074 = vmatpush1.bf16.msra.mxu1 %v11382_v1  ;;  %v10368_v47 = vadd.f32 %v4192_v51, %v13153_v37 }
 0x4e9   : > { %v4497_v46 = vmul.f32 0.01, %v10397_v17  ;;  %v4503_v18 = vmul.f32 0.01, %v10367_v2  ;;  %v10399_v13 = vadd.f32 %v4416_v23, %v13157_v4  ;;  %v4418_v7 = vpop.f32.mrb[99].mxu1  ;;  %6585 = vmatmul.mubr.bf16.gmra.mrb[140].mxu0 %v13112_v22  ;;  %7075 = vmatprep.subr.bf16.mxu1 %v11390_v5  ;;  %v4623_v34 = vmax.f32 %v10365_v27, %v4495_v48 }
 0x4ea   : > { %v4498_v32 = vmul.f32 0.01, %v10398_v62  ;;  %v4504_v15 = vmul.f32 0.01, %v10368_v47  ;;  %v10400_v6 = vadd.f32 %v4418_v7, %v13159_v28  ;;  %6624 = vmatpush1.bf16.msra.mxu0 %v11385_v41  ;;  %7037 = vmatmul.mubr.bf16.gmra.mrb[156].mxu1 %v13112_v22  ;;  %v4624_v33 = vmax.f32 %v10366_v14, %v4496_v30  ;;  %v11402_v22 = vld [vmem:[#allocation7 + $0x60c] ss:$16 sps:$4 sm:$0xff]  }
 0x4eb   : > { %v4631_v59 = vmax.f32 %v10367_v2, %v4503_v18  ;;  %v4505_v21 = vmul.f32 0.01, %v10399_v13  ;;  %6625 = vmatprep.subr.bf16.mxu0 %v11393_v52  ;;  %v4625_v12 = vmax.f32 %v10397_v17, %v4497_v46  ;;  %v11405_v27 = vld [vmem:[#allocation7 + $0x624] ss:$16 sps:$4 sm:$0xff]   ;;  %v11403_v30 = vld [vmem:[#allocation7 + $0x620] ss:$16 sps:$4 sm:$0xff]  }
 0x4ec   : > { %v4632_v29 = vmax.f32 %v10368_v47, %v4504_v15  ;;  %v4506_v26 = vmul.f32 0.01, %v10400_v6  ;;  %7076 = vmatpush1.bf16.msra.mxu1 %v11388_v38  ;;  %v4196_v57 = vpop.f32.mrb[84].mxu0  ;;  %v4626_v24 = vmax.f32 %v10398_v62, %v4498_v32  ;;  %v11406_v32 = vld [vmem:[#allocation7 + $0x628] ss:$16 sps:$4 sm:$0xff]  }
 0x4ed   : > { %v4751_v61 = vpack.c.bf16 %v4631_v59, %v4623_v34  ;;  %v4633_v58 = vmax.f32 %v10399_v13, %v4505_v21  ;;  %v10369_v54 = vadd.f32 %v4196_v57, %v13150_v3  ;;  %v4198_v42 = vpop.f32.mrb[85].mxu0  ;;  %7077 = vmatprep.subr.bf16.mxu1 %v11396_v56  ;;  %v11411_v56 = vld [vmem:[#allocation7 + $0x644] ss:$16 sps:$4 sm:$0xff]   ;;  %v11414_v21 = vld [vmem:[#allocation7 + $0x64c] ss:$16 sps:$4 sm:$0xff]  }
 0x4ee   : > { %v4634_v25 = vmax.f32 %v10400_v6, %v4506_v26  ;;  %v4422_v19 = vpop.f32.mrb[100].mxu1  ;;  %v10370_v11 = vadd.f32 %v4198_v42, %v13153_v37  ;;  %6626 = vmatpush1.bf16.msra.mxu0 %v11391_v16  ;;  %v4200_v55 = vpop.f32.mrb[86].mxu0  ;;  %v4752_v8 = vpack.c.bf16 %v4632_v29, %v4624_v33 }
 0x4ef   : > { %v13173_v50 = vpack.c.bf16 %v4633_v58, %v4625_v12  ;;  %v4511_v36 = vmul.f32 0.01, %v10369_v54  ;;  %v10401_v9 = vadd.f32 %v4422_v19, %v13157_v4  ;;  %v4424_v60 = vpop.f32.mrb[101].mxu1  ;;  %v10371_v49 = vadd.f32 %v4200_v55, %v13150_v3  ;;  %v4202_v1 = vpop.f32.mrb[87].mxu0  ;;  %6708 = vmatprep.subr.bf16.mxu0 %v11399_v53  ;;  %v11409_v12 = vld [vmem:[#allocation7 + $0x640] ss:$16 sps:$4 sm:$0xff]  }
 0x4f0   : > { %v4512_v44 = vmul.f32 0.01, %v10370_v11  ;;  %v13178_v5 = vadd.f32 %v4424_v60, %v13159_v28  ;;  %v4426_v43 = vpop.f32.mrb[102].mxu1  ;;  %7078 = vmatpush1.bf16.msra.mxu1 %v11394_v10  ;;  %v10372_v14 = vadd.f32 %v4202_v1, %v13153_v37  ;;  %6627 = vmatprep.mubr.bf16.mxu0 %v4752_v8  ;;  %v13181_v41 = vpack.c.bf16 %v4634_v25, %v4626_v24  ;;  %v11417_v25 = vld [vmem:[#allocation7 + $0x664] ss:$16 sps:$4 sm:$0xff]  }
 0x4f1   : > { %v4513_v38 = vmul.f32 0.01, %v10401_v9  ;;  %v4519_v48 = vmul.f32 0.01, %v10371_v49  ;;  %v10403_v17 = vadd.f32 %v4426_v43, %v13157_v4  ;;  %v4428_v20 = vpop.f32.mrb[103].mxu1  ;;  %7079 = vmatprep.mubr.bf16.mxu1 %v4752_v8  ;;  %6628 = vmatmul.mubr.bf16.vlgmr.msra.gmra.mrb[112].mxu0 %v4751_v61  ;;  %v4639_v62 = vmax.f32 %v10369_v54, %v4511_v36 }
 0x4f2   : > { %v4514_v2 = vmul.f32 0.01, %v13178_v5  ;;  %v4520_v51 = vmul.f32 0.01, %v10372_v14  ;;  %v10404_v52 = vadd.f32 %v4428_v20, %v13159_v28  ;;  %6709 = vmatpush1.bf16.msra.mxu0 %v11397_v45  ;;  %7160 = vmatprep.subr.bf16.mxu1 %v11402_v22  ;;  %v4640_v46 = vmax.f32 %v10370_v11, %v4512_v44  ;;  %v11415_v43 = vld [vmem:[#allocation7 + $0x660] ss:$16 sps:$4 sm:$0xff]  }
 0x4f3   : > { %v4647_v23 = vmax.f32 %v10371_v49, %v4519_v48  ;;  %v4521_v47 = vmul.f32 0.01, %v10403_v17  ;;  %7080 = vmatmul.mubr.bf16.vlgmr.msra.gmra.mrb[128].mxu1 %v4751_v61  ;;  %6710 = vmatprep.subr.bf16.mxu0 %v11405_v27  ;;  %v4641_v15 = vmax.f32 %v10401_v9, %v4513_v38  ;;  %v11412_v61 = vld [vmem:[#allocation7 + $0x648] ss:$16 sps:$4 sm:$0xff]   ;;  %v11423_v48 = vld [vmem:[#allocation7 + $0x684] ss:$16 sps:$4 sm:$0xff]  }
 0x4f4   : > { %v4648_v18 = vmax.f32 %v10372_v14, %v4520_v51  ;;  %v4522_v13 = vmul.f32 0.01, %v10404_v52  ;;  %7161 = vmatpush1.bf16.msra.mxu1 %v11400_v0  ;;  %v4206_v7 = vpop.f32.mrb[88].mxu0  ;;  %v4642_v53 = vmax.f32 %v13178_v5, %v4514_v2  ;;  %v11420_v0 = vld [vmem:[#allocation7 + $0x66c] ss:$16 sps:$4 sm:$0xff]  }
 0x4f5   : > { %v4649_v6 = vmax.f32 %v10403_v17, %v4521_v47  ;;  %v10373_v16 = vadd.f32 %v4206_v7, %v13150_v3  ;;  %v4208_v34 = vpop.f32.mrb[89].mxu0  ;;  %7162 = vmatprep.subr.bf16.mxu1 %v11408_v35  ;;  %v4759_v59 = vpack.c.bf16 %v4647_v23, %v4639_v62 }
 0x4f6   : > { %v4650_v33 = vmax.f32 %v10404_v52, %v4522_v13  ;;  %v4432_v29 = vpop.f32.mrb[104].mxu1  ;;  %v10374_v26 = vadd.f32 %v4208_v34, %v13153_v37  ;;  %6711 = vmatpush1.bf16.msra.mxu0 %v11403_v30  ;;  %v4210_v57 = vpop.f32.mrb[90].mxu0  ;;  %v4760_v10 = vpack.c.bf16 %v4648_v18, %v4640_v46  ;;  %v11418_v52 = vld [vmem:[#allocation7 + $0x668] ss:$16 sps:$4 sm:$0xff]   ;;  %v11426_v46 = vld [vmem:[#allocation7 + $0x68c] ss:$16 sps:$4 sm:$0xff]  }
 0x4f7   : > { %v4527_v58 = vmul.f32 0.01, %v10373_v16  ;;  %v13190_v54 = vadd.f32 %v4432_v29, %v13157_v4  ;;  %v4434_v42 = vpop.f32.mrb[105].mxu1  ;;  %v10375_v22 = vadd.f32 %v4210_v57, %v13150_v3  ;;  %v4212_v24 = vpop.f32.mrb[91].mxu0  ;;  %6712 = vmatprep.subr.bf16.mxu0 %v11411_v56  ;;  %v13193_v19 = vpack.c.bf16 %v4649_v6, %v4641_v15  ;;  %v11424_v34 = vld [vmem:[#allocation7 + $0x688] ss:$16 sps:$4 sm:$0xff]  }
 0x4f8   : > { %v4528_v11 = vmul.f32 0.01, %v10374_v26  ;;  %v13196_v55 = vadd.f32 %v4434_v42, %v13159_v28  ;;  %v4436_v8 = vpop.f32.mrb[106].mxu1  ;;  %7163 = vmatpush1.bf16.msra.mxu1 %v11406_v32  ;;  %v10376_v45 = vadd.f32 %v4212_v24, %v13153_v37  ;;  %6637 = vmatprep.mubr.bf16.mxu0 %v4760_v10  ;;  %v13199_v36 = vpack.c.bf16 %v4650_v33, %v4642_v53 }
 0x4f9   : > { %v4529_v9 = vmul.f32 0.01, %v13190_v54  ;;  %v4535_v60 = vmul.f32 0.01, %v10375_v22  ;;  %v10407_v49 = vadd.f32 %v4436_v8, %v13157_v4  ;;  %v4438_v1 = vpop.f32.mrb[107].mxu1  ;;  %7089 = vmatprep.mubr.bf16.mxu1 %v4760_v10  ;;  %6638 = vmatmul.mubr.bf16.gmra.mrb[116].mxu0 %v4759_v59  ;;  %v4655_v14 = vmax.f32 %v10373_v16, %v4527_v58 }
 0x4fa   : > { %v4530_v27 = vmul.f32 0.01, %v13196_v55  ;;  %v4536_v44 = vmul.f32 0.01, %v10376_v45  ;;  %v10408_v5 = vadd.f32 %v4438_v1, %v13159_v28  ;;  %6713 = vmatpush1.bf16.msra.mxu0 %v11409_v12  ;;  %7164 = vmatprep.subr.bf16.mxu1 %v11414_v21  ;;  %v4656_v17 = vmax.f32 %v10374_v26, %v4528_v11  ;;  %v11421_v16 = vld [vmem:[#allocation7 + $0x680] ss:$16 sps:$4 sm:$0xff]  }
 0x4fb   : > { %v4663_v35 = vmax.f32 %v10375_v22, %v4535_v60  ;;  %v4537_v38 = vmul.f32 0.01, %v10407_v49  ;;  %7090 = vmatmul.mubr.bf16.gmra.mrb[132].mxu1 %v4759_v59  ;;  %6714 = vmatprep.subr.bf16.mxu0 %v11417_v25  ;;  %v4657_v30 = vmax.f32 %v13190_v54, %v4529_v9  ;;  %v11429_v26 = vld [vmem:[#allocation7 + $0x6a4] ss:$16 sps:$4 sm:$0xff]   ;;  %v11432_v54 = vld [vmem:[#allocation7 + $0x6ac] ss:$16 sps:$4 sm:$0xff]  }
 0x4fc   : > { %v4664_v20 = vmax.f32 %v10376_v45, %v4536_v44  ;;  %v4538_v2 = vmul.f32 0.01, %v10408_v5  ;;  %7165 = vmatpush1.bf16.msra.mxu1 %v11412_v61  ;;  %v4216_v51 = vpop.f32.mrb[92].mxu0  ;;  %v4658_v18 = vmax.f32 %v13196_v55, %v4530_v27  ;;  %v11435_v1 = vld [vmem:[#allocation7 + $0x6c4] ss:$16 sps:$4 sm:$0xff]  }
 0x4fd   : > { %v4665_v62 = vmax.f32 %v10407_v49, %v4537_v38  ;;  %v10377_v23 = vadd.f32 %v4216_v51, %v13150_v3  ;;  %v4218_v47 = vpop.f32.mrb[93].mxu0  ;;  %7166 = vmatprep.subr.bf16.mxu1 %v11420_v0  ;;  %v4767_v56 = vpack.c.bf16 %v4663_v35, %v4655_v14  ;;  %v11427_v0 = vld [vmem:[#allocation7 + $0x6a0] ss:$16 sps:$4 sm:$0xff]   ;;  %v11430_v14 = vld [vmem:[#allocation7 + $0x6a8] ss:$16 sps:$4 sm:$0xff]  }
 0x4fe   : > { %v4666_v13 = vmax.f32 %v10408_v5, %v4538_v2  ;;  %v4442_v7 = vpop.f32.mrb[108].mxu1  ;;  %v10378_v32 = vadd.f32 %v4218_v47, %v13153_v37  ;;  %6715 = vmatpush1.bf16.msra.mxu0 %v11415_v43  ;;  %v4220_v15 = vpop.f32.mrb[94].mxu0  ;;  %v4768_v6 = vpack.c.bf16 %v4664_v20, %v4656_v17  ;;  %v11438_v2 = vld [vmem:[#allocation7 + $0x6cc] ss:$16 sps:$4 sm:$0xff]  }
 0x4ff   : > { %v4543_v59 = vmul.f32 0.01, %v10377_v23  ;;  %v13210_v21 = vadd.f32 %v4442_v7, %v13157_v4  ;;  %v4444_v53 = vpop.f32.mrb[109].mxu1  ;;  %v10379_v33 = vadd.f32 %v4220_v15, %v13150_v3  ;;  %v4222_v29 = vpop.f32.mrb[95].mxu0  ;;  %6716 = vmatprep.subr.bf16.mxu0 %v11423_v48  ;;  %v13213_v57 = vpack.c.bf16 %v4665_v62, %v4657_v30 }
 0x500   : > { %v4544_v10 = vmul.f32 0.01, %v10378_v32  ;;  %v13216_v12 = vadd.f32 %v4444_v53, %v13159_v28  ;;  %v4446_v61 = vpop.f32.mrb[110].mxu1  ;;  %7167 = vmatpush1.bf16.msra.mxu1 %v11418_v52  ;;  %v10380_v58 = vadd.f32 %v4222_v29, %v13153_v37  ;;  %6647 = vmatprep.mubr.bf16.mxu0 %v4768_v6  ;;  %v13219_v42 = vpack.c.bf16 %v4666_v13, %v4658_v18 }
 0x501   : > { %v4545_v22 = vmul.f32 0.01, %v13210_v21  ;;  %v4551_v24 = vmul.f32 0.01, %v10379_v33  ;;  %v10411_v25 = vadd.f32 %v4446_v61, %v13157_v4  ;;  %v4448_v11 = vpop.f32.mrb[111].mxu1  ;;  %7099 = vmatprep.mubr.bf16.mxu1 %v4768_v6  ;;  %6648 = vmatmul.mubr.bf16.gmra.mrb[120].mxu0 %v4767_v56  ;;  %v4671_v9 = vmax.f32 %v10377_v23, %v4543_v59 }
 0x502   : > { %v4546_v55 = vmul.f32 0.01, %v13216_v12  ;;  %v4552_v8 = vmul.f32 0.01, %v10380_v58  ;;  %v10412_v45 = vadd.f32 %v4448_v11, %v13159_v28  ;;  %6717 = vmatpush1.bf16.msra.mxu0 %v11421_v16  ;;  %7168 = vmatprep.subr.bf16.mxu1 %v11426_v46  ;;  %v4672_v27 = vmax.f32 %v10378_v32, %v4544_v10  ;;  %v11436_v46 = vld [vmem:[#allocation7 + $0x6c8] ss:$16 sps:$4 sm:$0xff]  }
 0x503   : > { %v4679_v60 = vmax.f32 %v10379_v33, %v4551_v24  ;;  %v4553_v49 = vmul.f32 0.01, %v10411_v25  ;;  %7100 = vmatmul.mubr.bf16.gmra.mrb[136].mxu1 %v4767_v56  ;;  %6718 = vmatprep.subr.bf16.mxu0 %v11429_v26  ;;  %v4673_v35 = vmax.f32 %v13210_v21, %v4545_v22  ;;  %v11433_v56 = vld [vmem:[#allocation7 + $0x6c0] ss:$16 sps:$4 sm:$0xff]   ;;  %v11441_v6 = vld [vmem:[#allocation7 + $0x6e4] ss:$16 sps:$4 sm:$0xff]  }
 0x504   : > { %v4680_v44 = vmax.f32 %v10380_v58, %v4552_v8  ;;  %v4554_v5 = vmul.f32 0.01, %v10412_v45  ;;  %7169 = vmatpush1.bf16.msra.mxu1 %v11424_v34  ;;  %v4226_v43 = vpop.f32.mrb[96].mxu0  ;;  %v4674_v51 = vmax.f32 %v13216_v12, %v4546_v55  ;;  %v11444_v33 = vld [vmem:[#allocation7 + $0x6ec] ss:$16 sps:$4 sm:$0xff]  }
 0x505   : > { %v4681_v38 = vmax.f32 %v10411_v25, %v4553_v49  ;;  %v10381_v48 = vadd.f32 %v4226_v43, %v13150_v3  ;;  %v4228_v17 = vpop.f32.mrb[97].mxu0  ;;  %7170 = vmatprep.subr.bf16.mxu1 %v11432_v54  ;;  %v4775_v20 = vpack.c.bf16 %v4679_v60, %v4671_v9  ;;  %v11439_v24 = vld [vmem:[#allocation7 + $0x6e0] ss:$16 sps:$4 sm:$0xff]   ;;  %v11447_v8 = vld [vmem:[#allocation7 + $0x704] ss:$16 sps:$4 sm:$0xff]  }
 0x506   : > { %v4682_v52 = vmax.f32 %v10412_v45, %v4554_v5  ;;  %v4452_v30 = vpop.f32.mrb[112].mxu1  ;;  %v10382_v62 = vadd.f32 %v4228_v17, %v13153_v37  ;;  %6719 = vmatpush1.bf16.msra.mxu0 %v11427_v0  ;;  %v4230_v23 = vpop.f32.mrb[98].mxu0  ;;  %v4776_v47 = vpack.c.bf16 %v4680_v44, %v4672_v27  ;;  %v11442_v49 = vld [vmem:[#allocation7 + $0x6e8] ss:$16 sps:$4 sm:$0xff]  }
 0x507   : > { %v4559_v18 = vmul.f32 0.01, %v10381_v48  ;;  %v13230_v13 = vadd.f32 %v4452_v30, %v13157_v4  ;;  %v4454_v7 = vpop.f32.mrb[113].mxu1  ;;  %v10383_v32 = vadd.f32 %v4230_v23, %v13150_v3  ;;  %v4232_v15 = vpop.f32.mrb[99].mxu0  ;;  %6720 = vmatprep.subr.bf16.mxu0 %v11435_v1  ;;  %v13233_v16 = vpack.c.bf16 %v4681_v38, %v4673_v35 }
 0x508   : > { %v4560_v34 = vmul.f32 0.01, %v10382_v62  ;;  %v13236_v59 = vadd.f32 %v4454_v7, %v13159_v28  ;;  %v4456_v21 = vpop.f32.mrb[114].mxu1  ;;  %7171 = vmatpush1.bf16.msra.mxu1 %v11430_v14  ;;  %v10384_v53 = vadd.f32 %v4232_v15, %v13153_v37  ;;  %6657 = vmatprep.mubr.bf16.mxu0 %v4776_v47  ;;  %v13239_v29 = vpack.c.bf16 %v4682_v52, %v4674_v51  ;;  %v11450_v14 = vld [vmem:[#allocation7 + $0x70c] ss:$16 sps:$4 sm:$0xff]  }
 0x509   : > { %v4561_v26 = vmul.f32 0.01, %v13230_v13  ;;  %v4567_v10 = vmul.f32 0.01, %v10383_v32  ;;  %v10415_v12 = vadd.f32 %v4456_v21, %v13157_v4  ;;  %v4458_v61 = vpop.f32.mrb[115].mxu1  ;;  %7109 = vmatprep.mubr.bf16.mxu1 %v4776_v47  ;;  %6658 = vmatmul.mubr.bf16.gmra.mrb[124].mxu0 %v4775_v20  ;;  %v4687_v25 = vmax.f32 %v10381_v48, %v4559_v18 }
 0x50a   : > { %v4562_v58 = vmul.f32 0.01, %v13236_v59  ;;  %v4568_v54 = vmul.f32 0.01, %v10384_v53  ;;  %v10416_v22 = vadd.f32 %v4458_v61, %v13159_v28  ;;  %6721 = vmatpush1.bf16.msra.mxu0 %v11433_v56  ;;  %7172 = vmatprep.subr.bf16.mxu1 %v11438_v2  ;;  %v4688_v45 = vmax.f32 %v10382_v62, %v4560_v34  ;;  %v11445_v51 = vld [vmem:[#allocation7 + $0x700] ss:$16 sps:$4 sm:$0xff]  }
 0x50b   : > { %v4695_v11 = vmax.f32 %v10383_v32, %v4567_v10  ;;  %v4569_v55 = vmul.f32 0.01, %v10415_v12  ;;  %7110 = vmatmul.mubr.bf16.gmra.mrb[140].mxu1 %v4775_v20  ;;  %6722 = vmatprep.subr.bf16.mxu0 %v11441_v6  ;;  %v4689_v1 = vmax.f32 %v13230_v13, %v4561_v26  ;;  %v11448_v52 = vld [vmem:[#allocation7 + $0x708] ss:$16 sps:$4 sm:$0xff]   ;;  %v11456_v6 = vld [vmem:[#allocation7 + $0x72c] ss:$16 sps:$4 sm:$0xff]  }
 0x50c   : > { %v4696_v0 = vmax.f32 %v10384_v53, %v4568_v54  ;;  %v4570_v9 = vmul.f32 0.01, %v10416_v22  ;;  %7173 = vmatpush1.bf16.msra.mxu1 %v11436_v46  ;;  %v4236_v60 = vpop.f32.mrb[100].mxu0  ;;  %v4690_v35 = vmax.f32 %v13236_v59, %v4562_v58  ;;  %v11453_v46 = vld [vmem:[#allocation7 + $0x724] ss:$16 sps:$4 sm:$0xff]  }
 0x50d   : > { %v4697_v27 = vmax.f32 %v10415_v12, %v4569_v55  ;;  %v10385_v44 = vadd.f32 %v4236_v60, %v13150_v3  ;;  %v4238_v5 = vpop.f32.mrb[101].mxu0  ;;  %7174 = vmatprep.subr.bf16.mxu1 %v11444_v33  ;;  %v4783_v43 = vpack.c.bf16 %v4695_v11, %v4687_v25  ;;  %v11451_v61 = vld [vmem:[#allocation7 + $0x720] ss:$16 sps:$4 sm:$0xff]  }
 0x50e   : > { %v4698_v38 = vmax.f32 %v10416_v22, %v4570_v9  ;;  %v4462_v48 = vpop.f32.mrb[116].mxu1  ;;  %v10386_v17 = vadd.f32 %v4238_v5, %v13153_v37  ;;  %6723 = vmatpush1.bf16.msra.mxu0 %v11439_v24  ;;  %v4240_v20 = vpop.f32.mrb[102].mxu0  ;;  %v4784_v2 = vpack.c.bf16 %v4696_v0, %v4688_v45  ;;  %v11459_v24 = vld [vmem:[#allocation7 + $0x744] ss:$16 sps:$4 sm:$0xff]   ;;  %v11454_v45 = vld [vmem:[#allocation7 + $0x728] ss:$16 sps:$4 sm:$0xff]  }
 0x50f   : > { %v4575_v30 = vmul.f32 0.01, %v10385_v44  ;;  %v13250_v62 = vadd.f32 %v4462_v48, %v13157_v4  ;;  %v4464_v23 = vpop.f32.mrb[117].mxu1  ;;  %v10387_v47 = vadd.f32 %v4240_v20, %v13150_v3  ;;  %v4242_v56 = vpop.f32.mrb[103].mxu0  ;;  %6724 = vmatprep.subr.bf16.mxu0 %v11447_v8  ;;  %v13253_v18 = vpack.c.bf16 %v4697_v27, %v4689_v1  ;;  %v11462_v27 = vld [vmem:[#allocation7 + $0x74c] ss:$16 sps:$4 sm:$0xff]  }
 0x510   : > { %v4576_v13 = vmul.f32 0.01, %v10386_v17  ;;  %v13256_v7 = vadd.f32 %v4464_v23, %v13159_v28  ;;  %v4466_v32 = vpop.f32.mrb[118].mxu1  ;;  %7175 = vmatpush1.bf16.msra.mxu1 %v11442_v49  ;;  %v10388_v15 = vadd.f32 %v4242_v56, %v13153_v37  ;;  %6667 = vmatprep.mubr.bf16.mxu0 %v4784_v2  ;;  %v13259_v34 = vpack.c.bf16 %v4698_v38, %v4690_v35  ;;  %v11457_v48 = vld [vmem:[#allocation7 + $0x740] ss:$16 sps:$4 sm:$0xff]  }
 0x511   : > { %v4577_v59 = vmul.f32 0.01, %v13250_v62  ;;  %v4583_v21 = vmul.f32 0.01, %v10387_v47  ;;  %v10419_v53 = vadd.f32 %v4466_v32, %v13157_v4  ;;  %v4468_v33 = vpop.f32.mrb[119].mxu1  ;;  %7119 = vmatprep.mubr.bf16.mxu1 %v4784_v2  ;;  %6668 = vmatmul.mubr.bf16.gmra.mrb[128].mxu0 %v4783_v43  ;;  %v4703_v58 = vmax.f32 %v10385_v44, %v4575_v30 }
 0x512   : > { %v4578_v26 = vmul.f32 0.01, %v13256_v7  ;;  %v4584_v10 = vmul.f32 0.01, %v10388_v15  ;;  %v10420_v12 = vadd.f32 %v4468_v33, %v13159_v28  ;;  %6725 = vmatpush1.bf16.msra.mxu0 %v11445_v51  ;;  %7176 = vmatprep.subr.bf16.mxu1 %v11450_v14  ;;  %v4704_v25 = vmax.f32 %v10386_v17, %v4576_v13  ;;  %v11460_v17 = vld [vmem:[#allocation7 + $0x748] ss:$16 sps:$4 sm:$0xff]  }
 0x513   : > { %v4711_v54 = vmax.f32 %v10387_v47, %v4583_v21  ;;  %v4585_v22 = vmul.f32 0.01, %v10419_v53  ;;  %7120 = vmatmul.mubr.bf16.gmra.mrb[144].mxu1 %v4783_v43  ;;  %6726 = vmatprep.subr.bf16.mxu0 %v11453_v46  ;;  %v4705_v0 = vmax.f32 %v13250_v62, %v4577_v59  ;;  %v11465_v62 = vld [vmem:[#allocation7 + $0x764] ss:$16 sps:$4 sm:$0xff]  }
 0x514   : > { %v4712_v11 = vmax.f32 %v10388_v15, %v4584_v10  ;;  %v4586_v55 = vmul.f32 0.01, %v10420_v12  ;;  %7177 = vmatpush1.bf16.msra.mxu1 %v11448_v52  ;;  %v4246_v8 = vpop.f32.mrb[104].mxu0  ;;  %v4706_v44 = vmax.f32 %v13256_v7, %v4578_v26  ;;  %v11468_v7 = vld [vmem:[#allocation7 + $0x76c] ss:$16 sps:$4 sm:$0xff]  }
 0x515   : > { %v4713_v9 = vmax.f32 %v10419_v53, %v4585_v22  ;;  %v10389_v60 = vadd.f32 %v4246_v8, %v13150_v3  ;;  %v4248_v49 = vpop.f32.mrb[105].mxu0  ;;  %7178 = vmatprep.subr.bf16.mxu1 %v11456_v6  ;;  %v4791_v1 = vpack.c.bf16 %v4711_v54, %v4703_v58  ;;  %v11463_v10 = vld [vmem:[#allocation7 + $0x760] ss:$16 sps:$4 sm:$0xff]   ;;  %v11471_v54 = vld [vmem:[#allocation7 + $0x784] ss:$16 sps:$4 sm:$0xff]  }
 0x516   : > { %v4714_v5 = vmax.f32 %v10420_v12, %v4586_v55  ;;  %v4472_v43 = vpop.f32.mrb[120].mxu1  ;;  %v10390_v14 = vadd.f32 %v4248_v49, %v13153_v37  ;;  %6727 = vmatpush1.bf16.msra.mxu0 %v11451_v61  ;;  %v4250_v35 = vpop.f32.mrb[106].mxu0  ;;  %v4792_v38 = vpack.c.bf16 %v4712_v11, %v4704_v25  ;;  %v11466_v55 = vld [vmem:[#allocation7 + $0x768] ss:$16 sps:$4 sm:$0xff]  }
 0x517   : > { %v4591_v20 = vmul.f32 0.01, %v10389_v60  ;;  %v13270_v2 = vadd.f32 %v4472_v43, %v13157_v4  ;;  %v4474_v51 = vpop.f32.mrb[121].mxu1  ;;  %v10391_v52 = vadd.f32 %v4250_v35, %v13150_v3  ;;  %v4252_v30 = vpop.f32.mrb[107].mxu0  ;;  %6728 = vmatprep.subr.bf16.mxu0 %v11459_v24  ;;  %v13273_v23 = vpack.c.bf16 %v4713_v9, %v4705_v0  ;;  %v11469_v35 = vld [vmem:[#allocation7 + $0x780] ss:$16 sps:$4 sm:$0xff]  }
 0x518   : > { %v4592_v47 = vmul.f32 0.01, %v10390_v14  ;;  %v13276_v56 = vadd.f32 %v4474_v51, %v13159_v28  ;;  %v4476_v46 = vpop.f32.mrb[122].mxu1  ;;  %7179 = vmatpush1.bf16.msra.mxu1 %v11454_v45  ;;  %v10392_v13 = vadd.f32 %v4252_v30, %v13153_v37  ;;  %6677 = vmatprep.mubr.bf16.mxu0 %v4792_v38  ;;  %v13279_v32 = vpack.c.bf16 %v4714_v5, %v4706_v44 }
 0x519   : > { %v4593_v15 = vmul.f32 0.01, %v13270_v2  ;;  %v4599_v6 = vmul.f32 0.01, %v10391_v52  ;;  %v10423_v59 = vadd.f32 %v4476_v46, %v13157_v4  ;;  %v4478_v21 = vpop.f32.mrb[123].mxu1  ;;  %7129 = vmatprep.mubr.bf16.mxu1 %v4792_v38  ;;  %6678 = vmatmul.mubr.bf16.gmra.mrb[132].mxu0 %v4791_v1  ;;  %v4719_v12 = vmax.f32 %v10389_v60, %v4591_v20 }
 0x51a   : > { %v4594_v53 = vmul.f32 0.01, %v13276_v56  ;;  %v4600_v33 = vmul.f32 0.01, %v10392_v13  ;;  %v10424_v26 = vadd.f32 %v4478_v21, %v13159_v28  ;;  %6729 = vmatpush1.bf16.msra.mxu0 %v11457_v48  ;;  %7180 = vmatprep.subr.bf16.mxu1 %v11462_v27  ;;  %v4720_v22 = vmax.f32 %v10390_v14, %v4592_v47  ;;  %v11474_v60 = vld [vmem:[#allocation7 + $0x78c] ss:$16 sps:$4 sm:$0xff]  }
 0x51b   : > { %v4727_v61 = vmax.f32 %v10391_v52, %v4599_v6  ;;  %v4601_v58 = vmul.f32 0.01, %v10423_v59  ;;  %7130 = vmatmul.mubr.bf16.gmra.mrb[148].mxu1 %v4791_v1  ;;  %6730 = vmatprep.subr.bf16.mxu0 %v11465_v62  ;;  %v4721_v8 = vmax.f32 %v13270_v2, %v4593_v15  ;;  %v11472_v38 = vld [vmem:[#allocation7 + $0x788] ss:$16 sps:$4 sm:$0xff]   ;;  %v11477_v52 = vld [vmem:[#allocation7 + $0x7a4] ss:$16 sps:$4 sm:$0xff]  }
 0x51c   : > { %v4728_v24 = vmax.f32 %v10392_v13, %v4600_v33  ;;  %v4602_v25 = vmul.f32 0.01, %v10424_v26  ;;  %7181 = vmatpush1.bf16.msra.mxu1 %v11460_v17  ;;  %v4256_v11 = vpop.f32.mrb[108].mxu0  ;;  %v4722_v27 = vmax.f32 %v13276_v56, %v4594_v53  ;;  %v11480_v13 = vld [vmem:[#allocation7 + $0x7ac] ss:$16 sps:$4 sm:$0xff]  }
 0x51d   : > { %v4729_v45 = vmax.f32 %v10423_v59, %v4601_v58  ;;  %v10393_v0 = vadd.f32 %v4256_v11, %v13150_v3  ;;  %v4258_v9 = vpop.f32.mrb[109].mxu0  ;;  %7182 = vmatprep.subr.bf16.mxu1 %v11468_v7  ;;  %v4799_v49 = vpack.c.bf16 %v4727_v61, %v4719_v12  ;;  %v11483_v61 = vld [vmem:[#allocation7 + $0x7c4] ss:$16 sps:$4 sm:$0xff]  }
 0x51e   : > { %v4730_v1 = vmax.f32 %v10424_v26, %v4602_v25  ;;  %v4482_v44 = vpop.f32.mrb[124].mxu1  ;;  %v10394_v5 = vadd.f32 %v4258_v9, %v13153_v37  ;;  %6731 = vmatpush1.bf16.msra.mxu0 %v11463_v10  ;;  %v4260_v43 = vpop.f32.mrb[110].mxu0  ;;  %v4800_v14 = vpack.c.bf16 %v4728_v24, %v4720_v22  ;;  %v11475_v26 = vld [vmem:[#allocation7 + $0x7a0] ss:$16 sps:$4 sm:$0xff]  }
 0x51f   : > { %v4607_v48 = vmul.f32 0.01, %v10393_v0  ;;  %v10425_v17 = vadd.f32 %v4482_v44, %v13157_v4  ;;  %v4484_v20 = vpop.f32.mrb[125].mxu1  ;;  %v10395_v2 = vadd.f32 %v4260_v43, %v13150_v3  ;;  %v4262_v51 = vpop.f32.mrb[111].mxu0  ;;  %6732 = vmatprep.subr.bf16.mxu0 %v11471_v54  ;;  %v13291_v30 = vpack.c.bf16 %v4729_v45, %v4721_v8  ;;  %v11481_v45 = vld [vmem:[#allocation7 + $0x7c0] ss:$16 sps:$4 sm:$0xff]  }
 0x520   : > { %v4608_v62 = vmul.f32 0.01, %v10394_v5  ;;  %v10426_v47 = vadd.f32 %v4484_v20, %v13159_v28  ;;  %v4486_v56 = vpop.f32.mrb[126].mxu1  ;;  %7183 = vmatpush1.bf16.msra.mxu1 %v11466_v55  ;;  %v10396_v46 = vadd.f32 %v4262_v51, %v13153_v37  ;;  %6687 = vmatprep.mubr.bf16.mxu0 %v4800_v14  ;;  %v13295_v7 = vpack.c.bf16 %v4730_v1, %v4722_v27  ;;  %v11489_v27 = vld [vmem:[#allocation7 + $0x7e4] ss:$16 sps:$4 sm:$0xff]  }
 0x521   : > { %v4609_v15 = vmul.f32 0.01, %v10425_v17  ;;  %v4615_v6 = vmul.f32 0.01, %v10395_v2  ;;  %v10427_v3 = vadd.f32 %v4486_v56, %v13157_v4  ;;  %v4488_v59 = vpop.f32.mrb[127].mxu1  ;;  %7139 = vmatprep.mubr.bf16.mxu1 %v4800_v14  ;;  %6688 = vmatmul.mubr.bf16.gmra.mrb[136].mxu0 %v4799_v49  ;;  %v4735_v10 = vmax.f32 %v10393_v0, %v4607_v48 }
 0x522   : > { %v4610_v21 = vmul.f32 0.01, %v10426_v47  ;;  %v4616_v53 = vmul.f32 0.01, %v10396_v46  ;;  %v10428_v33 = vadd.f32 %v4488_v59, %v13159_v28  ;;  %6733 = vmatpush1.bf16.msra.mxu0 %v11469_v35  ;;  %7184 = vmatprep.subr.bf16.mxu1 %v11474_v60  ;;  %v4736_v58 = vmax.f32 %v10394_v5, %v4608_v62  ;;  %v11478_v4 = vld [vmem:[#allocation7 + $0x7a8] ss:$16 sps:$4 sm:$0xff]  }
 0x523   : > { %v4743_v37 = vmax.f32 %v10395_v2, %v4615_v6  ;;  %v4617_v12 = vmul.f32 0.01, %v10427_v3  ;;  %7140 = vmatmul.mubr.bf16.gmra.mrb[152].mxu1 %v4799_v49  ;;  %6734 = vmatprep.subr.bf16.mxu0 %v11477_v52  ;;  %v4737_v24 = vmax.f32 %v10425_v17, %v4609_v15  ;;  %v11486_v0 = vld [vmem:[#allocation7 + $0x7cc] ss:$16 sps:$4 sm:$0xff]   ;;  %v11484_v49 = vld [vmem:[#allocation7 + $0x7c8] ss:$16 sps:$4 sm:$0xff]  }
 0x524   : > { %v4744_v54 = vmax.f32 %v10396_v46, %v4616_v53  ;;  %v4618_v22 = vmul.f32 0.01, %v10428_v33  ;;  %7185 = vmatpush1.bf16.msra.mxu1 %v11472_v38  ;;  %v4738_v55 = vmax.f32 %v10426_v47, %v4610_v21  ;;  %v11492_v1 = vld [vmem:[#allocation7 + $0x7ec] ss:$16 sps:$4 sm:$0xff]   ;;  %v11487_v44 = vld [vmem:[#allocation7 + $0x7e0] ss:$16 sps:$4 sm:$0xff]  }
 0x525   : > { %v4745_v25 = vmax.f32 %v10427_v3, %v4617_v12  ;;  %7186 = vmatprep.subr.bf16.mxu1 %v11480_v13  ;;  %v4807_v11 = vpack.c.bf16 %v4743_v37, %v4735_v10  ;;  %v11495_v5 = vld [vmem:[#allocation8 + $0x4] ss:$8 sps:$4 sm:$0xff]   ;;  %v11490_v43 = vld [vmem:[#allocation7 + $0x7e8] ss:$16 sps:$4 sm:$0xff]   ;;  %v11498_v35 = vld [vmem:[#allocation8 + $0x14] ss:$8 sps:$4 sm:$0xff]  }
 0x526   : > { %v4746_v28 = vmax.f32 %v10428_v33, %v4618_v22  ;;  %6735 = vmatpush1.bf16.msra.mxu0 %v11475_v26  ;;  %v4808_v8 = vpack.c.bf16 %v4744_v54, %v4736_v58  ;;  %v11493_v14 = vld [vmem:[#allocation8] ss:$8 sps:$4 sm:$0xff]   ;;  %v11496_v38 = vld [vmem:[#allocation8 + $0x10] ss:$8 sps:$4 sm:$0xff]   ;;  %v11501_v48 = vld [vmem:[#allocation8 + $0x24] ss:$8 sps:$4 sm:$0xff]  }
 0x527   : > { %6736 = vmatprep.subr.bf16.mxu0 %v11483_v61  ;;  %v13299_v9 = vpack.c.bf16 %v4745_v25, %v4737_v24  ;;  %v11504_v17 = vld [vmem:[#allocation8 + $0x34] ss:$8 sps:$4 sm:$0xff]   ;;  %v11502_v20 = vld [vmem:[#allocation8 + $0x30] ss:$8 sps:$4 sm:$0xff]   ;;  %v11507_v2 = vld [vmem:[#allocation8 + $0x44] ss:$8 sps:$4 sm:$0xff]  }
 0x528   : > { %7187 = vmatpush1.bf16.msra.mxu1 %v11478_v4  ;;  %6697 = vmatprep.mubr.bf16.mxu0 %v4808_v8  ;;  %v13301_v60 = vpack.c.bf16 %v4746_v28, %v4738_v55  ;;  %v11508_v51 = vld [vmem:[#allocation8 + $0x50] ss:$8 sps:$4 sm:$0xff]   ;;  %v11513_v52 = vld [vmem:[#allocation8 + $0x64] ss:$8 sps:$4 sm:$0xff]   ;;  %v11535_v6 = vld [vmem:[#allocation8 + $0xe0] ss:$8 sps:$4 sm:$0xff]  }
 0x529   : > { %7149 = vmatprep.mubr.bf16.mxu1 %v4808_v8  ;;  %6698 = vmatmul.mubr.bf16.gmra.mrb[140].mxu0 %v4807_v11  ;;  %v11514_v62 = vld [vmem:[#allocation8 + $0x70] ss:$8 sps:$4 sm:$0xff]   ;;  %v11519_v47 = vld [vmem:[#allocation8 + $0x84] ss:$8 sps:$4 sm:$0xff]   ;;  %v11540_v3 = vld [vmem:[#allocation8 + $0xf4] ss:$8 sps:$4 sm:$0xff]  }
 0x52a   : > { %6737 = vmatpush1.bf16.msra.mxu0 %v11481_v45  ;;  %7188 = vmatprep.subr.bf16.mxu1 %v11486_v0  ;;  %v11520_v56 = vld [vmem:[#allocation8 + $0x90] ss:$8 sps:$4 sm:$0xff]   ;;  %v11525_v46 = vld [vmem:[#allocation8 + $0xa4] ss:$8 sps:$4 sm:$0xff]  }
 0x52b   : > { %7150 = vmatmul.mubr.bf16.gmra.mrb[156].mxu1 %v4807_v11  ;;  %6740 = vmatprep.mubr.bf16.mxu0 %v13181_v41  ;;  %v11526_v13 = vld [vmem:[#allocation8 + $0xb0] ss:$8 sps:$4 sm:$0xff]   ;;  %v11531_v15 = vld [vmem:[#allocation8 + $0xc4] ss:$8 sps:$4 sm:$0xff]  }
 0x52c   : > { %7189 = vmatpush1.bf16.msra.mxu1 %v11484_v49  ;;  %7192 = vmatprep.mubr.bf16.mxu1 %v13181_v41  ;;  %v11499_v41 = vld [vmem:[#allocation8 + $0x20] ss:$8 sps:$4 sm:$0xff]   ;;  %v11538_v59 = vld [vmem:[#allocation8 + $0xf0] ss:$8 sps:$4 sm:$0xff]   ;;  %v11543_v21 = vld [vmem:[#allocation8 + $0x104] ss:$8 sps:$4 sm:$0xff]  }
 0x52d   : > { %6738 = vmatprep.subr.bf16.mxu0 %v11489_v27  ;;  %7190 = vmatprep.subr.bf16.mxu1 %v11492_v1 }
 0x52e   : > { %6739 = vmatpush1.bf16.msra.mxu0 %v11487_v44  ;;  %v11589_v44 = vld [vmem:[%s14924_s14 + $0x40] sm:$0xff]  }
 0x52f   : > { %7829 = vmatprep.subr.bf16.mxu0 %v11495_v5  ;;  %v11590_v5 = vld [vmem:[%s14924_s14] sm:$0xff]  }
 0x530   : > { %7191 = vmatpush1.bf16.msra.mxu1 %v11490_v43 }
 0x531   : > { %6741 = vmatmul.mubr.bf16.vlgmr.msra.gmra.mrb[112].mxu0 %v13173_v50  ;;  %10165 = vmatprep.subr.bf16.mxu1 %v11589_v44  ;;  %v11594_v44 = vld [vmem:[%s14924_s14 + $0x10] sm:$0xff]  }
 0x532   : > { %6750 = vmatprep.mubr.bf16.mxu0 %v13199_v36  ;;  %7830 = vmatpush1.bf16.msra.mxu0 %v11493_v14 }
 0x533   : > { %7193 = vmatmul.mubr.bf16.vlgmr.msra.gmra.mrb[128].mxu1 %v13173_v50  ;;  %7831 = vmatprep.subr.bf16.mxu0 %v11498_v35  ;;  %v11505_v50 = vld [vmem:[#allocation8 + $0x40] ss:$8 sps:$4 sm:$0xff]  }
 0x534   : > { %7202 = vmatprep.mubr.bf16.mxu1 %v13199_v36  ;;  %v11510_v36 = vld [vmem:[#allocation8 + $0x54] ss:$8 sps:$4 sm:$0xff]   ;;  %10166 = vmatpush3.bf16.msra.mxu1 %v11590_v5 }
 0x536   : > { %7832 = vmatpush1.bf16.msra.mxu0 %v11496_v38 }
 0x537   : > { %7833 = vmatprep.subr.bf16.mxu0 %v11501_v48  ;;  %v13371_v48 = vld [vmem:[%s13362_s27 + $0x10] sm:$0xff] }
 0x538   : > { %8601 = vperm.xlu1 %10970, %v13371_v48   ;;  %vm8660_vm4 = vcmp.gt.s32.totalorder %v13371_v48, 0 }
 0x539   : > { %6751 = vmatmul.mubr.bf16.gmra.mrb[116].mxu0 %v13193_v19 }
 0x53a   : > { %6760 = vmatprep.mubr.bf16.mxu0 %v13219_v42  ;;  %7834 = vmatpush1.bf16.msra.mxu0 %v11499_v41  ;;  %v13374_v41 = vld [vmem:[%s13362_s27] sm:$0xff] }
 0x53b   : > { %7203 = vmatmul.mubr.bf16.gmra.mrb[132].mxu1 %v13193_v19  ;;  %7835 = vmatprep.subr.bf16.mxu0 %v11504_v17  ;;  %v11511_v19 = vld [vmem:[#allocation8 + $0x60] ss:$8 sps:$4 sm:$0xff]   ;;  %vm8658_vm2 = vcmp.gt.s32.totalorder %v13374_v41, 0 }
 0x53c   : > { %7212 = vmatprep.mubr.bf16.mxu1 %v13219_v42  ;;  %v11516_v42 = vld [vmem:[#allocation8 + $0x74] ss:$8 sps:$4 sm:$0xff]   ;;  %8595 = vperm.xlu0 %10969, %v13374_v41  }
 0x53e   : > { %7836 = vmatpush1.bf16.msra.mxu0 %v11502_v20 }
 0x53f   : > { %7837 = vmatprep.subr.bf16.mxu0 %v11507_v2 }
 0x541   : > { %6761 = vmatmul.mubr.bf16.gmra.mrb[120].mxu0 %v13213_v57 }
 0x542   : > { %6770 = vmatprep.mubr.bf16.mxu0 %v13239_v29  ;;  %7838 = vmatpush1.bf16.msra.mxu0 %v11505_v50 }
 0x543   : > { %7213 = vmatmul.mubr.bf16.gmra.mrb[136].mxu1 %v13213_v57  ;;  %7839 = vmatprep.subr.bf16.mxu0 %v11510_v36  ;;  %v11517_v57 = vld [vmem:[#allocation8 + $0x80] ss:$8 sps:$4 sm:$0xff]  }
 0x544   : > { %7222 = vmatprep.mubr.bf16.mxu1 %v13239_v29  ;;  %v11522_v29 = vld [vmem:[#allocation8 + $0x94] ss:$8 sps:$4 sm:$0xff]  }
 0x546   : > { %7840 = vmatpush1.bf16.msra.mxu0 %v11508_v51  ;;  %v13379_v51 = vld [vmem:[%s13362_s27 + $0x8] sm:$0xff] }
 0x547   : > { %7841 = vmatprep.subr.bf16.mxu0 %v11513_v52  ;;  %vm8659_vm1 = vcmp.gt.s32.totalorder %v13379_v51, 0  ;;  %8598 = vperm.xlu0 %10969, %v13379_v51  }
 0x549   : > { %6771 = vmatmul.mubr.bf16.gmra.mrb[124].mxu0 %v13233_v16 }
 0x54a   : > { %6780 = vmatprep.mubr.bf16.mxu0 %v13259_v34  ;;  %7842 = vmatpush1.bf16.msra.mxu0 %v11511_v19 }
 0x54b   : > { %7223 = vmatmul.mubr.bf16.gmra.mrb[140].mxu1 %v13233_v16  ;;  %7843 = vmatprep.subr.bf16.mxu0 %v11516_v42  ;;  %v11523_v16 = vld [vmem:[#allocation8 + $0xa0] ss:$8 sps:$4 sm:$0xff]  }
 0x54c   : > { %7232 = vmatprep.mubr.bf16.mxu1 %v13259_v34  ;;  %v11528_v34 = vld [vmem:[#allocation8 + $0xb4] ss:$8 sps:$4 sm:$0xff]  }
 0x54e   : > { %7844 = vmatpush1.bf16.msra.mxu0 %v11514_v62 }
 0x54f   : > { %7845 = vmatprep.subr.bf16.mxu0 %v11519_v47  ;;  %v13385_v47 = vld [vmem:[%s13362_s27 + $0x18] sm:$0xff] }
 0x550   : > { %8604 = vperm.xlu1 %10970, %v13385_v47   ;;  %vm8661_vm3 = vcmp.gt.s32.totalorder %v13385_v47, 0 }
 0x551   : > { %6781 = vmatmul.mubr.bf16.gmra.mrb[128].mxu0 %v13253_v18 }
 0x552   : > { %6790 = vmatprep.mubr.bf16.mxu0 %v13279_v32  ;;  %7846 = vmatpush1.bf16.msra.mxu0 %v11517_v57 }
 0x553   : > { %7233 = vmatmul.mubr.bf16.gmra.mrb[144].mxu1 %v13253_v18  ;;  %7847 = vmatprep.subr.bf16.mxu0 %v11522_v29  ;;  %v11529_v18 = vld [vmem:[#allocation8 + $0xc0] ss:$8 sps:$4 sm:$0xff]  }
 0x554   : > { %7242 = vmatprep.mubr.bf16.mxu1 %v13279_v32  ;;  %v11532_v32 = vld [vmem:[#allocation8 + $0xd0] ss:$8 sps:$4 sm:$0xff]  }
 0x556   : > { %7848 = vmatpush1.bf16.msra.mxu0 %v11520_v56 }
 0x557   : > { %7849 = vmatprep.subr.bf16.mxu0 %v11525_v46 }
 0x559   : > { %6791 = vmatmul.mubr.bf16.gmra.mrb[132].mxu0 %v13273_v23 }
 0x55a   : > { %6800 = vmatprep.mubr.bf16.mxu0 %v13295_v7  ;;  %7850 = vmatpush1.bf16.msra.mxu0 %v11523_v16 }
 0x55b   : > { %7243 = vmatmul.mubr.bf16.gmra.mrb[148].mxu1 %v13273_v23  ;;  %7851 = vmatprep.subr.bf16.mxu0 %v11528_v34  ;;  %v11534_v23 = vld [vmem:[#allocation8 + $0xd4] ss:$8 sps:$4 sm:$0xff]   ;;  %v11541_v34 = vld [vmem:[#allocation8 + $0x100] ss:$8 sps:$4 sm:$0xff]  }
 0x55c   : > { %7252 = vmatprep.mubr.bf16.mxu1 %v13295_v7  ;;  %v11537_v7 = vld [vmem:[#allocation8 + $0xe4] ss:$8 sps:$4 sm:$0xff]  }
 0x55e   : > { %7852 = vmatpush1.bf16.msra.mxu0 %v11526_v13  ;;  %v15153_v13 = vmov 0  }
 0x55f   : > { %7853 = vmatprep.subr.bf16.mxu0 %v11531_v15  ;;  %v13392_v15 = vsel %vm8659_vm1, 1, %v15153_v13 }
 0x561   : > { %6801 = vmatmul.mubr.bf16.gmra.mrb[136].mxu0 %v13291_v30 }
 0x562   : > { %6810 = vmatprep.mubr.bf16.mxu0 %v13301_v60  ;;  %7854 = vmatpush1.bf16.msra.mxu0 %v11529_v18 }
 0x563   : > { %7253 = vmatmul.mubr.bf16.gmra.mrb[152].mxu1 %v13291_v30  ;;  %7855 = vmatprep.subr.bf16.mxu0 %v11534_v23  ;;  %v5067_v30 = vld [vmem:[%s14921_s11] sm:$0xf] }
 0x564   : > { %7262 = vmatprep.mubr.bf16.mxu1 %v13301_v60  ;;  %v13339_v53 = vrot.slane %v5067_v30, %v15147_v63  ;;  %v13342_v33 = vrot.slane %v5067_v30, %v15149_v39  ;;  %v13345_v26 = vrot.slane %v5067_v30, %v15148_v40  ;;  %v13348_v37 = vrot.slane %v5067_v30, %v15150_v31 }
 0x566   : > { %7856 = vmatpush1.bf16.msra.mxu0 %v11532_v32 }
 0x567   : > { %7857 = vmatprep.subr.bf16.mxu0 %v11537_v7 }
 0x569   : > { %6811 = vmatmul.mubr.bf16.gmra.mrb[140].mxu0 %v13299_v9 }
 0x56a   : > { %7858 = vmatpush1.bf16.msra.mxu0 %v11535_v6 }
 0x56b   : > { %7263 = vmatmul.mubr.bf16.gmra.mrb[156].mxu1 %v13299_v9  ;;  %7859 = vmatprep.subr.bf16.mxu0 %v11540_v3 }
 0x56e   : > { %7860 = vmatpush1.bf16.msra.mxu0 %v11538_v59  ;;  %v11546_v59 = vld [vmem:[#allocation8 + $0x114] ss:$8 sps:$4 sm:$0xff]  }
 0x56f   : > { %7942 = vmatprep.subr.bf16.mxu0 %v11543_v21 }
 0x604   : > { %v6742_v10 = vpop.f32.mrb[112].mxu0 }
 0x605   : > { %v10429_v12 = vadd.f32 %v6742_v10, %v13339_v53  ;;  %v6744_v61 = vpop.f32.mrb[113].mxu0 }
 0x606   : > { %v7194_v58 = vpop.f32.mrb[128].mxu1  ;;  %v10430_v54 = vadd.f32 %v6744_v61, %v13342_v33  ;;  %v6746_v22 = vpop.f32.mrb[114].mxu0  ;;  %v11544_v61 = vld [vmem:[#allocation8 + $0x110] ss:$8 sps:$4 sm:$0xff]  }
 0x607   : > { %v7273_v4 = vmul.f32 0.01, %v10429_v12  ;;  %v10461_v24 = vadd.f32 %v7194_v58, %v13345_v26  ;;  %v7196_v25 = vpop.f32.mrb[129].mxu1  ;;  %v10431_v11 = vadd.f32 %v6746_v22, %v13339_v53  ;;  %v6748_v40 = vpop.f32.mrb[115].mxu0  ;;  %v11591_v22 = vld [vmem:[%s14924_s14 + $0x48] sm:$0xff]  }
 0x608   : > { %v7274_v55 = vmul.f32 0.01, %v10430_v54  ;;  %v10462_v28 = vadd.f32 %v7196_v25, %v13348_v37  ;;  %v7198_v31 = vpop.f32.mrb[130].mxu1  ;;  %v10432_v8 = vadd.f32 %v6748_v40, %v13342_v33  ;;  %10167 = vmatprep.subr.bf16.mxu1 %v11591_v22  ;;  %v11550_v22 = vld [vmem:[#allocation8 + $0x130] ss:$8 sps:$4 sm:$0xff]  }
 0x609   : > { %v7275_v45 = vmul.f32 0.01, %v10461_v24  ;;  %v7277_v0 = vmul.f32 0.01, %v10431_v11  ;;  %v10463_v9 = vadd.f32 %v7198_v31, %v13345_v26  ;;  %v7200_v49 = vpop.f32.mrb[131].mxu1  ;;  %v7337_v43 = vmax.f32 %v10429_v12, %v7273_v4 }
 0x60a   : > { %v7276_v60 = vmul.f32 0.01, %v10462_v28  ;;  %v7278_v27 = vmul.f32 0.01, %v10432_v8  ;;  %v10464_v1 = vadd.f32 %v7200_v49, %v13348_v37  ;;  %v7338_v14 = vmax.f32 %v10430_v54, %v7274_v55  ;;  %v13410_v54 = vld [vmem:[%s13362_s27 + $0x28] sm:$0xff] }
 0x60b   : > { %v7341_v35 = vmax.f32 %v10431_v11, %v7277_v0  ;;  %v7279_v38 = vmul.f32 0.01, %v10463_v9  ;;  %v7339_v17 = vmax.f32 %v10461_v24, %v7275_v45  ;;  %v11592_v55 = vld [vmem:[%s14924_s14 + $0x8] sm:$0xff]   ;;  %v13426_v0 = vld [vmem:[%s13362_s27 + $0x20] sm:$0xff]  ;;  %8610 = vperm.xlu1 %10970, %v13410_v54   ;;  %vm8663_vm5 = vcmp.gt.s32.totalorder %v13410_v54, 0 }
 0x60c   : > { %v7340_v20 = vmax.f32 %v10462_v28, %v7276_v60  ;;  %v7342_v2 = vmax.f32 %v10432_v8, %v7278_v27  ;;  %v7280_v50 = vmul.f32 0.01, %v10464_v1  ;;  %v6752_v36 = vpop.f32.mrb[116].mxu0  ;;  %10168 = vmatpush3.bf16.msra.mxu1 %v11592_v55  ;;  %8607 = vperm.xlu0 %10969, %v13426_v0   ;;  %vm8662_vm6 = vcmp.gt.s32.totalorder %v13426_v0, 0 }
 0x60d   : > { %v7401_v52 = vpack.c.bf16 %v7341_v35, %v7337_v43  ;;  %v7343_v19 = vmax.f32 %v10463_v9, %v7279_v38  ;;  %v13382_v42 = vadd.f32 %v6752_v36, %v13339_v53  ;;  %v6754_v62 = vpop.f32.mrb[117].mxu0  ;;  %v11593_v9 = vld [vmem:[%s14924_s14 + $0x50] sm:$0xff]   ;;  %v11547_v38 = vld [vmem:[#allocation8 + $0x120] ss:$8 sps:$4 sm:$0xff]  }
 0x60e   : > { %v7344_v57 = vmax.f32 %v10464_v1, %v7280_v50  ;;  %v7204_v29 = vpop.f32.mrb[132].mxu1  ;;  %v13389_v56 = vadd.f32 %v6754_v62, %v13342_v33  ;;  %v6756_v46 = vpop.f32.mrb[118].mxu0  ;;  %v7402_v16 = vpack.c.bf16 %v7342_v2, %v7338_v14  ;;  %v11549_v1 = vld [vmem:[#allocation8 + $0x124] ss:$8 sps:$4 sm:$0xff]   ;;  %10169 = vmatprep.subr.bf16.mxu1 %v11593_v9 }
 0x60f   : > { %v13394_v18 = vpack.c.bf16 %v7343_v19, %v7339_v17  ;;  %v7281_v23 = vmul.f32 0.01, %v13382_v42  ;;  %v13398_v32 = vadd.f32 %v7204_v29, %v13345_v26  ;;  %v7206_v7 = vpop.f32.mrb[133].mxu1  ;;  %v10435_v6 = vadd.f32 %v6756_v46, %v13339_v53  ;;  %v6758_v3 = vpop.f32.mrb[119].mxu0  ;;  %v13446_v19 = vld [vmem:[%s13362_s27 + $0x38] sm:$0xff]  ;;  %v13453_v46 = vld [vmem:[%s13362_s27 + $0x30] sm:$0xff] }
 0x610   : > { %v7282_v21 = vmul.f32 0.01, %v13389_v56  ;;  %v13403_v30 = vadd.f32 %v7206_v7, %v13348_v37  ;;  %v7208_v10 = vpop.f32.mrb[134].mxu1  ;;  %v10436_v12 = vadd.f32 %v6758_v3, %v13342_v33  ;;  %7861 = vmatprep.mubr.bf16.mxu0 %v7402_v16  ;;  %v13406_v58 = vpack.c.bf16 %v7344_v57, %v7340_v20  ;;  %10170 = vmatpush3.bf16.msra.mxu1 %v11594_v44 }
 0x611   : > { %v7345_v4 = vmax.f32 %v13382_v42, %v7281_v23  ;;  %v7283_v24 = vmul.f32 0.01, %v13398_v32  ;;  %v7285_v25 = vmul.f32 0.01, %v10435_v6  ;;  %v10467_v11 = vadd.f32 %v7208_v10, %v13345_v26  ;;  %v7210_v40 = vpop.f32.mrb[135].mxu1  ;;  %7862 = vmatmul.mubr.bf16.vlgmr.msra.gmra.mrb[144].mxu0 %v7401_v52  ;;  %8616 = vperm.xlu1 %10970, %v13446_v19  }
 0x612   : > { %v7346_v28 = vmax.f32 %v13389_v56, %v7282_v21  ;;  %v7284_v31 = vmul.f32 0.01, %v13403_v30  ;;  %v7286_v8 = vmul.f32 0.01, %v10436_v12  ;;  %v10468_v45 = vadd.f32 %v7210_v40, %v13348_v37  ;;  %7943 = vmatpush1.bf16.msra.mxu0 %v11541_v34  ;;  %v11552_v52 = vld [vmem:[#allocation8 + $0x134] ss:$8 sps:$4 sm:$0xff]   ;;  %8613 = vperm.xlu0 %10969, %v13453_v46  }
 0x613   : > { %v7347_v49 = vmax.f32 %v13398_v32, %v7283_v24  ;;  %v7349_v60 = vmax.f32 %v10435_v6, %v7285_v25  ;;  %v7287_v27 = vmul.f32 0.01, %v10467_v11  ;;  %7944 = vmatprep.subr.bf16.mxu0 %v11546_v59  ;;  %v13439_v17 = vsel %vm8658_vm2, 1, %v15153_v13  ;;  %v11595_v34 = vld [vmem:[%s14924_s14 + $0x58] sm:$0xff]   ;;  %v11597_v24 = vld [vmem:[%s14924_s14 + $0x60] sm:$0xff]  }
 0x614   : > { %v7348_v5 = vmax.f32 %v13403_v30, %v7284_v31  ;;  %v7350_v43 = vmax.f32 %v10436_v12, %v7286_v8  ;;  %v7288_v14 = vmul.f32 0.01, %v10468_v45  ;;  %v6762_v35 = vpop.f32.mrb[120].mxu0  ;;  %v13456_v16 = vsel %vm8661_vm3, 1, %v15153_v13  ;;  %v11596_v21 = vld [vmem:[%s14924_s14 + $0x18] sm:$0xff]   ;;  %v13487_v31 = vld [vmem:[%s13362_s27 + $0x48] sm:$0xff]  ;;  %10171 = vmatprep.subr.bf16.mxu1 %v11595_v34 }
 0x615   : > { %v7351_v20 = vmax.f32 %v10467_v11, %v7287_v27  ;;  %v13442_v2 = vadd.f32 %v6762_v35, %v13339_v53  ;;  %v6764_v50 = vpop.f32.mrb[121].mxu0  ;;  %v7405_v36 = vpack.c.bf16 %v7349_v60, %v7345_v4  ;;  %15154 = vst [vmem:[#allocation31_spill] sm:$0xff] %v13456_v16  ;;  %v13493_v60 = vld [vmem:[%s13362_s27 + $0x40] sm:$0xff]  ;;  %10172 = vmatpush3.bf16.msra.mxu1 %v11596_v21  ;;  %v11599_v21 = vld [vmem:[%s14924_s14 + $0x68] sm:$0xff]   ;;  %vm8665_vm7 = vcmp.gt.s32.totalorder %v13446_v19, 0 }
 0x616   : > { %v7352_v42 = vmax.f32 %v10468_v45, %v7288_v14  ;;  %v7214_v62 = vpop.f32.mrb[136].mxu1  ;;  %v13450_v57 = vadd.f32 %v6764_v50, %v13342_v33  ;;  %7945 = vmatpush1.bf16.msra.mxu0 %v11544_v61  ;;  %v6766_v29 = vpop.f32.mrb[122].mxu0  ;;  %v7406_v56 = vpack.c.bf16 %v7350_v43, %v7346_v28  ;;  %v11598_v43 = vld [vmem:[%s14924_s14 + $0x20] sm:$0xff]   ;;  %8622 = vperm.xlu1 %10970, %v13487_v31   ;;  %v13503_v50 = vsel %vm8660_vm4, 1, %v15153_v13 }
 0x617   : > { %v7289_v23 = vmul.f32 0.01, %v13442_v2  ;;  %v13463_v32 = vadd.f32 %v7214_v62, %v13345_v26  ;;  %v7216_v7 = vpop.f32.mrb[137].mxu1  ;;  %v10439_v6 = vadd.f32 %v6766_v29, %v13339_v53  ;;  %v6768_v3 = vpop.f32.mrb[123].mxu0  ;;  %7946 = vmatprep.subr.bf16.mxu0 %v11549_v1  ;;  %v13466_v59 = vpack.c.bf16 %v7351_v20, %v7347_v49  ;;  %10173 = vmatprep.subr.bf16.mxu1 %v11597_v24  ;;  %v13510_v29 = vld [vmem:[%s13362_s27 + $0x58] sm:$0xff] }
 0x618   : > { %v7290_v30 = vmul.f32 0.01, %v13450_v57  ;;  %v13473_v10 = vadd.f32 %v7216_v7, %v13348_v37  ;;  %v7218_v12 = vpop.f32.mrb[138].mxu1  ;;  %v10440_v61 = vadd.f32 %v6768_v3, %v13342_v33  ;;  %7871 = vmatprep.mubr.bf16.mxu0 %v7406_v56  ;;  %v13476_v4 = vpack.c.bf16 %v7352_v42, %v7348_v5  ;;  %v11555_v5 = vld [vmem:[#allocation8 + $0x144] ss:$8 sps:$4 sm:$0xff]   ;;  %8619 = vperm.xlu0 %10969, %v13493_v60  }
 0x619   : > { %v7353_v25 = vmax.f32 %v13442_v2, %v7289_v23  ;;  %v7291_v11 = vmul.f32 0.01, %v13463_v32  ;;  %v7293_v40 = vmul.f32 0.01, %v10439_v6  ;;  %v10471_v55 = vadd.f32 %v7218_v12, %v13345_v26  ;;  %v7220_v28 = vpop.f32.mrb[139].mxu1  ;;  %7872 = vmatmul.mubr.bf16.gmra.mrb[148].mxu0 %v7405_v36  ;;  %10174 = vmatpush3.bf16.msra.mxu1 %v11598_v43  ;;  %v13551_v43 = vld [vmem:[%s13362_s27 + $0x68] sm:$0xff] }
 0x61a   : > { %v7354_v8 = vmax.f32 %v13450_v57, %v7290_v30  ;;  %v7292_v45 = vmul.f32 0.01, %v13473_v10  ;;  %v7294_v9 = vmul.f32 0.01, %v10440_v61  ;;  %v10472_v49 = vadd.f32 %v7220_v28, %v13348_v37  ;;  %7947 = vmatpush1.bf16.msra.mxu0 %v11547_v38  ;;  %v11553_v2 = vld [vmem:[#allocation8 + $0x140] ss:$8 sps:$4 sm:$0xff]   ;;  %8628 = vperm.xlu1 %10970, %v13510_v29  }
 0x61b   : > { %v7355_v27 = vmax.f32 %v13463_v32, %v7291_v11  ;;  %v7357_v1 = vmax.f32 %v10439_v6, %v7293_v40  ;;  %v7295_v44 = vmul.f32 0.01, %v10471_v55  ;;  %7948 = vmatprep.subr.bf16.mxu0 %v11552_v52  ;;  %v11558_v57 = vld [vmem:[#allocation8 + $0x154] ss:$8 sps:$4 sm:$0xff]   ;;  %v13520_v3 = vsel %vm8663_vm5, 1, %v15153_v13  ;;  %10175 = vmatprep.subr.bf16.mxu1 %v11599_v21 }
 0x61c   : > { %v7356_v14 = vmax.f32 %v13473_v10, %v7292_v45  ;;  %v7358_v35 = vmax.f32 %v10440_v61, %v7294_v9  ;;  %v7296_v38 = vmul.f32 0.01, %v10472_v49  ;;  %v6772_v20 = vpop.f32.mrb[124].mxu0  ;;  %v13517_v6 = vld [vmem:[%s13362_s27 + $0x50] sm:$0xff]  ;;  %15155 = vst [vmem:[#allocation32_spill] sm:$0xff] %v13520_v3  ;;  %v13567_v21 = vsel %vm8662_vm6, 1, %v15153_v13 }
 0x61d   : > { %v7359_v36 = vmax.f32 %v10471_v55, %v7295_v44  ;;  %v13506_v52 = vadd.f32 %v6772_v20, %v13339_v53  ;;  %v6774_v42 = vpop.f32.mrb[125].mxu0  ;;  %v7409_v62 = vpack.c.bf16 %v7357_v1, %v7353_v25  ;;  %v11600_v25 = vld [vmem:[%s14924_s14 + $0x28] sm:$0xff]   ;;  %v11601_v9 = vld [vmem:[%s14924_s14 + $0x70] sm:$0xff]   ;;  %8625 = vperm.xlu0 %10969, %v13517_v6   ;;  %15156 = vst [vmem:[#allocation33_spill] sm:$0xff] %v13567_v21  ;;  %vm8664_vm8 = vcmp.gt.s32.totalorder %v13453_v46, 0 }
 0x61e   : > { %v7360_v56 = vmax.f32 %v10472_v49, %v7296_v38  ;;  %v7224_v34 = vpop.f32.mrb[140].mxu1  ;;  %v13514_v23 = vadd.f32 %v6774_v42, %v13342_v33  ;;  %7949 = vmatpush1.bf16.msra.mxu0 %v11550_v22  ;;  %v6776_v32 = vpop.f32.mrb[126].mxu0  ;;  %v7410_v7 = vpack.c.bf16 %v7358_v35, %v7354_v8  ;;  %v11556_v8 = vld [vmem:[#allocation8 + $0x150] ss:$8 sps:$4 sm:$0xff]   ;;  %10176 = vmatpush3.bf16.msra.mxu1 %v11600_v25  ;;  %vm8667_vm9 = vcmp.gt.s32.totalorder %v13487_v31, 0 }
 0x61f   : > { %v7297_v30 = vmul.f32 0.01, %v13506_v52  ;;  %v13527_v10 = vadd.f32 %v7224_v34, %v13345_v26  ;;  %v7226_v12 = vpop.f32.mrb[141].mxu1  ;;  %v10443_v61 = vadd.f32 %v6776_v32, %v13339_v53  ;;  %v6778_v22 = vpop.f32.mrb[127].mxu0  ;;  %7950 = vmatprep.subr.bf16.mxu0 %v11555_v5  ;;  %v13530_v24 = vpack.c.bf16 %v7359_v36, %v7355_v27  ;;  %v13557_v36 = vld [vmem:[%s13362_s27 + $0x60] sm:$0xff]  ;;  %v11602_v34 = vld [vmem:[%s14924_s14 + $0x30] sm:$0xff]   ;;  %8634 = vperm.xlu1 %10970, %v13551_v43  }
 0x620   : > { %v7298_v11 = vmul.f32 0.01, %v13514_v23  ;;  %v13537_v40 = vadd.f32 %v7226_v12, %v13348_v37  ;;  %v7228_v55 = vpop.f32.mrb[142].mxu1  ;;  %v10444_v28 = vadd.f32 %v6778_v22, %v13342_v33  ;;  %7881 = vmatprep.mubr.bf16.mxu0 %v7410_v7  ;;  %v13540_v45 = vpack.c.bf16 %v7360_v56, %v7356_v14  ;;  %10177 = vmatprep.subr.bf16.mxu1 %v11601_v9  ;;  %v13577_v9 = vld [vmem:[%s13362_s27 + $0x70] sm:$0xff] }
 0x621   : > { %v7361_v49 = vmax.f32 %v13506_v52, %v7297_v30  ;;  %v7299_v27 = vmul.f32 0.01, %v13527_v10  ;;  %v7301_v1 = vmul.f32 0.01, %v10443_v61  ;;  %v10475_v44 = vadd.f32 %v7228_v55, %v13345_v26  ;;  %v7230_v5 = vpop.f32.mrb[143].mxu1  ;;  %7882 = vmatmul.mubr.bf16.gmra.mrb[152].mxu0 %v7409_v62  ;;  %8631 = vperm.xlu0 %10969, %v13557_v36  }
 0x622   : > { %v7362_v14 = vmax.f32 %v13514_v23, %v7298_v11  ;;  %v7300_v35 = vmul.f32 0.01, %v13537_v40  ;;  %v7302_v38 = vmul.f32 0.01, %v10444_v28  ;;  %v10476_v20 = vadd.f32 %v7230_v5, %v13348_v37  ;;  %7951 = vmatpush1.bf16.msra.mxu0 %v11553_v2  ;;  %v11561_v62 = vld [vmem:[#allocation8 + $0x164] ss:$8 sps:$4 sm:$0xff]   ;;  %10178 = vmatpush3.bf16.msra.mxu1 %v11602_v34 }
 0x623   : > { %v7363_v52 = vmax.f32 %v13527_v10, %v7299_v27  ;;  %v7365_v42 = vmax.f32 %v10443_v61, %v7301_v1  ;;  %v7303_v56 = vmul.f32 0.01, %v10475_v44  ;;  %7952 = vmatprep.subr.bf16.mxu0 %v11558_v57  ;;  %v13572_v61 = vld [vmem:[%s13362_s27 + $0x78] sm:$0xff]  ;;  %v13580_v27 = vsel %vm8665_vm7, 1, %v15153_v13 }
 0x624   : > { %v7364_v23 = vmax.f32 %v13537_v40, %v7300_v35  ;;  %v7366_v2 = vmax.f32 %v10444_v28, %v7302_v38  ;;  %v7304_v32 = vmul.f32 0.01, %v10476_v20  ;;  %v6782_v7 = vpop.f32.mrb[128].mxu0  ;;  %v11559_v28 = vld [vmem:[#allocation8 + $0x160] ss:$8 sps:$4 sm:$0xff]   ;;  %15157 = vst [vmem:[#allocation34_spill] sm:$0xff] %v13580_v27  ;;  %8640 = vperm.xlu1 %10970, %v13572_v61  }
 0x625   : > { %v7367_v57 = vmax.f32 %v10475_v44, %v7303_v56  ;;  %v10445_v30 = vadd.f32 %v6782_v7, %v13339_v53  ;;  %v6784_v10 = vpop.f32.mrb[129].mxu0  ;;  %v7413_v12 = vpack.c.bf16 %v7365_v42, %v7361_v49  ;;  %v11564_v38 = vld [vmem:[#allocation8 + $0x174] ss:$8 sps:$4 sm:$0xff]   ;;  %8637 = vperm.xlu0 %10969, %v13577_v9   ;;  %vm8666_vm10 = vcmp.gt.s32.totalorder %v13493_v60, 0 }
 0x626   : > { %v7368_v22 = vmax.f32 %v10476_v20, %v7304_v32  ;;  %v7234_v25 = vpop.f32.mrb[144].mxu1  ;;  %v10446_v11 = vadd.f32 %v6784_v10, %v13342_v33  ;;  %7953 = vmatpush1.bf16.msra.mxu0 %v11556_v8  ;;  %v6786_v40 = vpop.f32.mrb[130].mxu0  ;;  %v7414_v55 = vpack.c.bf16 %v7366_v2, %v7362_v14  ;;  %vm8669_vm11 = vcmp.gt.s32.totalorder %v13510_v29, 0 }
 0x627   : > { %v7305_v49 = vmul.f32 0.01, %v10445_v30  ;;  %v10477_v1 = vadd.f32 %v7234_v25, %v13345_v26  ;;  %v7236_v44 = vpop.f32.mrb[145].mxu1  ;;  %v10447_v5 = vadd.f32 %v6786_v40, %v13339_v53  ;;  %v6788_v35 = vpop.f32.mrb[131].mxu0  ;;  %7954 = vmatprep.subr.bf16.mxu0 %v11561_v62  ;;  %v13584_v20 = vpack.c.bf16 %v7367_v57, %v7363_v52 }
 0x628   : > { %v7306_v8 = vmul.f32 0.01, %v10446_v11  ;;  %v10478_v14 = vadd.f32 %v7236_v44, %v13348_v37  ;;  %v7238_v42 = vpop.f32.mrb[146].mxu1  ;;  %v10448_v56 = vadd.f32 %v6788_v35, %v13342_v33  ;;  %7891 = vmatprep.mubr.bf16.mxu0 %v7414_v55  ;;  %v13588_v2 = vpack.c.bf16 %v7368_v22, %v7364_v23  ;;  %v11562_v55 = vld [vmem:[#allocation8 + $0x170] ss:$8 sps:$4 sm:$0xff]   ;;  %8694 = vperm.xlu1 %10970, %v13392_v15  }
 0x629   : > { %v7369_v32 = vmax.f32 %v10445_v30, %v7305_v49  ;;  %v7307_v7 = vmul.f32 0.01, %v10477_v1  ;;  %v7309_v10 = vmul.f32 0.01, %v10447_v5  ;;  %v10479_v62 = vadd.f32 %v7238_v42, %v13345_v26  ;;  %v7240_v25 = vpop.f32.mrb[147].mxu1  ;;  %7892 = vmatmul.mubr.bf16.gmra.mrb[156].mxu0 %v7413_v12  ;;  %8691 = vperm.xlu0 %10969, %v13439_v17  }
 0x62a   : > { %v7370_v52 = vmax.f32 %v10446_v11, %v7306_v8  ;;  %v7308_v34 = vmul.f32 0.01, %v10478_v14  ;;  %v7310_v57 = vmul.f32 0.01, %v10448_v56  ;;  %v10480_v40 = vadd.f32 %v7240_v25, %v13348_v37  ;;  %7955 = vmatpush1.bf16.msra.mxu0 %v11559_v28  ;;  %v11567_v30 = vld [vmem:[#allocation8 + $0x184] ss:$8 sps:$4 sm:$0xff]  }
 0x62b   : > { %v7371_v23 = vmax.f32 %v10477_v1, %v7307_v7  ;;  %v7373_v22 = vmax.f32 %v10447_v5, %v7309_v10  ;;  %v7311_v44 = vmul.f32 0.01, %v10479_v62  ;;  %7956 = vmatprep.subr.bf16.mxu0 %v11564_v38  ;;  %v13597_v11 = vsel %vm8664_vm8, 1, %v15153_v13  ;;  %v11565_v10 = vld [vmem:[#allocation8 + $0x180] ss:$8 sps:$4 sm:$0xff]  }
 0x62c   : > { %v7372_v49 = vmax.f32 %v10478_v14, %v7308_v34  ;;  %v7374_v35 = vmax.f32 %v10448_v56, %v7310_v57  ;;  %v7312_v42 = vmul.f32 0.01, %v10480_v40  ;;  %v6792_v12 = vpop.f32.mrb[132].mxu0  ;;  %v13604_v34 = vsel %vm8667_vm9, 1, %v15153_v13  ;;  %8700 = vperm.xlu1 %10970, %v13456_v16  }
 0x62d   : > { %v7375_v8 = vmax.f32 %v10479_v62, %v7311_v44  ;;  %v10449_v28 = vadd.f32 %v6792_v12, %v13339_v53  ;;  %v6794_v25 = vpop.f32.mrb[133].mxu0  ;;  %v7417_v1 = vpack.c.bf16 %v7373_v22, %v7369_v32  ;;  %15158 = vst [vmem:[#allocation35_spill] sm:$0xff] %v13604_v34  ;;  %v11570_v12 = vld [vmem:[#allocation8 + $0x194] ss:$8 sps:$4 sm:$0xff]   ;;  %8697 = vperm.xlu0 %10969, %v13503_v50   ;;  %vm8668_vm12 = vcmp.gt.s32.totalorder %v13517_v6, 0 }
 0x62e   : > { %v7376_v5 = vmax.f32 %v10480_v40, %v7312_v42  ;;  %v7244_v38 = vpop.f32.mrb[148].mxu1  ;;  %v10450_v14 = vadd.f32 %v6794_v25, %v13342_v33  ;;  %7957 = vmatpush1.bf16.msra.mxu0 %v11562_v55  ;;  %v6796_v56 = vpop.f32.mrb[134].mxu0  ;;  %v7418_v7 = vpack.c.bf16 %v7374_v35, %v7370_v52  ;;  %vm8671_vm13 = vcmp.gt.s32.totalorder %v13551_v43, 0 }
 0x62f   : > { %v7313_v62 = vmul.f32 0.01, %v10449_v28  ;;  %v10481_v57 = vadd.f32 %v7244_v38, %v13345_v26  ;;  %v7246_v44 = vpop.f32.mrb[149].mxu1  ;;  %v10451_v32 = vadd.f32 %v6796_v56, %v13339_v53  ;;  %v6798_v22 = vpop.f32.mrb[135].mxu0  ;;  %7958 = vmatprep.subr.bf16.mxu0 %v11567_v30  ;;  %v13608_v40 = vpack.c.bf16 %v7375_v8, %v7371_v23 }
 0x630   : > { %v7314_v42 = vmul.f32 0.01, %v10450_v14  ;;  %v10482_v55 = vadd.f32 %v7246_v44, %v13348_v37  ;;  %v7248_v25 = vpop.f32.mrb[150].mxu1  ;;  %v10452_v52 = vadd.f32 %v6798_v22, %v13342_v33  ;;  %7901 = vmatprep.mubr.bf16.mxu0 %v7418_v7  ;;  %v13612_v35 = vpack.c.bf16 %v7376_v5, %v7372_v49  ;;  %v11568_v7 = vld [vmem:[#allocation8 + $0x190] ss:$8 sps:$4 sm:$0xff]   ;;  %8706 = vperm.xlu1 %10970, %v13520_v3  }
 0x631   : > { %15159 = vst [vmem:[#allocation36_spill] sm:$0xff] %v13608_v40  ;;  %v7377_v38 = vmax.f32 %v10449_v28, %v7313_v62  ;;  %v7315_v39 = vmul.f32 0.01, %v10481_v57  ;;  %v7317_v63 = vmul.f32 0.01, %v10451_v32  ;;  %v10483_v56 = vadd.f32 %v7248_v25, %v13345_v26  ;;  %v7250_v30 = vpop.f32.mrb[151].mxu1  ;;  %7902 = vmatmul.mubr.bf16.gmra.mrb[160].mxu0 %v7417_v1  ;;  %8703 = vperm.xlu0 %10969, %v13567_v21  }
 0x632   : > { %v7378_v23 = vmax.f32 %v10450_v14, %v7314_v42  ;;  %v7316_v8 = vmul.f32 0.01, %v10482_v55  ;;  %v7318_v44 = vmul.f32 0.01, %v10452_v52  ;;  %v10484_v40 = vadd.f32 %v7250_v30, %v13348_v37  ;;  %7959 = vmatpush1.bf16.msra.mxu0 %v11565_v10  ;;  %v11573_v28 = vld [vmem:[#allocation8 + $0x1a4] ss:$8 sps:$4 sm:$0xff]  }
 0x633   : > { %v7379_v49 = vmax.f32 %v10481_v57, %v7315_v39  ;;  %v7381_v5 = vmax.f32 %v10451_v32, %v7317_v63  ;;  %v7319_v22 = vmul.f32 0.01, %v10483_v56  ;;  %7960 = vmatprep.subr.bf16.mxu0 %v11570_v12  ;;  %v13621_v14 = vsel %vm8666_vm10, 1, %v15153_v13 }
 0x634   : > { %v7380_v62 = vmax.f32 %v10482_v55, %v7316_v8  ;;  %v7382_v25 = vmax.f32 %v10452_v52, %v7318_v44  ;;  %v7320_v16 = vmul.f32 0.01, %v10484_v40  ;;  %v6802_v1 = vpop.f32.mrb[136].mxu0  ;;  %15160 = vst [vmem:[#allocation38_spill] sm:$0xff] %v13621_v14  ;;  %v11571_v52 = vld [vmem:[#allocation8 + $0x1a0] ss:$8 sps:$4 sm:$0xff]   ;;  %8712 = vperm.xlu1 %10970, %v13580_v27  }
 0x635   : > { %v7383_v42 = vmax.f32 %v10483_v56, %v7319_v22  ;;  %v10453_v10 = vadd.f32 %v6802_v1, %v13339_v53  ;;  %v6804_v30 = vpop.f32.mrb[137].mxu0  ;;  %v7421_v39 = vpack.c.bf16 %v7381_v5, %v7377_v38  ;;  %v13628_v8 = vsel %vm8669_vm11, 1, %v15153_v13  ;;  %v11576_v1 = vld [vmem:[#allocation8 + $0x1b4] ss:$8 sps:$4 sm:$0xff]   ;;  %8709 = vperm.xlu0 %10969, %v13597_v11  }
 0x636   : > { %v7384_v63 = vmax.f32 %v10484_v40, %v7320_v16  ;;  %v7254_v57 = vpop.f32.mrb[152].mxu1  ;;  %v10454_v32 = vadd.f32 %v6804_v30, %v13342_v33  ;;  %7961 = vmatpush1.bf16.msra.mxu0 %v11568_v7  ;;  %v6806_v12 = vpop.f32.mrb[138].mxu0  ;;  %v7422_v55 = vpack.c.bf16 %v7382_v25, %v7378_v23  ;;  %vm8670_vm14 = vcmp.gt.s32.totalorder %v13557_v36, 0 }
 0x637   : > { %v7321_v56 = vmul.f32 0.01, %v10453_v10  ;;  %v10485_v44 = vadd.f32 %v7254_v57, %v13345_v26  ;;  %v7256_v22 = vpop.f32.mrb[153].mxu1  ;;  %v10455_v38 = vadd.f32 %v6806_v12, %v13339_v53  ;;  %v6808_v5 = vpop.f32.mrb[139].mxu0  ;;  %7962 = vmatprep.subr.bf16.mxu0 %v11573_v28  ;;  %v13632_v16 = vpack.c.bf16 %v7383_v42, %v7379_v49 }
 0x638   : > { %v7322_v40 = vmul.f32 0.01, %v10454_v32  ;;  %v10486_v7 = vadd.f32 %v7256_v22, %v13348_v37  ;;  %v7258_v30 = vpop.f32.mrb[154].mxu1  ;;  %v10456_v23 = vadd.f32 %v6808_v5, %v13342_v33  ;;  %7911 = vmatprep.mubr.bf16.mxu0 %v7422_v55  ;;  %v13636_v25 = vpack.c.bf16 %v7384_v63, %v7380_v62  ;;  %v11574_v55 = vld [vmem:[#allocation8 + $0x1b0] ss:$8 sps:$4 sm:$0xff]   ;;  %8718 = vperm.xlu1 %10970, %v13604_v34  }
 0x639   : > { %15161 = vst [vmem:[#allocation37_spill] sm:$0xff] %v13632_v16  ;;  %v7385_v57 = vmax.f32 %v10453_v10, %v7321_v56  ;;  %v7323_v3 = vmul.f32 0.01, %v10485_v44  ;;  %v7325_v21 = vmul.f32 0.01, %v10455_v38  ;;  %v10487_v12 = vadd.f32 %v7258_v30, %v13345_v26  ;;  %v7260_v28 = vpop.f32.mrb[155].mxu1  ;;  %7912 = vmatmul.mubr.bf16.gmra.mrb[164].mxu0 %v7421_v39  ;;  %8715 = vperm.xlu0 %10969, %v13621_v14  }
 0x63a   : > { %v7386_v49 = vmax.f32 %v10454_v32, %v7322_v40  ;;  %v7324_v42 = vmul.f32 0.01, %v10486_v7  ;;  %v7326_v22 = vmul.f32 0.01, %v10456_v23  ;;  %v10488_v16 = vadd.f32 %v7260_v28, %v13348_v37  ;;  %7963 = vmatpush1.bf16.msra.mxu0 %v11571_v52  ;;  %v11579_v10 = vld [vmem:[#allocation8 + $0x1c4] ss:$8 sps:$4 sm:$0xff]  }
 0x63b   : > { %v7387_v62 = vmax.f32 %v10485_v44, %v7323_v3  ;;  %v7389_v63 = vmax.f32 %v10455_v38, %v7325_v21  ;;  %v7327_v5 = vmul.f32 0.01, %v10487_v12  ;;  %7964 = vmatprep.subr.bf16.mxu0 %v11576_v1  ;;  %v13645_v32 = vsel %vm8668_vm12, 1, %v15153_v13 }
 0x63c   : > { %v7388_v56 = vmax.f32 %v10486_v7, %v7324_v42  ;;  %v7390_v30 = vmax.f32 %v10456_v23, %v7326_v22  ;;  %v7328_v27 = vmul.f32 0.01, %v10488_v16  ;;  %v6812_v39 = vpop.f32.mrb[140].mxu0  ;;  %v11577_v23 = vld [vmem:[#allocation8 + $0x1c0] ss:$8 sps:$4 sm:$0xff]   ;;  %v13652_v42 = vsel %vm8671_vm13, 1, %v15153_v13  ;;  %8724 = vperm.xlu1 %10970, %v13628_v8  }
 0x63d   : > { %v7391_v40 = vmax.f32 %v10487_v12, %v7327_v5  ;;  %v10457_v52 = vadd.f32 %v6812_v39, %v13339_v53  ;;  %v6814_v28 = vpop.f32.mrb[141].mxu0  ;;  %v7425_v3 = vpack.c.bf16 %v7389_v63, %v7385_v57  ;;  %v11582_v39 = vld [vmem:[#allocation8 + $0x1d4] ss:$8 sps:$4 sm:$0xff]   ;;  %8721 = vperm.xlu0 %10969, %v13645_v32   ;;  %vm8673_vm15 = vcmp.gt.s32.totalorder %v13572_v61, 0 }
 0x63e   : > { %v7392_v21 = vmax.f32 %v10488_v16, %v7328_v27  ;;  %v7264_v44 = vpop.f32.mrb[156].mxu1  ;;  %v10458_v38 = vadd.f32 %v6814_v28, %v13342_v33  ;;  %7965 = vmatpush1.bf16.msra.mxu0 %v11574_v55  ;;  %v6816_v1 = vpop.f32.mrb[142].mxu0  ;;  %v7426_v7 = vpack.c.bf16 %v7390_v30, %v7386_v49  ;;  %vm8672_vm0 = vcmp.gt.s32.totalorder %v13577_v9, 0 }
 0x63f   : > { %v7329_v12 = vmul.f32 0.01, %v10457_v52  ;;  %v10489_v22 = vadd.f32 %v7264_v44, %v13345_v26  ;;  %v7266_v5 = vpop.f32.mrb[157].mxu1  ;;  %v10459_v57 = vadd.f32 %v6816_v1, %v13339_v53  ;;  %v6818_v63 = vpop.f32.mrb[143].mxu0  ;;  %7966 = vmatprep.subr.bf16.mxu0 %v11579_v10  ;;  %v13656_v27 = vpack.c.bf16 %v7391_v40, %v7387_v62 }
 0x640   : > { %v7330_v16 = vmul.f32 0.01, %v10458_v38  ;;  %v10490_v55 = vadd.f32 %v7266_v5, %v13348_v37  ;;  %v7268_v28 = vpop.f32.mrb[158].mxu1  ;;  %v10460_v49 = vadd.f32 %v6818_v63, %v13342_v33  ;;  %7921 = vmatprep.mubr.bf16.mxu0 %v7426_v7  ;;  %v13660_v30 = vpack.c.bf16 %v7392_v21, %v7388_v56  ;;  %v11580_v33 = vld [vmem:[#allocation8 + $0x1d0] ss:$8 sps:$4 sm:$0xff]   ;;  %8730 = vperm.xlu1 %10970, %v13652_v42  }
 0x641   : > { %v7393_v44 = vmax.f32 %v10457_v52, %v7329_v12  ;;  %v7331_v34 = vmul.f32 0.01, %v10489_v22  ;;  %v7333_v14 = vmul.f32 0.01, %v10459_v57  ;;  %v10491_v53 = vadd.f32 %v7268_v28, %v13345_v26  ;;  %v7270_v10 = vpop.f32.mrb[159].mxu1  ;;  %7922 = vmatmul.mubr.bf16.gmra.mrb[168].mxu0 %v7425_v3 }
 0x642   : > { %v7394_v62 = vmax.f32 %v10458_v38, %v7330_v16  ;;  %v7332_v40 = vmul.f32 0.01, %v10490_v55  ;;  %v7334_v1 = vmul.f32 0.01, %v10460_v49  ;;  %v10492_v5 = vadd.f32 %v7270_v10, %v13348_v37  ;;  %7967 = vmatpush1.bf16.msra.mxu0 %v11577_v23  ;;  %v11585_v52 = vld [vmem:[#allocation8 + $0x1e4] ss:$8 sps:$4 sm:$0xff]  }
 0x643   : > { %v7395_v56 = vmax.f32 %v10489_v22, %v7331_v34  ;;  %v7397_v21 = vmax.f32 %v10459_v57, %v7333_v14  ;;  %v7335_v7 = vmul.f32 0.01, %v10491_v53  ;;  %7968 = vmatprep.subr.bf16.mxu0 %v11582_v39  ;;  %v13669_v3 = vsel %vm8670_vm14, 1, %v15153_v13  ;;  %v11583_v14 = vld [vmem:[#allocation8 + $0x1e0] ss:$8 sps:$4 sm:$0xff]  }
 0x644   : > { %v7396_v12 = vmax.f32 %v10490_v55, %v7332_v40  ;;  %v7398_v26 = vmax.f32 %v10460_v49, %v7334_v1  ;;  %v7336_v63 = vmul.f32 0.01, %v10492_v5  ;;  %8727 = vperm.xlu0 %10969, %v13669_v3   ;;  %v13675_v23 = vsel %vm8673_vm15, 1, %v15153_v13  ;;  %v11588_v57 = vld [vmem:[#allocation8 + $0x1f4] ss:$8 sps:$4 sm:$0xff]  }
 0x645   : > { %v7399_v38 = vmax.f32 %v10491_v53, %v7335_v7  ;;  %v7429_v16 = vpack.c.bf16 %v7397_v21, %v7393_v44  ;;  %v13678_v22 = vsel %vm8672_vm0, 1, %v15153_v13  ;;  %8736 = vperm.xlu1 %10970, %v13675_v23   ;;  %v11586_v28 = vld [vmem:[#allocation8 + $0x1f0] ss:$8 sps:$4 sm:$0xff]   ;;  %v11819_v49 = vmov 1   ;;  %v15162_v13 = vld [vmem:[#allocation36_spill] sm:$0xff] }
 0x646   : > { %v7400_v37 = vmax.f32 %v10492_v5, %v7336_v63  ;;  %7969 = vmatpush1.bf16.msra.mxu0 %v11580_v33  ;;  %v7430_v34 = vpack.c.bf16 %v7398_v26, %v7394_v62 }
 0x647   : > { %7970 = vmatprep.subr.bf16.mxu0 %v11585_v52  ;;  %v7431_v39 = vpack.c.bf16 %v7399_v38, %v7395_v56 }
 0x648   : > { %7931 = vmatprep.mubr.bf16.mxu0 %v7430_v34  ;;  %v7432_v55 = vpack.c.bf16 %v7400_v37, %v7396_v12  ;;  %8733 = vperm.xlu0 %10969, %v13678_v22  }
 0x649   : > { %7932 = vmatmul.mubr.bf16.gmra.mrb[172].mxu0 %v7429_v16  ;;  %10972 = vset.pattern.permute.xlu1 %v11819_v49 }
 0x64a   : > { %7971 = vmatpush1.bf16.msra.mxu0 %v11583_v14  ;;  %7974 = vmatprep.mubr.bf16.mxu0 %v13406_v58  ;;  %v15164_v58 = vld [vmem:[#allocation33_spill] sm:$0xff] }
 0x64b   : > { %7972 = vmatprep.subr.bf16.mxu0 %v11588_v57  ;;  %8790 = vperm.xlu1 %10972, %v13379_v51  }
 0x64c   : > { %10971 = vset.pattern.permute.xlu0 %v11819_v49 }
 0x64d   : > { %8787 = vperm.xlu0 %10971, %v13374_v41  }
 0x64e   : > { %7973 = vmatpush1.bf16.msra.mxu0 %v11586_v28  ;;  %v11821_v28 = vmov 3  }
 0x64f   : > { %8793 = vperm.xlu1 %10972, %v13371_v48  }
 0x651   : > { %7975 = vmatmul.mubr.bf16.vlgmr.msra.gmra.mrb[144].mxu0 %v13394_v18  ;;  %8796 = vperm.xlu0 %10971, %v13385_v47   ;;  %v15163_v18 = vld [vmem:[#allocation31_spill] sm:$0xff] }
 0x652   : > { %7984 = vmatprep.mubr.bf16.mxu0 %v13476_v4  ;;  %v15166_v4 = vld [vmem:[#allocation37_spill] sm:$0xff] }
 0x653   : > { %8799 = vperm.xlu1 %10972, %v13426_v0  }
 0x655   : > { %8802 = vperm.xlu0 %10971, %v13410_v54  }
 0x657   : > { %8805 = vperm.xlu1 %10972, %v13453_v46  }
 0x659   : > { %7985 = vmatmul.mubr.bf16.gmra.mrb[148].mxu0 %v13466_v59  ;;  %8808 = vperm.xlu0 %10971, %v13446_v19   ;;  %v15165_v59 = vld [vmem:[#allocation32_spill] sm:$0xff] }
 0x65a   : > { %7994 = vmatprep.mubr.bf16.mxu0 %v13540_v45  ;;  %v15168_v45 = vld [vmem:[#allocation38_spill] sm:$0xff] }
 0x65b   : > { %8811 = vperm.xlu1 %10972, %v13493_v60  }
 0x65d   : > { %8814 = vperm.xlu0 %10971, %v13487_v31  }
 0x65f   : > { %8817 = vperm.xlu1 %10972, %v13517_v6  }
 0x661   : > { %7995 = vmatmul.mubr.bf16.gmra.mrb[152].mxu0 %v13530_v24  ;;  %8820 = vperm.xlu0 %10971, %v13510_v29   ;;  %v15167_v24 = vld [vmem:[#allocation34_spill] sm:$0xff] }
 0x662   : > { %8004 = vmatprep.mubr.bf16.mxu0 %v13588_v2  ;;  %v11820_v2 = vmov 2  }
 0x663   : > { %8823 = vperm.xlu1 %10972, %v13557_v36  }
 0x665   : > { %8826 = vperm.xlu0 %10971, %v13551_v43  }
 0x667   : > { %8829 = vperm.xlu1 %10972, %v13577_v9  }
 0x669   : > { %8005 = vmatmul.mubr.bf16.gmra.mrb[156].mxu0 %v13584_v20  ;;  %8832 = vperm.xlu0 %10971, %v13572_v61   ;;  %v15169_v20 = vld [vmem:[#allocation35_spill] sm:$0xff] }
 0x66a   : > { %8014 = vmatprep.mubr.bf16.mxu0 %v13612_v35  ;;  %v13730_v35 = vpop.permute.xlu1 %8601 }
 0x66b   : > { %8851 = vperm.xlu1 %10972, %v13439_v17  }
 0x66d   : > { %8854 = vperm.xlu0 %10971, %v13392_v15  }
 0x66e   : > { %v13741_v44 = vpop.permute.xlu1 %8604 }
 0x66f   : > { %8857 = vperm.xlu1 %10972, %v13503_v50  }
 0x671   : > { %8015 = vmatmul.mubr.bf16.gmra.mrb[160].mxu0 %v15162_v13  ;;  %8860 = vperm.xlu0 %10971, %v15163_v18   ;;  %v11614_v13 = vld [vmem:[%s13362_s27] sm:$0xff] }
 0x672   : > { %8024 = vmatprep.mubr.bf16.mxu0 %v13636_v25  ;;  %v13732_v25 = vpop.permute.xlu0 %8595 }
 0x673   : > { %8863 = vperm.xlu1 %10972, %v15164_v58  }
 0x675   : > { %8866 = vperm.xlu0 %10971, %v15165_v59  }
 0x677   : > { %8869 = vperm.xlu1 %10972, %v13597_v11  }
 0x679   : > { %8025 = vmatmul.mubr.bf16.gmra.mrb[164].mxu0 %v15166_v4  ;;  %8872 = vperm.xlu0 %10971, %v15167_v24  }
 0x67a   : > { %8034 = vmatprep.mubr.bf16.mxu0 %v13660_v30  ;;  %v11604_v30 = vld [vmem:[%s14924_s14 + $0x38] sm:$0xff]  }
 0x67b   : > { %8875 = vperm.xlu1 %10972, %v15168_v45  }
 0x67d   : > { %8878 = vperm.xlu0 %10971, %v15169_v20  }
 0x67f   : > { %8881 = vperm.xlu1 %10972, %v13645_v32  }
 0x681   : > { %8035 = vmatmul.mubr.bf16.gmra.mrb[168].mxu0 %v13656_v27  ;;  %8884 = vperm.xlu0 %10971, %v13628_v8   ;;  %v11603_v27 = vld [vmem:[%s14924_s14 + $0x78] sm:$0xff]  }
 0x682   : > { %8044 = vmatprep.mubr.bf16.mxu0 %v7432_v55  ;;  %10179 = vmatprep.subr.bf16.mxu1 %v11603_v27  ;;  %v11615_v27 = vld [vmem:[%s13362_s27 + $0x18] sm:$0xff] }
 0x683   : > { %8887 = vperm.xlu1 %10972, %v13669_v3   ;;  %10180 = vmatpush3.bf16.msra.mxu1 %v11604_v30 }
 0x685   : > { %8890 = vperm.xlu0 %10971, %v13652_v42  }
 0x687   : > { %8893 = vperm.xlu1 %10972, %v13678_v22  }
 0x689   : > { %8045 = vmatmul.mubr.bf16.gmra.mrb[172].mxu0 %v7431_v39  ;;  %8896 = vperm.xlu0 %10971, %v13675_v23  }
 0x68b   : > { %10973 = vset.pattern.permute.xlu1 %v11820_v2 }
 0x68c   : > { %8947 = vperm.xlu1 %10973, %v13374_v41   ;;  %v13743_v41 = vpop.permute.xlu0 %8598 }
 0x68d   : > { %10974 = vset.pattern.permute.xlu0 %v11820_v2 }
 0x68e   : > { %8950 = vperm.xlu0 %10974, %v13379_v51   ;;  %v13747_v51 = vpop.permute.xlu1 %8610 }
 0x690   : > { %8953 = vperm.xlu1 %10973, %v13371_v48   ;;  %v13749_v53 = vpop.permute.xlu0 %8607 }
 0x692   : > { %8959 = vperm.xlu0 %10974, %v13426_v0   ;;  %v13753_v10 = vpop.permute.xlu1 %8616 }
 0x694   : > { %8956 = vperm.xlu1 %10973, %v13385_v47   ;;  %v13755_v62 = vpop.permute.xlu0 %8613 }
 0x696   : > { %8965 = vperm.xlu0 %10974, %v13453_v46   ;;  %v13759_v48 = vpop.permute.xlu1 %8622 }
 0x697   : > { %15170 = vst [vmem:[#allocation29_spill] sm:$0xff] %v13759_v48 }
 0x698   : > { %8962 = vperm.xlu1 %10973, %v13410_v54   ;;  %v13761_v0 = vpop.permute.xlu0 %8619 }
 0x69a   : > { %8971 = vperm.xlu0 %10974, %v13493_v60   ;;  %v13765_v47 = vpop.permute.xlu1 %8628 }
 0x69b   : > { %15171 = vst [vmem:[#allocation28_spill] sm:$0xff] %v13765_v47  ;;  %v11618_v47 = vld [vmem:[%s13362_s27 + $0x10] sm:$0xff] }
 0x69c   : > { %8968 = vperm.xlu1 %10973, %v13446_v19   ;;  %v13767_v40 = vpop.permute.xlu0 %8625 }
 0x69e   : > { %8977 = vperm.xlu0 %10974, %v13517_v6   ;;  %v13771_v54 = vpop.permute.xlu1 %8634 }
 0x69f   : > { %15172 = vst [vmem:[#allocation30_spill] sm:$0xff] %v13771_v54 }
 0x6a0   : > { %8974 = vperm.xlu1 %10973, %v13487_v31   ;;  %v13773_v1 = vpop.permute.xlu0 %8631 }
 0x6a2   : > { %8983 = vperm.xlu0 %10974, %v13557_v36  }
 0x6a3   : > { %v13777_v5 = vpop.permute.xlu1 %8640 }
 0x6a4   : > { %8980 = vperm.xlu1 %10973, %v13510_v29   ;;  %15173 = vst [vmem:[#allocation26_spill] sm:$0xff] %v13777_v5  ;;  %v13779_v33 = vpop.permute.xlu0 %8637 }
 0x6a6   : > { %8989 = vperm.xlu0 %10974, %v13577_v9  }
 0x6a7   : > { %v13783_v56 = vpop.permute.xlu1 %8694 }
 0x6a8   : > { %8986 = vperm.xlu1 %10973, %v13551_v43   ;;  %v13786_v21 = vpop.permute.xlu0 %8691 }
 0x6aa   : > { %9011 = vperm.xlu0 %10974, %v13439_v17  }
 0x6ab   : > { %v13789_v7 = vpop.permute.xlu1 %8700 }
 0x6ac   : > { %8992 = vperm.xlu1 %10973, %v13572_v61   ;;  %v13792_v52 = vpop.permute.xlu0 %8697 }
 0x6ae   : > { %9017 = vperm.xlu0 %10974, %v13503_v50  }
 0x6af   : > { %v13795_v12 = vpop.permute.xlu1 %8706 }
 0x6b0   : > { %9014 = vperm.xlu1 %10973, %v13392_v15   ;;  %v13798_v26 = vpop.permute.xlu0 %8703 }
 0x6b2   : > { %9023 = vperm.xlu0 %10974, %v15164_v58  }
 0x6b3   : > { %v13801_v63 = vpop.permute.xlu1 %8712 }
 0x6b4   : > { %9020 = vperm.xlu1 %10973, %v15163_v18   ;;  %v13804_v38 = vpop.permute.xlu0 %8709 }
 0x6b6   : > { %9029 = vperm.xlu0 %10974, %v13597_v11  }
 0x6b7   : > { %v13807_v16 = vpop.permute.xlu1 %8718 }
 0x6b8   : > { %9026 = vperm.xlu1 %10973, %v15165_v59   ;;  %15174 = vst [vmem:[#allocation27_spill] sm:$0xff] %v13807_v16  ;;  %v13810_v37 = vpop.permute.xlu0 %8715 }
 0x6ba   : > { %9035 = vperm.xlu0 %10974, %v15168_v45  }
 0x6bb   : > { %v13813_v34 = vpop.permute.xlu1 %8724 }
 0x6bc   : > { %9032 = vperm.xlu1 %10973, %v15167_v24   ;;  %15175 = vst [vmem:[#allocation23_spill] sm:$0xff] %v13813_v34  ;;  %v13816_v14 = vpop.permute.xlu0 %8721 }
 0x6bd   : > { %15176 = vst [vmem:[#allocation36_spill] sm:$0xff] %v13816_v14 }
 0x6be   : > { %9041 = vperm.xlu0 %10974, %v13645_v32  }
 0x6bf   : > { %v13819_v57 = vpop.permute.xlu1 %8730 }
 0x6c0   : > { %9038 = vperm.xlu1 %10973, %v15169_v20   ;;  %15177 = vst [vmem:[#allocation31_spill] sm:$0xff] %v13819_v57  ;;  %v11616_v57 = vld [vmem:[%s13362_s27 + $0x8] sm:$0xff] }
 0x6c2   : > { %9047 = vperm.xlu0 %10974, %v13669_v3  }
 0x6c3   : > { %v13822_v39 = vpop.permute.xlu0 %8727 }
 0x6c4   : > { %9044 = vperm.xlu1 %10973, %v13628_v8   ;;  %v13825_v55 = vpop.permute.xlu1 %8736 }
 0x6c5   : > { %15178 = vst [vmem:[#allocation33_spill] sm:$0xff] %v13825_v55  ;;  %v11617_v55 = vld [vmem:[%s13362_s27 + $0x28] sm:$0xff] }
 0x6c6   : > { %9053 = vperm.xlu0 %10974, %v13678_v22  }
 0x6c7   : > { %v13827_v49 = vpop.permute.xlu0 %8733 }
 0x6c8   : > { %9050 = vperm.xlu1 %10973, %v13652_v42  }
 0x6ca   : > { %10975 = vset.pattern.permute.xlu0 %v11821_v28  ;;  %v8791_v4 = vpop.permute.xlu1 %8790 }
 0x6cb   : > { %9107 = vperm.xlu0 %10975, %v11614_v13   ;;  %v13839_v13 = vld [vmem:[%s14926_s16] sm:$0xff]  }
 0x6cc   : > { %9056 = vperm.xlu1 %10973, %v13675_v23   ;;  %v8788_v2 = vpop.permute.xlu0 %8787  ;;  %10269 = vmatprep.subr.bf16.mxu1 %v13839_v13 }
 0x6ce   : > { %v8794_v30 = vpop.permute.xlu1 %8793 }
 0x6cf   : > { %9116 = vperm.xlu0 %10975, %v11615_v27  }
 0x6d0   : > { %10976 = vset.pattern.permute.xlu1 %v11821_v28  ;;  %v8797_v5 = vpop.permute.xlu0 %8796  ;;  %v11619_v28 = vld [vmem:[%s13362_s27 + $0x20] sm:$0xff]  ;;  %s11732_s27 = scalar_lea.vmem %s14858_s25, 2048 }
 0x6d1   : > { %9110 = vperm.xlu1 %10976, %v11616_v57   ;;  %p11733_p2 = scmp.ne.s32.totalorder %s14858_s25, %s11732_s27  ;;  %p11740_p11 = scmp.lt.s32.totalorder %s11738_s22, %s11732_s27 }
 0x6d2   : > { %v8800_v54 = vpop.permute.xlu1 %8799 }
 0x6d3   : > { %9122 = vperm.xlu0 %10975, %v11617_v55   ;;  %p11734_p4 = pnand %p11733_p2, %p15461_p3  ;;  %p11741_p13 = por %p11740_p11, %p11739_p8 }
 0x6d4   : > { %v8803_v34 = vpop.permute.xlu0 %8802 }
 0x6d5   : > { %9113 = vperm.xlu1 %10976, %v11618_v47   ;;  %p11735_p7 = pneg %p11734_p4 }
 0x6d6   : > { %v8806_v27 = vpop.permute.xlu1 %8805 }
 0x6d7   : > { %9128 = vperm.xlu0 %10975, %v13446_v19   ;;  %p11742_p0 = pnand %p11741_p13, %p11735_p7 }
 0x6d8   : > { %v13841_v16 = vpop.permute.xlu0 %8808 }
 0x6d9   : > { %9119 = vperm.xlu1 %10976, %v11619_v28  }
 0x6da   : > { %v13846_v57 = vpop.permute.xlu1 %8811 }
 0x6db   : > { %9134 = vperm.xlu0 %10975, %v13487_v31  }
 0x6dc   : > { %v13848_v55 = vpop.permute.xlu0 %8814 }
 0x6dd   : > { %9125 = vperm.xlu1 %10976, %v13453_v46  }
 0x6de   : > { %v13852_v19 = vpop.permute.xlu1 %8817 }
 0x6df   : > { %9140 = vperm.xlu0 %10975, %v13510_v29   ;;  %v15179_v29 = vlaneseq }
 0x6e0   : > { %v13854_v47 = vpop.permute.xlu0 %8820 }
 0x6e1   : > { %9131 = vperm.xlu1 %10976, %v13493_v60   ;;  %v13870_v14 = vand.u32 127, %v15179_v29  ;;  %v15210_v29 = vmov 0 }
 0x6e2   : > { %v13858_v28 = vpop.permute.xlu1 %8823 }
 0x6e3   : > { %9146 = vperm.xlu0 %10975, %v13551_v43   ;;  %vm8834_vm1 = vcmp.eq.s32.totalorder %v13870_v14, %v8788_v2  ;;  %vm8835_vm2 = vcmp.eq.s32.totalorder %v13870_v14, %v8791_v4  ;;  %vm8836_vm6 = vcmp.eq.s32.totalorder %v13870_v14, %v8794_v30  ;;  %vm8837_vm8 = vcmp.eq.s32.totalorder %v13870_v14, %v8797_v5  ;;  %v15203_v30 = vld [vmem:[#allocation25_spill] sm:$0xff] }
 0x6e4   : > { %v13860_v48 = vpop.permute.xlu0 %8826  ;;  %vm8838_vm12 = vcmp.eq.s32.totalorder %v13870_v14, %v8800_v54  ;;  %vm8839_vm14 = vcmp.eq.s32.totalorder %v13870_v14, %v8803_v34  ;;  %v15200_v34 = vld [vmem:[#allocation24_spill] sm:$0xff] }
 0x6e5   : > { %9137 = vperm.xlu1 %10976, %v13517_v6   ;;  %v15180_v6 = vmov 0 }
 0x6e6   : > { %v13864_v31 = vpop.permute.xlu1 %8829 }
 0x6e7   : > { %9152 = vperm.xlu0 %10975, %v13572_v61  }
 0x6e8   : > { %v13866_v46 = vpop.permute.xlu0 %8832 }
 0x6e9   : > { %9143 = vperm.xlu1 %10976, %v13557_v36  }
 0x6ea   : > { %v8852_v60 = vpop.permute.xlu1 %8851 }
 0x6eb   : > { %9174 = vperm.xlu0 %10975, %v13392_v15   ;;  %vm8898_vm3 = vcmp.eq.s32.totalorder %v8852_v60, 1  ;;  %v15182_v15 = vmov 0 }
 0x6ec   : > { %v8855_v43 = vpop.permute.xlu0 %8854  ;;  %vm13877_vm5 = vmand %vm8834_vm1, %vm8898_vm3 }
 0x6ed   : > { %9149 = vperm.xlu1 %10976, %v13577_v9   ;;  %vm8899_vm4 = vcmp.eq.s32.totalorder %v8855_v43, 1  ;;  %v15181_v6 = vsel %vm13877_vm5, 4294967295, %v15180_v6  ;;  %v15184_v9 = vmov 0 }
 0x6ee   : > { %vm13882_vm7 = vmand %vm8835_vm2, %vm8899_vm4  ;;  %v8858_v36 = vpop.permute.xlu1 %8857  ;;  %vm8840_vm2 = vcmp.eq.s32.totalorder %v13870_v14, %v8806_v27  ;;  %vm8841_vm4 = vcmp.eq.s32.totalorder %v13870_v14, %v13841_v16 }
 0x6ef   : > { %9180 = vperm.xlu0 %10975, %v15163_v18   ;;  %v15183_v15 = vsel %vm13882_vm7, 4294967295, %v15182_v15  ;;  %vm8900_vm9 = vcmp.eq.s32.totalorder %v8858_v36, 1  ;;  %v15186_v18 = vmov 0  ;;  %vm15265_vm7 = vcmp.eq.s32.totalorder %v13870_v14, 0 }
 0x6f0   : > { %v8861_v61 = vpop.permute.xlu0 %8860  ;;  %vm13889_vm11 = vmand %vm8836_vm6, %vm8900_vm9 }
 0x6f1   : > { %9171 = vperm.xlu1 %10976, %v13439_v17   ;;  %vm8901_vm10 = vcmp.eq.s32.totalorder %v8861_v61, 1  ;;  %v15185_v9 = vsel %vm13889_vm11, 4294967295, %v15184_v9  ;;  %v15188_v17 = vmov 0  ;;  %v15212_v61 = vmov 0 }
 0x6f2   : > { %vm13894_vm13 = vmand %vm8837_vm8, %vm8901_vm10  ;;  %v8864_v4 = vpop.permute.xlu1 %8863  ;;  %vm8842_vm10 = vcmp.eq.s32.totalorder %v13870_v14, %v13846_v57  ;;  %vm15258_vm11 = vcmp.eq.s32.totalorder %v13870_v14, %v13761_v0 }
 0x6f3   : > { %9186 = vperm.xlu0 %10975, %v15165_v59   ;;  %v15187_v18 = vsel %vm13894_vm13, 4294967295, %v15186_v18  ;;  %vm8902_vm15 = vcmp.eq.s32.totalorder %v8864_v4, 1  ;;  %v15190_v59 = vmov 0 }
 0x6f4   : > { %v8867_v2 = vpop.permute.xlu0 %8866  ;;  %vm13901_vm1 = vmand %vm8838_vm12, %vm8902_vm15  ;;  %vm8654_vm12 = vcmp.eq.s32.totalorder %v13870_v14, %v13773_v1  ;;  %v15196_v1 = vmov 0 }
 0x6f5   : > { %9177 = vperm.xlu1 %10976, %v13503_v50   ;;  %vm8903_vm0 = vcmp.eq.s32.totalorder %v8867_v2, 1  ;;  %v15189_v17 = vsel %vm13901_vm1, 4294967295, %v15188_v17  ;;  %v15192_v50 = vmov 0 }
 0x6f6   : > { %vm13906_vm3 = vmand %vm8839_vm14, %vm8903_vm0  ;;  %v8870_v54 = vpop.permute.xlu1 %8869  ;;  %vm8750_vm14 = vcmp.eq.s32.totalorder %v13822_v39, 1  ;;  %vm8843_vm0 = vcmp.eq.s32.totalorder %v13870_v14, %v13848_v55  ;;  %v15206_v55 = vmov 0 }
 0x6f7   : > { %9192 = vperm.xlu0 %10975, %v15167_v24   ;;  %v15191_v59 = vsel %vm13906_vm3, 4294967295, %v15190_v59  ;;  %vm8904_vm6 = vcmp.eq.s32.totalorder %v8870_v54, 1  ;;  %vm8844_vm3 = vcmp.eq.s32.totalorder %v13870_v14, %v13852_v19  ;;  %v15208_v19 = vmov 0 }
 0x6f8   : > { %v8873_v5 = vpop.permute.xlu0 %8872  ;;  %vm13914_vm9 = vmand %vm8840_vm2, %vm8904_vm6 }
 0x6f9   : > { %9183 = vperm.xlu1 %10976, %v15164_v58   ;;  %vm8905_vm8 = vcmp.eq.s32.totalorder %v8873_v5, 1  ;;  %v15193_v50 = vsel %vm13914_vm9, 4294967295, %v15192_v50  ;;  %v15194_v58 = vmov 0  ;;  %vm13941_vm9 = vmand %vm8654_vm12, %vm8750_vm14  ;;  %vm8845_vm12 = vcmp.eq.s32.totalorder %v13870_v14, %v13854_v47 }
 0x6fa   : > { %vm13923_vm15 = vmand %vm8841_vm4, %vm8905_vm8  ;;  %v8876_v24 = vpop.permute.xlu1 %8875  ;;  %vm8656_vm4 = vcmp.eq.s32.totalorder %v13870_v14, %v13779_v33  ;;  %vm8752_vm8 = vcmp.eq.s32.totalorder %v13827_v49, 1  ;;  %v15214_v5 = vmov 0 }
 0x6fb   : > { %9198 = vperm.xlu0 %10975, %v15169_v20   ;;  %v15195_v58 = vsel %vm13923_vm15, 4294967295, %v15194_v58  ;;  %v7497_v20 = vld [vmem:[%s14923_s13] sm:$0x3]  ;;  %vm8906_vm2 = vcmp.eq.s32.totalorder %v8876_v24, 1 }
 0x6fc   : > { %v8879_v16 = vpop.permute.xlu0 %8878  ;;  %vm13937_vm15 = vmand %vm8842_vm10, %vm8906_vm2  ;;  %v13948_v39 = vrot.slane %v7497_v20, %v15200_v34  ;;  %v13956_v27 = vrot.slane %v7497_v20, %v15203_v30 }
 0x6fd   : > { %9189 = vperm.xlu1 %10976, %v13597_v11   ;;  %vm8907_vm6 = vcmp.eq.s32.totalorder %v8879_v16, 1  ;;  %v15197_v1 = vsel %vm13937_vm15, 4294967295, %v15196_v1  ;;  %vm13958_vm10 = vmand %vm8656_vm4, %vm8752_vm8  ;;  %vm8846_vm8 = vcmp.eq.s32.totalorder %v13870_v14, %v13858_v28 }
 0x6fe   : > { %vm13950_vm1 = vmand %vm8843_vm0, %vm8907_vm6  ;;  %v8882_v33 = vpop.permute.xlu1 %8881  ;;  %vm15011_vm0 = vcmp.eq.s32.totalorder %v13870_v14, 0 }
 0x6ff   : > { %9204 = vperm.xlu0 %10975, %v13628_v8   ;;  %v15201_v8 = vmov 0  ;;  %vm8908_vm14 = vcmp.eq.s32.totalorder %v8882_v33, 1  ;;  %vm13974_vm4 = vmor %vm15011_vm0, %vm13941_vm9  ;;  %vm8847_vm9 = vcmp.eq.s32.totalorder %v13870_v14, %v13860_v48  ;;  %v15216_v48 = vmov 0 }
 0x700   : > { %v15202_v8 = vsel %vm13950_vm1, 4294967295, %v15201_v8  ;;  %v8885_v49 = vpop.permute.xlu0 %8884  ;;  %vm13966_vm6 = vmand %vm8844_vm3, %vm8908_vm14  ;;  %v15209_v19 = vsel %vm13974_vm4, 4294967295, %v15208_v19  ;;  %v15218_v33 = vmov 0  ;;  %vm15243_vm4 = vcmp.eq.s32.totalorder %v13870_v14, %v13749_v53 }
 0x701   : > { %9195 = vperm.xlu1 %10976, %v15168_v45   ;;  %vm8909_vm2 = vcmp.eq.s32.totalorder %v8885_v49, 1  ;;  %v15207_v55 = vsel %vm13966_vm6, 4294967295, %v15206_v55  ;;  %vm13991_vm3 = vmor %vm15011_vm0, %vm13958_vm10  ;;  %v15296_v53 = vmov 0 }
 0x702   : > { %vm13981_vm1 = vmand %vm8845_vm12, %vm8909_vm2  ;;  %v8888_v60 = vpop.permute.xlu1 %8887  ;;  %v15213_v61 = vsel %vm13991_vm3, 4294967295, %v15212_v61  ;;  %vm8848_vm2 = vcmp.eq.s32.totalorder %v13870_v14, %v13864_v31  ;;  %vm15227_vm3 = vcmp.eq.s32.totalorder %v13870_v14, %v13732_v25 }
 0x703   : > { %9210 = vperm.xlu0 %10975, %v13652_v42   ;;  %v15211_v29 = vsel %vm13981_vm1, 4294967295, %v15210_v29  ;;  %vm8910_vm12 = vcmp.eq.s32.totalorder %v8888_v60, 1 }
 0x704   : > { %v8891_v4 = vpop.permute.xlu0 %8890  ;;  %vm14002_vm14 = vmand %vm8846_vm8, %vm8910_vm12  ;;  %vm8849_vm8 = vcmp.eq.s32.totalorder %v13870_v14, %v13866_v46 }
 0x705   : > { %9201 = vperm.xlu1 %10976, %v13645_v32   ;;  %v15215_v5 = vsel %vm14002_vm14, 4294967295, %v15214_v5  ;;  %vm8911_vm10 = vcmp.eq.s32.totalorder %v8891_v4, 1 }
 0x706   : > { %vm14013_vm1 = vmand %vm8847_vm9, %vm8911_vm10  ;;  %v8894_v28 = vpop.permute.xlu1 %8893 }
 0x707   : > { %9216 = vperm.xlu0 %10975, %v13675_v23   ;;  %v15217_v48 = vsel %vm14013_vm1, 4294967295, %v15216_v48  ;;  %vm8912_vm12 = vcmp.eq.s32.totalorder %v8894_v28, 1  ;;  %vm15239_vm1 = vcmp.eq.s32.totalorder %v13870_v14, %v13747_v51 }
 0x708   : > { %v8897_v11 = vpop.permute.xlu0 %8896  ;;  %vm14020_vm6 = vmand %vm8848_vm2, %vm8912_vm12  ;;  %vm15222_vm12 = vcmp.eq.s32.totalorder %v13783_v56, 1  ;;  %vm15235_vm2 = vcmp.eq.s32.totalorder %v13870_v14, %v13730_v35  ;;  %v15291_v35 = vmov 0 }
 0x709   : > { %9207 = vperm.xlu1 %10976, %v13669_v3   ;;  %v15219_v33 = vsel %vm14020_vm6, 4294967295, %v15218_v33  ;;  %vm8913_vm0 = vcmp.eq.s32.totalorder %v8897_v11, 1  ;;  %vm15231_vm6 = vcmp.eq.s32.totalorder %v13870_v14, %v13741_v44 }
 0x70a   : > { %vm14029_vm10 = vmand %vm8849_vm8, %vm8913_vm0  ;;  %vm15226_vm0 = vcmp.eq.s32.totalorder %v13786_v21, 1  ;;  %vm15230_vm8 = vcmp.eq.s32.totalorder %v13789_v7, 1 }
 0x70b   : > { %vm14108_vm14 = vmand %vm15231_vm6, %vm15230_vm8  ;;  %vm15242_vm6 = vcmp.eq.s32.totalorder %v13798_v26, 1  ;;  %vm15247_vm8 = vcmp.eq.s32.totalorder %v13801_v63, 1  ;;  %v15249_v26 = vmov 0 }
 0x70d   : > { %9213 = vperm.xlu1 %10976, %v13678_v22   ;;  %v14037_v4 = vpop.permute.xlu0 %8950 }
 0x711   : > { %v14046_v11 = vpop.permute.xlu0 %8959 }
 0x724   : > { %v7976_v45 = vpop.f32.mrb[144].mxu0 }
 0x725   : > { %v10493_v42 = vadd.f32 %v7976_v45, %v13948_v39  ;;  %v7978_v47 = vpop.f32.mrb[145].mxu0 }
 0x726   : > { %v10494_v43 = vadd.f32 %v7978_v47, %v13956_v27  ;;  %v7980_v36 = vpop.f32.mrb[146].mxu0  ;;  %v14033_v47 = vpop.permute.xlu1 %8947 }
 0x727   : > { %v8055_v2 = vmul.f32 0.01, %v10493_v42  ;;  %v10495_v32 = vadd.f32 %v7980_v36, %v13948_v39  ;;  %v7982_v54 = vpop.f32.mrb[147].mxu0 }
 0x728   : > { %v8056_v24 = vmul.f32 0.01, %v10494_v43  ;;  %v10496_v16 = vadd.f32 %v7982_v54, %v13956_v27 }
 0x729   : > { %v8057_v23 = vmul.f32 0.01, %v10495_v32  ;;  %v8087_v31 = vmax.f32 %v10493_v42, %v8055_v2  ;;  %v15220_v42 = vmov 0 }
 0x72a   : > { %v8058_v20 = vmul.f32 0.01, %v10496_v16  ;;  %v8088_v49 = vmax.f32 %v10494_v43, %v8056_v24  ;;  %v15221_v42 = vsel %vm14029_vm10, 4294967295, %v15220_v42  ;;  %v11606_v24 = vld [vmem:[%s14926_s16 + $0x8] sm:$0xff]   ;;  %v14044_v22 = vpop.permute.xlu1 %8953  ;;  %vm15223_vm10 = vcmp.eq.s32.totalorder %v13870_v14, %v13743_v41 }
 0x72b   : > { %v8089_v34 = vmax.f32 %v10495_v32, %v8057_v23  ;;  %vm14078_vm9 = vmand %vm15223_vm10, %vm15222_vm12 }
 0x72c   : > { %v8090_v30 = vmax.f32 %v10496_v16, %v8058_v20  ;;  %v7986_v57 = vpop.f32.mrb[148].mxu0  ;;  %vm14094_vm10 = vmand %vm15227_vm3, %vm15226_vm0  ;;  %vm15234_vm0 = vcmp.eq.s32.totalorder %v13792_v52, 1  ;;  %vm15238_vm3 = vcmp.eq.s32.totalorder %v13795_v12, 1  ;;  %v15246_v12 = vld [vmem:[#allocation36_spill] sm:$0xff] }
 0x72d   : > { %v8119_v3 = vpack.c.bf16 %v8089_v34, %v8087_v31  ;;  %v10497_v46 = vadd.f32 %v7986_v57, %v13948_v39  ;;  %v7988_v45 = vpop.f32.mrb[149].mxu0  ;;  %vm14118_vm12 = vmand %vm15235_vm2, %vm15234_vm0  ;;  %vm15248_vm0 = vcmp.eq.s32.totalorder %v13870_v14, %v13753_v10  ;;  %v15256_v10 = vld [vmem:[#allocation27_spill] sm:$0xff] }
 0x72e   : > { %v10498_v60 = vadd.f32 %v7988_v45, %v13956_v27  ;;  %v7990_v43 = vpop.f32.mrb[150].mxu0  ;;  %v8120_v36 = vpack.c.bf16 %v8090_v30, %v8088_v49  ;;  %v11607_v49 = vld [vmem:[%s14926_s16 + $0x10] sm:$0xff]   ;;  %vm14132_vm2 = vmand %vm15239_vm1, %vm15238_vm3 }
 0x72f   : > { %v8059_v2 = vmul.f32 0.01, %v10497_v46  ;;  %v10499_v32 = vadd.f32 %v7990_v43, %v13948_v39  ;;  %v7992_v54 = vpop.f32.mrb[151].mxu0  ;;  %vm14147_vm1 = vmand %vm15243_vm4, %vm15242_vm6  ;;  %vm15251_vm4 = vcmp.eq.s32.totalorder %v13804_v38, 1  ;;  %vm15252_vm6 = vcmp.eq.s32.totalorder %v13870_v14, %v13755_v62 }
 0x730   : > { %v8060_v16 = vmul.f32 0.01, %v10498_v60  ;;  %v10500_v23 = vadd.f32 %v7992_v54, %v13956_v27  ;;  %8302 = vmatprep.mubr.bf16.mxu1 %v8120_v36  ;;  %v14053_v54 = vpop.permute.xlu1 %8956  ;;  %vm14160_vm15 = vmand %vm15248_vm0, %vm15247_vm8  ;;  %vm8747_vm8 = vcmp.eq.s32.totalorder %v15256_v10, 1  ;;  %vm15257_vm0 = vcmp.eq.s32.totalorder %v13810_v37, 1 }
 0x731   : > { %v8061_v28 = vmul.f32 0.01, %v10499_v32  ;;  %8303 = vmatmul.mubr.bf16.vlgmr.msra.gmra.mrb[160].mxu1 %v8119_v3  ;;  %v8091_v31 = vmax.f32 %v10497_v46, %v8059_v2  ;;  %v15250_v26 = vsel %vm14160_vm15, 4294967295, %v15249_v26  ;;  %vm14169_vm3 = vmand %vm15252_vm6, %vm15251_vm4  ;;  %vm15261_vm4 = vcmp.eq.s32.totalorder %v15246_v12, 1 }
 0x732   : > { %v8062_v20 = vmul.f32 0.01, %v10500_v23  ;;  %10270 = vmatpush3.bf16.msra.mxu1 %v13839_v13  ;;  %v8092_v30 = vmax.f32 %v10498_v60, %v8060_v16  ;;  %vm14182_vm15 = vmand %vm15258_vm11, %vm15257_vm0  ;;  %vm15262_vm6 = vcmp.eq.s32.totalorder %v13870_v14, %v13767_v40  ;;  %v15269_v40 = vmov 0 }
 0x733   : > { %v8093_v34 = vmax.f32 %v10499_v32, %v8061_v28  ;;  %10271 = vmatprep.subr.bf16.mxu1 %v11606_v24  ;;  %v14059_v32 = vpop.permute.xlu0 %8965  ;;  %vm14191_vm13 = vmand %vm15262_vm6, %vm15261_vm4 }
 0x734   : > { %v8094_v57 = vmax.f32 %v10500_v23, %v8062_v20  ;;  %v7996_v45 = vpop.f32.mrb[152].mxu0  ;;  %vm14199_vm5 = vmor %vm15265_vm7, %vm14094_vm10 }
 0x735   : > { %v10501_v43 = vadd.f32 %v7996_v45, %v13948_v39  ;;  %v7998_v3 = vpop.f32.mrb[153].mxu0  ;;  %v8121_v36 = vpack.c.bf16 %v8093_v34, %v8091_v31  ;;  %v14083_v34 = vpop.permute.xlu1 %8962  ;;  %vm15268_vm11 = vmmov %vm15265_vm7  ;;  %v15330_v31 = vld [vmem:[#allocation26_spill] sm:$0xff] }
 0x736   : > { %v10502_v13 = vadd.f32 %v7998_v3, %v13956_v27  ;;  %v8000_v46 = vpop.f32.mrb[154].mxu0  ;;  %v8122_v2 = vpack.c.bf16 %v8094_v57, %v8092_v30  ;;  %10272 = vmatpush3.bf16.msra.mxu1 %v11606_v24  ;;  %vm14209_vm0 = vmor %vm15268_vm11, %vm14078_vm9 }
 0x737   : > { %v8063_v60 = vmul.f32 0.01, %v10501_v43  ;;  %v10503_v16 = vadd.f32 %v8000_v46, %v13948_v39  ;;  %v8002_v23 = vpop.f32.mrb[155].mxu0  ;;  %10273 = vmatprep.subr.bf16.mxu1 %v11607_v49  ;;  %v14099_v56 = vpop.permute.xlu0 %8971  ;;  %v15270_v40 = vsel %vm14209_vm0, 4294967295, %v15269_v40  ;;  %vm15274_vm4 = vmmov %vm15268_vm11 }
 0x738   : > { %v8064_v28 = vmul.f32 0.01, %v10502_v13  ;;  %v10504_v20 = vadd.f32 %v8002_v23, %v13956_v27  ;;  %8310 = vmatprep.mubr.bf16.mxu1 %v8122_v2  ;;  %vm14226_vm6 = vmor %vm15274_vm4, %vm14118_vm12 }
 0x739   : > { %v8065_v24 = vmul.f32 0.01, %v10503_v16  ;;  %8311 = vmatmul.mubr.bf16.gmra.mrb[164].mxu1 %v8121_v36  ;;  %v8095_v57 = vmax.f32 %v10501_v43, %v8063_v60  ;;  %v14137_v52 = vpop.permute.xlu1 %8968  ;;  %vm15282_vm12 = vmmov %vm15274_vm4 }
 0x73a   : > { %v8066_v30 = vmul.f32 0.01, %v10504_v20  ;;  %10274 = vmatpush3.bf16.msra.mxu1 %v11607_v49  ;;  %v8096_v21 = vmax.f32 %v10502_v13, %v8064_v28  ;;  %v15280_v49 = vmov 0 }
 0x73b   : > { %v8097_v45 = vmax.f32 %v10503_v16, %v8065_v24  ;;  %v14152_v60 = vpop.permute.xlu0 %8977 }
 0x73c   : > { %v8098_v3 = vmax.f32 %v10504_v20, %v8066_v30  ;;  %v8006_v36 = vpop.f32.mrb[156].mxu0  ;;  %v15255_v20 = vld [vmem:[#allocation29_spill] sm:$0xff]  ;;  %v15312_v30 = vmov 0 }
 0x73d   : > { %v10505_v44 = vadd.f32 %v8006_v36, %v13948_v39  ;;  %v8008_v7 = vpop.f32.mrb[157].mxu0  ;;  %v8123_v43 = vpack.c.bf16 %v8097_v45, %v8095_v57  ;;  %v14203_v37 = vpop.permute.xlu1 %8974  ;;  %vm15271_vm7 = vcmp.eq.s32.totalorder %v13870_v14, %v15255_v20  ;;  %v15277_v36 = vld [vmem:[#allocation28_spill] sm:$0xff] }
 0x73e   : > { %v10506_v13 = vadd.f32 %v8008_v7, %v13956_v27  ;;  %v8010_v46 = vpop.f32.mrb[158].mxu0  ;;  %v8124_v2 = vpack.c.bf16 %v8098_v3, %v8096_v21  ;;  %vm14218_vm10 = vmand %vm15271_vm7, %vm8747_vm8  ;;  %vm8653_vm9 = vcmp.eq.s32.totalorder %v13870_v14, %v15277_v36  ;;  %v15294_v36 = vld [vmem:[#allocation31_spill] sm:$0xff] }
 0x73f   : > { %v8067_v16 = vmul.f32 0.01, %v10505_v44  ;;  %v10507_v23 = vadd.f32 %v8010_v46, %v13948_v39  ;;  %v8012_v28 = vpop.f32.mrb[159].mxu0  ;;  %v14213_v45 = vpop.permute.xlu0 %8983  ;;  %v15278_v46 = vld [vmem:[#allocation23_spill] sm:$0xff]  ;;  %vm15279_vm8 = vmmov %vm15274_vm4 }
 0x740   : > { %v8068_v63 = vmul.f32 0.01, %v10506_v13  ;;  %v10508_v24 = vadd.f32 %v8012_v28, %v13956_v27  ;;  %8318 = vmatprep.mubr.bf16.mxu1 %v8124_v2  ;;  %vm8749_vm11 = vcmp.eq.s32.totalorder %v15278_v46, 1  ;;  %vm14237_vm7 = vmor %vm15279_vm8, %vm14108_vm14 }
 0x741   : > { %v8069_v38 = vmul.f32 0.01, %v10507_v23  ;;  %8319 = vmatmul.mubr.bf16.gmra.mrb[168].mxu1 %v8123_v43  ;;  %v8099_v41 = vmax.f32 %v10505_v44, %v8067_v16  ;;  %v15281_v49 = vsel %vm14237_vm7, 4294967295, %v15280_v49  ;;  %vm14246_vm4 = vmor %vm15282_vm12, %vm14147_vm1 }
 0x742   : > { %v8070_v57 = vmul.f32 0.01, %v10508_v24  ;;  %v8100_v44 = vmax.f32 %v10506_v13, %v8068_v63  ;;  %vm15285_vm14 = vmmov %vm15279_vm8  ;;  %v15286_v63 = vmov 0  ;;  %v15350_v13 = vmov 0 }
 0x743   : > { %v8101_v21 = vmax.f32 %v10507_v23, %v8069_v38  ;;  %v14250_v23 = vpop.permute.xlu1 %8980  ;;  %vm14257_vm8 = vmor %vm15285_vm14, %vm14132_vm2  ;;  %v14261_v51 = vpop.permute.xlu0 %8989 }
 0x744   : > { %v8102_v7 = vmax.f32 %v10508_v24, %v8070_v57  ;;  %v8016_v43 = vpop.f32.mrb[160].mxu0  ;;  %v15287_v63 = vsel %vm14257_vm8, 4294967295, %v15286_v63  ;;  %vm14269_vm1 = vmand %vm8653_vm9, %vm8749_vm11  ;;  %v15288_v57 = vmov 0  ;;  %vm8751_vm9 = vcmp.eq.s32.totalorder %v15294_v36, 1 }
 0x745   : > { %v10509_v2 = vadd.f32 %v8016_v43, %v13948_v39  ;;  %v8018_v12 = vpop.f32.mrb[161].mxu0  ;;  %v8125_v16 = vpack.c.bf16 %v8101_v21, %v8099_v41  ;;  %v15289_v57 = vsel %vm14269_vm1, 4294967295, %v15288_v57  ;;  %vm15290_vm2 = vmmov %vm15282_vm12  ;;  %v15293_v41 = vld [vmem:[#allocation30_spill] sm:$0xff] }
 0x746   : > { %v10510_v25 = vadd.f32 %v8018_v12, %v13956_v27  ;;  %v8020_v28 = vpop.f32.mrb[162].mxu0  ;;  %v8126_v20 = vpack.c.bf16 %v8102_v7, %v8100_v44  ;;  %vm14277_vm12 = vmor %vm15290_vm2, %vm14169_vm3  ;;  %vm15298_vm3 = vnez %v15181_v6  ;;  %v15316_v6 = vmov 0 }
 0x747   : > { %v8071_v24 = vmul.f32 0.01, %v10509_v2  ;;  %v10511_v10 = vadd.f32 %v8020_v28, %v13948_v39  ;;  %v8022_v38 = vpop.f32.mrb[163].mxu0  ;;  %v15292_v35 = vsel %vm14277_vm12, 4294967295, %v15291_v35  ;;  %vm15295_vm11 = vmmov %vm15290_vm2  ;;  %v14299_v43 = vpop.permute.xlu1 %8986  ;;  %vm8996_vm12 = vcmp.eq.s32.totalorder %v13870_v14, %v14044_v22 }
 0x748   : > { %v8072_v21 = vmul.f32 0.01, %v10510_v25  ;;  %v10512_v44 = vadd.f32 %v8022_v38, %v13956_v27  ;;  %8326 = vmatprep.mubr.bf16.mxu1 %v8126_v20  ;;  %vm14289_vm1 = vmor %vm15295_vm11, %vm14182_vm15  ;;  %vm15300_vm11 = vnez %v15250_v26  ;;  %v9012_v12 = vpop.permute.xlu0 %9011  ;;  %v15305_v20 = vmov 0 }
 0x749   : > { %v15297_v53 = vsel %vm14289_vm1, 4294967295, %v15296_v53  ;;  %v8073_v7 = vmul.f32 0.01, %v10511_v10  ;;  %8327 = vmatmul.mubr.bf16.gmra.mrb[172].mxu1 %v8125_v16  ;;  %vm15301_vm1 = vmmov %vm15290_vm2  ;;  %v8103_v16 = vmax.f32 %v10509_v2, %v8071_v24  ;;  %vm15304_vm2 = vcmp.eq.s32.totalorder %v13870_v14, %v15293_v41 }
 0x74a   : > { %v8074_v46 = vmul.f32 0.01, %v10512_v44  ;;  %vm14309_vm8 = vmor %vm15301_vm1, %vm15300_vm11  ;;  %vm15307_vm15 = vnez %v15185_v9  ;;  %vm9058_vm0 = vcmp.eq.s32.totalorder %v9012_v12, 1  ;;  %v8104_v26 = vmax.f32 %v10510_v25, %v8072_v21 }
 0x74b   : > { %v8105_v28 = vmax.f32 %v10511_v10, %v8073_v7  ;;  %vm14316_vm14 = vmand %vm15304_vm2, %vm8751_vm9  ;;  %v15308_v2 = vmov 0  ;;  %vm15310_vm9 = vcmp.eq.s32.totalorder %v13870_v14, %v14033_v47  ;;  %v14347_v25 = vpop.permute.xlu1 %8992  ;;  %vm15326_vm7 = vnez %v15289_v57 }
 0x74c   : > { %v15306_v20 = vsel %vm14316_vm14, 4294967295, %v15305_v20  ;;  %v8106_v38 = vmax.f32 %v10512_v44, %v8074_v46  ;;  %v8026_v36 = vpop.f32.mrb[164].mxu0  ;;  %vm14328_vm11 = vmor %vm15301_vm1, %vm14191_vm13  ;;  %v9018_v0 = vpop.permute.xlu0 %9017  ;;  %v15328_v22 = vmov 0 }
 0x74d   : > { %v15309_v2 = vsel %vm14328_vm11, 4294967295, %v15308_v2  ;;  %vm9074_vm2 = vmand %vm15310_vm9, %vm9058_vm0  ;;  %v10513_v24 = vadd.f32 %v8026_v36, %v13948_v39  ;;  %v8028_v10 = vpop.f32.mrb[165].mxu0  ;;  %v8127_v41 = vpack.c.bf16 %v8105_v28, %v8103_v16 }
 0x74e   : > { %vm15311_vm14 = vmor %vm14199_vm5, %vm15298_vm3  ;;  %v10514_v47 = vadd.f32 %v8028_v10, %v13956_v27  ;;  %v8030_v21 = vpop.f32.mrb[166].mxu0  ;;  %v8128_v44 = vpack.c.bf16 %v8106_v38, %v8104_v26  ;;  %v15322_v26 = vmov 0 }
 0x74f   : > { %vm14343_vm13 = vmor %vm15311_vm14, %vm9074_vm2  ;;  %v8075_v7 = vmul.f32 0.01, %v10513_v24  ;;  %v10515_v46 = vadd.f32 %v8030_v21, %v13948_v39  ;;  %v8032_v12 = vpop.f32.mrb[167].mxu0  ;;  %vm15318_vm14 = vnez %v15189_v17  ;;  %vm9060_vm2 = vcmp.eq.s32.totalorder %v9018_v0, 1  ;;  %v9015_v38 = vpop.permute.xlu1 %9014  ;;  %v15334_v0 = vld [vmem:[#allocation33_spill] sm:$0xff] }
 0x750   : > { %v15313_v30 = vsel %vm14343_vm13, 4294967295, %v15312_v30  ;;  %vm15315_vm9 = vmmov %vm15301_vm1  ;;  %v8076_v16 = vmul.f32 0.01, %v10514_v47  ;;  %v10516_v3 = vadd.f32 %v8032_v12, %v13956_v27  ;;  %8334 = vmatprep.mubr.bf16.mxu1 %v8128_v44  ;;  %v9024_v9 = vpop.permute.xlu0 %9023  ;;  %vm15335_vm13 = vnez %v15270_v40 }
 0x751   : > { %vm14358_vm5 = vmor %vm15315_vm9, %vm14218_vm10  ;;  %v8077_v28 = vmul.f32 0.01, %v10515_v46  ;;  %8335 = vmatmul.mubr.bf16.gmra.mrb[176].mxu1 %v8127_v41  ;;  %v8107_v10 = vmax.f32 %v10513_v24, %v8075_v7  ;;  %vm15332_vm10 = vnez %v15297_v53  ;;  %v15338_v24 = vmov 0 }
 0x752   : > { %v15317_v6 = vsel %vm14358_vm5, 4294967295, %v15316_v6  ;;  %vm9076_vm9 = vmand %vm8996_vm12, %vm9060_vm2  ;;  %v8078_v36 = vmul.f32 0.01, %v10516_v3  ;;  %vm15327_vm5 = vcmp.eq.s32.totalorder %v13870_v14, 0  ;;  %v8108_v57 = vmax.f32 %v10514_v47, %v8076_v16 }
 0x753   : > { %vm15321_vm3 = vmor %vm14226_vm6, %vm15307_vm15  ;;  %vm9059_vm15 = vcmp.eq.s32.totalorder %v9015_v38, 1  ;;  %v8109_v41 = vmax.f32 %v10515_v46, %v8077_v28  ;;  %vm8753_vm6 = vcmp.eq.s32.totalorder %v15334_v0, 1  ;;  %vm15336_vm12 = vnez %v15183_v15  ;;  %v9021_v40 = vpop.permute.xlu1 %9020 }
 0x754   : > { %vm14382_vm0 = vmor %vm15321_vm3, %vm9076_vm9  ;;  %vm15331_vm9 = vnez %v15197_v1  ;;  %v8110_v21 = vmax.f32 %v10516_v3, %v8078_v36  ;;  %v8036_v44 = vpop.f32.mrb[168].mxu0  ;;  %v15344_v16 = vmov 0  ;;  %v15382_v1 = vmov 0 }
 0x755   : > { %v15323_v26 = vsel %vm14382_vm0, 4294967295, %v15322_v26  ;;  %vm14394_vm1 = vmor %vm15327_vm5, %vm15326_vm7  ;;  %vm15333_vm7 = vcmp.eq.s32.totalorder %v13870_v14, %v14037_v4  ;;  %v10517_v4 = vadd.f32 %v8036_v44, %v13948_v39  ;;  %v8038_v7 = vpop.f32.mrb[169].mxu0  ;;  %v8129_v47 = vpack.c.bf16 %v8109_v41, %v8107_v10 }
 0x756   : > { %v15329_v22 = vsel %vm14394_vm1, 4294967295, %v15328_v22  ;;  %vm9075_vm5 = vmand %vm15333_vm7, %vm9059_vm15  ;;  %vm9062_vm1 = vcmp.eq.s32.totalorder %v9024_v9, 1  ;;  %vm15341_vm0 = vcmp.eq.s32.totalorder %v13870_v14, %v14046_v11  ;;  %v10518_v15 = vadd.f32 %v8038_v7, %v13956_v27  ;;  %v8040_v46 = vpop.f32.mrb[170].mxu0 }
 0x757   : > { %vm15337_vm2 = vmor %vm15335_vm13, %vm15336_vm12  ;;  %v8130_v12 = vpack.c.bf16 %v8110_v21, %v8108_v57  ;;  %vm15342_vm13 = vnez %v15306_v20  ;;  %vm15343_vm12 = vcmp.eq.s32.totalorder %v13870_v14, 0  ;;  %v15347_v11 = vmov 0  ;;  %v9030_v20 = vpop.permute.xlu0 %9029  ;;  %v8042_v38 = vpop.f32.mrb[171].mxu0 }
 0x758   : > { %vm14417_vm11 = vmor %vm15337_vm2, %vm9075_vm5  ;;  %vm9061_vm7 = vcmp.eq.s32.totalorder %v9021_v40, 1  ;;  %v8079_v3 = vmul.f32 0.01, %v10517_v4  ;;  %v10519_v28 = vadd.f32 %v8040_v46, %v13948_v39  ;;  %v8080_v17 = vmul.f32 0.01, %v10518_v15 }
 0x759   : > { %v15339_v24 = vsel %vm14417_vm11, 4294967295, %v15338_v24  ;;  %vm9078_vm3 = vmand %vm15341_vm0, %vm9062_vm1  ;;  %v10520_v36 = vadd.f32 %v8042_v38, %v13956_v27  ;;  %8342 = vmatprep.mubr.bf16.mxu1 %v8130_v12  ;;  %vm15356_vm11 = vnez %v15187_v18  ;;  %v15358_v9 = vmov 0 }
 0x75a   : > { %vm14434_vm2 = vmor %vm15343_vm12, %vm15342_vm13  ;;  %vm15349_vm13 = vcmp.eq.s32.totalorder %v13870_v14, %v15330_v31  ;;  %v8081_v31 = vmul.f32 0.01, %v10519_v28  ;;  %8343 = vmatmul.mubr.bf16.gmra.mrb[180].mxu1 %v8129_v47  ;;  %v15366_v18 = vmov 0  ;;  %v8111_v10 = vmax.f32 %v10517_v4, %v8079_v3 }
 0x75b   : > { %v15345_v16 = vsel %vm14434_vm2, 4294967295, %v15344_v16  ;;  %vm15346_vm0 = vmor %vm14246_vm4, %vm15318_vm14  ;;  %vm15362_vm4 = vcmp.eq.s32.totalorder %v13870_v14, %v14059_v32  ;;  %v8112_v32 = vmax.f32 %v10518_v15, %v8080_v17  ;;  %v15377_v47 = vmov 0 }
 0x75c   : > { %vm14445_vm1 = vmor %vm15346_vm0, %vm9078_vm3  ;;  %vm15354_vm0 = vcmp.eq.s32.totalorder %v13870_v14, %v14053_v54  ;;  %v9027_v54 = vpop.permute.xlu1 %9026  ;;  %v8113_v41 = vmax.f32 %v10519_v28, %v8081_v31  ;;  %v8046_v21 = vpop.f32.mrb[172].mxu0 }
 0x75d   : > { %v15348_v11 = vsel %vm14445_vm1, 4294967295, %v15347_v11  ;;  %vm14455_vm12 = vmand %vm15349_vm13, %vm8753_vm6  ;;  %vm9064_vm1 = vcmp.eq.s32.totalorder %v9030_v20, 1  ;;  %vm8999_vm6 = vcmp.eq.s32.totalorder %v13870_v14, %v14083_v34  ;;  %vm15355_vm13 = vnez %v15281_v49  ;;  %v9036_v49 = vpop.permute.xlu0 %9035  ;;  %v8048_v44 = vpop.f32.mrb[173].mxu0 }
 0x75e   : > { %v15351_v13 = vsel %vm14455_vm12, 4294967295, %v15350_v13  ;;  %vm9077_vm5 = vmand %vm15354_vm0, %vm9061_vm7  ;;  %vm15360_vm7 = vnez %v15202_v8  ;;  %vm15361_vm0 = vnez %v15317_v6  ;;  %v8082_v34 = vmul.f32 0.01, %v10520_v36  ;;  %v8050_v4 = vpop.f32.mrb[174].mxu0  ;;  %v11612_v6 = vld [vmem:[%s14926_s16 + $0x38] sm:$0xff]  }
 0x75f   : > { %vm15357_vm12 = vmor %vm15355_vm13, %vm15356_vm11  ;;  %vm9063_vm15 = vcmp.eq.s32.totalorder %v9027_v54, 1  ;;  %vm15368_vm11 = vnez %v15287_v63  ;;  %v8131_v0 = vpack.c.bf16 %v8113_v41, %v8111_v10  ;;  %v10523_v15 = vadd.f32 %v8050_v4, %v13948_v39  ;;  %v8052_v46 = vpop.f32.mrb[175].mxu0 }
 0x760   : > { %vm14474_vm2 = vmor %vm15357_vm12, %vm9077_vm5  ;;  %vm15363_vm5 = vnez %v15292_v35  ;;  %vm15364_vm12 = vnez %v15193_v50  ;;  %v8114_v57 = vmax.f32 %v10520_v36, %v8082_v34  ;;  %v15371_v50 = vmov 0  ;;  %v9033_v63 = vpop.permute.xlu1 %9032 }
 0x761   : > { %v15359_v9 = vsel %vm14474_vm2, 4294967295, %v15358_v9  ;;  %vm9080_vm14 = vmand %vm15362_vm4, %vm9064_vm1  ;;  %vm9066_vm1 = vcmp.eq.s32.totalorder %v9036_v49, 1  ;;  %v10521_v35 = vadd.f32 %v8046_v21, %v13948_v39  ;;  %vm15375_vm4 = vcmp.eq.s32.totalorder %v13870_v14, %v14099_v56  ;;  %v9042_v56 = vpop.permute.xlu0 %9041 }
 0x762   : > { %vm15365_vm13 = vmor %vm15363_vm5, %vm15364_vm12  ;;  %vm15369_vm5 = vnez %v15191_v59  ;;  %v10522_v59 = vadd.f32 %v8048_v44, %v13956_v27  ;;  %v8132_v7 = vpack.c.bf16 %v8114_v57, %v8112_v32  ;;  %v10524_v53 = vadd.f32 %v8052_v46, %v13956_v27 }
 0x763   : > { %vm14492_vm2 = vmor %vm15365_vm13, %vm9080_vm14  ;;  %v8083_v40 = vmul.f32 0.01, %v10521_v35  ;;  %vm9068_vm13 = vcmp.eq.s32.totalorder %v9042_v56, 1  ;;  %v8085_v39 = vmul.f32 0.01, %v10523_v15 }
 0x764   : > { %v15367_v18 = vsel %vm14492_vm2, 4294967295, %v15366_v18  ;;  %vm9079_vm3 = vmand %vm8999_vm6, %vm9063_vm15  ;;  %vm15373_vm15 = vnez %v15211_v29  ;;  %vm15374_vm6 = vnez %v15329_v22  ;;  %v8084_v12 = vmul.f32 0.01, %v10522_v59  ;;  %8350 = vmatprep.mubr.bf16.mxu1 %v8132_v7  ;;  %v9039_v27 = vpop.permute.xlu1 %9038 }
 0x765   : > { %vm15370_vm14 = vmor %vm15368_vm11, %vm15369_vm5  ;;  %8351 = vmatmul.mubr.bf16.gmra.mrb[184].mxu1 %v8131_v0  ;;  %v9048_v62 = vpop.permute.xlu0 %9047  ;;  %v8115_v20 = vmax.f32 %v10521_v35, %v8083_v40  ;;  %v8117_v3 = vmax.f32 %v10523_v15, %v8085_v39  ;;  %v15416_v29 = vmov 0 }
 0x766   : > { %vm14503_vm12 = vmor %vm15370_vm14, %vm9079_vm3  ;;  %vm9065_vm14 = vcmp.eq.s32.totalorder %v9033_v63, 1  ;;  %vm15392_vm3 = vnez %v15207_v55  ;;  %v8116_v28 = vmax.f32 %v10522_v59, %v8084_v12 }
 0x767   : > { %v15372_v50 = vsel %vm14503_vm12, 4294967295, %v15371_v50  ;;  %vm9082_vm2 = vmand %vm15375_vm4, %vm9066_vm1  ;;  %vm15379_vm1 = vcmp.eq.s32.totalorder %v13870_v14, %v14137_v52  ;;  %v8086_v52 = vmul.f32 0.01, %v10524_v53  ;;  %vm15387_vm12 = vnez %v15351_v13 }
 0x768   : > { %vm15376_vm11 = vmor %vm15332_vm10, %vm15331_vm9  ;;  %vm15380_vm9 = vnez %v15195_v58  ;;  %v15389_v58 = vmov 0  ;;  %v9045_v38 = vpop.permute.xlu1 %9044 }
 0x769   : > { %vm14523_vm5 = vmor %vm15376_vm11, %vm9082_vm2  ;;  %v9054_v8 = vpop.permute.xlu0 %9053 }
 0x76a   : > { %v15378_v47 = vsel %vm14523_vm5, 4294967295, %v15377_v47  ;;  %vm9081_vm4 = vmand %vm15379_vm1, %vm9065_vm14  ;;  %vm15386_vm5 = vcmp.eq.s32.totalorder %v13870_v14, %v14152_v60  ;;  %v15394_v60 = vmov 0 }
 0x76b   : > { %vm15381_vm2 = vmor %vm14309_vm8, %vm15380_vm9  ;;  %vm15388_vm8 = vcmp.eq.s32.totalorder %v13870_v14, 0  ;;  %vm9006_vm9 = vcmp.eq.s32.totalorder %v13870_v14, %v14213_v45  ;;  %v8118_v45 = vmax.f32 %v10524_v53, %v8086_v52 }
 0x76c   : > { %vm14539_vm11 = vmor %vm15381_vm2, %vm9081_vm4  ;;  %vm15391_vm2 = vnez %v15309_v2  ;;  %v8133_v2 = vpack.c.bf16 %v8117_v3, %v8115_v20 }
 0x76d   : > { %v15383_v1 = vsel %vm14539_vm11, 4294967295, %v15382_v1  ;;  %vm9084_vm10 = vmand %vm15386_vm5, %vm9068_vm13  ;;  %vm9067_vm13 = vcmp.eq.s32.totalorder %v9039_v27, 1 }
 0x76e   : > { %vm14554_vm4 = vmor %vm15388_vm8, %vm15387_vm12  ;;  %vm15396_vm12 = vcmp.eq.s32.totalorder %v13870_v14, %v14203_v37  ;;  %vm9070_vm8 = vcmp.eq.s32.totalorder %v9048_v62, 1  ;;  %v8134_v37 = vpack.c.bf16 %v8118_v45, %v8116_v28 }
 0x76f   : > { %v15390_v58 = vsel %vm14554_vm4, 4294967295, %v15389_v58  ;;  %vm15393_vm11 = vmor %vm15391_vm2, %vm15392_vm3  ;;  %vm9005_vm4 = vcmp.eq.s32.totalorder %v13870_v14, %v14250_v23  ;;  %vm9008_vm2 = vcmp.eq.s32.totalorder %v13870_v14, %v14261_v51  ;;  %v15403_v23 = vmov 0 }
 0x770   : > { %vm14565_vm14 = vmor %vm15393_vm11, %vm9084_vm10  ;;  %8358 = vmatprep.mubr.bf16.mxu1 %v8134_v37 }
 0x771   : > { %v15395_v60 = vsel %vm14565_vm14, 4294967295, %v15394_v60  ;;  %vm9083_vm5 = vmand %vm15396_vm12, %vm9067_vm13  ;;  %vm15400_vm13 = vnez %v15209_v19  ;;  %vm15401_vm12 = vnez %v15215_v5  ;;  %8359 = vmatmul.mubr.bf16.gmra.mrb[188].mxu1 %v8133_v2  ;;  %v9051_v5 = vpop.permute.xlu1 %9050 }
 0x772   : > { %vm15397_vm3 = vmor %vm15361_vm0, %vm15360_vm7  ;;  %vm9069_vm7 = vcmp.eq.s32.totalorder %v9045_v38, 1 }
 0x773   : > { %vm14579_vm10 = vmor %vm15397_vm3, %vm9083_vm5  ;;  %vm9072_vm5 = vcmp.eq.s32.totalorder %v9054_v8, 1 }
 0x774   : > { %vm9086_vm11 = vmand %vm9006_vm9, %vm9070_vm8  ;;  %vm9007_vm9 = vcmp.eq.s32.totalorder %v13870_v14, %v14299_v43  ;;  %v11610_v43 = vld [vmem:[%s14926_s16 + $0x28] sm:$0xff]  }
 0x775   : > { %vm15402_vm14 = vmor %vm15400_vm13, %vm15401_vm12 }
 0x776   : > { %vm14590_vm1 = vmor %vm15402_vm14, %vm9086_vm11  ;;  %vm15408_vm11 = vnez %v15213_v61  ;;  %v9057_v61 = vpop.permute.xlu1 %9056 }
 0x777   : > { %v15404_v23 = vsel %vm14590_vm1, 4294967295, %v15403_v23  ;;  %vm9085_vm0 = vmand %vm9005_vm4, %vm9069_vm7  ;;  %vm15409_vm4 = vnez %v15219_v33  ;;  %vm9071_vm7 = vcmp.eq.s32.totalorder %v9051_v5, 1  ;;  %v15420_v33 = vmov 0 }
 0x778   : > { %vm15405_vm8 = vmor %vm15374_vm6, %vm15373_vm15  ;;  %vm9009_vm15 = vcmp.eq.s32.totalorder %v13870_v14, %v14347_v25  ;;  %vm15413_vm6 = vnez %v15345_v16  ;;  %v11611_v25 = vld [vmem:[%s14926_s16 + $0x30] sm:$0xff]   ;;  %v14651_v16 = vld [vmem:[%s14925_s15] ss:$0 sm:$0xff] }
 0x779   : > { %vm14601_vm3 = vmor %vm15405_vm8, %vm9085_vm0  ;;  %vm15414_vm0 = vnez %v15217_v48  ;;  %vm15418_vm8 = vnez %v15221_v42  ;;  %v11608_v48 = vld [vmem:[%s14926_s16 + $0x18] sm:$0xff]   ;;  %v11609_v42 = vld [vmem:[%s14926_s16 + $0x20] sm:$0xff]  }
 0x77a   : > { %vm9088_vm14 = vmand %vm9008_vm2, %vm9072_vm5  ;;  %10275 = vmatprep.subr.bf16.mxu1 %v11608_v48 }
 0x77b   : > { %vm15410_vm13 = vmor %vm15408_vm11, %vm15409_vm4  ;;  %vm9073_vm4 = vcmp.eq.s32.totalorder %v9057_v61, 1  ;;  %10276 = vmatpush3.bf16.msra.mxu1 %v11608_v48 }
 0x77c   : > { %vm14610_vm12 = vmor %vm15410_vm13, %vm9088_vm14  ;;  %vm15419_vm14 = vnez %v15390_v58  ;;  %10277 = vmatprep.subr.bf16.mxu1 %v11609_v42 }
 0x77d   : > { %vm9087_vm1 = vmand %vm9007_vm9, %vm9071_vm7 }
 0x77e   : > { %vm15415_vm2 = vmor %vm15413_vm6, %vm15414_vm0 }
 0x77f   : > { %vm14621_vm5 = vmor %vm15415_vm2, %vm9087_vm1  ;;  %10278 = vmatpush3.bf16.msra.mxu1 %v11609_v42 }
 0x780   : > { %v15417_v29 = vsel %vm14621_vm5, 4294967295, %v15416_v29  ;;  %vm8945_vm11 = vmor %vm15419_vm14, %vm15418_vm8  ;;  %10279 = vmatprep.subr.bf16.mxu1 %v11610_v43 }
 0x781   : > { %vm9089_vm9 = vmand %vm9009_vm15, %vm9073_vm4 }
 0x782   : > { %vm14629_vm13 = vmor %vm8945_vm11, %vm9089_vm9 }
 0x783   : > { %v15421_v33 = vsel %vm14629_vm13, 4294967295, %v15420_v33  ;;  %10280 = vmatpush3.bf16.msra.mxu1 %v11610_v43  ;;  %vm15438_vm13 = vnez %v15367_v18 }
 0x784   : > { %10281 = vmatprep.subr.bf16.mxu1 %v11611_v25 }
 0x787   : > { %10282 = vmatpush3.bf16.msra.mxu1 %v11611_v25 }
 0x788   : > { %10283 = vmatprep.subr.bf16.mxu1 %v11612_v6 }
 0x78b   : > { %10284 = vmatpush3.bf16.msra.mxu1 %v11612_v6 }
 0x804   : > { %v10181_v22 = vpop.f32.mrb[160].mxu1 }
 0x805   : > { %v10182_v13 = vpop.f32.mrb[161].mxu1 }
 0x806   : > { %v10183_v17 = vadd.f32 %v10182_v13, %v10181_v22  ;;  %v10184_v36 = vpop.f32.mrb[162].mxu1 }
 0x807   : > { %v10185_v31 = vpop.f32.mrb[163].mxu1 }
 0x808   : > { %v8305_v54 = vadd.f32 %v10183_v17, %v14651_v16  ;;  %v10186_v34 = vadd.f32 %v10185_v31, %v10184_v36 }
 0x80a   : > { %v8367_v49 = vmul.f32 0.01, %v8305_v54  ;;  %v8308_v10 = vadd.f32 %v10186_v34, %v14651_v16 }
 0x80c   : > { %v8368_v41 = vmul.f32 0.01, %v8308_v10  ;;  %v10187_v32 = vpop.f32.mrb[164].mxu1  ;;  %v8383_v21 = vmax.f32 %v8305_v54, %v8367_v49 }
 0x80d   : > { %v10188_v57 = vpop.f32.mrb[165].mxu1 }
 0x80e   : > { %v8384_v35 = vmax.f32 %v8308_v10, %v8368_v41  ;;  %v10189_v44 = vadd.f32 %v10188_v57, %v10187_v32  ;;  %v10190_v0 = vpop.f32.mrb[166].mxu1 }
 0x80f   : > { %v10191_v63 = vpop.f32.mrb[167].mxu1 }
 0x810   : > { %v8313_v59 = vadd.f32 %v10189_v44, %v14651_v16  ;;  %v10192_v4 = vadd.f32 %v10191_v63, %v10190_v0  ;;  %v8399_v7 = vpack.c.bf16 %v8384_v35, %v8383_v21 }
 0x812   : > { %v8369_v56 = vmul.f32 0.01, %v8313_v59  ;;  %v8316_v40 = vadd.f32 %v10192_v4, %v14651_v16  ;;  %10285 = vmatprep.mubr.bf16.mxu1 %v8399_v7 }
 0x814   : > { %v8370_v15 = vmul.f32 0.01, %v8316_v40  ;;  %v10193_v46 = vpop.f32.mrb[168].mxu1  ;;  %v8385_v53 = vmax.f32 %v8313_v59, %v8369_v56 }
 0x815   : > { %v10194_v12 = vpop.f32.mrb[169].mxu1 }
 0x816   : > { %v8386_v39 = vmax.f32 %v8316_v40, %v8370_v15  ;;  %v10195_v27 = vadd.f32 %v10194_v12, %v10193_v46  ;;  %v10196_v52 = vpop.f32.mrb[170].mxu1 }
 0x817   : > { %v10197_v58 = vpop.f32.mrb[171].mxu1 }
 0x818   : > { %v8400_v62 = vpack.c.bf16 %v8386_v39, %v8385_v53  ;;  %v8321_v20 = vadd.f32 %v10195_v27, %v14651_v16  ;;  %v10198_v3 = vadd.f32 %v10197_v58, %v10196_v52 }
 0x81a   : > { %v8371_v28 = vmul.f32 0.01, %v8321_v20  ;;  %v8324_v45 = vadd.f32 %v10198_v3, %v14651_v16  ;;  %10286 = vmatmul.mubr.bf16.vlgmr.msra.gmra.mrb[192].mxu1 %v8400_v62 }
 0x81c   : > { %v8372_v2 = vmul.f32 0.01, %v8324_v45  ;;  %v10199_v38 = vpop.f32.mrb[172].mxu1  ;;  %v8387_v8 = vmax.f32 %v8321_v20, %v8371_v28 }
 0x81d   : > { %v10200_v37 = vpop.f32.mrb[173].mxu1 }
 0x81e   : > { %v8388_v5 = vmax.f32 %v8324_v45, %v8372_v2  ;;  %v10201_v61 = vadd.f32 %v10200_v37, %v10199_v38  ;;  %v10202_v48 = vpop.f32.mrb[174].mxu1 }
 0x81f   : > { %v10203_v42 = vpop.f32.mrb[175].mxu1 }
 0x820   : > { %v8329_v43 = vadd.f32 %v10201_v61, %v14651_v16  ;;  %v10204_v25 = vadd.f32 %v10203_v42, %v10202_v48  ;;  %v8401_v6 = vpack.c.bf16 %v8388_v5, %v8387_v8 }
 0x822   : > { %v8373_v22 = vmul.f32 0.01, %v8329_v43  ;;  %v8332_v13 = vadd.f32 %v10204_v25, %v14651_v16  ;;  %10289 = vmatprep.mubr.bf16.mxu1 %v8401_v6 }
 0x824   : > { %v8374_v17 = vmul.f32 0.01, %v8332_v13  ;;  %v10205_v36 = vpop.f32.mrb[176].mxu1  ;;  %v8389_v54 = vmax.f32 %v8329_v43, %v8373_v22 }
 0x825   : > { %v10206_v31 = vpop.f32.mrb[177].mxu1 }
 0x826   : > { %v8390_v34 = vmax.f32 %v8332_v13, %v8374_v17  ;;  %v10207_v49 = vadd.f32 %v10206_v31, %v10205_v36  ;;  %v10208_v10 = vpop.f32.mrb[178].mxu1 }
 0x827   : > { %v10209_v41 = vpop.f32.mrb[179].mxu1 }
 0x828   : > { %v8337_v32 = vadd.f32 %v10207_v49, %v14651_v16  ;;  %v10210_v57 = vadd.f32 %v10209_v41, %v10208_v10  ;;  %v8402_v21 = vpack.c.bf16 %v8390_v34, %v8389_v54 }
 0x82a   : > { %v8375_v35 = vmul.f32 0.01, %v8337_v32  ;;  %v8340_v44 = vadd.f32 %v10210_v57, %v14651_v16  ;;  %10290 = vmatmul.mubr.bf16.gmra.mrb[196].mxu1 %v8402_v21  ;;  %v9111_v21 = vpop.permute.xlu1 %9110 }
 0x82b   : > { %vm9155_vm1 = vcmp.eq.s32.totalorder %v13870_v14, %v9111_v21 }
 0x82c   : > { %v8376_v0 = vmul.f32 0.01, %v8340_v44  ;;  %v8391_v4 = vmax.f32 %v8337_v32, %v8375_v35  ;;  %v9108_v35 = vpop.permute.xlu0 %9107 }
 0x82d   : > { %v10211_v63 = vpop.f32.mrb[180].mxu1  ;;  %vm9154_vm0 = vcmp.eq.s32.totalorder %v13870_v14, %v9108_v35 }
 0x82e   : > { %v10212_v59 = vpop.f32.mrb[181].mxu1  ;;  %v8392_v7 = vmax.f32 %v8340_v44, %v8376_v0  ;;  %v9114_v44 = vpop.permute.xlu1 %9113 }
 0x82f   : > { %v10213_v56 = vadd.f32 %v10212_v59, %v10211_v63  ;;  %v10214_v40 = vpop.f32.mrb[182].mxu1  ;;  %vm9156_vm15 = vcmp.eq.s32.totalorder %v13870_v14, %v9114_v44 }
 0x830   : > { %v10215_v15 = vpop.f32.mrb[183].mxu1  ;;  %v8403_v53 = vpack.c.bf16 %v8392_v7, %v8391_v4  ;;  %v9117_v0 = vpop.permute.xlu0 %9116 }
 0x831   : > { %v8345_v46 = vadd.f32 %v10213_v56, %v14651_v16  ;;  %v10216_v12 = vadd.f32 %v10215_v15, %v10214_v40  ;;  %vm9157_vm8 = vcmp.eq.s32.totalorder %v13870_v14, %v9117_v0 }
 0x832   : > { %10293 = vmatprep.mubr.bf16.mxu1 %v8403_v53  ;;  %v14669_v63 = vpop.permute.xlu1 %9119 }
 0x833   : > { %v8377_v39 = vmul.f32 0.01, %v8345_v46  ;;  %v8348_v27 = vadd.f32 %v10216_v12, %v14651_v16 }
 0x834   : > { %v9123_v59 = vpop.permute.xlu0 %9122 }
 0x835   : > { %v8378_v52 = vmul.f32 0.01, %v8348_v27  ;;  %v8393_v20 = vmax.f32 %v8345_v46, %v8377_v39 }
 0x836   : > { %v14671_v4 = vpop.permute.xlu1 %9125 }
 0x837   : > { %v8394_v3 = vmax.f32 %v8348_v27, %v8378_v52 }
 0x838   : > { %v10217_v58 = vpop.f32.mrb[184].mxu1  ;;  %v14673_v7 = vpop.permute.xlu0 %9128 }
 0x839   : > { %v10218_v62 = vpop.f32.mrb[185].mxu1  ;;  %v8404_v8 = vpack.c.bf16 %v8394_v3, %v8393_v20  ;;  %v14705_v3 = vld [vmem:[%s15425_s21] ss:$0 sm:$0xff] }
 0x83a   : > { %v10219_v28 = vadd.f32 %v10218_v62, %v10217_v58  ;;  %v10220_v45 = vpop.f32.mrb[186].mxu1  ;;  %v14675_v56 = vpop.permute.xlu1 %9131 }
 0x83b   : > { %v10221_v2 = vpop.f32.mrb[187].mxu1  ;;  %10294 = vmatmul.mubr.bf16.gmra.mrb[200].mxu1 %v8404_v8 }
 0x83c   : > { %v8353_v38 = vadd.f32 %v10219_v28, %v14651_v16  ;;  %v10222_v37 = vadd.f32 %v10221_v2, %v10220_v45 }
 0x83e   : > { %v8379_v5 = vmul.f32 0.01, %v8353_v38  ;;  %v8356_v61 = vadd.f32 %v10222_v37, %v14651_v16  ;;  %v14679_v40 = vpop.permute.xlu1 %9137 }
 0x840   : > { %v8380_v48 = vmul.f32 0.01, %v8356_v61  ;;  %v8395_v25 = vmax.f32 %v8353_v38, %v8379_v5 }
 0x842   : > { %v8396_v6 = vmax.f32 %v8356_v61, %v8380_v48  ;;  %v14683_v46 = vpop.permute.xlu1 %9143 }
 0x844   : > { %v10223_v42 = vpop.f32.mrb[188].mxu1  ;;  %v8405_v54 = vpack.c.bf16 %v8396_v6, %v8395_v25 }
 0x845   : > { %v10224_v43 = vpop.f32.mrb[189].mxu1 }
 0x846   : > { %v10225_v22 = vadd.f32 %v10224_v43, %v10223_v42  ;;  %v10226_v13 = vpop.f32.mrb[190].mxu1  ;;  %10297 = vmatprep.mubr.bf16.mxu1 %v8405_v54  ;;  %v14687_v53 = vpop.permute.xlu1 %9149 }
 0x847   : > { %v10227_v17 = vpop.f32.mrb[191].mxu1 }
 0x848   : > { %v8361_v36 = vadd.f32 %v10225_v22, %v14651_v16  ;;  %v10228_v31 = vadd.f32 %v10227_v17, %v10226_v13 }
 0x84a   : > { %v8381_v34 = vmul.f32 0.01, %v8361_v36  ;;  %v8364_v49 = vadd.f32 %v10228_v31, %v14651_v16  ;;  %v14677_v16 = vpop.permute.xlu0 %9134  ;;  %v9172_v27 = vpop.permute.xlu1 %9171 }
 0x84b   : > { %vm9218_vm2 = vcmp.eq.s32.totalorder %v9172_v27, 1 }
 0x84c   : > { %v8382_v10 = vmul.f32 0.01, %v8364_v49  ;;  %v8397_v41 = vmax.f32 %v8361_v36, %v8381_v34  ;;  %vm14707_vm9 = vmand %vm9154_vm0, %vm9218_vm2  ;;  %vm15432_vm0 = vnez %v15359_v9 }
 0x84e   : > { %v8398_v32 = vmax.f32 %v8364_v49, %v8382_v10  ;;  %v14681_v15 = vpop.permute.xlu0 %9140  ;;  %v9178_v58 = vpop.permute.xlu1 %9177 }
 0x84f   : > { %vm9220_vm6 = vcmp.eq.s32.totalorder %v9178_v58, 1 }
 0x850   : > { %v8406_v57 = vpack.c.bf16 %v8398_v32, %v8397_v41  ;;  %vm9236_vm4 = vmand %vm9156_vm15, %vm9220_vm6  ;;  %vm15431_vm15 = vnez %v15313_v30 }
 0x851   : > { %vm9250_vm6 = vmor %vm15431_vm15, %vm14707_vm9  ;;  %vm9160_vm9 = vcmp.eq.s32.totalorder %v13870_v14, %v14671_v4  ;;  %vm9161_vm15 = vcmp.eq.s32.totalorder %v13870_v14, %v14673_v7 }
 0x852   : > { %10298 = vmatmul.mubr.bf16.gmra.mrb[204].mxu1 %v8406_v57  ;;  %v14685_v12 = vpop.permute.xlu0 %9146  ;;  %v9184_v43 = vpop.permute.xlu1 %9183 }
 0x856   : > { %v14689_v39 = vpop.permute.xlu0 %9152  ;;  %v9190_v22 = vpop.permute.xlu1 %9189 }
 0x85a   : > { %v9175_v52 = vpop.permute.xlu0 %9174 }
 0x85b   : > { %vm9219_vm7 = vcmp.eq.s32.totalorder %v9175_v52, 1 }
 0x85c   : > { %vm14696_vm14 = vmand %vm9155_vm1, %vm9219_vm7  ;;  %vm15430_vm1 = vnez %v15323_v26 }
 0x85d   : > { %vm9252_vm7 = vmor %vm15430_vm1, %vm9236_vm4  ;;  %vm9224_vm1 = vcmp.eq.s32.totalorder %v9190_v22, 1 }
 0x85e   : > { %v9181_v62 = vpop.permute.xlu0 %9180 }
 0x85f   : > { %vm9221_vm11 = vcmp.eq.s32.totalorder %v9181_v62, 1 }
 0x860   : > { %vm14711_vm5 = vmand %vm9157_vm8, %vm9221_vm11  ;;  %vm15433_vm8 = vnez %v15339_v24 }
 0x861   : > { %vm9253_vm2 = vmor %vm15432_vm0, %vm14711_vm5  ;;  %vm9159_vm5 = vcmp.eq.s32.totalorder %v13870_v14, %v9123_v59 }
 0x862   : > { %vm9251_vm11 = vmor %vm15433_vm8, %vm14696_vm14  ;;  %v9187_v6 = vpop.permute.xlu0 %9186  ;;  %vm9222_vm14 = vcmp.eq.s32.totalorder %v9184_v43, 1 }
 0x863   : > { %vm9223_vm4 = vcmp.eq.s32.totalorder %v9187_v6, 1 }
 0x866   : > { %v9193_v24 = vpop.permute.xlu0 %9192 }
 0x867   : > { %vm9225_vm0 = vcmp.eq.s32.totalorder %v9193_v24, 1 }
 0x86a   : > { %v9199_v44 = vpop.permute.xlu0 %9198 }
 0x8ed   : > { %v10287_v45 = vpop.f32.mrb[192].mxu1 }
 0x8ee   : > { %v8521_v38 = vadd.f32 %v10287_v45, %v14705_v3  ;;  %v8512_v37 = vpop.f32.mrb[193].mxu1 }
 0x8ef   : > { %v8513_v8 = vadd.f32 %v14705_v3, %v8512_v37  ;;  %v10288_v5 = vpop.f32.mrb[194].mxu1 }
 0x8f0   : > { %v9268_v61 = vsel %vm9252_vm7, -100.0, %v8521_v38  ;;  %v8524_v48 = vadd.f32 %v10288_v5, %v14705_v3  ;;  %v8515_v42 = vpop.f32.mrb[195].mxu1  ;;  %vm9158_vm7 = vcmp.eq.s32.totalorder %v13870_v14, %v14669_v63 }
 0x8f1   : > { %9284 = vst [vmem:[%s14728_s8 + $0x10] sm:$0xff] %v9268_v61  ;;  %v9266_v26 = vsel %vm9250_vm6, -100.0, %v8513_v8  ;;  %v8516_v30 = vadd.f32 %v14705_v3, %v8515_v42  ;;  %vm14746_vm6 = vmand %vm9159_vm5, %vm9223_vm4  ;;  %vm15439_vm4 = vnez %v15348_v11  ;;  %v9196_v11 = vpop.permute.xlu1 %9195 }
 0x8f2   : > { %9282 = vst [vmem:[%s14728_s8] sm:$0xff] %v9266_v26  ;;  %v9269_v25 = vsel %vm9253_vm2, -100.0, %v8524_v48  ;;  %vm9240_vm2 = vmand %vm9160_vm9, %vm9224_vm1  ;;  %vm15440_vm1 = vnez %v15383_v1 }
 0x8f3   : > { %9285 = vst [vmem:[%s14728_s8 + $0x18] sm:$0xff] %v9269_v25  ;;  %v9267_v9 = vsel %vm9251_vm11, -100.0, %v8516_v30  ;;  %vm9238_vm8 = vmand %vm9158_vm7, %vm9222_vm14 }
 0x8f4   : > { %9283 = vst [vmem:[%s14728_s8 + $0x8] sm:$0xff] %v9267_v9  ;;  %vm14750_vm11 = vmand %vm9161_vm15, %vm9225_vm0  ;;  %vm9163_vm15 = vcmp.eq.s32.totalorder %v13870_v14, %v14677_v16  ;;  %vm9227_vm0 = vcmp.eq.s32.totalorder %v9199_v44, 1 }
 0x8f5   : > { %vm9256_vm5 = vmor %vm15438_vm13, %vm9240_vm2  ;;  %vm15441_vm13 = vnez %v15372_v50  ;;  %v9202_v1 = vpop.permute.xlu1 %9201  ;;  %vm9164_vm2 = vcmp.eq.s32.totalorder %v13870_v14, %v14679_v40  ;;  %v9205_v50 = vpop.permute.xlu0 %9204 }
 0x8f6   : > { %vm9254_vm9 = vmor %vm15439_vm4, %vm9238_vm8  ;;  %vm9228_vm8 = vcmp.eq.s32.totalorder %v9202_v1, 1 }
 0x8f7   : > { %vm9257_vm7 = vmor %vm15440_vm1, %vm14750_vm11  ;;  %vm9162_vm11 = vcmp.eq.s32.totalorder %v13870_v14, %v14675_v56 }
 0x8f8   : > { %vm9255_vm14 = vmor %vm15441_vm13, %vm14746_vm6  ;;  %vm9226_vm6 = vcmp.eq.s32.totalorder %v9196_v11, 1 }
 0x8f9   : > { %vm14782_vm4 = vmand %vm9163_vm15, %vm9227_vm0  ;;  %vm15449_vm0 = vnez %v15378_v47  ;;  %v9211_v47 = vpop.permute.xlu0 %9210 }
 0x8fa   : > { %vm9244_vm1 = vmand %vm9164_vm2, %vm9228_vm8 }
 0x8fd   : > { %v10291_v17 = vpop.f32.mrb[196].mxu1  ;;  %v9217_v19 = vpop.permute.xlu0 %9216 }
 0x8fe   : > { %v8537_v31 = vadd.f32 %v10291_v17, %v14705_v3  ;;  %v8528_v54 = vpop.f32.mrb[197].mxu1 }
 0x8ff   : > { %v8529_v34 = vadd.f32 %v14705_v3, %v8528_v54  ;;  %v10292_v49 = vpop.f32.mrb[198].mxu1 }
 0x900   : > { %v9272_v10 = vsel %vm9256_vm5, -100.0, %v8537_v31  ;;  %v8540_v41 = vadd.f32 %v10292_v49, %v14705_v3  ;;  %v8531_v32 = vpop.f32.mrb[199].mxu1  ;;  %vm9165_vm5 = vcmp.eq.s32.totalorder %v13870_v14, %v14681_v15  ;;  %v9208_v15 = vpop.permute.xlu1 %9207 }
 0x901   : > { %9288 = vst [vmem:[%s14728_s8 + $0x30] sm:$0xff] %v9272_v10  ;;  %v9270_v18 = vsel %vm9254_vm9, -100.0, %v8529_v34  ;;  %v8532_v57 = vadd.f32 %v14705_v3, %v8531_v32  ;;  %vm9229_vm9 = vcmp.eq.s32.totalorder %v9205_v50, 1 }
 0x902   : > { %9286 = vst [vmem:[%s14728_s8 + $0x20] sm:$0xff] %v9270_v18  ;;  %v9273_v21 = vsel %vm9257_vm7, -100.0, %v8540_v41  ;;  %vm14786_vm7 = vmand %vm9162_vm11, %vm9226_vm6  ;;  %vm9167_vm6 = vcmp.eq.s32.totalorder %v13870_v14, %v14685_v12 }
 0x903   : > { %9289 = vst [vmem:[%s14728_s8 + $0x38] sm:$0xff] %v9273_v21  ;;  %v9271_v35 = vsel %vm9255_vm14, -100.0, %v8532_v57  ;;  %vm14790_vm13 = vmand %vm9165_vm5, %vm9229_vm9  ;;  %vm15448_vm14 = vnez %v15395_v60  ;;  %vm9168_vm5 = vcmp.eq.s32.totalorder %v13870_v14, %v14687_v53 }
 0x904   : > { %9287 = vst [vmem:[%s14728_s8 + $0x28] sm:$0xff] %v9271_v35  ;;  %vm9260_vm15 = vmor %vm15448_vm14, %vm9244_vm1  ;;  %v9214_v45 = vpop.permute.xlu1 %9213  ;;  %vm9169_vm1 = vcmp.eq.s32.totalorder %v13870_v14, %v14689_v39 }
 0x905   : > { %vm9258_vm2 = vmor %vm15449_vm0, %vm14786_vm7  ;;  %vm9232_vm9 = vcmp.eq.s32.totalorder %v9214_v45, 1 }
 0x906   : > { %vm9261_vm8 = vmor %vm14601_vm3, %vm14790_vm13  ;;  %vm9231_vm3 = vcmp.eq.s32.totalorder %v9211_v47, 1  ;;  %vm9233_vm13 = vcmp.eq.s32.totalorder %v9217_v19, 1 }
 0x907   : > { %vm9259_vm11 = vmor %vm14579_vm10, %vm14782_vm4  ;;  %vm9166_vm10 = vcmp.eq.s32.totalorder %v13870_v14, %v14683_v46  ;;  %vm9230_vm4 = vcmp.eq.s32.totalorder %v9208_v15, 1 }
 0x908   : > { %vm14824_vm7 = vmand %vm9167_vm6, %vm9231_vm3  ;;  %vm15457_vm6 = vnez %v15421_v33  ;;  %vm15460_vm3 = vnez %v15417_v29 }
 0x909   : > { %vm9248_vm14 = vmand %vm9168_vm5, %vm9232_vm9 }
 0x90a   : > { %vm14832_vm0 = vmand %vm9169_vm1, %vm9233_vm13 }
 0x90b   : > { %vm9263_vm5 = vmor %vm15460_vm3, %vm14824_vm7 }
 0x90e   : > { %v10295_v59 = vpop.f32.mrb[200].mxu1 }
 0x90f   : > { %v8553_v7 = vadd.f32 %v10295_v59, %v14705_v3  ;;  %v8544_v56 = vpop.f32.mrb[201].mxu1 }
 0x910   : > { %v8545_v16 = vadd.f32 %v14705_v3, %v8544_v56  ;;  %v10296_v40 = vpop.f32.mrb[202].mxu1 }
 0x911   : > { %v9276_v27 = vsel %vm9260_vm15, -100.0, %v8553_v7  ;;  %v8556_v52 = vadd.f32 %v10296_v40, %v14705_v3  ;;  %v8547_v58 = vpop.f32.mrb[203].mxu1  ;;  %vm14828_vm15 = vmand %vm9166_vm10, %vm9230_vm4 }
 0x912   : > { %9292 = vst [vmem:[%s14728_s8 + $0x50] sm:$0xff] %v9276_v27  ;;  %v9274_v60 = vsel %vm9258_vm2, -100.0, %v8545_v16  ;;  %v8548_v62 = vadd.f32 %v14705_v3, %v8547_v58  ;;  %vm9264_vm2 = vmor %vm14610_vm12, %vm9248_vm14 }
 0x913   : > { %9290 = vst [vmem:[%s14728_s8 + $0x40] sm:$0xff] %v9274_v60  ;;  %v9277_v20 = vsel %vm9261_vm8, -100.0, %v8556_v52  ;;  %vm15456_vm8 = vnez %v15404_v23  ;;  %vm9265_vm12 = vmor %vm15457_vm6, %vm14832_vm0 }
 0x914   : > { %9293 = vst [vmem:[%s14728_s8 + $0x58] sm:$0xff] %v9277_v20  ;;  %v9275_v28 = vsel %vm9259_vm11, -100.0, %v8548_v62  ;;  %vm9262_vm11 = vmor %vm15456_vm8, %vm14828_vm15 }
 0x915   : > { %9291 = vst [vmem:[%s14728_s8 + $0x48] sm:$0xff] %v9275_v28 }
 0x925   : > { %v10299_v53 = vpop.f32.mrb[204].mxu1 }
 0x926   : > { %v8569_v46 = vadd.f32 %v10299_v53, %v14705_v3  ;;  %v8560_v38 = vpop.f32.mrb[205].mxu1 }
 0x927   : > { %v8561_v14 = vadd.f32 %v14705_v3, %v8560_v38  ;;  %v10300_v39 = vpop.f32.mrb[206].mxu1 }
 0x928   : > { %v9280_v37 = vsel %vm9264_vm2, -100.0, %v8569_v46  ;;  %v8572_v8 = vadd.f32 %v10300_v39, %v14705_v3  ;;  %v8563_v5 = vpop.f32.mrb[207].mxu1 }
 0x929   : > { %9296 = vst [vmem:[%s14728_s8 + $0x70] sm:$0xff] %v9280_v37  ;;  %v9278_v51 = vsel %vm9262_vm11, -100.0, %v8561_v14  ;;  %v8564_v61 = vadd.f32 %v14705_v3, %v8563_v5 }
 0x92a   : > { %9294 = vst [vmem:[%s14728_s8 + $0x60] sm:$0xff] %v9278_v51  ;;  %v9281_v23 = vsel %vm9265_vm12, -100.0, %v8572_v8 }
 0x92b   : > { %9297 = vst [vmem:[%s14728_s8 + $0x78] sm:$0xff] %v9281_v23  ;;  %v9279_v33 = vsel %vm9263_vm5, -100.0, %v8564_v61 }
 0x92c   : > { %9295 = vst [vmem:[%s14728_s8 + $0x68] sm:$0xff] %v9279_v33 }
 0x92d   : > { %11745 = shalt.err (!%p11742_p0)
}
 0x92e   : > { %s11746_s28 = scalar_lea.hbm %s14856_s29, 2048  ;;  %s11750_s21 = scalar_lea.hbm %s15459_s20, 4096 }
 0x92f   : > { %p11747_p5 = scmp.ne.s32.totalorder %s14856_s29, %s11746_s28  ;;  %p11751_p10 = scmp.lt.u32.totalorder %s14856_s29, %s15459_s20 }
 0x930   : > { %p11752_p12 = scmp.lt.u32.totalorder %s11750_s21, %s11746_s28  ;;  %p11754_p2 = scmp.lt.u32.totalorder %s11746_s28, %s14856_s29 }
 0x931   : > { %p11748_p6 = pnand %p11747_p5, %p15461_p3 }
 0x932   : > { %p11753_p1 = por %p11752_p12, %p11751_p10 }
 0x933   : > { %p11749_p9 = pneg %p11748_p6 }
 0x934   : > { %p11755_p4 = por %p11754_p2, %p11753_p1 }
 0x936   : > { %p11756_p7 = pnand %p11755_p4, %p11749_p9 }
 0x938   : > { %11759 = shalt.err (!%p11756_p7)
}
 0x939   : > { %s11823_s1 = smov 128   ;;  %s11824_s30 = smov 8  }
 0x93a   : > { %10893 = dma.vmem_to_hbm [thread:$0]  (%p15461_p3), %s14858_s25, 2048, %s14856_s29, %s14869_s26, %s11823_s1, %s11823_s1, %s11824_s30  }
 0x93b PF: > { %s15462_s27 = sld [smem:[#allocation18_spill]]  ;;  %s15463_s24 = sld [smem:[#allocation15_spill]] }
 0x93c   : > { %s15464_s18 = sld [smem:[#allocation22_spill]] }
 0x941   : > { %p10920_p8 = scmp.ge.s32.totalorder %s15462_s27, 2  ;;  %s9327_s22 = sand.u32 1, %s15463_s24  }
 0x942   : > { %p15465_p11 = scmp.ne.s32.totalorder %s15464_s18, 0  ;;  %s9328_s28 = scalar_lea.sflag [#allocation4], %s9327_s22 }
 0x944   : > { %p10909_p13 = pnand %p10920_p8, %p15465_p11 }
 0x946   : > { %11789 = dma.done.wait (!%p10909_p13), %s9328_s28, 2048  }
 0x947   : > { %11791 = vsyncadd (!%p10909_p13), %s9328_s28, 4294965248  ;;  %s15466_s30 = sld [smem:[#allocation19_spill]]  ;;  %s15467_s27 = sld [smem:[#allocation16_spill]] }
 0x948   : > { %s15468_s28 = sld [smem:[#allocation17_spill]]  ;;  %s15469_s29 = sld [smem:[#allocation20_spill]] }
 0x94d   : > { %p31_p0 = scmp.ge.s32.totalorder %s15466_s30, 4  }
 0x94f   :  { %33 = sbr.rel (!%p31_p0) target bundleno = 13 (0xd), region = 147 }
 0x956   :  { %9333 = vsyncpa [#allocation3], 1 }
 0x957   :  { %9335 = vsyncpa [#allocation3 + $0x1], 1 }
 0x958   :  { %9336 = vsyncpa [#allocation6], 1 }
 0x959   :  { %9337 = vsyncpa [#allocation9], 1 }
 0x95a   :  { %9338 = vsyncpa [#allocation4], 1 }
 0x95b   :  { %9340 = vsyncpa [#allocation4 + $0x1], 1 }

</bundles_post_ra>
